<compile_context>
chip_gen: v7x
topology: tpu7x:2x2x1
jax: 0.10.0
libtpu: 0.0.40
codegen_flags: <defaults>
</compile_context>

<pallas_src>
import jax
import jax.numpy as jnp
from jax.experimental import pallas as pl
from jax.experimental.pallas import tpu as pltpu

_BN_EPS = 1e-5                          # PyTorch BatchNorm2d default
_TILE_ROWS_CAP = 4096                   # max rows per grid step for flat passes
# Far above this kernel's KB-scale per-step footprint, but below v7x's 64 MiB
# physical VMEM (v5e/v6e have 128 MiB, so one cap is safe on all generations).
_VMEM_LIMIT_BYTES = 48 * 1024 * 1024


def _compiler_params():
    # All grids are fully parallel (per-tile partial stats, no carried state).
    return pltpu.CompilerParams(dimension_semantics=("parallel",),
                                vmem_limit_bytes=_VMEM_LIMIT_BYTES)


def _erf(x):
    # Abramowitz & Stegun 7.1.26 (|err| < 1.5e-7); divide + exp land on the
    # otherwise-idle EUP.
    p = 0.3275911
    a1, a2, a3, a4, a5 = (0.254829592, -0.284496736, 1.421413741,
                          -1.453152027, 1.061405429)
    ax = jnp.abs(x)
    t = pl.reciprocal(1.0 + p * ax, approx=True)      # EUP slot, ~free
    poly = ((((a5 * t + a4) * t + a3) * t + a2) * t + a1) * t
    y = 1.0 - poly * jnp.exp(-ax * ax)                # exp on EUP
    return jnp.where(x >= 0, y, -y)


def _gelu_exact(x):
    # nn.GELU() default == exact erf formulation.
    return 0.5 * x * (1.0 + _erf(x * 0.7071067811865476))


def _partial_stats(acc):
    """Fold a (rows, C) tile into (8, C) partial sum / sum-of-squares blocks
    (one row-group per grid step keeps the stats pass parallel; the tiny
    cross-tile reduction happens in the wrapper)."""
    rows, cout = acc.shape
    part = acc.reshape(rows // 8, 8, cout)
    return jnp.sum(part, axis=0), jnp.sum(part * part, axis=0)


# --------------------------------------------------------------------------
# Kernel 1: 3x3 conv stage (optionally fusing the previous stage's BN + GELU
# into the halo load path), emitting pre-BN z and partial BN statistics.
# --------------------------------------------------------------------------
def _make_conv3x3_kernel(h, w, cin, cout, fuse_act):
    hw = h * w
    taps = [(dy, dx) for dy in range(3) for dx in range(3)]

    def kernel(*refs):
        if fuse_act:
            x_ref, w_ref, b_ref, sc_ref, sh_ref, m_ref, z_ref, s1_ref, s2_ref = refs
        else:
            x_ref, w_ref, b_ref, z_ref, s1_ref, s2_ref = refs

        x = x_ref[0]                                   # (h+2, w+2, cin) halo tile
        if fuse_act:
            # Previous stage's BN affine + exact GELU fused into the load
            # path; the zero halo of the pre-BN input must stay zero after
            # the activation, so the padding ring is re-zeroed with a
            # precomputed (h+2, w+2, 1) interior mask.
            sc = sc_ref[...].reshape(1, 1, cin)
            sh = sh_ref[...].reshape(1, 1, cin)
            x = _gelu_exact(x * sc + sh) * m_ref[0]

        acc = jnp.zeros((hw, cout), jnp.float32)
        for t, (dy, dx) in enumerate(taps):            # static unroll: 9 taps
            tap = x[dy:dy + h, dx:dx + w, :]           # shifted halo window
            acc = acc + jnp.dot(tap.reshape(hw, cin), w_ref[t],
                                preferred_element_type=jnp.float32)
        acc = acc + b_ref[...]                         # conv bias
        z_ref[...] = acc                               # pre-BN activation
        s1, s2 = _partial_stats(acc)
        s1_ref[...] = s1
        s2_ref[...] = s2

    return kernel


def _conv3x3_stage(x_pad, w9, b, act_scale=None, act_shift=None, act_mask=None):
    """z = conv3x3(act(x_pad)) + b over a zero-padded NHWC input.  act is the
    identity (stage 1) or the fused previous-stage BN affine + GELU (stage 2).
    Returns (z, partial_sum, partial_sumsq)."""
    n, hp, wp_, cin = x_pad.shape
    h, w = hp - 2, wp_ - 2
    hw = h * w
    cout = w9.shape[-1]
    fuse = act_scale is not None
    assert hw % 8 == 0, "H*W must be a multiple of 8"

    in_specs = [pl.BlockSpec((1, hp, wp_, cin), lambda i: (i, 0, 0, 0)),
                pl.BlockSpec((9, cin, cout), lambda i: (0, 0, 0)),
                pl.BlockSpec((1, cout), lambda i: (0, 0))]
    args = [x_pad, w9, b.reshape(1, cout)]
    if fuse:
        in_specs += [pl.BlockSpec((1, cin), lambda i: (0, 0)),
                     pl.BlockSpec((1, cin), lambda i: (0, 0)),
                     pl.BlockSpec((1, hp, wp_, 1), lambda i: (0, 0, 0, 0))]
        args += [act_scale, act_shift, act_mask]

    out_specs = (pl.BlockSpec((hw, cout), lambda i: (i, 0)),
                 pl.BlockSpec((8, cout), lambda i: (i, 0)),
                 pl.BlockSpec((8, cout), lambda i: (i, 0)))
    out_shape = (jax.ShapeDtypeStruct((n * hw, cout), jnp.float32),
                 jax.ShapeDtypeStruct((n * 8, cout), jnp.float32),
                 jax.ShapeDtypeStruct((n * 8, cout), jnp.float32))

    return pl.pallas_call(
        _make_conv3x3_kernel(h, w, cin, cout, fuse),
        grid=(n,),
        in_specs=in_specs,
        out_specs=out_specs,
        out_shape=out_shape,
        compiler_params=_compiler_params(),
    )(*args)


# --------------------------------------------------------------------------
# Kernel 2: 1x1 projection over the channel concat, with both branch
# activations recomputed in-kernel from the stored pre-BN z1 / z2.
# --------------------------------------------------------------------------
def _make_proj_kernel():
    def kernel(z1_ref, z2_ref, sc1_ref, sh1_ref, sc2_ref, sh2_ref,
               wp1_ref, wp2_ref, bp_ref, z3_ref, x2_ref, s1_ref, s2_ref):
        # cat([x1, x2], C) @ Wp == x1 @ Wp[:, :C].T + x2 @ Wp[:, C:].T ;
        # x1/x2 are recomputed via the per-channel affine + GELU (cheap
        # VPU/EUP work hidden under the MXU/DMA), so the concat slab and the
        # post-activation x1 never touch HBM.
        x1 = _gelu_exact(z1_ref[...] * sc1_ref[...] + sh1_ref[...])
        x2 = _gelu_exact(z2_ref[...] * sc2_ref[...] + sh2_ref[...])
        x2_ref[...] = x2                               # module output (x2)
        acc = jnp.dot(x1, wp1_ref[...], preferred_element_type=jnp.float32)
        acc = acc + jnp.dot(x2, wp2_ref[...], preferred_element_type=jnp.float32)
        acc = acc + bp_ref[...]
        z3_ref[...] = acc                              # pre-BN projection
        s1, s2 = _partial_stats(acc)
        s1_ref[...] = s1
        s2_ref[...] = s2
    return kernel


def _proj_stage(z1, z2, sc1, sh1, sc2, sh2, wp1, wp2, bp):
    m, c = z1.shape
    cout = wp1.shape[-1]
    tr = _pick_rows(m)
    steps = m // tr
    assert tr % 8 == 0, "row tile must be a multiple of 8"

    row = lambda width: pl.BlockSpec((tr, width), lambda i: (i, 0))
    vec = lambda width: pl.BlockSpec((1, width), lambda i: (0, 0))
    mat = lambda shape: pl.BlockSpec(shape, lambda i: (0, 0))

    return pl.pallas_call(
        _make_proj_kernel(),
        grid=(steps,),
        in_specs=[row(c), row(c), vec(c), vec(c), vec(c), vec(c),
                  mat((c, cout)), mat((c, cout)), vec(cout)],
        out_specs=(row(cout), row(c),
                   pl.BlockSpec((8, cout), lambda i: (i, 0)),
                   pl.BlockSpec((8, cout), lambda i: (i, 0))),
        out_shape=(jax.ShapeDtypeStruct((m, cout), jnp.float32),
                   jax.ShapeDtypeStruct((m, c), jnp.float32),
                   jax.ShapeDtypeStruct((steps * 8, cout), jnp.float32),
                   jax.ShapeDtypeStruct((steps * 8, cout), jnp.float32)),
        compiler_params=_compiler_params(),
    )(z1, z2, sc1, sh1, sc2, sh2, wp1, wp2, bp.reshape(1, cout))


# --------------------------------------------------------------------------
# Kernel 3: lane-dense BN affine + GELU apply (final output only).
# --------------------------------------------------------------------------
def _apply_kernel(z_ref, sc_ref, sh_ref, o_ref):
    o_ref[...] = _gelu_exact(z_ref[...] * sc_ref[...] + sh_ref[...])


def _apply_bn_gelu(z, scale, shift):
    """GELU(z * scale + shift), per channel; runs on a lane-dense
    (M*C/128, 128) view when shapes allow (unmasked vst, 16x fewer vregs)."""
    m, c = z.shape
    rows = (m * c) // 128
    if 128 % c == 0 and (m * c) % 128 == 0 and rows % 8 == 0:
        rep = 128 // c
        zf = z.reshape(rows, 128)              # contiguous: layout plumbing only
        sc = jnp.tile(scale, (1, rep))         # lane l holds channel l % c
        sh = jnp.tile(shift, (1, rep))
        lane = 128
    else:                                      # lane-sparse fallback
        zf, sc, sh, rows, lane = z, scale, shift, m, c
    tr = _pick_rows(rows)
    out = pl.pallas_call(
        _apply_kernel,
        grid=(rows // tr,),
        in_specs=[pl.BlockSpec((tr, lane), lambda i: (i, 0)),
                  pl.BlockSpec((1, lane), lambda i: (0, 0)),
                  pl.BlockSpec((1, lane), lambda i: (0, 0))],
        out_specs=pl.BlockSpec((tr, lane), lambda i: (i, 0)),
        out_shape=jax.ShapeDtypeStruct((rows, lane), jnp.float32),
        compiler_params=_compiler_params(),
    )(zf, sc, sh)
    return out.reshape(m, c)


# --------------------------------------------------------------------------
# Host-side helpers.
# --------------------------------------------------------------------------
def _pick_rows(rows, cap=_TILE_ROWS_CAP):
    """Largest multiple-of-8 divisor of `rows` that is <= cap and leaves at
    least 2 grid steps (megacore / pipelining); falls back to the full extent."""
    if rows % 8 != 0:
        return rows
    t = min(cap, rows // 2)
    t -= t % 8
    while t >= 8:
        if rows % t == 0:
            return t
        t -= 8
    return rows


def _bn_affine(psum, psumsq, m, gamma, beta):
    """Fold the per-tile partial sums into train-mode BatchNorm (scale, shift):
    y = z*scale + shift.  Tiny (tiles x C) reduction, done in plain XLA."""
    # NOTE: var = E[z^2] - mean^2 can cancel in f32 when |mean| >> std at very
    # large M; per-tile partials keep the accumulation error small here.
    s = jnp.sum(psum, axis=0, keepdims=True)
    ss = jnp.sum(psumsq, axis=0, keepdims=True)
    mean = s / m
    var = ss / m - mean * mean
    inv_std = jax.lax.rsqrt(var + _BN_EPS)
    scale = gamma.reshape(1, -1) * inv_std
    shift = beta.reshape(1, -1) - mean * scale
    return scale, shift


def _fold3x3(w):
    """PyTorch (Cout, Cin, 3, 3) -> (9, Cin, Cout); tap index t = dy*3 + dx."""
    cout, cin = w.shape[0], w.shape[1]
    return jnp.transpose(w, (2, 3, 1, 0)).reshape(9, cin, cout)


def _pad_hw(x_nhwc):
    """Zero-pad H and W by 1 (SAME padding for the 3x3 convs)."""
    return jnp.pad(x_nhwc, ((0, 0), (1, 1), (1, 1), (0, 0)))


def init_down2_params(key, in_, out_):
    ks = jax.random.split(key, 6)
    return {
        "w1": 0.1 * jax.random.normal(ks[0], (out_, in_, 3, 3), jnp.float32),
        "b1": 0.1 * jax.random.normal(ks[1], (out_,), jnp.float32),
        "g1": jnp.ones((out_,), jnp.float32),
        "be1": jnp.zeros((out_,), jnp.float32),
        "w2": 0.1 * jax.random.normal(ks[2], (out_, out_, 3, 3), jnp.float32),
        "b2": 0.1 * jax.random.normal(ks[3], (out_,), jnp.float32),
        "g2": jnp.ones((out_,), jnp.float32),
        "be2": jnp.zeros((out_,), jnp.float32),
        "wp": 0.1 * jax.random.normal(ks[4], (out_, 2 * out_, 1, 1), jnp.float32),
        "bp": 0.1 * jax.random.normal(ks[5], (out_,), jnp.float32),
        "gp": jnp.ones((out_,), jnp.float32),
        "bep": jnp.zeros((out_,), jnp.float32),
    }


@jax.jit
def down2_forward(x_nchw, params):
    """Returns (x2, y) in NCHW, matching PyTorch Down2.forward (train-mode BN)."""
    x = jnp.transpose(x_nchw, (0, 2, 3, 1))            # NCHW -> NHWC (lane = C)
    n, h, w, _ = x.shape
    cout = params["w1"].shape[0]
    m = n * h * w

    # conv1: 3x3 (+bias); BN stats reduced in the wrapper.
    z1, p1, q1 = _conv3x3_stage(_pad_hw(x), _fold3x3(params["w1"]), params["b1"])
    sc1, sh1 = _bn_affine(p1, q1, m, params["g1"], params["be1"])

    # conv2: 3x3 over GELU(BN(z1)); the affine+GELU is fused into the halo
    # load path (x1 post-activation never hits HBM).  The interior mask keeps
    # the SAME-padding ring at zero after the fused activation.
    interior = _pad_hw(jnp.ones((1, h, w, 1), jnp.float32))
    z2, p2, q2 = _conv3x3_stage(
        _pad_hw(z1.reshape(n, h, w, cout)), _fold3x3(params["w2"]), params["b2"],
        act_scale=sc1, act_shift=sh1, act_mask=interior)
    sc2, sh2 = _bn_affine(p2, q2, m, params["g2"], params["be2"])

    # proj: channel concat fused as split-weight matmuls; also emits x2.
    wp = params["wp"][:, :, 0, 0]                       # (Cout, 2*Cout)
    z3, x2f, p3, q3 = _proj_stage(
        z1, z2, sc1, sh1, sc2, sh2,
        jnp.transpose(wp[:, :cout]), jnp.transpose(wp[:, cout:]), params["bp"])
    sc3, sh3 = _bn_affine(p3, q3, m, params["gp"], params["bep"])

    # final BN + GELU on a lane-dense view.
    yf = _apply_bn_gelu(z3, sc3, sh3)

    x2 = jnp.transpose(x2f.reshape(n, h, w, cout), (0, 3, 1, 2))
    y = jnp.transpose(yf.reshape(n, h, w, cout), (0, 3, 1, 2))
    return x2, y


def _reference_down2(x_nchw, p):
    """Pure-JAX reference (exact erf GELU, train-mode BN batch stats)."""
    x = jnp.transpose(x_nchw, (0, 2, 3, 1))

    def conv3x3(t, w, b):
        return jax.lax.conv_general_dilated(
            t, jnp.transpose(w, (2, 3, 1, 0)), (1, 1), "SAME",
            dimension_numbers=("NHWC", "HWIO", "NHWC"),
            precision=jax.lax.Precision.HIGHEST) + b

    def bn_gelu(t, g, be):
        mean = jnp.mean(t, axis=(0, 1, 2), keepdims=True)
        var = jnp.mean((t - mean) ** 2, axis=(0, 1, 2), keepdims=True)
        y = g * (t - mean) * jax.lax.rsqrt(var + _BN_EPS) + be
        return jax.nn.gelu(y, approximate=False)

    x1 = bn_gelu(conv3x3(x, p["w1"], p["b1"]), p["g1"], p["be1"])
    x2 = bn_gelu(conv3x3(x1, p["w2"], p["b2"]), p["g2"], p["be2"])
    cat = jnp.concatenate([x1, x2], axis=-1)
    yz = jnp.einsum("nhwc,oc->nhwo", cat, p["wp"][:, :, 0, 0],
                    precision=jax.lax.Precision.HIGHEST) + p["bp"]
    y = bn_gelu(yz, p["gp"], p["bep"])
    return (jnp.transpose(x2, (0, 3, 1, 2)), jnp.transpose(y, (0, 3, 1, 2)))


if __name__ == "__main__":
    key = jax.random.PRNGKey(0)
    k_x, k_p = jax.random.split(key)
    N, C_IN, C_OUT, H, W = 2, 4, 8, 16, 16
    x = jax.random.normal(k_x, (N, C_IN, H, W), jnp.float32)
    params = init_down2_params(k_p, C_IN, C_OUT)

    x2, y = down2_forward(x, params)
    jax.block_until_ready((x2, y))
    assert x2.shape == (N, C_OUT, H, W)
    assert y.shape == (N, C_OUT, H, W)

    x2_ref, y_ref = _reference_down2(x, params)
    err = max(float(jnp.max(jnp.abs(x2 - x2_ref))),
              float(jnp.max(jnp.abs(y - y_ref))))
    assert err < 5e-2, f"mismatch vs reference: max abs err = {err}"
    print("KERNEL_OK")
</pallas_src>

<mosaic_0001>
module attributes {stable_mosaic.version = 11 : i64} {
  func.func @kernel(%arg0: i32, %arg1: memref<1x18x18x4xf32, #tpu.memory_space<vmem>>, %arg2: memref<9x4x8xf32, #tpu.memory_space<vmem>>, %arg3: memref<1x8xf32, #tpu.memory_space<vmem>>, %arg4: memref<256x8xf32, #tpu.memory_space<vmem>>, %arg5: memref<8x8xf32, #tpu.memory_space<vmem>>, %arg6: memref<8x8xf32, #tpu.memory_space<vmem>>) attributes {dimension_semantics = [#tpu.dimension_semantics<parallel>], iteration_bounds = array<i64: 2>, scalar_prefetch = 0 : i64, scratch_operands = 0 : i64, tpu.core_type = #tpu.core_type<tc>, window_params = [{transform_indices = @transform_0, window_bounds = array<i64: 1, 18, 18, 4>}, {pipeline_mode = #tpu.pipeline_mode<synchronous>, transform_indices = @transform_1, window_bounds = array<i64: 9, 4, 8>}, {pipeline_mode = #tpu.pipeline_mode<synchronous>, transform_indices = @transform_2, window_bounds = array<i64: 1, 8>}, {transform_indices = @transform_3, window_bounds = array<i64: 256, 8>}, {transform_indices = @transform_4, window_bounds = array<i64: 8, 8>}, {transform_indices = @transform_5, window_bounds = array<i64: 8, 8>}]} {
    %c0 = arith.constant 0 : index
    %c0_0 = arith.constant 0 : index
    %c0_1 = arith.constant 0 : index
    %c0_2 = arith.constant 0 : index
    %0 = vector.load %arg1[%c0, %c0_0, %c0_1, %c0_2] : memref<1x18x18x4xf32, #tpu.memory_space<vmem>>, vector<1x18x18x4xf32>
    %1 = vector.shape_cast %0 : vector<1x18x18x4xf32> to vector<18x18x4xf32>
    %cst = arith.constant 0.000000e+00 : f32
    %2 = vector.broadcast %cst : f32 to vector<256x8xf32>
    %3 = vector.extract_strided_slice %1 {offsets = [0, 0, 0], sizes = [16, 16, 4], strides = [1, 1, 1]} : vector<18x18x4xf32> to vector<16x16x4xf32>
    %4 = vector.shape_cast %3 : vector<16x16x4xf32> to vector<256x4xf32>
    %c0_3 = arith.constant 0 : index
    %c0_4 = arith.constant 0 : index
    %c0_5 = arith.constant 0 : index
    %5 = vector.load %arg2[%c0_3, %c0_4, %c0_5] : memref<9x4x8xf32, #tpu.memory_space<vmem>>, vector<1x4x8xf32>
    %6 = vector.shape_cast %5 : vector<1x4x8xf32> to vector<4x8xf32>
    %cst_6 = arith.constant dense<0.000000e+00> : vector<256x8xf32>
    %7 = tpu.matmul %4, %6, %cst_6 {dimension_numbers = #tpu.dot_dimension_numbers<[1], [0], [0], [1], [0, 0, 1, 1], [], []>} : vector<256x4xf32>, vector<4x8xf32>, vector<256x8xf32> -> vector<256x8xf32>
    %8 = arith.addf %2, %7 : vector<256x8xf32>
    %9 = vector.extract_strided_slice %1 {offsets = [0, 1, 0], sizes = [16, 16, 4], strides = [1, 1, 1]} : vector<18x18x4xf32> to vector<16x16x4xf32>
    %10 = vector.shape_cast %9 : vector<16x16x4xf32> to vector<256x4xf32>
    %c1 = arith.constant 1 : index
    %c0_7 = arith.constant 0 : index
    %c0_8 = arith.constant 0 : index
    %11 = vector.load %arg2[%c1, %c0_7, %c0_8] : memref<9x4x8xf32, #tpu.memory_space<vmem>>, vector<1x4x8xf32>
    %12 = vector.shape_cast %11 : vector<1x4x8xf32> to vector<4x8xf32>
    %cst_9 = arith.constant dense<0.000000e+00> : vector<256x8xf32>
    %13 = tpu.matmul %10, %12, %cst_9 {dimension_numbers = #tpu.dot_dimension_numbers<[1], [0], [0], [1], [0, 0, 1, 1], [], []>} : vector<256x4xf32>, vector<4x8xf32>, vector<256x8xf32> -> vector<256x8xf32>
    %14 = arith.addf %8, %13 : vector<256x8xf32>
    %15 = vector.extract_strided_slice %1 {offsets = [0, 2, 0], sizes = [16, 16, 4], strides = [1, 1, 1]} : vector<18x18x4xf32> to vector<16x16x4xf32>
    %16 = vector.shape_cast %15 : vector<16x16x4xf32> to vector<256x4xf32>
    %c2 = arith.constant 2 : index
    %c0_10 = arith.constant 0 : index
    %c0_11 = arith.constant 0 : index
    %17 = vector.load %arg2[%c2, %c0_10, %c0_11] : memref<9x4x8xf32, #tpu.memory_space<vmem>>, vector<1x4x8xf32>
    %18 = vector.shape_cast %17 : vector<1x4x8xf32> to vector<4x8xf32>
    %cst_12 = arith.constant dense<0.000000e+00> : vector<256x8xf32>
    %19 = tpu.matmul %16, %18, %cst_12 {dimension_numbers = #tpu.dot_dimension_numbers<[1], [0], [0], [1], [0, 0, 1, 1], [], []>} : vector<256x4xf32>, vector<4x8xf32>, vector<256x8xf32> -> vector<256x8xf32>
    %20 = arith.addf %14, %19 : vector<256x8xf32>
    %21 = vector.extract_strided_slice %1 {offsets = [1, 0, 0], sizes = [16, 16, 4], strides = [1, 1, 1]} : vector<18x18x4xf32> to vector<16x16x4xf32>
    %22 = vector.shape_cast %21 : vector<16x16x4xf32> to vector<256x4xf32>
    %c3 = arith.constant 3 : index
    %c0_13 = arith.constant 0 : index
    %c0_14 = arith.constant 0 : index
    %23 = vector.load %arg2[%c3, %c0_13, %c0_14] : memref<9x4x8xf32, #tpu.memory_space<vmem>>, vector<1x4x8xf32>
    %24 = vector.shape_cast %23 : vector<1x4x8xf32> to vector<4x8xf32>
    %cst_15 = arith.constant dense<0.000000e+00> : vector<256x8xf32>
    %25 = tpu.matmul %22, %24, %cst_15 {dimension_numbers = #tpu.dot_dimension_numbers<[1], [0], [0], [1], [0, 0, 1, 1], [], []>} : vector<256x4xf32>, vector<4x8xf32>, vector<256x8xf32> -> vector<256x8xf32>
    %26 = arith.addf %20, %25 : vector<256x8xf32>
    %27 = vector.extract_strided_slice %1 {offsets = [1, 1, 0], sizes = [16, 16, 4], strides = [1, 1, 1]} : vector<18x18x4xf32> to vector<16x16x4xf32>
    %28 = vector.shape_cast %27 : vector<16x16x4xf32> to vector<256x4xf32>
    %c4 = arith.constant 4 : index
    %c0_16 = arith.constant 0 : index
    %c0_17 = arith.constant 0 : index
    %29 = vector.load %arg2[%c4, %c0_16, %c0_17] : memref<9x4x8xf32, #tpu.memory_space<vmem>>, vector<1x4x8xf32>
    %30 = vector.shape_cast %29 : vector<1x4x8xf32> to vector<4x8xf32>
    %cst_18 = arith.constant dense<0.000000e+00> : vector<256x8xf32>
    %31 = tpu.matmul %28, %30, %cst_18 {dimension_numbers = #tpu.dot_dimension_numbers<[1], [0], [0], [1], [0, 0, 1, 1], [], []>} : vector<256x4xf32>, vector<4x8xf32>, vector<256x8xf32> -> vector<256x8xf32>
    %32 = arith.addf %26, %31 : vector<256x8xf32>
    %33 = vector.extract_strided_slice %1 {offsets = [1, 2, 0], sizes = [16, 16, 4], strides = [1, 1, 1]} : vector<18x18x4xf32> to vector<16x16x4xf32>
    %34 = vector.shape_cast %33 : vector<16x16x4xf32> to vector<256x4xf32>
    %c5 = arith.constant 5 : index
    %c0_19 = arith.constant 0 : index
    %c0_20 = arith.constant 0 : index
    %35 = vector.load %arg2[%c5, %c0_19, %c0_20] : memref<9x4x8xf32, #tpu.memory_space<vmem>>, vector<1x4x8xf32>
    %36 = vector.shape_cast %35 : vector<1x4x8xf32> to vector<4x8xf32>
    %cst_21 = arith.constant dense<0.000000e+00> : vector<256x8xf32>
    %37 = tpu.matmul %34, %36, %cst_21 {dimension_numbers = #tpu.dot_dimension_numbers<[1], [0], [0], [1], [0, 0, 1, 1], [], []>} : vector<256x4xf32>, vector<4x8xf32>, vector<256x8xf32> -> vector<256x8xf32>
    %38 = arith.addf %32, %37 : vector<256x8xf32>
    %39 = vector.extract_strided_slice %1 {offsets = [2, 0, 0], sizes = [16, 16, 4], strides = [1, 1, 1]} : vector<18x18x4xf32> to vector<16x16x4xf32>
    %40 = vector.shape_cast %39 : vector<16x16x4xf32> to vector<256x4xf32>
    %c6 = arith.constant 6 : index
    %c0_22 = arith.constant 0 : index
    %c0_23 = arith.constant 0 : index
    %41 = vector.load %arg2[%c6, %c0_22, %c0_23] : memref<9x4x8xf32, #tpu.memory_space<vmem>>, vector<1x4x8xf32>
    %42 = vector.shape_cast %41 : vector<1x4x8xf32> to vector<4x8xf32>
    %cst_24 = arith.constant dense<0.000000e+00> : vector<256x8xf32>
    %43 = tpu.matmul %40, %42, %cst_24 {dimension_numbers = #tpu.dot_dimension_numbers<[1], [0], [0], [1], [0, 0, 1, 1], [], []>} : vector<256x4xf32>, vector<4x8xf32>, vector<256x8xf32> -> vector<256x8xf32>
    %44 = arith.addf %38, %43 : vector<256x8xf32>
    %45 = vector.extract_strided_slice %1 {offsets = [2, 1, 0], sizes = [16, 16, 4], strides = [1, 1, 1]} : vector<18x18x4xf32> to vector<16x16x4xf32>
    %46 = vector.shape_cast %45 : vector<16x16x4xf32> to vector<256x4xf32>
    %c7 = arith.constant 7 : index
    %c0_25 = arith.constant 0 : index
    %c0_26 = arith.constant 0 : index
    %47 = vector.load %arg2[%c7, %c0_25, %c0_26] : memref<9x4x8xf32, #tpu.memory_space<vmem>>, vector<1x4x8xf32>
    %48 = vector.shape_cast %47 : vector<1x4x8xf32> to vector<4x8xf32>
    %cst_27 = arith.constant dense<0.000000e+00> : vector<256x8xf32>
    %49 = tpu.matmul %46, %48, %cst_27 {dimension_numbers = #tpu.dot_dimension_numbers<[1], [0], [0], [1], [0, 0, 1, 1], [], []>} : vector<256x4xf32>, vector<4x8xf32>, vector<256x8xf32> -> vector<256x8xf32>
    %50 = arith.addf %44, %49 : vector<256x8xf32>
    %51 = vector.extract_strided_slice %1 {offsets = [2, 2, 0], sizes = [16, 16, 4], strides = [1, 1, 1]} : vector<18x18x4xf32> to vector<16x16x4xf32>
    %52 = vector.shape_cast %51 : vector<16x16x4xf32> to vector<256x4xf32>
    %c8 = arith.constant 8 : index
    %c0_28 = arith.constant 0 : index
    %c0_29 = arith.constant 0 : index
    %53 = vector.load %arg2[%c8, %c0_28, %c0_29] : memref<9x4x8xf32, #tpu.memory_space<vmem>>, vector<1x4x8xf32>
    %54 = vector.shape_cast %53 : vector<1x4x8xf32> to vector<4x8xf32>
    %cst_30 = arith.constant dense<0.000000e+00> : vector<256x8xf32>
    %55 = tpu.matmul %52, %54, %cst_30 {dimension_numbers = #tpu.dot_dimension_numbers<[1], [0], [0], [1], [0, 0, 1, 1], [], []>} : vector<256x4xf32>, vector<4x8xf32>, vector<256x8xf32> -> vector<256x8xf32>
    %56 = arith.addf %50, %55 : vector<256x8xf32>
    %c0_31 = arith.constant 0 : index
    %c0_32 = arith.constant 0 : index
    %57 = vector.load %arg3[%c0_31, %c0_32] : memref<1x8xf32, #tpu.memory_space<vmem>>, vector<1x8xf32>
    %58 = vector.broadcast %57 : vector<1x8xf32> to vector<256x8xf32>
    %59 = arith.addf %56, %58 : vector<256x8xf32>
    %c0_33 = arith.constant 0 : index
    %c0_34 = arith.constant 0 : index
    %60 = vector.load %arg4[%c0_33, %c0_34] : memref<256x8xf32, #tpu.memory_space<vmem>>, vector<256x8xf32>
    tpu.vector_store %arg4[%c0_33, %c0_34], %59 {strides = array<i32>} : memref<256x8xf32, #tpu.memory_space<vmem>>, vector<256x8xf32>,
    %61 = vector.shape_cast %59 : vector<256x8xf32> to vector<32x8x8xf32>
    %cst_35 = arith.constant dense<0.000000e+00> : vector<8x8xf32>
    %62 = vector.multi_reduction <add>, %61, %cst_35 [0] : vector<32x8x8xf32> to vector<8x8xf32>
    %63 = arith.mulf %61, %61 : vector<32x8x8xf32>
    %cst_36 = arith.constant dense<0.000000e+00> : vector<8x8xf32>
    %64 = vector.multi_reduction <add>, %63, %cst_36 [0] : vector<32x8x8xf32> to vector<8x8xf32>
    %c0_37 = arith.constant 0 : index
    %c0_38 = arith.constant 0 : index
    %65 = vector.load %arg5[%c0_37, %c0_38] : memref<8x8xf32, #tpu.memory_space<vmem>>, vector<8x8xf32>
    tpu.vector_store %arg5[%c0_37, %c0_38], %62 {strides = array<i32>} : memref<8x8xf32, #tpu.memory_space<vmem>>, vector<8x8xf32>,
    %c0_39 = arith.constant 0 : index
    %c0_40 = arith.constant 0 : index
    %66 = vector.load %arg6[%c0_39, %c0_40] : memref<8x8xf32, #tpu.memory_space<vmem>>, vector<8x8xf32>
    tpu.vector_store %arg6[%c0_39, %c0_40], %64 {strides = array<i32>} : memref<8x8xf32, #tpu.memory_space<vmem>>, vector<8x8xf32>,
    return
  }
  func.func @transform_0(%arg0: i32) -> (i32, i32, i32, i32) {
    %c0_i32 = arith.constant 0 : i32
    %c0_i32_0 = arith.constant 0 : i32
    %c0_i32_1 = arith.constant 0 : i32
    %c0_i32_2 = arith.constant 0 : i32
    return %arg0, %c0_i32, %c0_i32_0, %c0_i32_1 : i32, i32, i32, i32
  }
  func.func @transform_1(%arg0: i32) -> (i32, i32, i32) {
    %c0_i32 = arith.constant 0 : i32
    %c0_i32_0 = arith.constant 0 : i32
    %c0_i32_1 = arith.constant 0 : i32
    %c0_i32_2 = arith.constant 0 : i32
    return %c0_i32, %c0_i32_0, %c0_i32_1 : i32, i32, i32
  }
  func.func @transform_2(%arg0: i32) -> (i32, i32) {
    %c0_i32 = arith.constant 0 : i32
    %c0_i32_0 = arith.constant 0 : i32
    %c0_i32_1 = arith.constant 0 : i32
    return %c0_i32, %c0_i32_0 : i32, i32
  }
  func.func @transform_3(%arg0: i32) -> (i32, i32) {
    %c0_i32 = arith.constant 0 : i32
    %c0_i32_0 = arith.constant 0 : i32
    return %arg0, %c0_i32 : i32, i32
  }
  func.func @transform_4(%arg0: i32) -> (i32, i32) {
    %c0_i32 = arith.constant 0 : i32
    %c0_i32_0 = arith.constant 0 : i32
    return %arg0, %c0_i32 : i32, i32
  }
  func.func @transform_5(%arg0: i32) -> (i32, i32) {
    %c0_i32 = arith.constant 0 : i32
    %c0_i32_0 = arith.constant 0 : i32
    return %arg0, %c0_i32 : i32, i32
  }
}

module attributes {stable_mosaic.version = 11 : i64} {
  func.func @kernel(%arg0: i32, %arg1: memref<1x18x18x8xf32, #tpu.memory_space<vmem>>, %arg2: memref<9x8x8xf32, #tpu.memory_space<vmem>>, %arg3: memref<1x8xf32, #tpu.memory_space<vmem>>, %arg4: memref<1x8xf32, #tpu.memory_space<vmem>>, %arg5: memref<1x8xf32, #tpu.memory_space<vmem>>, %arg6: memref<1x18x18x1xf32, #tpu.memory_space<vmem>>, %arg7: memref<256x8xf32, #tpu.memory_space<vmem>>, %arg8: memref<8x8xf32, #tpu.memory_space<vmem>>, %arg9: memref<8x8xf32, #tpu.memory_space<vmem>>) attributes {dimension_semantics = [#tpu.dimension_semantics<parallel>], iteration_bounds = array<i64: 2>, scalar_prefetch = 0 : i64, scratch_operands = 0 : i64, tpu.core_type = #tpu.core_type<tc>, window_params = [{transform_indices = @transform_0, window_bounds = array<i64: 1, 18, 18, 8>}, {pipeline_mode = #tpu.pipeline_mode<synchronous>, transform_indices = @transform_1, window_bounds = array<i64: 9, 8, 8>}, {pipeline_mode = #tpu.pipeline_mode<synchronous>, transform_indices = @transform_2, window_bounds = array<i64: 1, 8>}, {pipeline_mode = #tpu.pipeline_mode<synchronous>, transform_indices = @transform_3, window_bounds = array<i64: 1, 8>}, {pipeline_mode = #tpu.pipeline_mode<synchronous>, transform_indices = @transform_4, window_bounds = array<i64: 1, 8>}, {pipeline_mode = #tpu.pipeline_mode<synchronous>, transform_indices = @transform_5, window_bounds = array<i64: 1, 18, 18, 1>}, {transform_indices = @transform_6, window_bounds = array<i64: 256, 8>}, {transform_indices = @transform_7, window_bounds = array<i64: 8, 8>}, {transform_indices = @transform_8, window_bounds = array<i64: 8, 8>}]} {
    %c0 = arith.constant 0 : index
    %c0_0 = arith.constant 0 : index
    %c0_1 = arith.constant 0 : index
    %c0_2 = arith.constant 0 : index
    %0 = vector.load %arg1[%c0, %c0_0, %c0_1, %c0_2] : memref<1x18x18x8xf32, #tpu.memory_space<vmem>>, vector<1x18x18x8xf32>
    %1 = vector.shape_cast %0 : vector<1x18x18x8xf32> to vector<18x18x8xf32>
    %c0_3 = arith.constant 0 : index
    %c0_4 = arith.constant 0 : index
    %2 = vector.load %arg4[%c0_3, %c0_4] : memref<1x8xf32, #tpu.memory_space<vmem>>, vector<1x8xf32>
    %3 = vector.shape_cast %2 : vector<1x8xf32> to vector<1x1x8xf32>
    %c0_5 = arith.constant 0 : index
    %c0_6 = arith.constant 0 : index
    %4 = vector.load %arg5[%c0_5, %c0_6] : memref<1x8xf32, #tpu.memory_space<vmem>>, vector<1x8xf32>
    %5 = vector.shape_cast %4 : vector<1x8xf32> to vector<1x1x8xf32>
    %6 = vector.broadcast %3 : vector<1x1x8xf32> to vector<18x18x8xf32>
    %7 = arith.mulf %1, %6 : vector<18x18x8xf32>
    %8 = vector.broadcast %5 : vector<1x1x8xf32> to vector<18x18x8xf32>
    %9 = arith.addf %7, %8 : vector<18x18x8xf32>
    %cst = arith.constant 5.000000e-01 : f32
    %10 = vector.broadcast %cst : f32 to vector<18x18x8xf32>
    %11 = arith.mulf %10, %9 : vector<18x18x8xf32>
    %cst_7 = arith.constant 0.707106769 : f32
    %12 = vector.broadcast %cst_7 : f32 to vector<18x18x8xf32>
    %13 = arith.mulf %9, %12 : vector<18x18x8xf32>
    %14 = math.absf %13 : vector<18x18x8xf32>
    %cst_8 = arith.constant 0.327591091 : f32
    %15 = vector.broadcast %cst_8 : f32 to vector<18x18x8xf32>
    %16 = arith.mulf %15, %14 : vector<18x18x8xf32>
    %cst_9 = arith.constant 1.000000e+00 : f32
    %17 = vector.broadcast %cst_9 : f32 to vector<18x18x8xf32>
    %18 = arith.addf %17, %16 : vector<18x18x8xf32>
    %19 = tpu.reciprocal %18 {approx = true} : vector<18x18x8xf32> -> vector<18x18x8xf32>
    %cst_10 = arith.constant 1.06140542 : f32
    %20 = vector.broadcast %cst_10 : f32 to vector<18x18x8xf32>
    %21 = arith.mulf %20, %19 : vector<18x18x8xf32>
    %cst_11 = arith.constant -1.45315206 : f32
    %22 = vector.broadcast %cst_11 : f32 to vector<18x18x8xf32>
    %23 = arith.addf %21, %22 : vector<18x18x8xf32>
    %24 = arith.mulf %23, %19 : vector<18x18x8xf32>
    %cst_12 = arith.constant 1.42141378 : f32
    %25 = vector.broadcast %cst_12 : f32 to vector<18x18x8xf32>
    %26 = arith.addf %24, %25 : vector<18x18x8xf32>
    %27 = arith.mulf %26, %19 : vector<18x18x8xf32>
    %cst_13 = arith.constant -0.284496725 : f32
    %28 = vector.broadcast %cst_13 : f32 to vector<18x18x8xf32>
    %29 = arith.addf %27, %28 : vector<18x18x8xf32>
    %30 = arith.mulf %29, %19 : vector<18x18x8xf32>
    %cst_14 = arith.constant 0.254829586 : f32
    %31 = vector.broadcast %cst_14 : f32 to vector<18x18x8xf32>
    %32 = arith.addf %30, %31 : vector<18x18x8xf32>
    %33 = arith.mulf %32, %19 : vector<18x18x8xf32>
    %cst_15 = arith.constant 0.000000e+00 : f32
    %34 = vector.broadcast %cst_15 : f32 to vector<18x18x8xf32>
    %35 = arith.subf %34, %14 : vector<18x18x8xf32>
    %36 = arith.mulf %35, %14 : vector<18x18x8xf32>
    %37 = math.exp %36 : vector<18x18x8xf32>
    %38 = arith.mulf %33, %37 : vector<18x18x8xf32>
    %cst_16 = arith.constant 1.000000e+00 : f32
    %39 = vector.broadcast %cst_16 : f32 to vector<18x18x8xf32>
    %40 = arith.subf %39, %38 : vector<18x18x8xf32>
    %cst_17 = arith.constant 0.000000e+00 : f32
    %41 = vector.broadcast %cst_17 : f32 to vector<18x18x8xf32>
    %42 = arith.cmpf oge, %13, %41 : vector<18x18x8xf32>
    %cst_18 = arith.constant 0.000000e+00 : f32
    %43 = vector.broadcast %cst_18 : f32 to vector<18x18x8xf32>
    %44 = arith.subf %43, %40 : vector<18x18x8xf32>
    %45 = arith.select %42, %40, %44 : vector<18x18x8xi1>, vector<18x18x8xf32>
    %cst_19 = arith.constant 1.000000e+00 : f32
    %46 = vector.broadcast %cst_19 : f32 to vector<18x18x8xf32>
    %47 = arith.addf %46, %45 : vector<18x18x8xf32>
    %48 = arith.mulf %11, %47 : vector<18x18x8xf32>
    %c0_20 = arith.constant 0 : index
    %c0_21 = arith.constant 0 : index
    %c0_22 = arith.constant 0 : index
    %c0_23 = arith.constant 0 : index
    %49 = vector.load %arg6[%c0_20, %c0_21, %c0_22, %c0_23] : memref<1x18x18x1xf32, #tpu.memory_space<vmem>>, vector<1x18x18x1xf32>
    %50 = vector.shape_cast %49 : vector<1x18x18x1xf32> to vector<18x18x1xf32>
    %51 = vector.broadcast %50 : vector<18x18x1xf32> to vector<18x18x8xf32>
    %52 = arith.mulf %48, %51 : vector<18x18x8xf32>
    %cst_24 = arith.constant 0.000000e+00 : f32
    %53 = vector.broadcast %cst_24 : f32 to vector<256x8xf32>
    %54 = vector.extract_strided_slice %52 {offsets = [0, 0, 0], sizes = [16, 16, 8], strides = [1, 1, 1]} : vector<18x18x8xf32> to vector<16x16x8xf32>
    %55 = vector.shape_cast %54 : vector<16x16x8xf32> to vector<256x8xf32>
    %c0_25 = arith.constant 0 : index
    %c0_26 = arith.constant 0 : index
    %c0_27 = arith.constant 0 : index
    %56 = vector.load %arg2[%c0_25, %c0_26, %c0_27] : memref<9x8x8xf32, #tpu.memory_space<vmem>>, vector<1x8x8xf32>
    %57 = vector.shape_cast %56 : vector<1x8x8xf32> to vector<8x8xf32>
    %cst_28 = arith.constant dense<0.000000e+00> : vector<256x8xf32>
    %58 = tpu.matmul %55, %57, %cst_28 {dimension_numbers = #tpu.dot_dimension_numbers<[1], [0], [0], [1], [0, 0, 1, 1], [], []>} : vector<256x8xf32>, vector<8x8xf32>, vector<256x8xf32> -> vector<256x8xf32>
    %59 = arith.addf %53, %58 : vector<256x8xf32>
    %60 = vector.extract_strided_slice %52 {offsets = [0, 1, 0], sizes = [16, 16, 8], strides = [1, 1, 1]} : vector<18x18x8xf32> to vector<16x16x8xf32>
    %61 = vector.shape_cast %60 : vector<16x16x8xf32> to vector<256x8xf32>
    %c1 = arith.constant 1 : index
    %c0_29 = arith.constant 0 : index
    %c0_30 = arith.constant 0 : index
    %62 = vector.load %arg2[%c1, %c0_29, %c0_30] : memref<9x8x8xf32, #tpu.memory_space<vmem>>, vector<1x8x8xf32>
    %63 = vector.shape_cast %62 : vector<1x8x8xf32> to vector<8x8xf32>
    %cst_31 = arith.constant dense<0.000000e+00> : vector<256x8xf32>
    %64 = tpu.matmul %61, %63, %cst_31 {dimension_numbers = #tpu.dot_dimension_numbers<[1], [0], [0], [1], [0, 0, 1, 1], [], []>} : vector<256x8xf32>, vector<8x8xf32>, vector<256x8xf32> -> vector<256x8xf32>
    %65 = arith.addf %59, %64 : vector<256x8xf32>
    %66 = vector.extract_strided_slice %52 {offsets = [0, 2, 0], sizes = [16, 16, 8], strides = [1, 1, 1]} : vector<18x18x8xf32> to vector<16x16x8xf32>
    %67 = vector.shape_cast %66 : vector<16x16x8xf32> to vector<256x8xf32>
    %c2 = arith.constant 2 : index
    %c0_32 = arith.constant 0 : index
    %c0_33 = arith.constant 0 : index
    %68 = vector.load %arg2[%c2, %c0_32, %c0_33] : memref<9x8x8xf32, #tpu.memory_space<vmem>>, vector<1x8x8xf32>
    %69 = vector.shape_cast %68 : vector<1x8x8xf32> to vector<8x8xf32>
    %cst_34 = arith.constant dense<0.000000e+00> : vector<256x8xf32>
    %70 = tpu.matmul %67, %69, %cst_34 {dimension_numbers = #tpu.dot_dimension_numbers<[1], [0], [0], [1], [0, 0, 1, 1], [], []>} : vector<256x8xf32>, vector<8x8xf32>, vector<256x8xf32> -> vector<256x8xf32>
    %71 = arith.addf %65, %70 : vector<256x8xf32>
    %72 = vector.extract_strided_slice %52 {offsets = [1, 0, 0], sizes = [16, 16, 8], strides = [1, 1, 1]} : vector<18x18x8xf32> to vector<16x16x8xf32>
    %73 = vector.shape_cast %72 : vector<16x16x8xf32> to vector<256x8xf32>
    %c3 = arith.constant 3 : index
    %c0_35 = arith.constant 0 : index
    %c0_36 = arith.constant 0 : index
    %74 = vector.load %arg2[%c3, %c0_35, %c0_36] : memref<9x8x8xf32, #tpu.memory_space<vmem>>, vector<1x8x8xf32>
    %75 = vector.shape_cast %74 : vector<1x8x8xf32> to vector<8x8xf32>
    %cst_37 = arith.constant dense<0.000000e+00> : vector<256x8xf32>
    %76 = tpu.matmul %73, %75, %cst_37 {dimension_numbers = #tpu.dot_dimension_numbers<[1], [0], [0], [1], [0, 0, 1, 1], [], []>} : vector<256x8xf32>, vector<8x8xf32>, vector<256x8xf32> -> vector<256x8xf32>
    %77 = arith.addf %71, %76 : vector<256x8xf32>
    %78 = vector.extract_strided_slice %52 {offsets = [1, 1, 0], sizes = [16, 16, 8], strides = [1, 1, 1]} : vector<18x18x8xf32> to vector<16x16x8xf32>
    %79 = vector.shape_cast %78 : vector<16x16x8xf32> to vector<256x8xf32>
    %c4 = arith.constant 4 : index
    %c0_38 = arith.constant 0 : index
    %c0_39 = arith.constant 0 : index
    %80 = vector.load %arg2[%c4, %c0_38, %c0_39] : memref<9x8x8xf32, #tpu.memory_space<vmem>>, vector<1x8x8xf32>
    %81 = vector.shape_cast %80 : vector<1x8x8xf32> to vector<8x8xf32>
    %cst_40 = arith.constant dense<0.000000e+00> : vector<256x8xf32>
    %82 = tpu.matmul %79, %81, %cst_40 {dimension_numbers = #tpu.dot_dimension_numbers<[1], [0], [0], [1], [0, 0, 1, 1], [], []>} : vector<256x8xf32>, vector<8x8xf32>, vector<256x8xf32> -> vector<256x8xf32>
    %83 = arith.addf %77, %82 : vector<256x8xf32>
    %84 = vector.extract_strided_slice %52 {offsets = [1, 2, 0], sizes = [16, 16, 8], strides = [1, 1, 1]} : vector<18x18x8xf32> to vector<16x16x8xf32>
    %85 = vector.shape_cast %84 : vector<16x16x8xf32> to vector<256x8xf32>
    %c5 = arith.constant 5 : index
    %c0_41 = arith.constant 0 : index
    %c0_42 = arith.constant 0 : index
    %86 = vector.load %arg2[%c5, %c0_41, %c0_42] : memref<9x8x8xf32, #tpu.memory_space<vmem>>, vector<1x8x8xf32>
    %87 = vector.shape_cast %86 : vector<1x8x8xf32> to vector<8x8xf32>
    %cst_43 = arith.constant dense<0.000000e+00> : vector<256x8xf32>
    %88 = tpu.matmul %85, %87, %cst_43 {dimension_numbers = #tpu.dot_dimension_numbers<[1], [0], [0], [1], [0, 0, 1, 1], [], []>} : vector<256x8xf32>, vector<8x8xf32>, vector<256x8xf32> -> vector<256x8xf32>
    %89 = arith.addf %83, %88 : vector<256x8xf32>
    %90 = vector.extract_strided_slice %52 {offsets = [2, 0, 0], sizes = [16, 16, 8], strides = [1, 1, 1]} : vector<18x18x8xf32> to vector<16x16x8xf32>
    %91 = vector.shape_cast %90 : vector<16x16x8xf32> to vector<256x8xf32>
    %c6 = arith.constant 6 : index
    %c0_44 = arith.constant 0 : index
    %c0_45 = arith.constant 0 : index
    %92 = vector.load %arg2[%c6, %c0_44, %c0_45] : memref<9x8x8xf32, #tpu.memory_space<vmem>>, vector<1x8x8xf32>
    %93 = vector.shape_cast %92 : vector<1x8x8xf32> to vector<8x8xf32>
    %cst_46 = arith.constant dense<0.000000e+00> : vector<256x8xf32>
    %94 = tpu.matmul %91, %93, %cst_46 {dimension_numbers = #tpu.dot_dimension_numbers<[1], [0], [0], [1], [0, 0, 1, 1], [], []>} : vector<256x8xf32>, vector<8x8xf32>, vector<256x8xf32> -> vector<256x8xf32>
    %95 = arith.addf %89, %94 : vector<256x8xf32>
    %96 = vector.extract_strided_slice %52 {offsets = [2, 1, 0], sizes = [16, 16, 8], strides = [1, 1, 1]} : vector<18x18x8xf32> to vector<16x16x8xf32>
    %97 = vector.shape_cast %96 : vector<16x16x8xf32> to vector<256x8xf32>
    %c7 = arith.constant 7 : index
    %c0_47 = arith.constant 0 : index
    %c0_48 = arith.constant 0 : index
    %98 = vector.load %arg2[%c7, %c0_47, %c0_48] : memref<9x8x8xf32, #tpu.memory_space<vmem>>, vector<1x8x8xf32>
    %99 = vector.shape_cast %98 : vector<1x8x8xf32> to vector<8x8xf32>
    %cst_49 = arith.constant dense<0.000000e+00> : vector<256x8xf32>
    %100 = tpu.matmul %97, %99, %cst_49 {dimension_numbers = #tpu.dot_dimension_numbers<[1], [0], [0], [1], [0, 0, 1, 1], [], []>} : vector<256x8xf32>, vector<8x8xf32>, vector<256x8xf32> -> vector<256x8xf32>
    %101 = arith.addf %95, %100 : vector<256x8xf32>
    %102 = vector.extract_strided_slice %52 {offsets = [2, 2, 0], sizes = [16, 16, 8], strides = [1, 1, 1]} : vector<18x18x8xf32> to vector<16x16x8xf32>
    %103 = vector.shape_cast %102 : vector<16x16x8xf32> to vector<256x8xf32>
    %c8 = arith.constant 8 : index
    %c0_50 = arith.constant 0 : index
    %c0_51 = arith.constant 0 : index
    %104 = vector.load %arg2[%c8, %c0_50, %c0_51] : memref<9x8x8xf32, #tpu.memory_space<vmem>>, vector<1x8x8xf32>
    %105 = vector.shape_cast %104 : vector<1x8x8xf32> to vector<8x8xf32>
    %cst_52 = arith.constant dense<0.000000e+00> : vector<256x8xf32>
    %106 = tpu.matmul %103, %105, %cst_52 {dimension_numbers = #tpu.dot_dimension_numbers<[1], [0], [0], [1], [0, 0, 1, 1], [], []>} : vector<256x8xf32>, vector<8x8xf32>, vector<256x8xf32> -> vector<256x8xf32>
    %107 = arith.addf %101, %106 : vector<256x8xf32>
    %c0_53 = arith.constant 0 : index
    %c0_54 = arith.constant 0 : index
    %108 = vector.load %arg3[%c0_53, %c0_54] : memref<1x8xf32, #tpu.memory_space<vmem>>, vector<1x8xf32>
    %109 = vector.broadcast %108 : vector<1x8xf32> to vector<256x8xf32>
    %110 = arith.addf %107, %109 : vector<256x8xf32>
    %c0_55 = arith.constant 0 : index
    %c0_56 = arith.constant 0 : index
    %111 = vector.load %arg7[%c0_55, %c0_56] : memref<256x8xf32, #tpu.memory_space<vmem>>, vector<256x8xf32>
    tpu.vector_store %arg7[%c0_55, %c0_56], %110 {strides = array<i32>} : memref<256x8xf32, #tpu.memory_space<vmem>>, vector<256x8xf32>,
    %112 = vector.shape_cast %110 : vector<256x8xf32> to vector<32x8x8xf32>
    %cst_57 = arith.constant dense<0.000000e+00> : vector<8x8xf32>
    %113 = vector.multi_reduction <add>, %112, %cst_57 [0] : vector<32x8x8xf32> to vector<8x8xf32>
    %114 = arith.mulf %112, %112 : vector<32x8x8xf32>
    %cst_58 = arith.constant dense<0.000000e+00> : vector<8x8xf32>
    %115 = vector.multi_reduction <add>, %114, %cst_58 [0] : vector<32x8x8xf32> to vector<8x8xf32>
    %c0_59 = arith.constant 0 : index
    %c0_60 = arith.constant 0 : index
    %116 = vector.load %arg8[%c0_59, %c0_60] : memref<8x8xf32, #tpu.memory_space<vmem>>, vector<8x8xf32>
    tpu.vector_store %arg8[%c0_59, %c0_60], %113 {strides = array<i32>} : memref<8x8xf32, #tpu.memory_space<vmem>>, vector<8x8xf32>,
    %c0_61 = arith.constant 0 : index
    %c0_62 = arith.constant 0 : index
    %117 = vector.load %arg9[%c0_61, %c0_62] : memref<8x8xf32, #tpu.memory_space<vmem>>, vector<8x8xf32>
    tpu.vector_store %arg9[%c0_61, %c0_62], %115 {strides = array<i32>} : memref<8x8xf32, #tpu.memory_space<vmem>>, vector<8x8xf32>,
    return
  }
  func.func @transform_0(%arg0: i32) -> (i32, i32, i32, i32) {
    %c0_i32 = arith.constant 0 : i32
    %c0_i32_0 = arith.constant 0 : i32
    %c0_i32_1 = arith.constant 0 : i32
    %c0_i32_2 = arith.constant 0 : i32
    return %arg0, %c0_i32, %c0_i32_0, %c0_i32_1 : i32, i32, i32, i32
  }
  func.func @transform_1(%arg0: i32) -> (i32, i32, i32) {
    %c0_i32 = arith.constant 0 : i32
    %c0_i32_0 = arith.constant 0 : i32
    %c0_i32_1 = arith.constant 0 : i32
    %c0_i32_2 = arith.constant 0 : i32
    return %c0_i32, %c0_i32_0, %c0_i32_1 : i32, i32, i32
  }
  func.func @transform_2(%arg0: i32) -> (i32, i32) {
    %c0_i32 = arith.constant 0 : i32
    %c0_i32_0 = arith.constant 0 : i32
    %c0_i32_1 = arith.constant 0 : i32
    return %c0_i32, %c0_i32_0 : i32, i32
  }
  func.func @transform_3(%arg0: i32) -> (i32, i32) {
    %c0_i32 = arith.constant 0 : i32
    %c0_i32_0 = arith.constant 0 : i32
    %c0_i32_1 = arith.constant 0 : i32
    return %c0_i32, %c0_i32_0 : i32, i32
  }
  func.func @transform_4(%arg0: i32) -> (i32, i32) {
    %c0_i32 = arith.constant 0 : i32
    %c0_i32_0 = arith.constant 0 : i32
    %c0_i32_1 = arith.constant 0 : i32
    return %c0_i32, %c0_i32_0 : i32, i32
  }
  func.func @transform_5(%arg0: i32) -> (i32, i32, i32, i32) {
    %c0_i32 = arith.constant 0 : i32
    %c0_i32_0 = arith.constant 0 : i32
    %c0_i32_1 = arith.constant 0 : i32
    %c0_i32_2 = arith.constant 0 : i32
    %c0_i32_3 = arith.constant 0 : i32
    return %c0_i32, %c0_i32_0, %c0_i32_1, %c0_i32_2 : i32, i32, i32, i32
  }
  func.func @transform_6(%arg0: i32) -> (i32, i32) {
    %c0_i32 = arith.constant 0 : i32
    %c0_i32_0 = arith.constant 0 : i32
    return %arg0, %c0_i32 : i32, i32
  }
  func.func @transform_7(%arg0: i32) -> (i32, i32) {
    %c0_i32 = arith.constant 0 : i32
    %c0_i32_0 = arith.constant 0 : i32
    return %arg0, %c0_i32 : i32, i32
  }
  func.func @transform_8(%arg0: i32) -> (i32, i32) {
    %c0_i32 = arith.constant 0 : i32
    %c0_i32_0 = arith.constant 0 : i32
    return %arg0, %c0_i32 : i32, i32
  }
}

module attributes {stable_mosaic.version = 11 : i64} {
  func.func @kernel(%arg0: i32, %arg1: memref<256x8xf32, #tpu.memory_space<vmem>>, %arg2: memref<256x8xf32, #tpu.memory_space<vmem>>, %arg3: memref<1x8xf32, #tpu.memory_space<vmem>>, %arg4: memref<1x8xf32, #tpu.memory_space<vmem>>, %arg5: memref<1x8xf32, #tpu.memory_space<vmem>>, %arg6: memref<1x8xf32, #tpu.memory_space<vmem>>, %arg7: memref<8x8xf32, #tpu.memory_space<vmem>>, %arg8: memref<8x8xf32, #tpu.memory_space<vmem>>, %arg9: memref<1x8xf32, #tpu.memory_space<vmem>>, %arg10: memref<256x8xf32, #tpu.memory_space<vmem>>, %arg11: memref<256x8xf32, #tpu.memory_space<vmem>>, %arg12: memref<8x8xf32, #tpu.memory_space<vmem>>, %arg13: memref<8x8xf32, #tpu.memory_space<vmem>>) attributes {dimension_semantics = [#tpu.dimension_semantics<parallel>], iteration_bounds = array<i64: 2>, scalar_prefetch = 0 : i64, scratch_operands = 0 : i64, tpu.core_type = #tpu.core_type<tc>, window_params = [{transform_indices = @transform_0, window_bounds = array<i64: 256, 8>}, {transform_indices = @transform_1, window_bounds = array<i64: 256, 8>}, {pipeline_mode = #tpu.pipeline_mode<synchronous>, transform_indices = @transform_2, window_bounds = array<i64: 1, 8>}, {pipeline_mode = #tpu.pipeline_mode<synchronous>, transform_indices = @transform_3, window_bounds = array<i64: 1, 8>}, {pipeline_mode = #tpu.pipeline_mode<synchronous>, transform_indices = @transform_4, window_bounds = array<i64: 1, 8>}, {pipeline_mode = #tpu.pipeline_mode<synchronous>, transform_indices = @transform_5, window_bounds = array<i64: 1, 8>}, {pipeline_mode = #tpu.pipeline_mode<synchronous>, transform_indices = @transform_6, window_bounds = array<i64: 8, 8>}, {pipeline_mode = #tpu.pipeline_mode<synchronous>, transform_indices = @transform_7, window_bounds = array<i64: 8, 8>}, {pipeline_mode = #tpu.pipeline_mode<synchronous>, transform_indices = @transform_8, window_bounds = array<i64: 1, 8>}, {transform_indices = @transform_9, window_bounds = array<i64: 256, 8>}, {transform_indices = @transform_10, window_bounds = array<i64: 256, 8>}, {transform_indices = @transform_11, window_bounds = array<i64: 8, 8>}, {transform_indices = @transform_12, window_bounds = array<i64: 8, 8>}]} {
    %c0 = arith.constant 0 : index
    %c0_0 = arith.constant 0 : index
    %0 = vector.load %arg1[%c0, %c0_0] : memref<256x8xf32, #tpu.memory_space<vmem>>, vector<256x8xf32>
    %c0_1 = arith.constant 0 : index
    %c0_2 = arith.constant 0 : index
    %1 = vector.load %arg3[%c0_1, %c0_2] : memref<1x8xf32, #tpu.memory_space<vmem>>, vector<1x8xf32>
    %2 = vector.broadcast %1 : vector<1x8xf32> to vector<256x8xf32>
    %3 = arith.mulf %0, %2 : vector<256x8xf32>
    %c0_3 = arith.constant 0 : index
    %c0_4 = arith.constant 0 : index
    %4 = vector.load %arg4[%c0_3, %c0_4] : memref<1x8xf32, #tpu.memory_space<vmem>>, vector<1x8xf32>
    %5 = vector.broadcast %4 : vector<1x8xf32> to vector<256x8xf32>
    %6 = arith.addf %3, %5 : vector<256x8xf32>
    %cst = arith.constant 5.000000e-01 : f32
    %7 = vector.broadcast %cst : f32 to vector<256x8xf32>
    %8 = arith.mulf %7, %6 : vector<256x8xf32>
    %cst_5 = arith.constant 0.707106769 : f32
    %9 = vector.broadcast %cst_5 : f32 to vector<256x8xf32>
    %10 = arith.mulf %6, %9 : vector<256x8xf32>
    %11 = math.absf %10 : vector<256x8xf32>
    %cst_6 = arith.constant 0.327591091 : f32
    %12 = vector.broadcast %cst_6 : f32 to vector<256x8xf32>
    %13 = arith.mulf %12, %11 : vector<256x8xf32>
    %cst_7 = arith.constant 1.000000e+00 : f32
    %14 = vector.broadcast %cst_7 : f32 to vector<256x8xf32>
    %15 = arith.addf %14, %13 : vector<256x8xf32>
    %16 = tpu.reciprocal %15 {approx = true} : vector<256x8xf32> -> vector<256x8xf32>
    %cst_8 = arith.constant 1.06140542 : f32
    %17 = vector.broadcast %cst_8 : f32 to vector<256x8xf32>
    %18 = arith.mulf %17, %16 : vector<256x8xf32>
    %cst_9 = arith.constant -1.45315206 : f32
    %19 = vector.broadcast %cst_9 : f32 to vector<256x8xf32>
    %20 = arith.addf %18, %19 : vector<256x8xf32>
    %21 = arith.mulf %20, %16 : vector<256x8xf32>
    %cst_10 = arith.constant 1.42141378 : f32
    %22 = vector.broadcast %cst_10 : f32 to vector<256x8xf32>
    %23 = arith.addf %21, %22 : vector<256x8xf32>
    %24 = arith.mulf %23, %16 : vector<256x8xf32>
    %cst_11 = arith.constant -0.284496725 : f32
    %25 = vector.broadcast %cst_11 : f32 to vector<256x8xf32>
    %26 = arith.addf %24, %25 : vector<256x8xf32>
    %27 = arith.mulf %26, %16 : vector<256x8xf32>
    %cst_12 = arith.constant 0.254829586 : f32
    %28 = vector.broadcast %cst_12 : f32 to vector<256x8xf32>
    %29 = arith.addf %27, %28 : vector<256x8xf32>
    %30 = arith.mulf %29, %16 : vector<256x8xf32>
    %cst_13 = arith.constant 0.000000e+00 : f32
    %31 = vector.broadcast %cst_13 : f32 to vector<256x8xf32>
    %32 = arith.subf %31, %11 : vector<256x8xf32>
    %33 = arith.mulf %32, %11 : vector<256x8xf32>
    %34 = math.exp %33 : vector<256x8xf32>
    %35 = arith.mulf %30, %34 : vector<256x8xf32>
    %cst_14 = arith.constant 1.000000e+00 : f32
    %36 = vector.broadcast %cst_14 : f32 to vector<256x8xf32>
    %37 = arith.subf %36, %35 : vector<256x8xf32>
    %cst_15 = arith.constant 0.000000e+00 : f32
    %38 = vector.broadcast %cst_15 : f32 to vector<256x8xf32>
    %39 = arith.cmpf oge, %10, %38 : vector<256x8xf32>
    %cst_16 = arith.constant 0.000000e+00 : f32
    %40 = vector.broadcast %cst_16 : f32 to vector<256x8xf32>
    %41 = arith.subf %40, %37 : vector<256x8xf32>
    %42 = arith.select %39, %37, %41 : vector<256x8xi1>, vector<256x8xf32>
    %cst_17 = arith.constant 1.000000e+00 : f32
    %43 = vector.broadcast %cst_17 : f32 to vector<256x8xf32>
    %44 = arith.addf %43, %42 : vector<256x8xf32>
    %45 = arith.mulf %8, %44 : vector<256x8xf32>
    %c0_18 = arith.constant 0 : index
    %c0_19 = arith.constant 0 : index
    %46 = vector.load %arg2[%c0_18, %c0_19] : memref<256x8xf32, #tpu.memory_space<vmem>>, vector<256x8xf32>
    %c0_20 = arith.constant 0 : index
    %c0_21 = arith.constant 0 : index
    %47 = vector.load %arg5[%c0_20, %c0_21] : memref<1x8xf32, #tpu.memory_space<vmem>>, vector<1x8xf32>
    %48 = vector.broadcast %47 : vector<1x8xf32> to vector<256x8xf32>
    %49 = arith.mulf %46, %48 : vector<256x8xf32>
    %c0_22 = arith.constant 0 : index
    %c0_23 = arith.constant 0 : index
    %50 = vector.load %arg6[%c0_22, %c0_23] : memref<1x8xf32, #tpu.memory_space<vmem>>, vector<1x8xf32>
    %51 = vector.broadcast %50 : vector<1x8xf32> to vector<256x8xf32>
    %52 = arith.addf %49, %51 : vector<256x8xf32>
    %cst_24 = arith.constant 5.000000e-01 : f32
    %53 = vector.broadcast %cst_24 : f32 to vector<256x8xf32>
    %54 = arith.mulf %53, %52 : vector<256x8xf32>
    %cst_25 = arith.constant 0.707106769 : f32
    %55 = vector.broadcast %cst_25 : f32 to vector<256x8xf32>
    %56 = arith.mulf %52, %55 : vector<256x8xf32>
    %57 = math.absf %56 : vector<256x8xf32>
    %cst_26 = arith.constant 0.327591091 : f32
    %58 = vector.broadcast %cst_26 : f32 to vector<256x8xf32>
    %59 = arith.mulf %58, %57 : vector<256x8xf32>
    %cst_27 = arith.constant 1.000000e+00 : f32
    %60 = vector.broadcast %cst_27 : f32 to vector<256x8xf32>
    %61 = arith.addf %60, %59 : vector<256x8xf32>
    %62 = tpu.reciprocal %61 {approx = true} : vector<256x8xf32> -> vector<256x8xf32>
    %cst_28 = arith.constant 1.06140542 : f32
    %63 = vector.broadcast %cst_28 : f32 to vector<256x8xf32>
    %64 = arith.mulf %63, %62 : vector<256x8xf32>
    %cst_29 = arith.constant -1.45315206 : f32
    %65 = vector.broadcast %cst_29 : f32 to vector<256x8xf32>
    %66 = arith.addf %64, %65 : vector<256x8xf32>
    %67 = arith.mulf %66, %62 : vector<256x8xf32>
    %cst_30 = arith.constant 1.42141378 : f32
    %68 = vector.broadcast %cst_30 : f32 to vector<256x8xf32>
    %69 = arith.addf %67, %68 : vector<256x8xf32>
    %70 = arith.mulf %69, %62 : vector<256x8xf32>
    %cst_31 = arith.constant -0.284496725 : f32
    %71 = vector.broadcast %cst_31 : f32 to vector<256x8xf32>
    %72 = arith.addf %70, %71 : vector<256x8xf32>
    %73 = arith.mulf %72, %62 : vector<256x8xf32>
    %cst_32 = arith.constant 0.254829586 : f32
    %74 = vector.broadcast %cst_32 : f32 to vector<256x8xf32>
    %75 = arith.addf %73, %74 : vector<256x8xf32>
    %76 = arith.mulf %75, %62 : vector<256x8xf32>
    %cst_33 = arith.constant 0.000000e+00 : f32
    %77 = vector.broadcast %cst_33 : f32 to vector<256x8xf32>
    %78 = arith.subf %77, %57 : vector<256x8xf32>
    %79 = arith.mulf %78, %57 : vector<256x8xf32>
    %80 = math.exp %79 : vector<256x8xf32>
    %81 = arith.mulf %76, %80 : vector<256x8xf32>
    %cst_34 = arith.constant 1.000000e+00 : f32
    %82 = vector.broadcast %cst_34 : f32 to vector<256x8xf32>
    %83 = arith.subf %82, %81 : vector<256x8xf32>
    %cst_35 = arith.constant 0.000000e+00 : f32
    %84 = vector.broadcast %cst_35 : f32 to vector<256x8xf32>
    %85 = arith.cmpf oge, %56, %84 : vector<256x8xf32>
    %cst_36 = arith.constant 0.000000e+00 : f32
    %86 = vector.broadcast %cst_36 : f32 to vector<256x8xf32>
    %87 = arith.subf %86, %83 : vector<256x8xf32>
    %88 = arith.select %85, %83, %87 : vector<256x8xi1>, vector<256x8xf32>
    %cst_37 = arith.constant 1.000000e+00 : f32
    %89 = vector.broadcast %cst_37 : f32 to vector<256x8xf32>
    %90 = arith.addf %89, %88 : vector<256x8xf32>
    %91 = arith.mulf %54, %90 : vector<256x8xf32>
    %c0_38 = arith.constant 0 : index
    %c0_39 = arith.constant 0 : index
    %92 = vector.load %arg11[%c0_38, %c0_39] : memref<256x8xf32, #tpu.memory_space<vmem>>, vector<256x8xf32>
    tpu.vector_store %arg11[%c0_38, %c0_39], %91 {strides = array<i32>} : memref<256x8xf32, #tpu.memory_space<vmem>>, vector<256x8xf32>,
    %c0_40 = arith.constant 0 : index
    %c0_41 = arith.constant 0 : index
    %93 = vector.load %arg7[%c0_40, %c0_41] : memref<8x8xf32, #tpu.memory_space<vmem>>, vector<8x8xf32>
    %cst_42 = arith.constant dense<0.000000e+00> : vector<256x8xf32>
    %94 = tpu.matmul %45, %93, %cst_42 {dimension_numbers = #tpu.dot_dimension_numbers<[1], [0], [0], [1], [0, 0, 1, 1], [], []>} : vector<256x8xf32>, vector<8x8xf32>, vector<256x8xf32> -> vector<256x8xf32>
    %c0_43 = arith.constant 0 : index
    %c0_44 = arith.constant 0 : index
    %95 = vector.load %arg8[%c0_43, %c0_44] : memref<8x8xf32, #tpu.memory_space<vmem>>, vector<8x8xf32>
    %cst_45 = arith.constant dense<0.000000e+00> : vector<256x8xf32>
    %96 = tpu.matmul %91, %95, %cst_45 {dimension_numbers = #tpu.dot_dimension_numbers<[1], [0], [0], [1], [0, 0, 1, 1], [], []>} : vector<256x8xf32>, vector<8x8xf32>, vector<256x8xf32> -> vector<256x8xf32>
    %97 = arith.addf %94, %96 : vector<256x8xf32>
    %c0_46 = arith.constant 0 : index
    %c0_47 = arith.constant 0 : index
    %98 = vector.load %arg9[%c0_46, %c0_47] : memref<1x8xf32, #tpu.memory_space<vmem>>, vector<1x8xf32>
    %99 = vector.broadcast %98 : vector<1x8xf32> to vector<256x8xf32>
    %100 = arith.addf %97, %99 : vector<256x8xf32>
    %c0_48 = arith.constant 0 : index
    %c0_49 = arith.constant 0 : index
    %101 = vector.load %arg10[%c0_48, %c0_49] : memref<256x8xf32, #tpu.memory_space<vmem>>, vector<256x8xf32>
    tpu.vector_store %arg10[%c0_48, %c0_49], %100 {strides = array<i32>} : memref<256x8xf32, #tpu.memory_space<vmem>>, vector<256x8xf32>,
    %102 = vector.shape_cast %100 : vector<256x8xf32> to vector<32x8x8xf32>
    %cst_50 = arith.constant dense<0.000000e+00> : vector<8x8xf32>
    %103 = vector.multi_reduction <add>, %102, %cst_50 [0] : vector<32x8x8xf32> to vector<8x8xf32>
    %104 = arith.mulf %102, %102 : vector<32x8x8xf32>
    %cst_51 = arith.constant dense<0.000000e+00> : vector<8x8xf32>
    %105 = vector.multi_reduction <add>, %104, %cst_51 [0] : vector<32x8x8xf32> to vector<8x8xf32>
    %c0_52 = arith.constant 0 : index
    %c0_53 = arith.constant 0 : index
    %106 = vector.load %arg12[%c0_52, %c0_53] : memref<8x8xf32, #tpu.memory_space<vmem>>, vector<8x8xf32>
    tpu.vector_store %arg12[%c0_52, %c0_53], %103 {strides = array<i32>} : memref<8x8xf32, #tpu.memory_space<vmem>>, vector<8x8xf32>,
    %c0_54 = arith.constant 0 : index
    %c0_55 = arith.constant 0 : index
    %107 = vector.load %arg13[%c0_54, %c0_55] : memref<8x8xf32, #tpu.memory_space<vmem>>, vector<8x8xf32>
    tpu.vector_store %arg13[%c0_54, %c0_55], %105 {strides = array<i32>} : memref<8x8xf32, #tpu.memory_space<vmem>>, vector<8x8xf32>,
    return
  }
  func.func @transform_0(%arg0: i32) -> (i32, i32) {
    %c0_i32 = arith.constant 0 : i32
    %c0_i32_0 = arith.constant 0 : i32
    return %arg0, %c0_i32 : i32, i32
  }
  func.func @transform_1(%arg0: i32) -> (i32, i32) {
    %c0_i32 = arith.constant 0 : i32
    %c0_i32_0 = arith.constant 0 : i32
    return %arg0, %c0_i32 : i32, i32
  }
  func.func @transform_2(%arg0: i32) -> (i32, i32) {
    %c0_i32 = arith.constant 0 : i32
    %c0_i32_0 = arith.constant 0 : i32
    %c0_i32_1 = arith.constant 0 : i32
    return %c0_i32, %c0_i32_0 : i32, i32
  }
  func.func @transform_3(%arg0: i32) -> (i32, i32) {
    %c0_i32 = arith.constant 0 : i32
    %c0_i32_0 = arith.constant 0 : i32
    %c0_i32_1 = arith.constant 0 : i32
    return %c0_i32, %c0_i32_0 : i32, i32
  }
  func.func @transform_4(%arg0: i32) -> (i32, i32) {
    %c0_i32 = arith.constant 0 : i32
    %c0_i32_0 = arith.constant 0 : i32
    %c0_i32_1 = arith.constant 0 : i32
    return %c0_i32, %c0_i32_0 : i32, i32
  }
  func.func @transform_5(%arg0: i32) -> (i32, i32) {
    %c0_i32 = arith.constant 0 : i32
    %c0_i32_0 = arith.constant 0 : i32
    %c0_i32_1 = arith.constant 0 : i32
    return %c0_i32, %c0_i32_0 : i32, i32
  }
  func.func @transform_6(%arg0: i32) -> (i32, i32) {
    %c0_i32 = arith.constant 0 : i32
    %c0_i32_0 = arith.constant 0 : i32
    %c0_i32_1 = arith.constant 0 : i32
    return %c0_i32, %c0_i32_0 : i32, i32
  }
  func.func @transform_7(%arg0: i32) -> (i32, i32) {
    %c0_i32 = arith.constant 0 : i32
    %c0_i32_0 = arith.constant 0 : i32
    %c0_i32_1 = arith.constant 0 : i32
    return %c0_i32, %c0_i32_0 : i32, i32
  }
  func.func @transform_8(%arg0: i32) -> (i32, i32) {
    %c0_i32 = arith.constant 0 : i32
    %c0_i32_0 = arith.constant 0 : i32
    %c0_i32_1 = arith.constant 0 : i32
    return %c0_i32, %c0_i32_0 : i32, i32
  }
  func.func @transform_9(%arg0: i32) -> (i32, i32) {
    %c0_i32 = arith.constant 0 : i32
    %c0_i32_0 = arith.constant 0 : i32
    return %arg0, %c0_i32 : i32, i32
  }
  func.func @transform_10(%arg0: i32) -> (i32, i32) {
    %c0_i32 = arith.constant 0 : i32
    %c0_i32_0 = arith.constant 0 : i32
    return %arg0, %c0_i32 : i32, i32
  }
  func.func @transform_11(%arg0: i32) -> (i32, i32) {
    %c0_i32 = arith.constant 0 : i32
    %c0_i32_0 = arith.constant 0 : i32
    return %arg0, %c0_i32 : i32, i32
  }
  func.func @transform_12(%arg0: i32) -> (i32, i32) {
    %c0_i32 = arith.constant 0 : i32
    %c0_i32_0 = arith.constant 0 : i32
    return %arg0, %c0_i32 : i32, i32
  }
}

module attributes {stable_mosaic.version = 11 : i64} {
  func.func @_apply_kernel(%arg0: i32, %arg1: memref<16x128xf32, #tpu.memory_space<vmem>>, %arg2: memref<1x128xf32, #tpu.memory_space<vmem>>, %arg3: memref<1x128xf32, #tpu.memory_space<vmem>>, %arg4: memref<16x128xf32, #tpu.memory_space<vmem>>) attributes {dimension_semantics = [#tpu.dimension_semantics<parallel>], iteration_bounds = array<i64: 2>, scalar_prefetch = 0 : i64, scratch_operands = 0 : i64, tpu.core_type = #tpu.core_type<tc>, window_params = [{transform_indices = @transform_0, window_bounds = array<i64: 16, 128>}, {pipeline_mode = #tpu.pipeline_mode<synchronous>, transform_indices = @transform_1, window_bounds = array<i64: 1, 128>}, {pipeline_mode = #tpu.pipeline_mode<synchronous>, transform_indices = @transform_2, window_bounds = array<i64: 1, 128>}, {transform_indices = @transform_3, window_bounds = array<i64: 16, 128>}]} {
    %c0 = arith.constant 0 : index
    %c0_0 = arith.constant 0 : index
    %0 = vector.load %arg1[%c0, %c0_0] : memref<16x128xf32, #tpu.memory_space<vmem>>, vector<16x128xf32>
    %c0_1 = arith.constant 0 : index
    %c0_2 = arith.constant 0 : index
    %1 = vector.load %arg2[%c0_1, %c0_2] : memref<1x128xf32, #tpu.memory_space<vmem>>, vector<1x128xf32>
    %2 = vector.broadcast %1 : vector<1x128xf32> to vector<16x128xf32>
    %3 = arith.mulf %0, %2 : vector<16x128xf32>
    %c0_3 = arith.constant 0 : index
    %c0_4 = arith.constant 0 : index
    %4 = vector.load %arg3[%c0_3, %c0_4] : memref<1x128xf32, #tpu.memory_space<vmem>>, vector<1x128xf32>
    %5 = vector.broadcast %4 : vector<1x128xf32> to vector<16x128xf32>
    %6 = arith.addf %3, %5 : vector<16x128xf32>
    %cst = arith.constant 5.000000e-01 : f32
    %7 = vector.broadcast %cst : f32 to vector<16x128xf32>
    %8 = arith.mulf %7, %6 : vector<16x128xf32>
    %cst_5 = arith.constant 0.707106769 : f32
    %9 = vector.broadcast %cst_5 : f32 to vector<16x128xf32>
    %10 = arith.mulf %6, %9 : vector<16x128xf32>
    %11 = math.absf %10 : vector<16x128xf32>
    %cst_6 = arith.constant 0.327591091 : f32
    %12 = vector.broadcast %cst_6 : f32 to vector<16x128xf32>
    %13 = arith.mulf %12, %11 : vector<16x128xf32>
    %cst_7 = arith.constant 1.000000e+00 : f32
    %14 = vector.broadcast %cst_7 : f32 to vector<16x128xf32>
    %15 = arith.addf %14, %13 : vector<16x128xf32>
    %16 = tpu.reciprocal %15 {approx = true} : vector<16x128xf32> -> vector<16x128xf32>
    %cst_8 = arith.constant 1.06140542 : f32
    %17 = vector.broadcast %cst_8 : f32 to vector<16x128xf32>
    %18 = arith.mulf %17, %16 : vector<16x128xf32>
    %cst_9 = arith.constant -1.45315206 : f32
    %19 = vector.broadcast %cst_9 : f32 to vector<16x128xf32>
    %20 = arith.addf %18, %19 : vector<16x128xf32>
    %21 = arith.mulf %20, %16 : vector<16x128xf32>
    %cst_10 = arith.constant 1.42141378 : f32
    %22 = vector.broadcast %cst_10 : f32 to vector<16x128xf32>
    %23 = arith.addf %21, %22 : vector<16x128xf32>
    %24 = arith.mulf %23, %16 : vector<16x128xf32>
    %cst_11 = arith.constant -0.284496725 : f32
    %25 = vector.broadcast %cst_11 : f32 to vector<16x128xf32>
    %26 = arith.addf %24, %25 : vector<16x128xf32>
    %27 = arith.mulf %26, %16 : vector<16x128xf32>
    %cst_12 = arith.constant 0.254829586 : f32
    %28 = vector.broadcast %cst_12 : f32 to vector<16x128xf32>
    %29 = arith.addf %27, %28 : vector<16x128xf32>
    %30 = arith.mulf %29, %16 : vector<16x128xf32>
    %cst_13 = arith.constant 0.000000e+00 : f32
    %31 = vector.broadcast %cst_13 : f32 to vector<16x128xf32>
    %32 = arith.subf %31, %11 : vector<16x128xf32>
    %33 = arith.mulf %32, %11 : vector<16x128xf32>
    %34 = math.exp %33 : vector<16x128xf32>
    %35 = arith.mulf %30, %34 : vector<16x128xf32>
    %cst_14 = arith.constant 1.000000e+00 : f32
    %36 = vector.broadcast %cst_14 : f32 to vector<16x128xf32>
    %37 = arith.subf %36, %35 : vector<16x128xf32>
    %cst_15 = arith.constant 0.000000e+00 : f32
    %38 = vector.broadcast %cst_15 : f32 to vector<16x128xf32>
    %39 = arith.cmpf oge, %10, %38 : vector<16x128xf32>
    %cst_16 = arith.constant 0.000000e+00 : f32
    %40 = vector.broadcast %cst_16 : f32 to vector<16x128xf32>
    %41 = arith.subf %40, %37 : vector<16x128xf32>
    %42 = arith.select %39, %37, %41 : vector<16x128xi1>, vector<16x128xf32>
    %cst_17 = arith.constant 1.000000e+00 : f32
    %43 = vector.broadcast %cst_17 : f32 to vector<16x128xf32>
    %44 = arith.addf %43, %42 : vector<16x128xf32>
    %45 = arith.mulf %8, %44 : vector<16x128xf32>
    %c0_18 = arith.constant 0 : index
    %c0_19 = arith.constant 0 : index
    %46 = vector.load %arg4[%c0_18, %c0_19] : memref<16x128xf32, #tpu.memory_space<vmem>>, vector<16x128xf32>
    tpu.vector_store %arg4[%c0_18, %c0_19], %45 {strides = array<i32>} : memref<16x128xf32, #tpu.memory_space<vmem>>, vector<16x128xf32>,
    return
  }
  func.func @transform_0(%arg0: i32) -> (i32, i32) {
    %c0_i32 = arith.constant 0 : i32
    %c0_i32_0 = arith.constant 0 : i32
    return %arg0, %c0_i32 : i32, i32
  }
  func.func @transform_1(%arg0: i32) -> (i32, i32) {
    %c0_i32 = arith.constant 0 : i32
    %c0_i32_0 = arith.constant 0 : i32
    %c0_i32_1 = arith.constant 0 : i32
    return %c0_i32, %c0_i32_0 : i32, i32
  }
  func.func @transform_2(%arg0: i32) -> (i32, i32) {
    %c0_i32 = arith.constant 0 : i32
    %c0_i32_0 = arith.constant 0 : i32
    %c0_i32_1 = arith.constant 0 : i32
    return %c0_i32, %c0_i32_0 : i32, i32
  }
  func.func @transform_3(%arg0: i32) -> (i32, i32) {
    %c0_i32 = arith.constant 0 : i32
    %c0_i32_0 = arith.constant 0 : i32
    return %arg0, %c0_i32 : i32, i32
  }
}

</mosaic_0001>

<bundles_post_ra>
// kernel: down2_forward.4
= control target key start
LH: loop header
LB: loop body
LE: loop exit
PB: predicated region body
PF: predicated region fallthrough
CT: control target
= control target key end

     0   :  { %s4768_s18 = smov 0   ;;  %s6104_s0 = inlined_call_operand.vmem [shape: f32[2,18,18,4], index: 0, kind: input, shape index: {}]   ;;  %s6105_s1 = inlined_call_operand.vmem [shape: f32[9,4,8], index: 1, kind: input, shape index: {}]   ;;  %s6106_s2 = inlined_call_operand.vmem [shape: f32[1,8], index: 2, kind: input, shape index: {}]   ;;  %s6107_s3 = inlined_call_operand.vmem [shape: f32[512,8], index: 3, kind: output, shape index: {0}]   ;;  %s6108_s4 = inlined_call_operand.vmem [shape: f32[16,8], index: 4, kind: output, shape index: {1}]   ;;  %s6109_s5 = inlined_call_operand.vmem [shape: f32[16,8], index: 5, kind: output, shape index: {2}]  }
   0x1 LB: > { %s4774_s19 = sadd.s32 4294967295, %s4736_s18   ;;  %p3402_p0 = scmp.ge.s32.totalorder %s4736_s18, 1  ;;  %s4736_s18 = sphi %s4768_s18, %s16_s18  }
   0x2   : > { %p192_p1 = scmp.lt.s32.totalorder %s4736_s18, 3 }
   0x4   : > { %p193_p2 = pnand %p3402_p0, %p192_p1 }
   0x6   : > { %196 = sbr.rel (%p193_p2) target bundleno = 535 (0x217), region = 32 }
   0xd   : > { %v3408_v0 = vld [vmem:[%s6105_s1 + $0x4] sm:$0xf]  ;;  %vm498_vm0 = vcmask 1043456   ;;  %v4784_v1 = vld [vmem:[%s6105_s1 + $0x10] sm:$0xf]  ;;  %p228_p3 = scmp.lt.s32.totalorder %s4774_s19, 1 }
   0xe   : > { %4013 = vmatprep.subr.msk.mxu1 %vm498_vm0, %v3408_v0  ;;  %4213 = vmatprep.subr.msk.mxu0 %vm498_vm0, %v4784_v1  ;;  %v301_v2 = vld [vmem:[%s6105_s1] sm:$0xf]  ;;  %v3577_v3 = vld [vmem:[%s6105_s1 + $0x14] sm:$0xf]  ;;  %vm350_vm1 = vcmask 1046528   ;;  %vm433_vm2 = vcmask 31744  }
   0xf   : > { %4014 = vmatpush3.msk.msra.mxu1 %vm498_vm0, %v3408_v0  ;;  %4214 = vmatpush3.msk.msra.mxu0 %vm498_vm0, %v4784_v1  ;;  %s4800_s28 = scalar_select %p228_p3, %s4774_s19, 1  ;;  %v4873_v33 = vld [vmem:[%s6105_s1 + $0x18] sm:$0xf]  ;;  %v4883_v35 = vld [vmem:[%s6105_s1 + $0x8] sm:$0xf]  ;;  %vm1019_vm3 = vcmask 1045504  }
  0x10   : > { %4063 = vmatprep.subr.msk.mxu1 %vm498_vm0, %v301_v2  ;;  %4263 = vmatprep.subr.msk.mxu0 %vm498_vm0, %v3577_v3  ;;  %s3404_s20 = sshll.u32 %s4774_s19, 5  ;;  %vm3087_vm4 = vcmask 64512  }
  0x11   : > { %s4721_s29 = smul.u32 432, %s4800_s28  ;;  %p234_p4 = scmp.lt.s32.totalorder %s3404_s20, 63 }
  0x12   : > { %s3406_s26 = sshll.u32 %s4800_s28, 3 }
  0x13   : > { %s4808_s7 = scalar_lea.vmem %s6104_s0, %s4721_s29  ;;  %s6285_s20 = smov (!%p234_p4, %s3404_s20), 63 }
  0x14   : > { %v4811_v4 = vld [vmem:[%s4808_s7] sm:$0xff]  ;;  %v4814_v5 = vld [vmem:[%s4808_s7 + $0x8] sm:$0xff]  ;;  %v4817_v6 = vld [vmem:[%s4808_s7 + $0x18] sm:$0xff]  ;;  %s3405_s21 = sshll.u32 %s6285_s20, 3  ;;  %s242_s30 = scalar_lea.vmem %s6108_s4, %s3406_s26 }
  0x15   : > { %6183 = vst [vmem:[#allocation2_spill] sm:$0xff] %v4817_v6  ;;  %v351_v7 = vrot.slane %v4811_v4, 1  ;;  %v352_v8 = vrot.slane %v4814_v5, 1  ;;  %v4822_v9 = vld [vmem:[%s4808_s7 + $0x20] sm:$0xff]  ;;  %v356_v10 = vrot.slane %v4817_v6, 1  ;;  %v4834_v15 = vld [vmem:[%s4808_s7 + $0x30] sm:$0xff]  ;;  %s5920_s25 = scalar_lea.vmem %s6107_s3, %s3405_s21 }
  0x16   : > { %6184 = vst [vmem:[#allocation3_spill] sm:$0xff] %v4822_v9  ;;  %v4826_v11 = vld [vmem:[%s4808_s7 + $0x10] sm:$0x3]  ;;  %v357_v12 = vrot.slane %v4822_v9, 1  ;;  %v4831_v14 = vld [vmem:[%s4808_s7 + $0x28] sm:$0x3] }
  0x17   : > { %v354_v13 = vrot.slane %v4826_v11, 1  ;;  %v353_v16 = vsel %vm350_vm1, %v351_v7, %v352_v8  ;;  %v359_v17 = vrot.slane %v4831_v14, 1  ;;  %v4839_v18 = vld [vmem:[%s4808_s7 + $0x38] sm:$0xff]  ;;  %v361_v19 = vrot.slane %v4834_v15, 1  ;;  %v4843_v20 = vld [vmem:[%s4808_s7 + $0x40] sm:$0x3] }
  0x18   : > { %4015 = vmatprep.mubr.msk.f32.mxu1 %vm433_vm2, %v353_v16  ;;  %v358_v21 = vsel %vm350_vm1, %v356_v10, %v357_v12  ;;  %v362_v23 = vrot.slane %v4839_v18, 1  ;;  %v364_v24 = vrot.slane %v4843_v20, 1  ;;  %v4851_v25 = vld [vmem:[%s4808_s7 + $0x48] sm:$0xff]  ;;  %v4854_v26 = vld [vmem:[%s4808_s7 + $0x50] sm:$0xff]  ;;  %v4857_v27 = vld [vmem:[%s4808_s7 + $0x58] sm:$0x3] }
  0x19   : > { %v355_v22 = vsel %vm350_vm1, %v352_v8, %v354_v13  ;;  %4215 = vmatprep.mubr.msk.f32.mxu0 %vm433_vm2, %v358_v21  ;;  %v360_v28 = vsel %vm350_vm1, %v357_v12, %v359_v17  ;;  %v366_v29 = vrot.slane %v4851_v25, 1  ;;  %v367_v30 = vrot.slane %v4854_v26, 1  ;;  %v4865_v31 = vld [vmem:[%s4808_s7 + $0x60] sm:$0xff]  ;;  %v4868_v32 = vld [vmem:[%s4808_s7 + $0x68] sm:$0xff]  ;;  %v4899_v41 = vld [vmem:[%s4808_s7 + $0x70] sm:$0x3] }
  0x1a   : > { %4016 = vmatmul.mubr.msk.f32.vlgmr.msra.gmra.mrb[0].mxu1 %vm433_vm2, %v355_v22  ;;  %4216 = vmatmul.mubr.msk.f32.vlgmr.msra.gmra.mrb[0].mxu0 %vm433_vm2, %v360_v28  ;;  %v4878_v34 = vsel %vm350_vm1, %v361_v19, %v362_v23  ;;  %v4888_v36 = vsel %vm350_vm1, %v362_v23, %v364_v24  ;;  %v369_v37 = vrot.slane %v4857_v27, 1  ;;  %v371_v39 = vrot.slane %v4865_v31, 1  ;;  %v4905_v42 = vld [vmem:[%s4808_s7 + $0x78] sm:$0xff]  ;;  %v4908_v43 = vld [vmem:[%s4808_s7 + $0x80] sm:$0xff]  ;;  %v4928_v49 = vld [vmem:[%s4808_s7 + $0x88] sm:$0x3] }
  0x1b   : > { %4064 = vmatpush3.msk.msra.mxu1 %vm498_vm0, %v301_v2  ;;  %6185 = vst [vmem:[#allocation4_spill] sm:$0xff] %v4878_v34  ;;  %4264 = vmatpush3.msk.msra.mxu0 %vm498_vm0, %v3577_v3  ;;  %6186 = vst [vmem:[#allocation5_spill] sm:$0xff] %v4888_v36  ;;  %v4894_v38 = vsel %vm350_vm1, %v366_v29, %v367_v30  ;;  %v372_v40 = vrot.slane %v4868_v32, 1  ;;  %v374_v45 = vrot.slane %v4899_v41, 1  ;;  %v376_v47 = vrot.slane %v4905_v42, 1  ;;  %v4933_v50 = vld [vmem:[%s4808_s7 + $0x90] sm:$0xff] }
  0x1c   : > { %4018 = vmatprep.mubr.msk.f32.mxu1 %vm433_vm2, %v358_v21  ;;  %4218 = vmatprep.mubr.msk.f32.mxu0 %vm433_vm2, %v4878_v34  ;;  %6187 = vst [vmem:[#allocation6_spill] sm:$0xff] %v4894_v38  ;;  %v4919_v44 = vsel %vm350_vm1, %v367_v30, %v369_v37  ;;  %v377_v48 = vrot.slane %v4908_v43, 1  ;;  %v4936_v51 = vld [vmem:[%s4808_s7 + $0x98] sm:$0xff]  ;;  %v379_v53 = vrot.slane %v4928_v49, 1  ;;  %v381_v55 = vrot.slane %v4933_v50, 1  ;;  %v4959_v58 = vld [vmem:[%s4808_s7 + $0xa8] sm:$0xff] }
  0x1d   : > { %4313 = vmatprep.subr.msk.mxu0 %vm498_vm0, %v4873_v33  ;;  %4113 = vmatprep.subr.msk.mxu1 %vm498_vm0, %v4883_v35  ;;  %6188 = vst [vmem:[#allocation7_spill] sm:$0xff] %v4919_v44  ;;  %v4923_v46 = vsel %vm350_vm1, %v371_v39, %v372_v40  ;;  %v4945_v52 = vsel %vm350_vm1, %v372_v40, %v374_v45  ;;  %v382_v56 = vrot.slane %v4936_v51, 1  ;;  %v4954_v57 = vld [vmem:[%s4808_s7 + $0xa0] sm:$0x3]  ;;  %v4962_v59 = vld [vmem:[%s4808_s7 + $0xb0] sm:$0xff]  ;;  %v386_v63 = vrot.slane %v4959_v58, 1 }
  0x1e   : > { %4019 = vmatmul.mubr.msk.f32.gmra.mrb[2].mxu1 %vm433_vm2, %v360_v28  ;;  %4219 = vmatmul.mubr.msk.f32.gmra.mrb[2].mxu0 %vm433_vm2, %v4888_v36  ;;  %6189 = vst [vmem:[#allocation8_spill] sm:$0xff] %v4923_v46  ;;  %6190 = vst [vmem:[#allocation9_spill] sm:$0xff] %v4945_v52  ;;  %v4949_v54 = vsel %vm350_vm1, %v376_v47, %v377_v48  ;;  %v4971_v60 = vsel %vm350_vm1, %v377_v48, %v379_v53  ;;  %v384_v61 = vrot.slane %v4954_v57, 1  ;;  %v4980_v2 = vld [vmem:[%s4808_s7 + $0xb8] sm:$0x3]  ;;  %v4985_v3 = vld [vmem:[%s4808_s7 + $0xc0] sm:$0xff] }
  0x1f   : > { %4021 = vmatprep.mubr.msk.f32.mxu1 %vm433_vm2, %v4878_v34  ;;  %4221 = vmatprep.mubr.msk.f32.mxu0 %vm433_vm2, %v4894_v38  ;;  %6191 = vst [vmem:[#allocation10_spill] sm:$0xff] %v4949_v54  ;;  %6192 = vst [vmem:[#allocation11_spill] sm:$0xff] %v4971_v60  ;;  %v4975_v62 = vsel %vm350_vm1, %v381_v55, %v382_v56  ;;  %v387_v0 = vrot.slane %v4962_v59, 1  ;;  %v4988_v7 = vld [vmem:[%s4808_s7 + $0xc8] sm:$0xff]  ;;  %v389_v10 = vrot.slane %v4980_v2, 1  ;;  %v391_v13 = vrot.slane %v4985_v3, 1 }
  0x20   : > { %6193 = vst [vmem:[#allocation12_spill] sm:$0xff] %v4975_v62  ;;  %v4997_v8 = vsel %vm350_vm1, %v382_v56, %v384_v61  ;;  %v392_v16 = vrot.slane %v4988_v7, 1  ;;  %v5006_v17 = vld [vmem:[%s4808_s7 + $0xd0] sm:$0x3]  ;;  %v1025_v23 = vrot.slane %v4817_v6, 2  ;;  %v1026_v24 = vrot.slane %v4822_v9, 2 }
  0x21   : > { %6194 = vst [vmem:[#allocation13_spill] sm:$0xff] %v4997_v8  ;;  %v5001_v12 = vsel %vm350_vm1, %v386_v63, %v387_v0  ;;  %v5017_v19 = vsel %vm350_vm1, %v387_v0, %v389_v10  ;;  %v394_v21 = vrot.slane %v5006_v17, 1  ;;  %v5026_v28 = vld [vmem:[%s4808_s7 + $0xd8] sm:$0xff]  ;;  %v5029_v29 = vld [vmem:[%s4808_s7 + $0xe0] sm:$0xff]  ;;  %v1028_v30 = vrot.slane %v4831_v14, 2  ;;  %v5054_v53 = vld [vmem:[%s4808_s7 + $0xf0] sm:$0xff] }
  0x22   : > { %4022 = vmatmul.mubr.msk.f32.gmra.mrb[4].mxu1 %vm433_vm2, %v4888_v36  ;;  %4222 = vmatmul.mubr.msk.f32.gmra.mrb[4].mxu0 %vm433_vm2, %v4919_v44  ;;  %6195 = vst [vmem:[#allocation14_spill] sm:$0xff] %v5001_v12  ;;  %6196 = vst [vmem:[#allocation15_spill] sm:$0xff] %v5017_v19  ;;  %v5021_v22 = vsel %vm350_vm1, %v391_v13, %v392_v16  ;;  %v396_v39 = vrot.slane %v5026_v28, 1  ;;  %v397_v40 = vrot.slane %v5029_v29, 1  ;;  %v5046_v45 = vld [vmem:[%s4808_s7 + $0xe8] sm:$0x3] }
  0x23   : > { %4024 = vmatprep.mubr.msk.f32.mxu1 %vm433_vm2, %v4894_v38  ;;  %4224 = vmatprep.mubr.msk.f32.mxu0 %vm433_vm2, %v4923_v46  ;;  %6197 = vst [vmem:[#allocation16_spill] sm:$0xff] %v5021_v22  ;;  %v5041_v37 = vsel %vm350_vm1, %v392_v16, %v394_v21  ;;  %v5049_v47 = vsel %vm1019_vm3, %v1025_v23, %v1026_v24  ;;  %v1030_v48 = vrot.slane %v4834_v15, 2  ;;  %v1031_v14 = vrot.slane %v4839_v18, 2  ;;  %v5057_v55 = vld [vmem:[%s4808_s7 + $0xf8] sm:$0xff]  ;;  %v5078_v16 = vld [vmem:[%s4808_s7 + $0x100] sm:$0x3] }
  0x24   : > { %6198 = vst [vmem:[#allocation17_spill] sm:$0xff] %v5041_v37  ;;  %v399_v56 = vrot.slane %v5046_v45, 1  ;;  %v1033_v61 = vrot.slane %v4843_v20, 2  ;;  %v5070_v63 = vsel %vm1019_vm3, %v1026_v24, %v1028_v30  ;;  %v5073_v0 = vsel %vm350_vm1, %v396_v39, %v397_v40  ;;  %v5089_v24 = vld [vmem:[%s4808_s7 + $0x110] sm:$0xff]  ;;  %v5096_v30 = vld [vmem:[%s6105_s1 + $0x1c] sm:$0xf] }
  0x25   : > { %6199 = vst [vmem:[#allocation18_spill] sm:$0xff] %v5073_v0  ;;  %v401_v10 = vrot.slane %v5054_v53, 1  ;;  %v402_v13 = vrot.slane %v5057_v55, 1  ;;  %v5081_v21 = vsel %vm1019_vm3, %v1030_v48, %v1031_v14  ;;  %v1035_v20 = vrot.slane %v4851_v25, 2  ;;  %v5192_v36 = vld [vmem:[%s4808_s7 + $0x148] sm:$0x3] }
  0x26   : > { %4025 = vmatmul.mubr.msk.f32.gmra.mrb[6].mxu1 %vm433_vm2, %v4919_v44  ;;  %4225 = vmatmul.mubr.msk.f32.gmra.mrb[6].mxu0 %vm433_vm2, %v4945_v52  ;;  %v1036_v23 = vrot.slane %v4854_v26, 2  ;;  %v5103_v39 = vsel %vm350_vm1, %v397_v40, %v399_v56  ;;  %v5106_v48 = vsel %vm1019_vm3, %v1031_v14, %v1033_v61  ;;  %v407_v40 = vrot.slane %v5089_v24, 1  ;;  %v5120_v56 = vld [vmem:[%s4808_s7 + $0x118] sm:$0x3] }
  0x27   : > { %4027 = vmatprep.mubr.msk.f32.mxu1 %vm433_vm2, %v4923_v46  ;;  %4227 = vmatprep.mubr.msk.f32.mxu0 %vm433_vm2, %v4949_v54  ;;  %6200 = vst [vmem:[#allocation19_spill] sm:$0xff] %v5103_v39  ;;  %6201 = vst [vmem:[#allocation20_spill] sm:$0xff] %v5106_v48  ;;  %v1040_v61 = vrot.slane %v4865_v31, 2  ;;  %v5165_v46 = vld [vmem:[%s4808_s7 + $0x138] sm:$0xff]  ;;  %v1048_v44 = vrot.slane %v4928_v49, 2  ;;  %v1053_v34 = vrot.slane %v4954_v57, 2 }
  0x28   : > { %v5123_v14 = vsel %vm1019_vm3, %v1035_v20, %v1036_v23  ;;  %v409_v20 = vrot.slane %v5120_v56, 1  ;;  %v416_v38 = vrot.slane %v5165_v46, 1  ;;  %v1055_v57 = vrot.slane %v4959_v58, 2 }
  0x29   : > { %6203 = vst [vmem:[#allocation22_spill] sm:$0xff] %v5123_v14 }
  0x2a   : > { %4028 = vmatmul.mubr.msk.f32.gmra.mrb[8].mxu1 %vm433_vm2, %v4945_v52  ;;  %4228 = vmatmul.mubr.msk.f32.gmra.mrb[8].mxu0 %vm433_vm2, %v4971_v60  ;;  %v5157_v52 = vld [vmem:[%s4808_s7 + $0x130] sm:$0x3] }
  0x2b   : > { %4030 = vmatprep.mubr.msk.f32.mxu1 %vm433_vm2, %v4949_v54  ;;  %4230 = vmatprep.mubr.msk.f32.mxu0 %vm433_vm2, %v4975_v62 }
  0x2e   : > { %4031 = vmatmul.mubr.msk.f32.gmra.mrb[10].mxu1 %vm433_vm2, %v4971_v60  ;;  %4231 = vmatmul.mubr.msk.f32.gmra.mrb[10].mxu0 %vm433_vm2, %v4997_v8 }
  0x2f   : > { %4033 = vmatprep.mubr.msk.f32.mxu1 %vm433_vm2, %v4975_v62  ;;  %4233 = vmatprep.mubr.msk.f32.mxu0 %vm433_vm2, %v5001_v12  ;;  %v1043_v62 = vrot.slane %v4899_v41, 2  ;;  %v1045_v41 = vrot.slane %v4905_v42, 2 }
  0x32   : > { %4034 = vmatmul.mubr.msk.f32.gmra.mrb[12].mxu1 %vm433_vm2, %v4997_v8  ;;  %4234 = vmatmul.mubr.msk.f32.gmra.mrb[12].mxu0 %vm433_vm2, %v5017_v19  ;;  %v5128_v8 = vld [vmem:[%s4808_s7 + $0x120] sm:$0xff] }
  0x33   : > { %4036 = vmatprep.mubr.msk.f32.mxu1 %vm433_vm2, %v5001_v12  ;;  %4236 = vmatprep.mubr.msk.f32.mxu0 %vm433_vm2, %v5021_v22  ;;  %v1038_v12 = vrot.slane %v4857_v27, 2  ;;  %v411_v54 = vrot.slane %v5128_v8, 1 }
  0x35   : > { %v5149_v60 = vsel %vm1019_vm3, %v1036_v23, %v1038_v12  ;;  %v5168_v12 = vld [vmem:[%s4808_s7 + $0x140] sm:$0xff] }
  0x36   : > { %4037 = vmatmul.mubr.msk.f32.gmra.mrb[14].mxu1 %vm433_vm2, %v5017_v19  ;;  %4237 = vmatmul.mubr.msk.f32.gmra.mrb[14].mxu0 %vm433_vm2, %v5041_v37  ;;  %v5114_v19 = vsel %vm350_vm1, %v401_v10, %v402_v13  ;;  %v5131_v10 = vld [vmem:[%s4808_s7 + $0x128] sm:$0xff]  ;;  %6205 = vst [vmem:[#allocation24_spill] sm:$0xff] %v5149_v60 }
  0x37   : > { %4039 = vmatprep.mubr.msk.f32.mxu1 %vm433_vm2, %v5021_v22  ;;  %4265 = vmatprep.mubr.msk.f32.mxu0 %vm433_vm2, %v5049_v47  ;;  %v5086_v22 = vld [vmem:[%s4808_s7 + $0x108] sm:$0xff]  ;;  %6202 = vst [vmem:[#allocation21_spill] sm:$0xff] %v5114_v19 }
  0x3a   : > { %4040 = vmatmul.mubr.msk.f32.gmra.mrb[16].mxu1 %vm433_vm2, %v5041_v37  ;;  %4266 = vmatmul.mubr.msk.f32.vlgmr.msra.gmra.mrb[0].mxu0 %vm433_vm2, %v5070_v63  ;;  %v404_v37 = vrot.slane %v5078_v16, 1 }
  0x3b   : > { %4042 = vmatprep.mubr.msk.f32.mxu1 %vm433_vm2, %v5073_v0  ;;  %4314 = vmatpush3.msk.msra.mxu0 %vm498_vm0, %v4873_v33  ;;  %v406_v0 = vrot.slane %v5086_v22, 1  ;;  %v1041_v33 = vrot.slane %v4868_v32, 2 }
  0x3c   : > { %4268 = vmatprep.mubr.msk.f32.mxu0 %vm433_vm2, %v5081_v21  ;;  %4363 = vmatprep.subr.msk.mxu0 %vm498_vm0, %v5096_v30  ;;  %v5142_v27 = vsel %vm350_vm1, %v402_v13, %v404_v37  ;;  %v1046_v13 = vrot.slane %v4908_v43, 2 }
  0x3d   : > { %6204 = vst [vmem:[#allocation23_spill] sm:$0xff] %v5142_v27  ;;  %v5160_v37 = vsel %vm1019_vm3, %v1040_v61, %v1041_v33  ;;  %v5180_v23 = vsel %vm1019_vm3, %v1041_v33, %v1043_v62  ;;  %v414_v61 = vrot.slane %v5157_v52, 1  ;;  %v1050_v62 = vrot.slane %v4933_v50, 2 }
  0x3e   : > { %4043 = vmatmul.mubr.msk.f32.gmra.mrb[18].mxu1 %vm433_vm2, %v5103_v39  ;;  %4269 = vmatmul.mubr.msk.f32.gmra.mrb[2].mxu0 %vm433_vm2, %v5106_v48  ;;  %v5152_v39 = vsel %vm350_vm1, %v406_v0, %v407_v40  ;;  %6207 = vst [vmem:[#allocation26_spill] sm:$0xff] %v5160_v37  ;;  %v5177_v0 = vsel %vm350_vm1, %v407_v40, %v409_v20  ;;  %6209 = vst [vmem:[#allocation28_spill] sm:$0xff] %v5180_v23  ;;  %v1051_v33 = vrot.slane %v4936_v51, 2  ;;  %v5200_v20 = vld [vmem:[%s4808_s7 + $0x150] sm:$0xff]  ;;  %v5262_v48 = vld [vmem:[%s4808_s7 + $0x178] sm:$0x3] }
  0x3f   : > { %4045 = vmatprep.mubr.msk.f32.mxu1 %vm433_vm2, %v5114_v19  ;;  %4271 = vmatprep.mubr.msk.f32.mxu0 %vm433_vm2, %v5123_v14  ;;  %6206 = vst [vmem:[#allocation25_spill] sm:$0xff] %v5152_v39  ;;  %v412_v19 = vrot.slane %v5131_v10, 1  ;;  %6208 = vst [vmem:[#allocation27_spill] sm:$0xff] %v5177_v0  ;;  %v5195_v40 = vsel %vm1019_vm3, %v1045_v41, %v1046_v13  ;;  %v419_v41 = vrot.slane %v5192_v36, 1 }
  0x40   : > { %6211 = vst [vmem:[#allocation30_spill] sm:$0xff] %v5195_v40 }
  0x41   : > { %v5212_v49 = vsel %vm350_vm1, %v412_v19, %v414_v61  ;;  %v1056_v61 = vrot.slane %v4962_v59, 2 }
  0x42   : > { %4046 = vmatmul.mubr.msk.f32.gmra.mrb[20].mxu1 %vm433_vm2, %v5142_v27  ;;  %4272 = vmatmul.mubr.msk.f32.gmra.mrb[4].mxu0 %vm433_vm2, %v5149_v60  ;;  %v5186_v27 = vsel %vm350_vm1, %v411_v54, %v412_v19  ;;  %v5203_v54 = vld [vmem:[%s4808_s7 + $0x158] sm:$0xff]  ;;  %6212 = vst [vmem:[#allocation31_spill] sm:$0xff] %v5212_v49  ;;  %v5227_v60 = vld [vmem:[%s4808_s7 + $0x160] sm:$0x3]  ;;  %v5230_v19 = vsel %vm1019_vm3, %v1050_v62, %v1051_v33 }
  0x43   : > { %4048 = vmatprep.mubr.msk.f32.mxu1 %vm433_vm2, %v5152_v39  ;;  %4274 = vmatprep.mubr.msk.f32.mxu0 %vm433_vm2, %v5160_v37  ;;  %6210 = vst [vmem:[#allocation29_spill] sm:$0xff] %v5186_v27  ;;  %v417_v39 = vrot.slane %v5168_v12, 1  ;;  %v5219_v37 = vsel %vm1019_vm3, %v1046_v13, %v1048_v44  ;;  %v5238_v44 = vld [vmem:[%s4808_s7 + $0x170] sm:$0xff]  ;;  %v5250_v13 = vsel %vm1019_vm3, %v1051_v33, %v1053_v34  ;;  %v424_v62 = vrot.slane %v5227_v60, 1 }
  0x44   : > { %6213 = vst [vmem:[#allocation32_spill] sm:$0xff] %v5219_v37  ;;  %6215 = vst [vmem:[#allocation34_spill] sm:$0xff] %v5238_v44  ;;  %v1060_v34 = vrot.slane %v4985_v3, 2  ;;  %v1061_v33 = vrot.slane %v4988_v7, 2 }
  0x45   : > { %6217 = vst [vmem:[#allocation36_spill] sm:$0xff] %v5250_v13 }
  0x46   : > { %4049 = vmatmul.mubr.msk.f32.gmra.mrb[22].mxu1 %vm433_vm2, %v5177_v0  ;;  %4275 = vmatmul.mubr.msk.f32.gmra.mrb[6].mxu0 %vm433_vm2, %v5180_v23  ;;  %v5222_v0 = vsel %vm350_vm1, %v416_v38, %v417_v39  ;;  %v421_v23 = vrot.slane %v5200_v20, 1  ;;  %v5247_v38 = vsel %vm350_vm1, %v417_v39, %v419_v41  ;;  %v5265_v39 = vsel %vm1019_vm3, %v1055_v57, %v1056_v61 }
  0x47   : > { %4051 = vmatprep.mubr.msk.f32.mxu1 %vm433_vm2, %v5186_v27  ;;  %4277 = vmatprep.mubr.msk.f32.mxu0 %vm433_vm2, %v5195_v40  ;;  %6214 = vst [vmem:[#allocation33_spill] sm:$0xff] %v5222_v0  ;;  %v422_v27 = vrot.slane %v5203_v54, 1  ;;  %v5235_v40 = vld [vmem:[%s4808_s7 + $0x168] sm:$0xff]  ;;  %6216 = vst [vmem:[#allocation35_spill] sm:$0xff] %v5247_v38 }
  0x49   : > { %v5256_v14 = vsel %vm350_vm1, %v421_v23, %v422_v27  ;;  %v429_v23 = vrot.slane %v5262_v48, 1 }
  0x4a   : > { %4052 = vmatmul.mubr.msk.f32.gmra.mrb[24].mxu1 %vm433_vm2, %v5212_v49  ;;  %4278 = vmatmul.mubr.msk.f32.gmra.mrb[8].mxu0 %vm433_vm2, %v5219_v37  ;;  %6218 = vst [vmem:[#allocation37_spill] sm:$0xff] %v5256_v14  ;;  %v1058_v49 = vrot.slane %v4980_v2, 2  ;;  %v426_v37 = vrot.slane %v5235_v40, 1  ;;  %v5276_v2 = vsel %vm350_vm1, %v422_v27, %v424_v62  ;;  %v1066_v27 = vrot.slane %v5029_v29, 2 }
  0x4b   : > { %4054 = vmatprep.mubr.msk.f32.mxu1 %vm433_vm2, %v5222_v0  ;;  %4280 = vmatprep.mubr.msk.f32.mxu0 %vm433_vm2, %v5230_v19  ;;  %v427_v0 = vrot.slane %v5238_v44, 1  ;;  %6219 = vst [vmem:[#allocation38_spill] sm:$0xff] %v5276_v2  ;;  %v1070_v62 = vrot.slane %v5054_v53, 2 }
  0x4c   : > { %v5282_v41 = vsel %vm1019_vm3, %v1056_v61, %v1058_v49  ;;  %v1068_v49 = vrot.slane %v5046_v45, 2 }
  0x4d   : > { %v5285_v57 = vsel %vm350_vm1, %v426_v37, %v427_v0  ;;  %v5300_v37 = vsel %vm350_vm1, %v427_v0, %v429_v23  ;;  %v5335_v23 = vld [vmem:[%s6105_s1 + $0xc] sm:$0xf] }
  0x4e   : > { %4055 = vmatmul.mubr.msk.f32.gmra.mrb[26].mxu1 %vm433_vm2, %v5247_v38  ;;  %4281 = vmatmul.mubr.msk.f32.gmra.mrb[10].mxu0 %vm433_vm2, %v5250_v13  ;;  %6220 = vst [vmem:[#allocation39_spill] sm:$0xff] %v5285_v57  ;;  %v1063_v38 = vrot.slane %v5006_v17, 2  ;;  %v5289_v13 = vsel %vm1019_vm3, %v1060_v34, %v1061_v33  ;;  %6221 = vst [vmem:[#allocation40_spill] sm:$0xff] %v5300_v37  ;;  %v1071_v34 = vrot.slane %v5057_v55, 2 }
  0x4f   : > { %4057 = vmatprep.mubr.msk.f32.mxu1 %vm433_vm2, %v5256_v14  ;;  %4283 = vmatprep.mubr.msk.f32.mxu0 %vm433_vm2, %v5265_v39  ;;  %v1065_v14 = vrot.slane %v5026_v28, 2  ;;  %v5322_v45 = vsel %vm1019_vm3, %v1066_v27, %v1068_v49 }
  0x50   : > { %v5305_v17 = vsel %vm1019_vm3, %v1061_v33, %v1063_v38  ;;  %v5326_v0 = vsel %vm1019_vm3, %v1070_v62, %v1071_v34  ;;  %v1075_v38 = vrot.slane %v5086_v22, 2  ;;  %v1076_v33 = vrot.slane %v5089_v24, 2 }
  0x51   : > { %v5309_v61 = vsel %vm1019_vm3, %v1065_v14, %v1066_v27  ;;  %v1073_v14 = vrot.slane %v5078_v16, 2  ;;  %v1078_v27 = vrot.slane %v5120_v56, 2  ;;  %v1080_v62 = vrot.slane %v5128_v8, 2 }
  0x52   : > { %4058 = vmatmul.mubr.msk.f32.gmra.mrb[28].mxu1 %vm433_vm2, %v5276_v2  ;;  %4284 = vmatmul.mubr.msk.f32.gmra.mrb[12].mxu0 %vm433_vm2, %v5282_v41  ;;  %v5350_v49 = vsel %vm1019_vm3, %v1075_v38, %v1076_v33  ;;  %v1085_v38 = vrot.slane %v5165_v46, 2  ;;  %v1096_v2 = vrot.slane %v5238_v44, 2 }
  0x53   : > { %4060 = vmatprep.mubr.msk.f32.mxu1 %vm433_vm2, %v5285_v57  ;;  %4286 = vmatprep.mubr.msk.f32.mxu0 %vm433_vm2, %v5289_v13  ;;  %v5346_v16 = vsel %vm1019_vm3, %v1071_v34, %v1073_v14  ;;  %6222 = vst [vmem:[#allocation41_spill] sm:$0xff] %v5350_v49  ;;  %v5365_v56 = vsel %vm1019_vm3, %v1076_v33, %v1078_v27  ;;  %v1083_v34 = vrot.slane %v5157_v52, 2  ;;  %v1088_v33 = vrot.slane %v5192_v36, 2 }
  0x54   : > { %v1091_v57 = vrot.slane %v5203_v54, 2 }
  0x56   : > { %4061 = vmatmul.mubr.msk.f32.gmra.mrb[30].mxu1 %vm433_vm2, %v5300_v37  ;;  %4287 = vmatmul.mubr.msk.f32.gmra.mrb[14].mxu0 %vm433_vm2, %v5305_v17  ;;  %v1086_v37 = vrot.slane %v5168_v12, 2 }
  0x57   : > { %4065 = vmatprep.mubr.msk.f32.mxu1 %vm433_vm2, %v4811_v4  ;;  %4289 = vmatprep.mubr.msk.f32.mxu0 %vm433_vm2, %v5309_v61 }
  0x58   : > { %v5386_v27 = vsel %vm1019_vm3, %v1085_v38, %v1086_v37  ;;  %v5399_v36 = vsel %vm1019_vm3, %v1086_v37, %v1088_v33  ;;  %v1095_v38 = vrot.slane %v5235_v40, 2  ;;  %v1098_v37 = vrot.slane %v5262_v48, 2 }
  0x59   : > { %6224 = vst [vmem:[#allocation43_spill] sm:$0xff] %v5386_v27  ;;  %6225 = vst [vmem:[#allocation44_spill] sm:$0xff] %v5399_v36 }
  0x5a   : > { %4066 = vmatmul.mubr.msk.f32.vlgmr.msra.gmra.mrb[0].mxu1 %vm433_vm2, %v4814_v5  ;;  %4290 = vmatmul.mubr.msk.f32.gmra.mrb[16].mxu0 %vm433_vm2, %v5322_v45  ;;  %v5426_v33 = vsel %vm1019_vm3, %v1095_v38, %v1096_v2  ;;  %v5442_v48 = vsel %vm1019_vm3, %v1096_v2, %v1098_v37  ;;  %v1021_v38 = vrot.slane %v4814_v5, 2  ;;  %v1023_v37 = vrot.slane %v4826_v11, 2  ;;  %v6232_v5 = vld [vmem:[#allocation20_spill] sm:$0xff]  ;;  %v6233_v11 = vld [vmem:[#allocation22_spill] sm:$0xff] }
  0x5b   : > { %4114 = vmatpush3.msk.msra.mxu1 %vm498_vm0, %v4883_v35  ;;  %4068 = vmatprep.mubr.msk.f32.mxu1 %vm433_vm2, %v4817_v6  ;;  %v1081_v35 = vrot.slane %v5131_v10, 2  ;;  %v5413_v6 = vld [vmem:[%s4808_s7 + $0x188] sm:$0xff]  ;;  %6228 = vst [vmem:[#allocation47_spill] sm:$0xff] %v5426_v33  ;;  %6229 = vst [vmem:[#allocation48_spill] sm:$0xff] %v5442_v48 }
  0x5c   : > { %4292 = vmatprep.mubr.msk.f32.mxu0 %vm433_vm2, %v5326_v0  ;;  %4163 = vmatprep.subr.msk.mxu1 %vm498_vm0, %v5335_v23 }
  0x5d   : > { %v5369_v14 = vsel %vm1019_vm3, %v1080_v62, %v1081_v35  ;;  %v5382_v52 = vsel %vm1019_vm3, %v1081_v35, %v1083_v34  ;;  %v1090_v62 = vrot.slane %v5200_v20, 2  ;;  %v1093_v35 = vrot.slane %v5227_v60, 2 }
  0x5e   : > { %4069 = vmatmul.mubr.msk.f32.gmra.mrb[2].mxu1 %vm433_vm2, %v4822_v9  ;;  %4293 = vmatmul.mubr.msk.f32.gmra.mrb[18].mxu0 %vm433_vm2, %v5346_v16  ;;  %6223 = vst [vmem:[#allocation42_spill] sm:$0xff] %v5382_v52  ;;  %v5410_v9 = vld [vmem:[%s4808_s7 + $0x180] sm:$0xff] }
  0x5f   : > { %4071 = vmatprep.mubr.msk.f32.mxu1 %vm433_vm2, %v4834_v15  ;;  %4295 = vmatprep.mubr.msk.f32.mxu0 %vm433_vm2, %v5350_v49  ;;  %v5403_v34 = vsel %vm1019_vm3, %v1090_v62, %v1091_v57  ;;  %v5422_v60 = vsel %vm1019_vm3, %v1091_v57, %v1093_v35  ;;  %v1966_v62 = vrot.slane %v5410_v9, 2 }
  0x60   : > { %6226 = vst [vmem:[#allocation45_spill] sm:$0xff] %v5403_v34  ;;  %6227 = vst [vmem:[#allocation46_spill] sm:$0xff] %v5422_v60 }
  0x62   : > { %4072 = vmatmul.mubr.msk.f32.gmra.mrb[4].mxu1 %vm433_vm2, %v4839_v18  ;;  %4296 = vmatmul.mubr.msk.f32.gmra.mrb[20].mxu0 %vm433_vm2, %v5365_v56 }
  0x63   : > { %4074 = vmatprep.mubr.msk.f32.mxu1 %vm433_vm2, %v4851_v25  ;;  %4298 = vmatprep.mubr.msk.f32.mxu0 %vm433_vm2, %v5369_v14 }
  0x66   : > { %4075 = vmatmul.mubr.msk.f32.gmra.mrb[6].mxu1 %vm433_vm2, %v4854_v26  ;;  %4299 = vmatmul.mubr.msk.f32.gmra.mrb[22].mxu0 %vm433_vm2, %v5382_v52  ;;  %v5431_v52 = vld [vmem:[%s4808_s7 + $0x190] sm:$0x3] }
  0x67   : > { %4077 = vmatprep.mubr.msk.f32.mxu1 %vm433_vm2, %v4865_v31  ;;  %4301 = vmatprep.mubr.msk.f32.mxu0 %vm433_vm2, %v5386_v27  ;;  %v1967_v27 = vrot.slane %v5413_v6, 2  ;;  %v1969_v57 = vrot.slane %v5431_v52, 2 }
  0x69   : > { %v5446_v35 = vsel %vm1019_vm3, %v1966_v62, %v1967_v27  ;;  %v5457_v2 = vsel %vm1019_vm3, %v1967_v27, %v1969_v57  ;;  %v5472_v27 = vld [vmem:[%s6105_s1 + $0x20] sm:$0xf] }
  0x6a   : > { %4078 = vmatmul.mubr.msk.f32.gmra.mrb[8].mxu1 %vm433_vm2, %v4868_v32  ;;  %4302 = vmatmul.mubr.msk.f32.gmra.mrb[24].mxu0 %vm433_vm2, %v5399_v36  ;;  %6230 = vst [vmem:[#allocation49_spill] sm:$0xff] %v5446_v35  ;;  %6231 = vst [vmem:[#allocation50_spill] sm:$0xff] %v5457_v2  ;;  %v6237_v57 = vld [vmem:[#allocation30_spill] sm:$0xff] }
  0x6b   : > { %4080 = vmatprep.mubr.msk.f32.mxu1 %vm433_vm2, %v4905_v42  ;;  %4304 = vmatprep.mubr.msk.f32.mxu0 %vm433_vm2, %v5403_v34 }
  0x6e   : > { %4081 = vmatmul.mubr.msk.f32.gmra.mrb[10].mxu1 %vm433_vm2, %v4908_v43  ;;  %4305 = vmatmul.mubr.msk.f32.gmra.mrb[26].mxu0 %vm433_vm2, %v5422_v60 }
  0x6f   : > { %4083 = vmatprep.mubr.msk.f32.mxu1 %vm433_vm2, %v4933_v50  ;;  %4307 = vmatprep.mubr.msk.f32.mxu0 %vm433_vm2, %v5426_v33 }
  0x72   : > { %4084 = vmatmul.mubr.msk.f32.gmra.mrb[12].mxu1 %vm433_vm2, %v4936_v51  ;;  %4308 = vmatmul.mubr.msk.f32.gmra.mrb[28].mxu0 %vm433_vm2, %v5442_v48 }
  0x73   : > { %4086 = vmatprep.mubr.msk.f32.mxu1 %vm433_vm2, %v4959_v58  ;;  %4310 = vmatprep.mubr.msk.f32.mxu0 %vm433_vm2, %v5446_v35  ;;  %v6242_v35 = vld [vmem:[#allocation6_spill] sm:$0xff] }
  0x76   : > { %4087 = vmatmul.mubr.msk.f32.gmra.mrb[14].mxu1 %vm433_vm2, %v4962_v59  ;;  %4311 = vmatmul.mubr.msk.f32.gmra.mrb[30].mxu0 %vm433_vm2, %v5457_v2  ;;  %v6241_v2 = vld [vmem:[#allocation5_spill] sm:$0xff] }
  0x77   : > { %4089 = vmatprep.mubr.msk.f32.mxu1 %vm433_vm2, %v4985_v3  ;;  %4315 = vmatprep.mubr.msk.f32.mxu0 %vm433_vm2, %v4834_v15 }
  0x7a   : > { %4090 = vmatmul.mubr.msk.f32.gmra.mrb[16].mxu1 %vm433_vm2, %v4988_v7  ;;  %4316 = vmatmul.mubr.msk.f32.vlgmr.msra.gmra.mrb[0].mxu0 %vm433_vm2, %v4839_v18 }
  0x7b   : > { %4092 = vmatprep.mubr.msk.f32.mxu1 %vm433_vm2, %v5026_v28  ;;  %4364 = vmatpush3.msk.msra.mxu0 %vm498_vm0, %v5096_v30  ;;  %v1020_v30 = vrot.slane %v4811_v4, 2  ;;  %v1024_v4 = vsel %vm1019_vm3, %v1021_v38, %v1023_v37  ;;  %v6239_v37 = vld [vmem:[#allocation36_spill] sm:$0xff] }
  0x7c   : > { %4318 = vmatprep.mubr.msk.f32.mxu0 %vm433_vm2, %v4851_v25  ;;  %4413 = vmatprep.subr.msk.mxu0 %vm498_vm0, %v5472_v27 }
  0x7d   : > { %v1022_v62 = vsel %vm1019_vm3, %v1020_v30, %v1021_v38  ;;  %v6238_v30 = vld [vmem:[#allocation32_spill] sm:$0xff]  ;;  %v5596_v38 = vld [vmem:[%s4808_s7 + $0x198] sm:$0xff] }
  0x7e   : > { %4093 = vmatmul.mubr.msk.f32.gmra.mrb[18].mxu1 %vm433_vm2, %v5029_v29  ;;  %4319 = vmatmul.mubr.msk.f32.gmra.mrb[2].mxu0 %vm433_vm2, %v4854_v26 }
  0x7f   : > { %4095 = vmatprep.mubr.msk.f32.mxu1 %vm433_vm2, %v5054_v53  ;;  %4321 = vmatprep.mubr.msk.f32.mxu0 %vm433_vm2, %v4865_v31 }
  0x82   : > { %4096 = vmatmul.mubr.msk.f32.gmra.mrb[20].mxu1 %vm433_vm2, %v5057_v55  ;;  %4322 = vmatmul.mubr.msk.f32.gmra.mrb[4].mxu0 %vm433_vm2, %v4868_v32 }
  0x83   : > { %4098 = vmatprep.mubr.msk.f32.mxu1 %vm433_vm2, %v5086_v22  ;;  %4324 = vmatprep.mubr.msk.f32.mxu0 %vm433_vm2, %v4905_v42 }
  0x86   : > { %4099 = vmatmul.mubr.msk.f32.gmra.mrb[22].mxu1 %vm433_vm2, %v5089_v24  ;;  %4325 = vmatmul.mubr.msk.f32.gmra.mrb[6].mxu0 %vm433_vm2, %v4908_v43 }
  0x87   : > { %4101 = vmatprep.mubr.msk.f32.mxu1 %vm433_vm2, %v5128_v8  ;;  %4327 = vmatprep.mubr.msk.f32.mxu0 %vm433_vm2, %v4933_v50 }
  0x8a   : > { %4102 = vmatmul.mubr.msk.f32.gmra.mrb[24].mxu1 %vm433_vm2, %v5131_v10  ;;  %4328 = vmatmul.mubr.msk.f32.gmra.mrb[8].mxu0 %vm433_vm2, %v4936_v51 }
  0x8b   : > { %4104 = vmatprep.mubr.msk.f32.mxu1 %vm433_vm2, %v5165_v46  ;;  %4330 = vmatprep.mubr.msk.f32.mxu0 %vm433_vm2, %v4959_v58 }
  0x8e   : > { %4105 = vmatmul.mubr.msk.f32.gmra.mrb[26].mxu1 %vm433_vm2, %v5168_v12  ;;  %4331 = vmatmul.mubr.msk.f32.gmra.mrb[10].mxu0 %vm433_vm2, %v4962_v59 }
  0x8f   : > { %4107 = vmatprep.mubr.msk.f32.mxu1 %vm433_vm2, %v5200_v20  ;;  %4333 = vmatprep.mubr.msk.f32.mxu0 %vm433_vm2, %v4985_v3 }
  0x92   : > { %4108 = vmatmul.mubr.msk.f32.gmra.mrb[28].mxu1 %vm433_vm2, %v5203_v54  ;;  %4334 = vmatmul.mubr.msk.f32.gmra.mrb[12].mxu0 %vm433_vm2, %v4988_v7 }
  0x93   : > { %4110 = vmatprep.mubr.msk.f32.mxu1 %vm433_vm2, %v5235_v40  ;;  %4336 = vmatprep.mubr.msk.f32.mxu0 %vm433_vm2, %v5026_v28 }
  0x96   : > { %4111 = vmatmul.mubr.msk.f32.gmra.mrb[30].mxu1 %vm433_vm2, %v5238_v44  ;;  %4337 = vmatmul.mubr.msk.f32.gmra.mrb[14].mxu0 %vm433_vm2, %v5029_v29 }
  0x97   : > { %4115 = vmatprep.mubr.msk.f32.mxu1 %vm433_vm2, %v1022_v62  ;;  %4339 = vmatprep.mubr.msk.f32.mxu0 %vm433_vm2, %v5054_v53  ;;  %v5607_v62 = vld [vmem:[%s4808_s7 + $0x1a0] sm:$0xff] }
  0x9a   : > { %4116 = vmatmul.mubr.msk.f32.vlgmr.msra.gmra.mrb[0].mxu1 %vm433_vm2, %v1024_v4  ;;  %4340 = vmatmul.mubr.msk.f32.gmra.mrb[16].mxu0 %vm433_vm2, %v5057_v55  ;;  %v6240_v4 = vld [vmem:[#allocation4_spill] sm:$0xff] }
  0x9b   : > { %4164 = vmatpush3.msk.msra.mxu1 %vm498_vm0, %v5335_v23  ;;  %4118 = vmatprep.mubr.msk.f32.mxu1 %vm433_vm2, %v5049_v47  ;;  %v6234_v47 = vld [vmem:[#allocation24_spill] sm:$0xff] }
  0x9c   : > { %4342 = vmatprep.mubr.msk.f32.mxu0 %vm433_vm2, %v5086_v22  ;;  %4463 = vmatprep.subr.msk.mxu1 %vm498_vm0, %v4784_v1  ;;  %v6236_v23 = vld [vmem:[#allocation28_spill] sm:$0xff] }
  0x9e   : > { %4119 = vmatmul.mubr.msk.f32.gmra.mrb[2].mxu1 %vm433_vm2, %v5070_v63  ;;  %4343 = vmatmul.mubr.msk.f32.gmra.mrb[18].mxu0 %vm433_vm2, %v5089_v24  ;;  %v6235_v63 = vld [vmem:[#allocation26_spill] sm:$0xff] }
  0x9f   : > { %4121 = vmatprep.mubr.msk.f32.mxu1 %vm433_vm2, %v5081_v21  ;;  %4345 = vmatprep.mubr.msk.f32.mxu0 %vm433_vm2, %v5128_v8 }
  0xa2   : > { %4122 = vmatmul.mubr.msk.f32.gmra.mrb[4].mxu1 %vm433_vm2, %v6232_v5  ;;  %4346 = vmatmul.mubr.msk.f32.gmra.mrb[20].mxu0 %vm433_vm2, %v5131_v10 }
  0xa3   : > { %4124 = vmatprep.mubr.msk.f32.mxu1 %vm433_vm2, %v6233_v11  ;;  %4348 = vmatprep.mubr.msk.f32.mxu0 %vm433_vm2, %v5165_v46 }
  0xa6   : > { %4125 = vmatmul.mubr.msk.f32.gmra.mrb[6].mxu1 %vm433_vm2, %v6234_v47  ;;  %4349 = vmatmul.mubr.msk.f32.gmra.mrb[22].mxu0 %vm433_vm2, %v5168_v12 }
  0xa7   : > { %4127 = vmatprep.mubr.msk.f32.mxu1 %vm433_vm2, %v6235_v63  ;;  %4351 = vmatprep.mubr.msk.f32.mxu0 %vm433_vm2, %v5200_v20 }
  0xaa   : > { %4128 = vmatmul.mubr.msk.f32.gmra.mrb[8].mxu1 %vm433_vm2, %v6236_v23  ;;  %4352 = vmatmul.mubr.msk.f32.gmra.mrb[24].mxu0 %vm433_vm2, %v5203_v54 }
  0xab   : > { %4130 = vmatprep.mubr.msk.f32.mxu1 %vm433_vm2, %v6237_v57  ;;  %4354 = vmatprep.mubr.msk.f32.mxu0 %vm433_vm2, %v5235_v40 }
  0xae   : > { %4131 = vmatmul.mubr.msk.f32.gmra.mrb[10].mxu1 %vm433_vm2, %v6238_v30  ;;  %4355 = vmatmul.mubr.msk.f32.gmra.mrb[26].mxu0 %vm433_vm2, %v5238_v44  ;;  %v6243_v44 = vld [vmem:[#allocation7_spill] sm:$0xff] }
  0xaf   : > { %4133 = vmatprep.mubr.msk.f32.mxu1 %vm433_vm2, %v5230_v19  ;;  %4357 = vmatprep.mubr.msk.f32.mxu0 %vm433_vm2, %v5410_v9 }
  0xb2   : > { %4134 = vmatmul.mubr.msk.f32.gmra.mrb[12].mxu1 %vm433_vm2, %v6239_v37  ;;  %4358 = vmatmul.mubr.msk.f32.gmra.mrb[28].mxu0 %vm433_vm2, %v5413_v6 }
  0xb3   : > { %4136 = vmatprep.mubr.msk.f32.mxu1 %vm433_vm2, %v5265_v39  ;;  %4360 = vmatprep.mubr.msk.f32.mxu0 %vm433_vm2, %v5596_v38 }
  0xb6   : > { %4137 = vmatmul.mubr.msk.f32.gmra.mrb[14].mxu1 %vm433_vm2, %v5282_v41  ;;  %4361 = vmatmul.mubr.msk.f32.gmra.mrb[30].mxu0 %vm433_vm2, %v5607_v62 }
  0xb7   : > { %4139 = vmatprep.mubr.msk.f32.mxu1 %vm433_vm2, %v5289_v13  ;;  %4365 = vmatprep.mubr.msk.f32.mxu0 %vm433_vm2, %v6240_v4  ;;  %v6244_v4 = vld [vmem:[#allocation8_spill] sm:$0xff] }
  0xba   : > { %4140 = vmatmul.mubr.msk.f32.gmra.mrb[16].mxu1 %vm433_vm2, %v5305_v17  ;;  %4366 = vmatmul.mubr.msk.f32.vlgmr.msra.gmra.mrb[0].mxu0 %vm433_vm2, %v6241_v2  ;;  %v6245_v2 = vld [vmem:[#allocation9_spill] sm:$0xff] }
  0xbb   : > { %4142 = vmatprep.mubr.msk.f32.mxu1 %vm433_vm2, %v5309_v61  ;;  %4414 = vmatpush3.msk.msra.mxu0 %vm498_vm0, %v5472_v27  ;;  %v6248_v27 = vld [vmem:[#allocation12_spill] sm:$0xff] }
  0xbc   : > { %4368 = vmatprep.mubr.msk.f32.mxu0 %vm433_vm2, %v6242_v35  ;;  %v6246_v35 = vld [vmem:[#allocation10_spill] sm:$0xff] }
  0xbe   : > { %4143 = vmatmul.mubr.msk.f32.gmra.mrb[18].mxu1 %vm433_vm2, %v5322_v45  ;;  %4369 = vmatmul.mubr.msk.f32.gmra.mrb[2].mxu0 %vm433_vm2, %v6243_v44  ;;  %v6247_v44 = vld [vmem:[#allocation11_spill] sm:$0xff] }
  0xbf   : > { %4145 = vmatprep.mubr.msk.f32.mxu1 %vm433_vm2, %v5326_v0  ;;  %4371 = vmatprep.mubr.msk.f32.mxu0 %vm433_vm2, %v6244_v4  ;;  %v6249_v4 = vld [vmem:[#allocation42_spill] sm:$0xff] }
  0xc2   : > { %4146 = vmatmul.mubr.msk.f32.gmra.mrb[20].mxu1 %vm433_vm2, %v5346_v16  ;;  %4372 = vmatmul.mubr.msk.f32.gmra.mrb[4].mxu0 %vm433_vm2, %v6245_v2  ;;  %v6250_v2 = vld [vmem:[#allocation13_spill] sm:$0xff] }
  0xc3   : > { %4148 = vmatprep.mubr.msk.f32.mxu1 %vm433_vm2, %v5350_v49  ;;  %4374 = vmatprep.mubr.msk.f32.mxu0 %vm433_vm2, %v6246_v35  ;;  %v6251_v49 = vld [vmem:[#allocation43_spill] sm:$0xff]  ;;  %v6252_v35 = vld [vmem:[#allocation14_spill] sm:$0xff] }
  0xc6   : > { %4149 = vmatmul.mubr.msk.f32.gmra.mrb[22].mxu1 %vm433_vm2, %v5365_v56  ;;  %4375 = vmatmul.mubr.msk.f32.gmra.mrb[6].mxu0 %vm433_vm2, %v6247_v44  ;;  %v6253_v44 = vld [vmem:[#allocation15_spill] sm:$0xff] }
  0xc7   : > { %4151 = vmatprep.mubr.msk.f32.mxu1 %vm433_vm2, %v5369_v14  ;;  %4377 = vmatprep.mubr.msk.f32.mxu0 %vm433_vm2, %v6248_v27  ;;  %v6254_v27 = vld [vmem:[#allocation16_spill] sm:$0xff] }
  0xca   : > { %4152 = vmatmul.mubr.msk.f32.gmra.mrb[24].mxu1 %vm433_vm2, %v6249_v4  ;;  %4378 = vmatmul.mubr.msk.f32.gmra.mrb[8].mxu0 %vm433_vm2, %v6250_v2  ;;  %v6255_v2 = vld [vmem:[#allocation17_spill] sm:$0xff] }
  0xcb   : > { %4154 = vmatprep.mubr.msk.f32.mxu1 %vm433_vm2, %v6251_v49  ;;  %4380 = vmatprep.mubr.msk.f32.mxu0 %vm433_vm2, %v6252_v35  ;;  %v6256_v35 = vld [vmem:[#allocation18_spill] sm:$0xff] }
  0xce   : > { %4155 = vmatmul.mubr.msk.f32.gmra.mrb[26].mxu1 %vm433_vm2, %v5399_v36  ;;  %4381 = vmatmul.mubr.msk.f32.gmra.mrb[10].mxu0 %vm433_vm2, %v6253_v44  ;;  %v6257_v44 = vld [vmem:[#allocation19_spill] sm:$0xff] }
  0xcf   : > { %4157 = vmatprep.mubr.msk.f32.mxu1 %vm433_vm2, %v5403_v34  ;;  %4383 = vmatprep.mubr.msk.f32.mxu0 %vm433_vm2, %v6254_v27  ;;  %v6258_v34 = vld [vmem:[#allocation2_spill] sm:$0xff]  ;;  %v6259_v27 = vld [vmem:[#allocation21_spill] sm:$0xff]  ;;  %v5734_v36 = vld [vmem:[%s4808_s7 + $0x1a8] sm:$0x3]  ;;  %s246_s7 = scalar_lea.vmem %s6109_s5, %s3406_s26 }
  0xd2   : > { %4158 = vmatmul.mubr.msk.f32.gmra.mrb[28].mxu1 %vm433_vm2, %v5422_v60  ;;  %4384 = vmatmul.mubr.msk.f32.gmra.mrb[12].mxu0 %vm433_vm2, %v6255_v2  ;;  %v6260_v60 = vld [vmem:[#allocation3_spill] sm:$0xff] }
  0xd3   : > { %4160 = vmatprep.mubr.msk.f32.mxu1 %vm433_vm2, %v5426_v33  ;;  %4386 = vmatprep.mubr.msk.f32.mxu0 %vm433_vm2, %v6256_v35  ;;  %v6261_v2 = vld [vmem:[#allocation23_spill] sm:$0xff]  ;;  %v6269_v33 = vld [vmem:[#allocation38_spill] sm:$0xff] }
  0xd6   : > { %4161 = vmatmul.mubr.msk.f32.gmra.mrb[30].mxu1 %vm433_vm2, %v5442_v48  ;;  %4387 = vmatmul.mubr.msk.f32.gmra.mrb[14].mxu0 %vm433_vm2, %v6257_v44  ;;  %v6262_v48 = vld [vmem:[#allocation25_spill] sm:$0xff] }
  0xd7   : > { %4165 = vmatprep.mubr.msk.f32.mxu1 %vm433_vm2, %v6258_v34  ;;  %4389 = vmatprep.mubr.msk.f32.mxu0 %vm433_vm2, %v6259_v27  ;;  %v6263_v34 = vld [vmem:[#allocation27_spill] sm:$0xff] }
  0xda   : > { %4166 = vmatmul.mubr.msk.f32.vlgmr.msra.gmra.mrb[0].mxu1 %vm433_vm2, %v6260_v60  ;;  %4390 = vmatmul.mubr.msk.f32.gmra.mrb[16].mxu0 %vm433_vm2, %v6261_v2  ;;  %v6264_v60 = vld [vmem:[#allocation29_spill] sm:$0xff] }
  0xdb   : > { %4464 = vmatpush3.msk.msra.mxu1 %vm498_vm0, %v4784_v1  ;;  %4168 = vmatprep.mubr.msk.f32.mxu1 %vm433_vm2, %v4834_v15  ;;  %v6265_v1 = vld [vmem:[#allocation31_spill] sm:$0xff]  ;;  %v6266_v15 = vld [vmem:[#allocation33_spill] sm:$0xff] }
  0xdc   : > { %4392 = vmatprep.mubr.msk.f32.mxu0 %vm433_vm2, %v6262_v48 }
  0xde   : > { %4169 = vmatmul.mubr.msk.f32.gmra.mrb[2].mxu1 %vm433_vm2, %v4839_v18  ;;  %4393 = vmatmul.mubr.msk.f32.gmra.mrb[18].mxu0 %vm433_vm2, %v6263_v34  ;;  %v6267_v18 = vld [vmem:[#allocation35_spill] sm:$0xff] }
  0xdf   : > { %4171 = vmatprep.mubr.msk.f32.mxu1 %vm433_vm2, %v4851_v25  ;;  %4395 = vmatprep.mubr.msk.f32.mxu0 %vm433_vm2, %v6264_v60  ;;  %v6268_v25 = vld [vmem:[#allocation37_spill] sm:$0xff] }
  0xe2   : > { %4172 = vmatmul.mubr.msk.f32.gmra.mrb[4].mxu1 %vm433_vm2, %v4854_v26  ;;  %4396 = vmatmul.mubr.msk.f32.gmra.mrb[20].mxu0 %vm433_vm2, %v6265_v1  ;;  %v1695_v26 = vrot.slane %v5410_v9, 1 }
  0xe3   : > { %4174 = vmatprep.mubr.msk.f32.mxu1 %vm433_vm2, %v4865_v31  ;;  %4398 = vmatprep.mubr.msk.f32.mxu0 %vm433_vm2, %v6266_v15  ;;  %v1696_v31 = vrot.slane %v5413_v6, 1 }
  0xe5   : > { %v5731_v15 = vsel %vm350_vm1, %v1695_v26, %v1696_v31 }
  0xe6   : > { %4175 = vmatmul.mubr.msk.f32.gmra.mrb[6].mxu1 %vm433_vm2, %v4868_v32  ;;  %4399 = vmatmul.mubr.msk.f32.gmra.mrb[22].mxu0 %vm433_vm2, %v6267_v18  ;;  %v6270_v32 = vld [vmem:[#allocation39_spill] sm:$0xff]  ;;  %v2507_v18 = vrot.slane %v5607_v62, 1 }
  0xe7   : > { %4177 = vmatprep.mubr.msk.f32.mxu1 %vm433_vm2, %v4905_v42  ;;  %4401 = vmatprep.mubr.msk.f32.mxu0 %vm433_vm2, %v6268_v25  ;;  %v1698_v42 = vrot.slane %v5431_v52, 1  ;;  %v2506_v25 = vrot.slane %v5596_v38, 1  ;;  %v2509_v52 = vrot.slane %v5734_v36, 1 }
  0xe9   : > { %v2508_v26 = vsel %vm350_vm1, %v2506_v25, %v2507_v18 }
  0xea   : > { %4178 = vmatmul.mubr.msk.f32.gmra.mrb[8].mxu1 %vm433_vm2, %v4908_v43  ;;  %4402 = vmatmul.mubr.msk.f32.gmra.mrb[24].mxu0 %vm433_vm2, %v6269_v33  ;;  %v6271_v43 = vld [vmem:[#allocation40_spill] sm:$0xff] }
  0xeb   : > { %4180 = vmatprep.mubr.msk.f32.mxu1 %vm433_vm2, %v4933_v50  ;;  %4404 = vmatprep.mubr.msk.f32.mxu0 %vm433_vm2, %v6270_v32  ;;  %v5745_v50 = vsel %vm350_vm1, %v1696_v31, %v1698_v42 }
  0xee   : > { %4181 = vmatmul.mubr.msk.f32.gmra.mrb[10].mxu1 %vm433_vm2, %v4936_v51  ;;  %4405 = vmatmul.mubr.msk.f32.gmra.mrb[26].mxu0 %vm433_vm2, %v6271_v43  ;;  %v2510_v51 = vsel %vm350_vm1, %v2507_v18, %v2509_v52 }
  0xef   : > { %4183 = vmatprep.mubr.msk.f32.mxu1 %vm433_vm2, %v4959_v58  ;;  %4407 = vmatprep.mubr.msk.f32.mxu0 %vm433_vm2, %v5731_v15  ;;  %v6275_v58 = vld [vmem:[#allocation33_spill] sm:$0xff] }
  0xf2   : > { %4184 = vmatmul.mubr.msk.f32.gmra.mrb[12].mxu1 %vm433_vm2, %v4962_v59  ;;  %4408 = vmatmul.mubr.msk.f32.gmra.mrb[28].mxu0 %vm433_vm2, %v5745_v50  ;;  %v6276_v59 = vld [vmem:[#allocation45_spill] sm:$0xff] }
  0xf3   : > { %4186 = vmatprep.mubr.msk.f32.mxu1 %vm433_vm2, %v4985_v3  ;;  %4410 = vmatprep.mubr.msk.f32.mxu0 %vm433_vm2, %v2508_v26  ;;  %v6277_v3 = vld [vmem:[#allocation35_spill] sm:$0xff] }
  0xf6   : > { %4187 = vmatmul.mubr.msk.f32.gmra.mrb[14].mxu1 %vm433_vm2, %v4988_v7  ;;  %4411 = vmatmul.mubr.msk.f32.gmra.mrb[30].mxu0 %vm433_vm2, %v2510_v51  ;;  %v6278_v7 = vld [vmem:[#allocation46_spill] sm:$0xff] }
  0xf7   : > { %4189 = vmatprep.mubr.msk.f32.mxu1 %vm433_vm2, %v5026_v28  ;;  %4415 = vmatprep.mubr.msk.f32.mxu0 %vm433_vm2, %v5081_v21  ;;  %v2777_v28 = vrot.slane %v5596_v38, 2  ;;  %v2780_v21 = vrot.slane %v5734_v36, 2 }
  0xfa   : > { %4190 = vmatmul.mubr.msk.f32.gmra.mrb[16].mxu1 %vm433_vm2, %v5029_v29  ;;  %4416 = vmatmul.mubr.msk.f32.vlgmr.msra.gmra.mrb[0].mxu0 %vm433_vm2, %v6232_v5  ;;  %v2778_v29 = vrot.slane %v5607_v62, 2 }
  0xfb   : > { %4192 = vmatprep.mubr.msk.f32.mxu1 %vm433_vm2, %v5054_v53  ;;  %4418 = vmatprep.mubr.msk.f32.mxu0 %vm433_vm2, %v6233_v11  ;;  %v6281_v53 = vld [vmem:[#allocation48_spill] sm:$0xff] }
  0xfe   : > { %4193 = vmatmul.mubr.msk.f32.gmra.mrb[18].mxu1 %vm433_vm2, %v5057_v55  ;;  %4419 = vmatmul.mubr.msk.f32.gmra.mrb[2].mxu0 %vm433_vm2, %v6234_v47  ;;  %v6282_v55 = vld [vmem:[#allocation49_spill] sm:$0xff] }
  0xff   : > { %4195 = vmatprep.mubr.msk.f32.mxu1 %vm433_vm2, %v5086_v22  ;;  %4421 = vmatprep.mubr.msk.f32.mxu0 %vm433_vm2, %v6235_v63  ;;  %v6280_v22 = vld [vmem:[#allocation47_spill] sm:$0xff] }
 0x102   : > { %4196 = vmatmul.mubr.msk.f32.gmra.mrb[20].mxu1 %vm433_vm2, %v5089_v24  ;;  %4422 = vmatmul.mubr.msk.f32.gmra.mrb[4].mxu0 %vm433_vm2, %v6236_v23  ;;  %v2779_v24 = vsel %vm1019_vm3, %v2777_v28, %v2778_v29 }
 0x103   : > { %4198 = vmatprep.mubr.msk.f32.mxu1 %vm433_vm2, %v5128_v8  ;;  %4424 = vmatprep.mubr.msk.f32.mxu0 %vm433_vm2, %v6237_v57  ;;  %v6279_v8 = vld [vmem:[#allocation37_spill] sm:$0xff] }
 0x106   : > { %4199 = vmatmul.mubr.msk.f32.gmra.mrb[22].mxu1 %vm433_vm2, %v5131_v10  ;;  %4425 = vmatmul.mubr.msk.f32.gmra.mrb[6].mxu0 %vm433_vm2, %v6238_v30  ;;  %v6283_v10 = vld [vmem:[#allocation50_spill] sm:$0xff] }
 0x107   : > { %4201 = vmatprep.mubr.msk.f32.mxu1 %vm433_vm2, %v5165_v46  ;;  %4427 = vmatprep.mubr.msk.f32.mxu0 %vm433_vm2, %v5230_v19  ;;  %v6272_v46 = vld [vmem:[#allocation34_spill] sm:$0xff] }
 0x10a   : > { %4202 = vmatmul.mubr.msk.f32.gmra.mrb[24].mxu1 %vm433_vm2, %v5168_v12  ;;  %4428 = vmatmul.mubr.msk.f32.gmra.mrb[8].mxu0 %vm433_vm2, %v6239_v37  ;;  %v2781_v12 = vsel %vm1019_vm3, %v2778_v29, %v2780_v21 }
 0x10b   : > { %4204 = vmatprep.mubr.msk.f32.mxu1 %vm433_vm2, %v5200_v20  ;;  %4430 = vmatprep.mubr.msk.f32.mxu0 %vm433_vm2, %v5265_v39 }
 0x10e   : > { %4205 = vmatmul.mubr.msk.f32.gmra.mrb[26].mxu1 %vm433_vm2, %v5203_v54  ;;  %4431 = vmatmul.mubr.msk.f32.gmra.mrb[10].mxu0 %vm433_vm2, %v5282_v41 }
 0x10f   : > { %4207 = vmatprep.mubr.msk.f32.mxu1 %vm433_vm2, %v5235_v40  ;;  %4433 = vmatprep.mubr.msk.f32.mxu0 %vm433_vm2, %v5289_v13 }
 0x112   : > { %4208 = vmatmul.mubr.msk.f32.gmra.mrb[28].mxu1 %vm433_vm2, %v6272_v46  ;;  %4434 = vmatmul.mubr.msk.f32.gmra.mrb[12].mxu0 %vm433_vm2, %v5305_v17 }
 0x113   : > { %4210 = vmatprep.mubr.msk.f32.mxu1 %vm433_vm2, %v5410_v9  ;;  %4436 = vmatprep.mubr.msk.f32.mxu0 %vm433_vm2, %v5309_v61  ;;  %v6273_v9 = vld [vmem:[#allocation41_spill] sm:$0xff] }
 0x116   : > { %4211 = vmatmul.mubr.msk.f32.gmra.mrb[30].mxu1 %vm433_vm2, %v5413_v6  ;;  %4437 = vmatmul.mubr.msk.f32.gmra.mrb[14].mxu0 %vm433_vm2, %v5322_v45  ;;  %v6274_v6 = vld [vmem:[#allocation44_spill] sm:$0xff] }
 0x117   : > { %4239 = vmatprep.mubr.msk.f32.mxu1 %vm433_vm2, %v6256_v35  ;;  %4439 = vmatprep.mubr.msk.f32.mxu0 %vm433_vm2, %v5326_v0 }
 0x11a   : > { %4240 = vmatmul.mubr.msk.f32.vlgmr.msra.gmra.mrb[16].mxu1 %vm433_vm2, %v6257_v44  ;;  %4440 = vmatmul.mubr.msk.f32.gmra.mrb[16].mxu0 %vm433_vm2, %v5346_v16 }
 0x11b   : > { %4242 = vmatprep.mubr.msk.f32.mxu1 %vm433_vm2, %v6259_v27  ;;  %4442 = vmatprep.mubr.msk.f32.mxu0 %vm433_vm2, %v6273_v9 }
 0x11e   : > { %4243 = vmatmul.mubr.msk.f32.gmra.mrb[18].mxu1 %vm433_vm2, %v6261_v2  ;;  %4443 = vmatmul.mubr.msk.f32.gmra.mrb[18].mxu0 %vm433_vm2, %v5365_v56 }
 0x11f   : > { %4245 = vmatprep.mubr.msk.f32.mxu1 %vm433_vm2, %v6262_v48  ;;  %4445 = vmatprep.mubr.msk.f32.mxu0 %vm433_vm2, %v5369_v14  ;;  %v5915_v48 = vld [vmem:[%s6106_s2] ss:$0 sm:$0xff] }
 0x122   : > { %4246 = vmatmul.mubr.msk.f32.gmra.mrb[20].mxu1 %vm433_vm2, %v6263_v34  ;;  %4446 = vmatmul.mubr.msk.f32.gmra.mrb[20].mxu0 %vm433_vm2, %v6249_v4 }
 0x123   : > { %4248 = vmatprep.mubr.msk.f32.mxu1 %vm433_vm2, %v6264_v60  ;;  %4448 = vmatprep.mubr.msk.f32.mxu0 %vm433_vm2, %v6251_v49 }
 0x126   : > { %4249 = vmatmul.mubr.msk.f32.gmra.mrb[22].mxu1 %vm433_vm2, %v6265_v1  ;;  %4449 = vmatmul.mubr.msk.f32.gmra.mrb[22].mxu0 %vm433_vm2, %v6274_v6 }
 0x127   : > { %4251 = vmatprep.mubr.msk.f32.mxu1 %vm433_vm2, %v6275_v58  ;;  %4451 = vmatprep.mubr.msk.f32.mxu0 %vm433_vm2, %v6276_v59 }
 0x12a   : > { %4252 = vmatmul.mubr.msk.f32.gmra.mrb[24].mxu1 %vm433_vm2, %v6277_v3  ;;  %4452 = vmatmul.mubr.msk.f32.gmra.mrb[24].mxu0 %vm433_vm2, %v6278_v7 }
 0x12b   : > { %4254 = vmatprep.mubr.msk.f32.mxu1 %vm433_vm2, %v6279_v8  ;;  %4454 = vmatprep.mubr.msk.f32.mxu0 %vm433_vm2, %v6280_v22 }
 0x12e   : > { %4255 = vmatmul.mubr.msk.f32.gmra.mrb[26].mxu1 %vm433_vm2, %v6269_v33  ;;  %4455 = vmatmul.mubr.msk.f32.gmra.mrb[26].mxu0 %vm433_vm2, %v6281_v53 }
 0x12f   : > { %4257 = vmatprep.mubr.msk.f32.mxu1 %vm433_vm2, %v6270_v32  ;;  %4457 = vmatprep.mubr.msk.f32.mxu0 %vm433_vm2, %v6282_v55 }
 0x132   : > { %4258 = vmatmul.mubr.msk.f32.gmra.mrb[28].mxu1 %vm433_vm2, %v6271_v43  ;;  %4458 = vmatmul.mubr.msk.f32.gmra.mrb[28].mxu0 %vm433_vm2, %v6283_v10 }
 0x133   : > { %4260 = vmatprep.mubr.msk.f32.mxu1 %vm433_vm2, %v5731_v15  ;;  %4460 = vmatprep.mubr.msk.f32.mxu0 %vm433_vm2, %v2779_v24 }
 0x136   : > { %4261 = vmatmul.mubr.msk.f32.gmra.mrb[30].mxu1 %vm433_vm2, %v5745_v50  ;;  %4461 = vmatmul.mubr.msk.f32.gmra.mrb[30].mxu0 %vm433_vm2, %v2781_v12 }
 0x1ad   : > { %v4167_v40 = vpop.f32.mrb[0].mxu1 }
 0x1ae   : > { %v1503_v20 = vpop.f32.mrb[1].mxu1 }
 0x1b1   : > { %v4170_v54 = vpop.f32.mrb[2].mxu1 }
 0x1b2   : > { %v1513_v19 = vpop.f32.mrb[3].mxu1 }
 0x1b5   : > { %v4173_v13 = vpop.f32.mrb[4].mxu1 }
 0x1b6   : > { %v1523_v39 = vpop.f32.mrb[5].mxu1 }
 0x1b9   : > { %v5891_v41 = vpop.f32.mrb[6].mxu1 }
 0x1ba   : > { %v5893_v17 = vpop.f32.mrb[7].mxu1 }
 0x1bd   : > { %v5895_v61 = vpop.f32.mrb[8].mxu1 }
 0x1be   : > { %v5897_v45 = vpop.f32.mrb[9].mxu1 }
 0x1c1   : > { %v5899_v0 = vpop.f32.mrb[10].mxu1 }
 0x1c2   : > { %v5901_v16 = vpop.f32.mrb[11].mxu1 }
 0x1c5   : > { %v5904_v49 = vpop.f32.mrb[12].mxu1 }
 0x1c6   : > { %v5906_v56 = vpop.f32.mrb[13].mxu1 }
 0x1c9   : > { %v5908_v14 = vpop.f32.mrb[14].mxu1 }
 0x1ca   : > { %v5910_v36 = vpop.f32.mrb[15].mxu1 }
 0x1cd   : > { %v4417_v33 = vpop.f32.mrb[0].mxu0 }
 0x1ce   : > { %v4465_v5 = vadd.f32 %v4417_v33, %v4167_v40  ;;  %v2857_v11 = vpop.f32.mrb[1].mxu0 }
 0x1cf   : > { %v4466_v47 = vadd.f32 %v2857_v11, %v1503_v20 }
 0x1d0   : > { %v3056_v63 = vadd.f32 %v4465_v5, %v5915_v48 }
 0x1d1   : > { %v3055_v23 = vadd.f32 %v4466_v47, %v5915_v48  ;;  %v4420_v57 = vpop.f32.mrb[2].mxu0 }
 0x1d2   : > { %3089 = vst.msk [vmem:[%s5920_s25 + $0x8] sm:$0xff] %vm3087_vm4, %v3056_v63  ;;  %v3121_v30 = vsel %vm3087_vm4, %v3056_v63, 0.0  ;;  %v3184_v38 = vmul.f32 %v3056_v63, %v3056_v63  ;;  %v4467_v37 = vadd.f32 %v4420_v57, %v4170_v54  ;;  %v2867_v62 = vpop.f32.mrb[3].mxu0 }
 0x1d3   : > { %3088 = vst.msk [vmem:[%s5920_s25] sm:$0xff] %vm3087_vm4, %v3055_v23  ;;  %v3120_v4 = vsel %vm3087_vm4, %v3055_v23, 0.0  ;;  %v3183_v35 = vmul.f32 %v3055_v23, %v3055_v23  ;;  %v4468_v44 = vadd.f32 %v2867_v62, %v1513_v19 }
 0x1d4   : > { %v3216_v27 = vsel %vm3087_vm4, %v3184_v38, 0.0  ;;  %v3122_v2 = vadd.f32 %v3121_v30, %v3120_v4  ;;  %v3058_v34 = vadd.f32 %v4467_v37, %v5915_v48 }
 0x1d5   : > { %v3215_v60 = vsel %vm3087_vm4, %v3183_v35, 0.0  ;;  %v3057_v1 = vadd.f32 %v4468_v44, %v5915_v48  ;;  %v4423_v15 = vpop.f32.mrb[4].mxu0 }
 0x1d6   : > { %v3217_v18 = vadd.f32 %v3216_v27, %v3215_v60  ;;  %3091 = vst.msk [vmem:[%s5920_s25 + $0x18] sm:$0xff] %vm3087_vm4, %v3058_v34  ;;  %v3186_v25 = vmul.f32 %v3058_v34, %v3058_v34  ;;  %v4469_v31 = vadd.f32 %v4423_v15, %v4173_v13  ;;  %v2877_v32 = vpop.f32.mrb[5].mxu0  ;;  %v3125_v51 = vsel %vm3087_vm4, %v3058_v34, 0.0 }
 0x1d7   : > { %3090 = vst.msk [vmem:[%s5920_s25 + $0x10] sm:$0xff] %vm3087_vm4, %v3057_v1  ;;  %v3123_v42 = vsel %vm3087_vm4, %v3057_v1, 0.0  ;;  %v3185_v43 = vmul.f32 %v3057_v1, %v3057_v1  ;;  %v4470_v50 = vadd.f32 %v2877_v32, %v1523_v39 }
 0x1d8   : > { %v3124_v52 = vadd.f32 %v3123_v42, %v3122_v2  ;;  %v3060_v26 = vadd.f32 %v4469_v31, %v5915_v48  ;;  %v3220_v58 = vsel %vm3087_vm4, %v3186_v25, 0.0 }
 0x1d9   : > { %v3218_v46 = vsel %vm3087_vm4, %v3185_v43, 0.0  ;;  %v3059_v9 = vadd.f32 %v4470_v50, %v5915_v48  ;;  %v4426_v6 = vpop.f32.mrb[6].mxu0 }
 0x1da   : > { %v3219_v59 = vadd.f32 %v3218_v46, %v3217_v18  ;;  %3093 = vst.msk [vmem:[%s5920_s25 + $0x28] sm:$0xff] %vm3087_vm4, %v3060_v26  ;;  %v3188_v3 = vmul.f32 %v3060_v26, %v3060_v26  ;;  %v3126_v7 = vadd.f32 %v3125_v51, %v3124_v52  ;;  %v2887_v8 = vpop.f32.mrb[7].mxu0  ;;  %v4471_v29 = vadd.f32 %v4426_v6, %v5891_v41 }
 0x1db   : > { %3092 = vst.msk [vmem:[%s5920_s25 + $0x20] sm:$0xff] %vm3087_vm4, %v3059_v9  ;;  %v3127_v22 = vsel %vm3087_vm4, %v3059_v9, 0.0  ;;  %v3187_v28 = vmul.f32 %v3059_v9, %v3059_v9  ;;  %v4472_v53 = vadd.f32 %v2887_v8, %v5893_v17  ;;  %v3129_v24 = vsel %vm3087_vm4, %v3060_v26, 0.0 }
 0x1dc   : > { %v3128_v55 = vadd.f32 %v3127_v22, %v3126_v7  ;;  %v3221_v21 = vadd.f32 %v3220_v58, %v3219_v59  ;;  %v3062_v12 = vadd.f32 %v4471_v29, %v5915_v48  ;;  %v3224_v41 = vsel %vm3087_vm4, %v3188_v3, 0.0 }
 0x1dd   : > { %v3222_v10 = vsel %vm3087_vm4, %v3187_v28, 0.0  ;;  %v3061_v40 = vadd.f32 %v4472_v53, %v5915_v48  ;;  %v4429_v20 = vpop.f32.mrb[8].mxu0 }
 0x1de   : > { %v3223_v54 = vadd.f32 %v3222_v10, %v3221_v21  ;;  %v3130_v19 = vadd.f32 %v3129_v24, %v3128_v55  ;;  %v4473_v13 = vadd.f32 %v4429_v20, %v5895_v61  ;;  %v2897_v39 = vpop.f32.mrb[9].mxu0  ;;  %3095 = vst.msk [vmem:[%s5920_s25 + $0x38] sm:$0xff] %vm3087_vm4, %v3062_v12  ;;  %v3190_v17 = vmul.f32 %v3062_v12, %v3062_v12 }
 0x1df   : > { %3094 = vst.msk [vmem:[%s5920_s25 + $0x30] sm:$0xff] %vm3087_vm4, %v3061_v40  ;;  %v3131_v33 = vsel %vm3087_vm4, %v3061_v40, 0.0  ;;  %v3189_v5 = vmul.f32 %v3061_v40, %v3061_v40  ;;  %v4474_v23 = vadd.f32 %v2897_v39, %v5897_v45  ;;  %v3133_v30 = vsel %vm3087_vm4, %v3062_v12, 0.0 }
 0x1e0   : > { %v3132_v11 = vadd.f32 %v3131_v33, %v3130_v19  ;;  %v3225_v47 = vadd.f32 %v3224_v41, %v3223_v54  ;;  %v3064_v63 = vadd.f32 %v4473_v13, %v5915_v48  ;;  %v3228_v38 = vsel %vm3087_vm4, %v3190_v17, 0.0 }
 0x1e1   : > { %v3226_v61 = vsel %vm3087_vm4, %v3189_v5, 0.0  ;;  %v4432_v57 = vpop.f32.mrb[10].mxu0  ;;  %v3063_v62 = vadd.f32 %v4474_v23, %v5915_v48 }
 0x1e2   : > { %v3227_v37 = vadd.f32 %v3226_v61, %v3225_v47  ;;  %3097 = vst.msk [vmem:[%s5920_s25 + $0x48] sm:$0xff] %vm3087_vm4, %v3064_v63  ;;  %v2907_v4 = vpop.f32.mrb[11].mxu0  ;;  %v3192_v35 = vmul.f32 %v3064_v63, %v3064_v63  ;;  %v3134_v44 = vadd.f32 %v3133_v30, %v3132_v11  ;;  %v4475_v27 = vadd.f32 %v4432_v57, %v5899_v0 }
 0x1e3   : > { %v4476_v45 = vadd.f32 %v2907_v4, %v5901_v16  ;;  %3096 = vst.msk [vmem:[%s5920_s25 + $0x40] sm:$0xff] %vm3087_vm4, %v3063_v62  ;;  %v3135_v2 = vsel %vm3087_vm4, %v3063_v62, 0.0  ;;  %v3191_v34 = vmul.f32 %v3063_v62, %v3063_v62  ;;  %v3137_v31 = vsel %vm3087_vm4, %v3064_v63, 0.0 }
 0x1e4   : > { %v3229_v60 = vadd.f32 %v3228_v38, %v3227_v37  ;;  %v3136_v1 = vadd.f32 %v3135_v2, %v3134_v44  ;;  %v3066_v15 = vadd.f32 %v4475_v27, %v5915_v48  ;;  %v3232_v42 = vsel %vm3087_vm4, %v3192_v35, 0.0 }
 0x1e5   : > { %v3065_v18 = vadd.f32 %v4476_v45, %v5915_v48  ;;  %v4435_v25 = vpop.f32.mrb[12].mxu0  ;;  %v3230_v0 = vsel %vm3087_vm4, %v3191_v34, 0.0 }
 0x1e6   : > { %v4477_v32 = vadd.f32 %v4435_v25, %v5904_v49  ;;  %v2917_v16 = vpop.f32.mrb[13].mxu0  ;;  %v3231_v43 = vadd.f32 %v3230_v0, %v3229_v60  ;;  %3099 = vst.msk [vmem:[%s5920_s25 + $0x58] sm:$0xff] %vm3087_vm4, %v3066_v15  ;;  %v3194_v50 = vmul.f32 %v3066_v15, %v3066_v15  ;;  %v3138_v52 = vadd.f32 %v3137_v31, %v3136_v1 }
 0x1e7   : > { %3098 = vst.msk [vmem:[%s5920_s25 + $0x50] sm:$0xff] %vm3087_vm4, %v3065_v18  ;;  %v3139_v26 = vsel %vm3087_vm4, %v3065_v18, 0.0  ;;  %v3193_v51 = vmul.f32 %v3065_v18, %v3065_v18  ;;  %v4478_v9 = vadd.f32 %v2917_v16, %v5906_v56  ;;  %v3141_v59 = vsel %vm3087_vm4, %v3066_v15, 0.0 }
 0x1e8   : > { %v3068_v46 = vadd.f32 %v4477_v32, %v5915_v48  ;;  %v3140_v49 = vadd.f32 %v3139_v26, %v3138_v52  ;;  %v3233_v6 = vadd.f32 %v3232_v42, %v3231_v43  ;;  %v3236_v56 = vsel %vm3087_vm4, %v3194_v50, 0.0 }
 0x1e9   : > { %v4438_v58 = vpop.f32.mrb[14].mxu0  ;;  %v3234_v3 = vsel %vm3087_vm4, %v3193_v51, 0.0  ;;  %v3067_v8 = vadd.f32 %v4478_v9, %v5915_v48 }
 0x1ea   : > { %3101 = vst.msk [vmem:[%s5920_s25 + $0x68] sm:$0xff] %vm3087_vm4, %v3068_v46  ;;  %v3196_v7 = vmul.f32 %v3068_v46, %v3068_v46  ;;  %v2927_v22 = vpop.f32.mrb[15].mxu0  ;;  %v3235_v28 = vadd.f32 %v3234_v3, %v3233_v6  ;;  %v3142_v29 = vadd.f32 %v3141_v59, %v3140_v49  ;;  %v4479_v53 = vadd.f32 %v4438_v58, %v5908_v14 }
 0x1eb   : > { %v4480_v55 = vadd.f32 %v2927_v22, %v5910_v36  ;;  %3100 = vst.msk [vmem:[%s5920_s25 + $0x60] sm:$0xff] %vm3087_vm4, %v3067_v8  ;;  %v3143_v21 = vsel %vm3087_vm4, %v3067_v8, 0.0  ;;  %v3195_v24 = vmul.f32 %v3067_v8, %v3067_v8  ;;  %v3145_v36 = vsel %vm3087_vm4, %v3068_v46, 0.0 }
 0x1ec   : > { %v3144_v12 = vadd.f32 %v3143_v21, %v3142_v29  ;;  %v3237_v40 = vadd.f32 %v3236_v56, %v3235_v28  ;;  %v3070_v20 = vadd.f32 %v4479_v53, %v5915_v48  ;;  %v3240_v17 = vsel %vm3087_vm4, %v3196_v7, 0.0 }
 0x1ed   : > { %v4241_v10 = vpop.f32.mrb[16].mxu1  ;;  %v3069_v54 = vadd.f32 %v4480_v55, %v5915_v48  ;;  %v4441_v19 = vpop.f32.mrb[16].mxu0  ;;  %v3238_v13 = vsel %vm3087_vm4, %v3195_v24, 0.0 }
 0x1ee   : > { %v1855_v14 = vpop.f32.mrb[17].mxu1  ;;  %v4481_v39 = vadd.f32 %v4441_v19, %v4241_v10  ;;  %v2937_v41 = vpop.f32.mrb[17].mxu0  ;;  %v3239_v33 = vadd.f32 %v3238_v13, %v3237_v40  ;;  %3103 = vst.msk [vmem:[%s5920_s25 + $0x78] sm:$0xff] %vm3087_vm4, %v3070_v20  ;;  %v3198_v5 = vmul.f32 %v3070_v20, %v3070_v20  ;;  %v3146_v11 = vadd.f32 %v3145_v36, %v3144_v12 }
 0x1ef   : > { %3102 = vst.msk [vmem:[%s5920_s25 + $0x70] sm:$0xff] %vm3087_vm4, %v3069_v54  ;;  %v3147_v47 = vsel %vm3087_vm4, %v3069_v54, 0.0  ;;  %v3197_v63 = vmul.f32 %v3069_v54, %v3069_v54  ;;  %v4482_v61 = vadd.f32 %v2937_v41, %v1855_v14  ;;  %v3149_v4 = vsel %vm3087_vm4, %v3070_v20, 0.0 }
 0x1f0   : > { %v3072_v23 = vadd.f32 %v4481_v39, %v5915_v48  ;;  %v3148_v30 = vadd.f32 %v3147_v47, %v3146_v11  ;;  %v3241_v38 = vadd.f32 %v3240_v17, %v3239_v33  ;;  %v3244_v15 = vsel %vm3087_vm4, %v3198_v5, 0.0 }
 0x1f1   : > { %v4244_v57 = vpop.f32.mrb[18].mxu1  ;;  %v4444_v37 = vpop.f32.mrb[18].mxu0  ;;  %v3242_v35 = vsel %vm3087_vm4, %v3197_v63, 0.0  ;;  %v3071_v27 = vadd.f32 %v4482_v61, %v5915_v48 }
 0x1f2   : > { %v1865_v62 = vpop.f32.mrb[19].mxu1  ;;  %3105 = vst.msk [vmem:[%s5920_s25 + $0x88] sm:$0xff] %vm3087_vm4, %v3072_v23  ;;  %v3200_v44 = vmul.f32 %v3072_v23, %v3072_v23  ;;  %v2947_v45 = vpop.f32.mrb[19].mxu0  ;;  %v3243_v2 = vadd.f32 %v3242_v35, %v3241_v38  ;;  %v3150_v34 = vadd.f32 %v3149_v4, %v3148_v30  ;;  %v4483_v60 = vadd.f32 %v4444_v37, %v4244_v57 }
 0x1f3   : > { %v4484_v1 = vadd.f32 %v2947_v45, %v1865_v62  ;;  %3104 = vst.msk [vmem:[%s5920_s25 + $0x80] sm:$0xff] %vm3087_vm4, %v3071_v27  ;;  %v3151_v18 = vsel %vm3087_vm4, %v3071_v27, 0.0  ;;  %v3199_v25 = vmul.f32 %v3071_v27, %v3071_v27  ;;  %v3153_v52 = vsel %vm3087_vm4, %v3072_v23, 0.0 }
 0x1f4   : > { %v3152_v0 = vadd.f32 %v3151_v18, %v3150_v34  ;;  %v3245_v32 = vadd.f32 %v3244_v15, %v3243_v2  ;;  %v3074_v16 = vadd.f32 %v4483_v60, %v5915_v48  ;;  %v3248_v9 = vsel %vm3087_vm4, %v3200_v44, 0.0 }
 0x1f5   : > { %v4247_v31 = vpop.f32.mrb[20].mxu1  ;;  %v3073_v42 = vadd.f32 %v4484_v1, %v5915_v48  ;;  %v4447_v43 = vpop.f32.mrb[20].mxu0  ;;  %v3246_v26 = vsel %vm3087_vm4, %v3199_v25, 0.0 }
 0x1f6   : > { %v1875_v50 = vpop.f32.mrb[21].mxu1  ;;  %v4485_v51 = vadd.f32 %v4447_v43, %v4247_v31  ;;  %v2957_v46 = vpop.f32.mrb[21].mxu0  ;;  %v3247_v49 = vadd.f32 %v3246_v26, %v3245_v32  ;;  %3107 = vst.msk [vmem:[%s5920_s25 + $0x98] sm:$0xff] %vm3087_vm4, %v3074_v16  ;;  %v3202_v6 = vmul.f32 %v3074_v16, %v3074_v16  ;;  %v3154_v58 = vadd.f32 %v3153_v52, %v3152_v0 }
 0x1f7   : > { %3106 = vst.msk [vmem:[%s5920_s25 + $0x90] sm:$0xff] %vm3087_vm4, %v3073_v42  ;;  %v3155_v59 = vsel %vm3087_vm4, %v3073_v42, 0.0  ;;  %v3201_v3 = vmul.f32 %v3073_v42, %v3073_v42  ;;  %v4486_v8 = vadd.f32 %v2957_v46, %v1875_v50  ;;  %v3157_v56 = vsel %vm3087_vm4, %v3074_v16, 0.0 }
 0x1f8   : > { %v3076_v7 = vadd.f32 %v4485_v51, %v5915_v48  ;;  %v3156_v28 = vadd.f32 %v3155_v59, %v3154_v58  ;;  %v3249_v29 = vadd.f32 %v3248_v9, %v3247_v49  ;;  %v3252_v14 = vsel %vm3087_vm4, %v3202_v6, 0.0 }
 0x1f9   : > { %v4250_v22 = vpop.f32.mrb[22].mxu1  ;;  %v4450_v53 = vpop.f32.mrb[22].mxu0  ;;  %v3250_v21 = vsel %vm3087_vm4, %v3201_v3, 0.0  ;;  %v3075_v10 = vadd.f32 %v4486_v8, %v5915_v48 }
 0x1fa   : > { %v1885_v55 = vpop.f32.mrb[23].mxu1  ;;  %3109 = vst.msk [vmem:[%s5920_s25 + $0xa8] sm:$0xff] %vm3087_vm4, %v3076_v7  ;;  %v3204_v24 = vmul.f32 %v3076_v7, %v3076_v7  ;;  %v2967_v12 = vpop.f32.mrb[23].mxu0  ;;  %v3251_v40 = vadd.f32 %v3250_v21, %v3249_v29  ;;  %v3158_v20 = vadd.f32 %v3157_v56, %v3156_v28  ;;  %v4487_v54 = vadd.f32 %v4450_v53, %v4250_v22 }
 0x1fb   : > { %v4488_v19 = vadd.f32 %v2967_v12, %v1885_v55  ;;  %3108 = vst.msk [vmem:[%s5920_s25 + $0xa0] sm:$0xff] %vm3087_vm4, %v3075_v10  ;;  %v3159_v36 = vsel %vm3087_vm4, %v3075_v10, 0.0  ;;  %v3203_v13 = vmul.f32 %v3075_v10, %v3075_v10  ;;  %v3161_v63 = vsel %vm3087_vm4, %v3076_v7, 0.0 }
 0x1fc   : > { %v3160_v41 = vadd.f32 %v3159_v36, %v3158_v20  ;;  %v3253_v17 = vadd.f32 %v3252_v14, %v3251_v40  ;;  %v3078_v33 = vadd.f32 %v4487_v54, %v5915_v48  ;;  %v3256_v30 = vsel %vm3087_vm4, %v3204_v24, 0.0 }
 0x1fd   : > { %v4253_v39 = vpop.f32.mrb[24].mxu1  ;;  %v3077_v5 = vadd.f32 %v4488_v19, %v5915_v48  ;;  %v4453_v11 = vpop.f32.mrb[24].mxu0  ;;  %v3254_v23 = vsel %vm3087_vm4, %v3203_v13, 0.0 }
 0x1fe   : > { %v1895_v47 = vpop.f32.mrb[25].mxu1  ;;  %v4489_v61 = vadd.f32 %v4453_v11, %v4253_v39  ;;  %v2977_v57 = vpop.f32.mrb[25].mxu0  ;;  %v3255_v38 = vadd.f32 %v3254_v23, %v3253_v17  ;;  %3111 = vst.msk [vmem:[%s5920_s25 + $0xb8] sm:$0xff] %vm3087_vm4, %v3078_v33  ;;  %v3206_v37 = vmul.f32 %v3078_v33, %v3078_v33  ;;  %v3162_v62 = vadd.f32 %v3161_v63, %v3160_v41 }
 0x1ff   : > { %3110 = vst.msk [vmem:[%s5920_s25 + $0xb0] sm:$0xff] %vm3087_vm4, %v3077_v5  ;;  %v3163_v4 = vsel %vm3087_vm4, %v3077_v5, 0.0  ;;  %v3205_v35 = vmul.f32 %v3077_v5, %v3077_v5  ;;  %v4490_v27 = vadd.f32 %v2977_v57, %v1895_v47  ;;  %v3165_v15 = vsel %vm3087_vm4, %v3078_v33, 0.0 }
 0x200   : > { %v3080_v44 = vadd.f32 %v4489_v61, %v5915_v48  ;;  %v3164_v2 = vadd.f32 %v3163_v4, %v3162_v62  ;;  %v3257_v34 = vadd.f32 %v3256_v30, %v3255_v38  ;;  %v3260_v50 = vsel %vm3087_vm4, %v3206_v37, 0.0 }
 0x201   : > { %v4256_v45 = vpop.f32.mrb[26].mxu1  ;;  %v4456_v60 = vpop.f32.mrb[26].mxu0  ;;  %v3258_v18 = vsel %vm3087_vm4, %v3205_v35, 0.0  ;;  %v3079_v31 = vadd.f32 %v4490_v27, %v5915_v48 }
 0x202   : > { %v1905_v1 = vpop.f32.mrb[27].mxu1  ;;  %3113 = vst.msk [vmem:[%s5920_s25 + $0xc8] sm:$0xff] %vm3087_vm4, %v3080_v44  ;;  %v3208_v25 = vmul.f32 %v3080_v44, %v3080_v44  ;;  %v2987_v0 = vpop.f32.mrb[27].mxu0  ;;  %v3259_v32 = vadd.f32 %v3258_v18, %v3257_v34  ;;  %v3166_v16 = vadd.f32 %v3165_v15, %v3164_v2  ;;  %v4491_v42 = vadd.f32 %v4456_v60, %v4256_v45 }
 0x203   : > { %v4492_v43 = vadd.f32 %v2987_v0, %v1905_v1  ;;  %3112 = vst.msk [vmem:[%s5920_s25 + $0xc0] sm:$0xff] %vm3087_vm4, %v3079_v31  ;;  %v3167_v52 = vsel %vm3087_vm4, %v3079_v31, 0.0  ;;  %v3207_v26 = vmul.f32 %v3079_v31, %v3079_v31  ;;  %v3169_v3 = vsel %vm3087_vm4, %v3080_v44, 0.0 }
 0x204   : > { %v3168_v46 = vadd.f32 %v3167_v52, %v3166_v16  ;;  %v3261_v9 = vadd.f32 %v3260_v50, %v3259_v32  ;;  %v3082_v49 = vadd.f32 %v4491_v42, %v5915_v48  ;;  %v3264_v28 = vsel %vm3087_vm4, %v3208_v25, 0.0 }
 0x205   : > { %v4259_v51 = vpop.f32.mrb[28].mxu1  ;;  %v3081_v6 = vadd.f32 %v4492_v43, %v5915_v48  ;;  %v4459_v58 = vpop.f32.mrb[28].mxu0  ;;  %v3262_v7 = vsel %vm3087_vm4, %v3207_v26, 0.0 }
 0x206   : > { %v1915_v59 = vpop.f32.mrb[29].mxu1  ;;  %v4493_v8 = vadd.f32 %v4459_v58, %v4259_v51  ;;  %v2997_v22 = vpop.f32.mrb[29].mxu0  ;;  %v3263_v29 = vadd.f32 %v3262_v7, %v3261_v9  ;;  %3115 = vst.msk [vmem:[%s5920_s25 + $0xd8] sm:$0xff] %vm3087_vm4, %v3082_v49  ;;  %v3210_v53 = vmul.f32 %v3082_v49, %v3082_v49  ;;  %v3170_v55 = vadd.f32 %v3169_v3, %v3168_v46 }
 0x207   : > { %3114 = vst.msk [vmem:[%s5920_s25 + $0xd0] sm:$0xff] %vm3087_vm4, %v3081_v6  ;;  %v3171_v56 = vsel %vm3087_vm4, %v3081_v6, 0.0  ;;  %v3209_v21 = vmul.f32 %v3081_v6, %v3081_v6  ;;  %v4494_v10 = vadd.f32 %v2997_v22, %v1915_v59  ;;  %v3173_v14 = vsel %vm3087_vm4, %v3082_v49, 0.0 }
 0x208   : > { %v3084_v24 = vadd.f32 %v4493_v8, %v5915_v48  ;;  %v3172_v40 = vadd.f32 %v3171_v56, %v3170_v55  ;;  %v3265_v20 = vadd.f32 %v3264_v28, %v3263_v29  ;;  %v3268_v11 = vsel %vm3087_vm4, %v3210_v53, 0.0 }
 0x209   : > { %v4262_v12 = vpop.f32.mrb[30].mxu1  ;;  %v4462_v54 = vpop.f32.mrb[30].mxu0  ;;  %v3266_v36 = vsel %vm3087_vm4, %v3209_v21, 0.0  ;;  %v3083_v13 = vadd.f32 %v4494_v10, %v5915_v48 }
 0x20a   : > { %v1925_v19 = vpop.f32.mrb[31].mxu1  ;;  %3117 = vst.msk [vmem:[%s5920_s25 + $0xe8] sm:$0xff] %vm3087_vm4, %v3084_v24  ;;  %v3007_v39 = vpop.f32.mrb[31].mxu0  ;;  %v3267_v41 = vadd.f32 %v3266_v36, %v3265_v20  ;;  %v3174_v17 = vadd.f32 %v3173_v14, %v3172_v40  ;;  %v4495_v33 = vadd.f32 %v4462_v54, %v4262_v12  ;;  %v3212_v47 = vmul.f32 %v3084_v24, %v3084_v24 }
 0x20b   : > { %v4496_v5 = vadd.f32 %v3007_v39, %v1925_v19  ;;  %3116 = vst.msk [vmem:[%s5920_s25 + $0xe0] sm:$0xff] %vm3087_vm4, %v3083_v13  ;;  %v3175_v63 = vsel %vm3087_vm4, %v3083_v13, 0.0  ;;  %v3211_v23 = vmul.f32 %v3083_v13, %v3083_v13  ;;  %v3177_v37 = vsel %vm3087_vm4, %v3084_v24, 0.0 }
 0x20c   : > { %v3176_v61 = vadd.f32 %v3175_v63, %v3174_v17  ;;  %v3269_v57 = vadd.f32 %v3268_v11, %v3267_v41  ;;  %v3086_v30 = vadd.f32 %v4495_v33, %v5915_v48  ;;  %v3272_v44 = vsel %vm3087_vm4, %v3212_v47, 0.0 }
 0x20d   : > { %v3085_v38 = vadd.f32 %v4496_v5, %v5915_v48  ;;  %v3270_v62 = vsel %vm3087_vm4, %v3211_v23, 0.0 }
 0x20e   : > { %v3271_v4 = vadd.f32 %v3270_v62, %v3269_v57  ;;  %3119 = vst.msk [vmem:[%s5920_s25 + $0xf8] sm:$0xff] %vm3087_vm4, %v3086_v30  ;;  %v3178_v35 = vadd.f32 %v3177_v37, %v3176_v61  ;;  %v3214_v27 = vmul.f32 %v3086_v30, %v3086_v30  ;;  %v3181_v48 = vsel %vm3087_vm4, %v3086_v30, 0.0 }
 0x20f   : > { %3118 = vst.msk [vmem:[%s5920_s25 + $0xf0] sm:$0xff] %vm3087_vm4, %v3085_v38  ;;  %v3179_v45 = vsel %vm3087_vm4, %v3085_v38, 0.0  ;;  %v3213_v2 = vmul.f32 %v3085_v38, %v3085_v38 }
 0x210   : > { %v3180_v34 = vadd.f32 %v3179_v45, %v3178_v35  ;;  %v3273_v60 = vadd.f32 %v3272_v44, %v3271_v4  ;;  %v3276_v25 = vsel %vm3087_vm4, %v3214_v27, 0.0 }
 0x211   : > { %v3274_v1 = vsel %vm3087_vm4, %v3213_v2, 0.0 }
 0x212   : > { %v3182_v15 = vadd.f32 %v3181_v48, %v3180_v34  ;;  %v3275_v18 = vadd.f32 %v3274_v1, %v3273_v60 }
 0x214   : > { %v3277_v31 = vadd.f32 %v3276_v25, %v3275_v18  ;;  %3278 = vst.msk [vmem:[%s242_s30] sm:$0xff] %vm3087_vm4, %v3182_v15 }
 0x216   : > { %3279 = vst.msk [vmem:[%s246_s7] sm:$0xff] %vm3087_vm4, %v3277_v31 }
 0x217 PF: > { %s16_s18 = sadd.s32 1, %s4736_s18  }
 0x218   : > { %p13_p5 = scmp.ge.s32.totalorder %s16_s18, 4  }
 0x21a   :  { %15 = sbr.rel (!%p13_p5) target bundleno = 1 (0x1), region = 94 }

// kernel: down2_forward.7
= control target key start
LH: loop header
LB: loop body
LE: loop exit
PB: predicated region body
PF: predicated region fallthrough
CT: control target
= control target key end

     0   :  { %s361_s12 = smov 0   ;;  %s391_s0 = inlined_call_operand.vmem [shape: f32[32,128], index: 0, kind: input, shape index: {}]   ;;  %s392_s1 = inlined_call_operand.vmem [shape: f32[1,128], index: 1, kind: input, shape index: {}]   ;;  %s393_s2 = inlined_call_operand.vmem [shape: f32[1,128], index: 2, kind: input, shape index: {}]   ;;  %s394_s3 = inlined_call_operand.vmem [shape: f32[32,128], index: 3, kind: output, shape index: {}]  }
   0x1 LB: > { %s304_s13 = sadd.s32 4294967295, %s339_s12   ;;  %p308_p0 = scmp.ge.s32.totalorder %s339_s12, 1  ;;  %s339_s12 = sphi %s361_s12, %s13_s12  }
   0x2   : > { %p138_p1 = scmp.lt.s32.totalorder %s339_s12, 3 }
   0x4   : > { %p139_p2 = pnand %p308_p0, %p138_p1 }
   0x5   : > { %s309_s14 = sshll.u32 (!%p139_p2), %s304_s13, 1  ;;  %v313_v0 = vld [vmem:[%s392_s1] ss:$0 sm:$0xff] (!%p139_p2) }
   0x6   : > { %142 = sbr.rel (%p139_p2) target bundleno = 71 (0x47), region = 32  ;;  %p163_p3 = scmp.lt.s32.totalorder (!%p139_p2), %s309_s14, 3  ;;  %v314_v3 = vld [vmem:[%s393_s2] ss:$0 sm:$0xff] (!%p139_p2) }
   0xd   : > { %s396_s14 = smov (!%p163_p3, %s309_s14), 3 }
   0xe   : > { %s310_s15 = sshll.u32 %s396_s14, 3 }
   0xf   : > { %s166_s20 = scalar_lea.vmem %s391_s0, %s310_s15  ;;  %s172_s25 = scalar_lea.vmem %s394_s3, %s310_s15 }
  0x10   : > { %v174_v1 = vld [vmem:[%s166_s20] sm:$0xff]  ;;  %v175_v2 = vld [vmem:[%s166_s20 + $0x8] sm:$0xff] }
  0x11   : > { %v183_v4 = vmul.f32 %v313_v0, %v174_v1  ;;  %v184_v5 = vmul.f32 %v313_v0, %v175_v2 }
  0x13   : > { %v192_v6 = vadd.f32 %v314_v3, %v183_v4  ;;  %v193_v7 = vadd.f32 %v314_v3, %v184_v5 }
  0x15   : > { %v196_v8 = vmul.f32 0.70710677, %v192_v6  ;;  %v197_v9 = vmul.f32 0.70710677, %v193_v7  ;;  %v194_v49 = vmul.f32 0.5, %v192_v6  ;;  %v195_v52 = vmul.f32 0.5, %v193_v7 }
  0x17   : > { %v198_v10 = vand.u32 2147483647, %v196_v8  ;;  %v199_v11 = vand.u32 2147483647, %v197_v9  ;;  %vm236_vm0 = vcmp.ge.f32.partialorder %v196_v8, 0.0  ;;  %vm237_vm1 = vcmp.ge.f32.partialorder %v197_v9, 0.0 }
  0x19   : > { %v200_v12 = vmul.f32 0.3275911, %v198_v10  ;;  %v201_v13 = vmul.f32 0.3275911, %v199_v11  ;;  %v224_v16 = vsub.f32 0.0, %v198_v10  ;;  %v225_v17 = vsub.f32 0.0, %v199_v11 }
  0x1b   : > { %v202_v14 = vadd.f32 1.0, %v200_v12  ;;  %v203_v15 = vadd.f32 1.0, %v201_v13  ;;  %v226_v18 = vmul.f32 %v224_v16, %v198_v10  ;;  %v227_v19 = vmul.f32 %v225_v17, %v199_v11 }
  0x1d   : > { %325 = vrcp.f32 %v202_v14  ;;  %v228_v23 = vmul.f32 1.442695, %v226_v18  ;;  %v230_v26 = vmul.f32 1.442695, %v227_v19 }
  0x1e   : > { %327 = vrcp.f32 %v203_v15 }
  0x1f   : > { %329 = vpow2.f32 %v228_v23 }
  0x20   : > { %331 = vpow2.f32 %v230_v26 }
  0x27   : > { %v326_v20 = vpop.eup %325 }
  0x28   : > { %v328_v21 = vpop.eup %327  ;;  %v206_v22 = vmul.f32 1.0614054, %v326_v20 }
  0x29   : > { %v207_v24 = vmul.f32 1.0614054, %v328_v21  ;;  %v330_v39 = vpop.eup %329 }
  0x2a   : > { %v208_v25 = vadd.f32 -1.4531521, %v206_v22  ;;  %v332_v41 = vpop.eup %331 }
  0x2b   : > { %v209_v27 = vadd.f32 -1.4531521, %v207_v24 }
  0x2c   : > { %v210_v28 = vmul.f32 %v326_v20, %v208_v25 }
  0x2d   : > { %v211_v29 = vmul.f32 %v328_v21, %v209_v27 }
  0x2e   : > { %v212_v30 = vadd.f32 1.4214138, %v210_v28 }
  0x2f   : > { %v213_v31 = vadd.f32 1.4214138, %v211_v29 }
  0x30   : > { %v214_v32 = vmul.f32 %v326_v20, %v212_v30 }
  0x31   : > { %v215_v33 = vmul.f32 %v328_v21, %v213_v31 }
  0x32   : > { %v216_v34 = vadd.f32 -0.28449672, %v214_v32 }
  0x33   : > { %v217_v35 = vadd.f32 -0.28449672, %v215_v33 }
  0x34   : > { %v218_v36 = vmul.f32 %v326_v20, %v216_v34 }
  0x35   : > { %v219_v37 = vmul.f32 %v328_v21, %v217_v35 }
  0x36   : > { %v220_v38 = vadd.f32 0.2548296, %v218_v36 }
  0x37   : > { %v221_v40 = vadd.f32 0.2548296, %v219_v37 }
  0x38   : > { %v222_v42 = vmul.f32 %v326_v20, %v220_v38 }
  0x39   : > { %v223_v43 = vmul.f32 %v328_v21, %v221_v40 }
  0x3a   : > { %v232_v44 = vmul.f32 %v330_v39, %v222_v42 }
  0x3b   : > { %v233_v45 = vmul.f32 %v332_v41, %v223_v43 }
  0x3c   : > { %v234_v46 = vsub.f32 1.0, %v232_v44 }
  0x3d   : > { %v235_v47 = vsub.f32 1.0, %v233_v45 }
  0x3e   : > { %v238_v48 = vsub.f32 0.0, %v234_v46 }
  0x3f   : > { %v239_v50 = vsub.f32 0.0, %v235_v47 }
  0x40   : > { %v240_v51 = vsel %vm236_vm0, %v234_v46, %v238_v48 }
  0x41   : > { %v242_v53 = vadd.f32 1.0, %v240_v51  ;;  %v241_v54 = vsel %vm237_vm1, %v235_v47, %v239_v50 }
  0x42   : > { %v243_v55 = vadd.f32 1.0, %v241_v54 }
  0x43   : > { %v244_v56 = vmul.f32 %v242_v53, %v194_v49 }
  0x44   : > { %v245_v57 = vmul.f32 %v243_v55, %v195_v52 }
  0x45   : > { %246 = vst [vmem:[%s172_s25] sm:$0xff] %v244_v56 }
  0x46   : > { %247 = vst [vmem:[%s172_s25 + $0x8] sm:$0xff] %v245_v57 }
  0x47 PF: > { %s13_s12 = sadd.s32 1, %s339_s12  }
  0x48   : > { %p10_p4 = scmp.ge.s32.totalorder %s13_s12, 4  }
  0x4a   :  { %12 = sbr.rel (!%p10_p4) target bundleno = 1 (0x1), region = 62 }

// kernel: down2_forward.6
= control target key start
LH: loop header
LB: loop body
LE: loop exit
PB: predicated region body
PF: predicated region fallthrough
CT: control target
= control target key end

     0   :  { %s4062_s21 = smov 0   ;;  %s6021_s0 = inlined_call_operand.vmem [shape: f32[512,8], index: 0, kind: input, shape index: {}]   ;;  %s6022_s1 = inlined_call_operand.vmem [shape: f32[512,8], index: 1, kind: input, shape index: {}]   ;;  %s6023_s2 = inlined_call_operand.vmem [shape: f32[1,8], index: 2, kind: input, shape index: {}]   ;;  %s6024_s3 = inlined_call_operand.vmem [shape: f32[1,8], index: 3, kind: input, shape index: {}]   ;;  %s6025_s4 = inlined_call_operand.vmem [shape: f32[1,8], index: 4, kind: input, shape index: {}]   ;;  %s6026_s5 = inlined_call_operand.vmem [shape: f32[1,8], index: 5, kind: input, shape index: {}]   ;;  %s6027_s6 = inlined_call_operand.vmem [shape: f32[8,8], index: 6, kind: input, shape index: {}]   ;;  %s6028_s7 = inlined_call_operand.vmem [shape: f32[8,8], index: 7, kind: input, shape index: {}]   ;;  %s6029_s8 = inlined_call_operand.vmem [shape: f32[1,8], index: 8, kind: input, shape index: {}]   ;;  %s6030_s9 = inlined_call_operand.vmem [shape: f32[512,8], index: 9, kind: output, shape index: {0}]   ;;  %s6031_s10 = inlined_call_operand.vmem [shape: f32[512,8], index: 10, kind: output, shape index: {1}]   ;;  %s6032_s11 = inlined_call_operand.vmem [shape: f32[16,8], index: 11, kind: output, shape index: {2}]   ;;  %s6033_s12 = inlined_call_operand.vmem [shape: f32[16,8], index: 12, kind: output, shape index: {3}]  }
   0x1 LB: > { %s4068_s22 = sadd.s32 4294967295, %s3995_s21   ;;  %p3433_p0 = scmp.ge.s32.totalorder %s3995_s21, 1  ;;  %s3995_s21 = sphi %s4062_s21, %s23_s21  }
   0x2   : > { %p381_p1 = scmp.lt.s32.totalorder %s3995_s21, 3 }
   0x4   : > { %p382_p2 = pnand %p3433_p0, %p381_p1 }
   0x6   : > { %385 = sbr.rel (%p382_p2) target bundleno = 717 (0x2cd), region = 56 }
   0xd   : > { %v2391_v0 = vld [vmem:[%s6028_s7] sm:$0xff]  ;;  %s3434_s27 = sshll.u32 %s4068_s22, 5  ;;  %vm2357_vm3 = vcmask 64512   ;;  %p465_p4 = scmp.lt.s32.totalorder %s4068_s22, 1 }
   0xe   : > { %v2390_v1 = vld [vmem:[%s6027_s6] sm:$0xff]  ;;  %3581 = vmatprep.subr.mxu1 %v2391_v0  ;;  %p442_p3 = scmp.lt.s32.totalorder %s3434_s27, 63 }
   0xf   : > { %3631 = vmatprep.subr.mxu0 %v2390_v1  ;;  %3582 = vmatpush3.msra.mxu1 %v2391_v0  ;;  %v4084_v2 = vld [vmem:[%s6025_s4] ss:$0 sm:$0xff]  ;;  %s6043_s22 = smov (!%p465_p4, %s4068_s22), 1 }
  0x10   : > { %3632 = vmatpush3.msra.mxu0 %v2390_v1  ;;  %s6041_s27 = smov (!%p442_p3, %s3434_s27), 63  ;;  %v4095_v3 = vld [vmem:[%s6026_s5] ss:$0 sm:$0xff] }
  0x11   : > { %s4079_s28 = sshll.u32 %s6041_s27, 3  ;;  %v4100_v4 = vld [vmem:[%s6023_s2] ss:$0 sm:$0xff] }
  0x12   : > { %s4090_s15 = scalar_lea.vmem %s6022_s1, %s4079_s28  ;;  %s4107_s24 = scalar_lea.vmem %s6021_s0, %s4079_s28  ;;  %v4112_v6 = vld [vmem:[%s6024_s3] ss:$0 sm:$0xff] }
  0x13   : > { %v1415_v5 = vld [vmem:[%s4090_s15] sm:$0xff]  ;;  %v1416_v7 = vld [vmem:[%s4090_s15 + $0x8] sm:$0xff]  ;;  %v1417_v12 = vld [vmem:[%s4090_s15 + $0x10] sm:$0xff]  ;;  %s4293_s30 = scalar_lea.vmem %s6031_s10, %s4079_s28  ;;  %s5750_s16 = scalar_lea.vmem %s6030_s9, %s4079_s28 }
  0x14   : > { %v1454_v8 = vmul.f32 %v4084_v2, %v1415_v5  ;;  %v473_v9 = vld [vmem:[%s4107_s24] sm:$0xff]  ;;  %v1455_v10 = vmul.f32 %v4084_v2, %v1416_v7  ;;  %v474_v11 = vld [vmem:[%s4107_s24 + $0x8] sm:$0xff]  ;;  %v475_v17 = vld [vmem:[%s4107_s24 + $0x10] sm:$0xff]  ;;  %v1456_v20 = vmul.f32 %v4084_v2, %v1417_v12  ;;  %s3442_s28 = sshll.u32 %s6043_s22, 3 }
  0x15   : > { %v512_v13 = vmul.f32 %v4100_v4, %v473_v9  ;;  %v513_v14 = vmul.f32 %v4100_v4, %v474_v11  ;;  %v514_v25 = vmul.f32 %v4100_v4, %v475_v17  ;;  %v1418_v28 = vld [vmem:[%s4090_s15 + $0x18] sm:$0xff]  ;;  %s468_s18 = scalar_lea.vmem %s6032_s11, %s3442_s28  ;;  %s472_s20 = scalar_lea.vmem %s6033_s12, %s3442_s28 }
  0x16   : > { %v1493_v15 = vadd.f32 %v4095_v3, %v1454_v8  ;;  %v1494_v16 = vadd.f32 %v4095_v3, %v1455_v10  ;;  %v1495_v31 = vadd.f32 %v4095_v3, %v1456_v20  ;;  %v1457_v39 = vmul.f32 %v4084_v2, %v1418_v28  ;;  %v476_v40 = vld [vmem:[%s4107_s24 + $0x18] sm:$0xff]  ;;  %v1419_v28 = vld [vmem:[%s4090_s15 + $0x20] sm:$0xff] }
  0x17   : > { %v551_v18 = vadd.f32 %v4112_v6, %v512_v13  ;;  %v4127_v19 = vadd.f32 %v4112_v6, %v513_v14  ;;  %v4147_v38 = vadd.f32 %v4112_v6, %v514_v25  ;;  %v515_v49 = vmul.f32 %v4100_v4, %v476_v40 }
  0x18   : > { %v4130_v21 = vmul.f32 0.70710677, %v1493_v15  ;;  %v4132_v22 = vmul.f32 0.70710677, %v1494_v16  ;;  %v4152_v50 = vmul.f32 0.5, %v1493_v15  ;;  %v1496_v56 = vadd.f32 %v4095_v3, %v1457_v39 }
  0x19   : > { %v4134_v23 = vmul.f32 0.70710677, %v551_v18  ;;  %v4137_v24 = vmul.f32 0.70710677, %v4127_v19  ;;  %v4154_v52 = vmul.f32 0.70710677, %v1495_v31  ;;  %v4167_v63 = vadd.f32 %v4112_v6, %v515_v49 }
  0x1a   : > { %v1589_v26 = vand.u32 2147483647, %v4130_v21  ;;  %v1590_v27 = vand.u32 2147483647, %v4132_v22  ;;  %v4157_v55 = vmul.f32 0.70710677, %v4147_v38  ;;  %v1458_v39 = vmul.f32 %v4084_v2, %v1419_v28 }
  0x1b   : > { %v647_v29 = vand.u32 2147483647, %v4134_v23  ;;  %v648_v30 = vand.u32 2147483647, %v4137_v24  ;;  %v4160_v57 = vmul.f32 0.5, %v551_v18  ;;  %v4162_v59 = vmul.f32 0.5, %v1494_v16 }
  0x1c   : > { %v1621_v32 = vmul.f32 0.3275911, %v1589_v26  ;;  %v2005_v33 = vsub.f32 0.0, %v1589_v26  ;;  %v1622_v34 = vmul.f32 0.3275911, %v1590_v27  ;;  %v2006_v35 = vsub.f32 0.0, %v1590_v27 }
  0x1d   : > { %v679_v36 = vmul.f32 0.3275911, %v647_v29  ;;  %v1063_v37 = vsub.f32 0.0, %v647_v29  ;;  %v680_v43 = vmul.f32 0.3275911, %v648_v30  ;;  %v1064_v44 = vsub.f32 0.0, %v648_v30 }
  0x1e   : > { %v1653_v41 = vadd.f32 1.0, %v1621_v32  ;;  %v2037_v42 = vmul.f32 %v2005_v33, %v1589_v26  ;;  %v1654_v47 = vadd.f32 1.0, %v1622_v34  ;;  %v2038_v48 = vmul.f32 %v2006_v35, %v1590_v27 }
  0x1f   : > { %v711_v45 = vadd.f32 1.0, %v679_v36  ;;  %v1095_v46 = vmul.f32 %v1063_v37, %v647_v29  ;;  %v712_v53 = vadd.f32 1.0, %v680_v43  ;;  %v1096_v54 = vmul.f32 %v1064_v44, %v648_v30 }
  0x20   : > { %3721 = vrcp.f32 %v1653_v41  ;;  %v2069_v51 = vmul.f32 1.442695, %v2037_v42  ;;  %v1591_v60 = vand.u32 2147483647, %v4154_v52  ;;  %v2071_v61 = vmul.f32 1.442695, %v2038_v48 }
  0x21   : > { %3723 = vrcp.f32 %v711_v45  ;;  %v1127_v58 = vmul.f32 1.442695, %v1095_v46  ;;  %v649_v62 = vand.u32 2147483647, %v4157_v55  ;;  %v4169_v5 = vmul.f32 0.70710677, %v1496_v56 }
  0x22   : > { %3725 = vrcp.f32 %v1654_v47  ;;  %v1623_v0 = vmul.f32 0.3275911, %v1591_v60  ;;  %v2007_v1 = vsub.f32 0.0, %v1591_v60  ;;  %v1129_v7 = vmul.f32 1.442695, %v1096_v54 }
  0x23   : > { %3727 = vpow2.f32 %v2069_v51  ;;  %v681_v8 = vmul.f32 0.3275911, %v649_v62  ;;  %v1065_v9 = vsub.f32 0.0, %v649_v62  ;;  %v1592_v12 = vand.u32 2147483647, %v4169_v5 }
  0x24   : > { %3729 = vrcp.f32 %v712_v53  ;;  %v1655_v10 = vadd.f32 1.0, %v1623_v0  ;;  %v2039_v11 = vmul.f32 %v2007_v1, %v1591_v60  ;;  %v4173_v15 = vmul.f32 0.70710677, %v4167_v63  ;;  %v1420_v60 = vld [vmem:[%s4090_s15 + $0x28] sm:$0xff] }
  0x25   : > { %3731 = vpow2.f32 %v1127_v58  ;;  %v713_v13 = vadd.f32 1.0, %v681_v8  ;;  %v1097_v14 = vmul.f32 %v1065_v9, %v649_v62  ;;  %v1624_v17 = vmul.f32 0.3275911, %v1592_v12 }
  0x26   : > { %3733 = vpow2.f32 %v2071_v61  ;;  %v2073_v16 = vmul.f32 1.442695, %v2039_v11  ;;  %v2008_v18 = vsub.f32 0.0, %v1592_v12  ;;  %v4178_v25 = vmul.f32 0.5, %v4127_v19  ;;  %v477_v19 = vld [vmem:[%s4107_s24 + $0x20] sm:$0xff] }
  0x27   : > { %3735 = vrcp.f32 %v1655_v10  ;;  %v4180_v26 = vmul.f32 0.5, %v1495_v31  ;;  %v650_v27 = vand.u32 2147483647, %v4173_v15  ;;  %v1656_v32 = vadd.f32 1.0, %v1624_v17 }
  0x28   : > { %3737 = vrcp.f32 %v713_v13  ;;  %v2040_v33 = vmul.f32 %v2008_v18, %v1592_v12  ;;  %v1131_v31 = vmul.f32 1.442695, %v1097_v14  ;;  %v4197_v48 = vadd.f32 %v4095_v3, %v1458_v39 }
  0x29   : > { %3739 = vpow2.f32 %v1129_v7  ;;  %v682_v35 = vmul.f32 0.3275911, %v650_v27  ;;  %v1066_v36 = vsub.f32 0.0, %v650_v27  ;;  %v516_v49 = vmul.f32 %v4100_v4, %v477_v19 }
  0x2a   : > { %v4175_v20 = vpop.eup %3721  ;;  %3741 = vpow2.f32 %v2073_v16  ;;  %v2075_v42 = vmul.f32 1.442695, %v2040_v33  ;;  %v4204_v54 = vmul.f32 0.5, %v4147_v38  ;;  %v4206_v58 = vmul.f32 0.5, %v1496_v56 }
  0x2b   : > { %v4184_v29 = vpop.eup %3723  ;;  %v1717_v30 = vmul.f32 1.0614054, %v4175_v20  ;;  %3743 = vrcp.f32 %v1656_v32  ;;  %v714_v43 = vadd.f32 1.0, %v682_v35  ;;  %v1098_v44 = vmul.f32 %v1066_v36, %v650_v27 }
  0x2c   : > { %v775_v34 = vmul.f32 1.0614054, %v4184_v29  ;;  %v4190_v40 = vpop.eup %3725  ;;  %v4215_v10 = vmul.f32 0.70710677, %v4197_v48  ;;  %v4222_v13 = vadd.f32 %v4112_v6, %v516_v49  ;;  %v4232_v27 = vmul.f32 %v4084_v2, %v1420_v60 }
  0x2d   : > { %v1749_v37 = vadd.f32 -1.4531521, %v1717_v30  ;;  %v4192_v45 = vpop.eup %3727  ;;  %v1718_v47 = vmul.f32 1.0614054, %v4190_v40  ;;  %3745 = vrcp.f32 %v714_v43  ;;  %v1133_v9 = vmul.f32 1.442695, %v1098_v44 }
  0x2e   : > { %v807_v41 = vadd.f32 -1.4531521, %v775_v34  ;;  %v4200_v51 = vpop.eup %3729  ;;  %3747 = vpow2.f32 %v1131_v31  ;;  %v4229_v18 = vand.u32 2147483647, %v4215_v10  ;;  %vm2197_vm0 = vcmp.ge.f32.partialorder %v4130_v21, 0.0 }
  0x2f   : > { %v1781_v46 = vmul.f32 %v4175_v20, %v1749_v37  ;;  %v4209_v61 = vpop.eup %3731  ;;  %v1750_v0 = vadd.f32 -1.4531521, %v1718_v47  ;;  %v776_v1 = vmul.f32 1.0614054, %v4200_v51  ;;  %3749 = vpow2.f32 %v2075_v42 }
  0x30   : > { %v839_v53 = vmul.f32 %v4184_v29, %v807_v41  ;;  %v4212_v7 = vpop.eup %3733  ;;  %3751 = vpow2.f32 %v1133_v9  ;;  %v1625_v37 = vmul.f32 0.3275911, %v4229_v18  ;;  %vm1255_vm1 = vcmp.ge.f32.partialorder %v4134_v23, 0.0 }
  0x31   : > { %v1813_v62 = vadd.f32 1.4214138, %v1781_v46  ;;  %v4217_v38 = vpop.eup %3735  ;;  %v1782_v11 = vmul.f32 %v4190_v40, %v1750_v0  ;;  %v808_v12 = vadd.f32 -1.4531521, %v776_v1  ;;  %vm2198_vm2 = vcmp.ge.f32.partialorder %v4132_v22, 0.0 }
  0x32   : > { %v871_v8 = vadd.f32 1.4214138, %v839_v53  ;;  %v4224_v14 = vpop.eup %3737  ;;  %v1719_v17 = vmul.f32 1.0614054, %v4217_v38  ;;  %v1657_v49 = vadd.f32 1.0, %v1625_v37  ;;  %vm1256_vm4 = vcmp.ge.f32.partialorder %v4137_v24, 0.0 }
  0x33   : > { %v1845_v56 = vmul.f32 %v4175_v20, %v1813_v62  ;;  %v4234_v28 = vpop.eup %3739  ;;  %v1814_v32 = vadd.f32 1.4214138, %v1782_v11  ;;  %v840_v33 = vmul.f32 %v4200_v51, %v808_v12  ;;  %v777_v34 = vmul.f32 1.0614054, %v4224_v14 }
  0x34   : > { %v903_v16 = vmul.f32 %v4184_v29, %v871_v8  ;;  %v4238_v35 = vpop.eup %3741  ;;  %v1751_v19 = vadd.f32 -1.4531521, %v1719_v17  ;;  %3753 = vrcp.f32 %v1657_v49  ;;  %vm2199_vm5 = vcmp.ge.f32.partialorder %v4154_v52, 0.0  ;;  %v478_v52 = vld [vmem:[%s4107_s24 + $0x28] sm:$0xff] }
  0x35   : > { %v1877_v30 = vadd.f32 -0.28449672, %v1845_v56  ;;  %v4241_v31 = vpop.eup %3743  ;;  %v1846_v41 = vmul.f32 %v4190_v40, %v1814_v32  ;;  %v872_v42 = vadd.f32 1.4214138, %v840_v33  ;;  %v809_v43 = vadd.f32 -1.4531521, %v777_v34 }
  0x36   : > { %v935_v36 = vadd.f32 -0.28449672, %v903_v16  ;;  %v1783_v46 = vmul.f32 %v4217_v38, %v1751_v19  ;;  %v1720_v47 = vmul.f32 1.0614054, %v4241_v31  ;;  %vm1257_vm6 = vcmp.ge.f32.partialorder %v4157_v55, 0.0 }
  0x37   : > { %v1909_v39 = vmul.f32 %v4175_v20, %v1877_v30  ;;  %v1878_v60 = vadd.f32 -0.28449672, %v1846_v41  ;;  %v904_v62 = vmul.f32 %v4200_v51, %v872_v42  ;;  %v841_v0 = vmul.f32 %v4224_v14, %v809_v43  ;;  %v4252_v1 = vpop.eup %3745 }
  0x38   : > { %v967_v44 = vmul.f32 %v4184_v29, %v935_v36  ;;  %v1815_v9 = vadd.f32 1.4214138, %v1783_v46  ;;  %v1752_v56 = vadd.f32 -1.4531521, %v1720_v47  ;;  %v3748_v11 = vpop.eup %3747  ;;  %v778_v19 = vmul.f32 1.0614054, %v4252_v1 }
  0x39   : > { %v1941_v53 = vadd.f32 0.2548296, %v1909_v39  ;;  %v1910_v16 = vmul.f32 %v4190_v40, %v1878_v60  ;;  %v936_v17 = vadd.f32 -0.28449672, %v904_v62  ;;  %v873_v30 = vadd.f32 1.4214138, %v841_v0  ;;  %v4256_v32 = vpop.eup %3749 }
  0x3a   : > { %v999_v8 = vadd.f32 0.2548296, %v967_v44  ;;  %v1847_v34 = vmul.f32 %v4217_v38, %v1815_v9  ;;  %v1784_v36 = vmul.f32 %v4241_v31, %v1752_v56  ;;  %v810_v44 = vadd.f32 -1.4531521, %v778_v19  ;;  %v4269_v60 = vpop.eup %3751 }
  0x3b   : > { %v1973_v12 = vmul.f32 %v4175_v20, %v1941_v53  ;;  %v1942_v20 = vadd.f32 0.2548296, %v1910_v16  ;;  %v968_v39 = vmul.f32 %v4200_v51, %v936_v17  ;;  %v905_v41 = vmul.f32 %v4224_v14, %v873_v30 }
  0x3c   : > { %v1031_v33 = vmul.f32 %v4184_v29, %v999_v8  ;;  %v1879_v29 = vadd.f32 -0.28449672, %v1847_v34  ;;  %v1816_v43 = vadd.f32 1.4214138, %v1784_v36  ;;  %v842_v8 = vmul.f32 %v4252_v1, %v810_v44 }
  0x3d   : > { %v2133_v37 = vmul.f32 %v4192_v45, %v1973_v12  ;;  %v1974_v47 = vmul.f32 %v4190_v40, %v1942_v20  ;;  %v1000_v49 = vadd.f32 0.2548296, %v968_v39  ;;  %v937_v53 = vadd.f32 -0.28449672, %v905_v41 }
  0x3e   : > { %v1191_v42 = vmul.f32 %v4209_v61, %v1031_v33  ;;  %v1911_v62 = vmul.f32 %v4217_v38, %v1879_v29  ;;  %v1848_v0 = vmul.f32 %v4241_v31, %v1816_v43  ;;  %v2009_v30 = vsub.f32 0.0, %v4229_v18 }
  0x3f   : > { %v2165_v46 = vsub.f32 1.0, %v2133_v37  ;;  %v2134_v9 = vmul.f32 %v4212_v7, %v1974_v47  ;;  %v1032_v56 = vmul.f32 %v4200_v51, %v1000_v49  ;;  %v969_v40 = vmul.f32 %v4224_v14, %v937_v53  ;;  %v4283_v51 = vpop.eup %3753 }
  0x40   : > { %v1223_v45 = vsub.f32 1.0, %v1191_v42  ;;  %v1943_v16 = vadd.f32 0.2548296, %v1911_v62  ;;  %v1880_v17 = vadd.f32 -0.28449672, %v1848_v0  ;;  %vm2200_vm7 = vcmp.ge.f32.partialorder %v4169_v5, 0.0 }
  0x41   : > { %v2229_v61 = vsub.f32 0.0, %v2165_v46  ;;  %v2166_v34 = vsub.f32 1.0, %v2134_v9  ;;  %v1192_v7 = vmul.f32 %v4234_v28, %v1032_v56  ;;  %v1001_v36 = vadd.f32 0.2548296, %v969_v40 }
  0x42   : > { %v1287_v12 = vsub.f32 0.0, %v1223_v45  ;;  %v1975_v20 = vmul.f32 %v4217_v38, %v1943_v16  ;;  %v1912_v39 = vmul.f32 %v4241_v31, %v1880_v17  ;;  %v874_v43 = vadd.f32 1.4214138, %v842_v8 }
  0x43   : > { %v2261_v33 = vsel %vm2197_vm0, %v2165_v46, %v2229_v61  ;;  %v2230_v41 = vsub.f32 0.0, %v2166_v34  ;;  %v1224_v28 = vsub.f32 1.0, %v1192_v7  ;;  %v1033_v42 = vmul.f32 %v4224_v14, %v1001_v36 }
  0x44   : > { %v2293_v19 = vadd.f32 1.0, %v2261_v33  ;;  %v1319_v37 = vsel %vm1255_vm1, %v1223_v45, %v1287_v12  ;;  %v2135_v29 = vmul.f32 %v4238_v35, %v1975_v20  ;;  %v1944_v38 = vadd.f32 0.2548296, %v1912_v39 }
  0x45   : > { %v1351_v21 = vadd.f32 1.0, %v1319_v37  ;;  %v2262_v46 = vsel %vm2198_vm2, %v2166_v34, %v2230_v41  ;;  %v1288_v47 = vsub.f32 0.0, %v1224_v28  ;;  %v1193_v49 = vmul.f32 %v3748_v11, %v1033_v42 }
  0x46   : > { %v2325_v23 = vmul.f32 %v2293_v19, %v4152_v50  ;;  %v2294_v14 = vadd.f32 1.0, %v2262_v46  ;;  %v2167_v53 = vsub.f32 1.0, %v2135_v29  ;;  %v1976_v50 = vmul.f32 %v4241_v31, %v1944_v38 }
  0x47   : > { %v1383_v44 = vmul.f32 %v1351_v21, %v4160_v57  ;;  %v906_v35 = vmul.f32 %v4252_v1, %v874_v43  ;;  %v1320_v57 = vsel %vm1256_vm4, %v1224_v28, %v1288_v47  ;;  %v1225_v22 = vsub.f32 1.0, %v1193_v49  ;;  %v1421_v28 = vld [vmem:[%s4090_s15 + $0x30] sm:$0xff] }
  0x48   : > { %2358 = vst.msk [vmem:[%s4293_s30] sm:$0xff] %vm2357_vm3, %v2325_v23  ;;  %3583 = vmatprep.mubr.msk.f32.mxu1 %vm2357_vm3, %v2325_v23  ;;  %v1721_v45 = vmul.f32 1.0614054, %v4283_v51  ;;  %v2041_v11 = vmul.f32 %v2009_v30, %v4229_v18  ;;  %v2326_v62 = vmul.f32 %v2294_v14, %v4162_v59  ;;  %v1352_v0 = vadd.f32 1.0, %v1320_v57 }
  0x49   : > { %3633 = vmatprep.mubr.msk.f32.mxu0 %vm2357_vm3, %v1383_v44  ;;  %v2231_v8 = vsub.f32 0.0, %v2167_v53  ;;  %v2136_v61 = vmul.f32 %v4256_v32, %v1976_v50  ;;  %v1289_v9 = vsub.f32 0.0, %v1225_v22  ;;  %v938_v31 = vadd.f32 -0.28449672, %v906_v35 }
  0x4a   : > { %v1753_v56 = vadd.f32 -1.4531521, %v1721_v45  ;;  %v4316_v40 = vadd.f32 %v4095_v3, %v4232_v27  ;;  %2359 = vst.msk [vmem:[%s4293_s30 + $0x8] sm:$0xff] %vm2357_vm3, %v2326_v62  ;;  %3584 = vmatmul.mubr.msk.f32.vlgmr.msra.gmra.mrb[0].mxu1 %vm2357_vm3, %v2326_v62  ;;  %v1384_v24 = vmul.f32 %v1352_v0, %v4178_v25  ;;  %v2077_v12 = vmul.f32 1.442695, %v2041_v11  ;;  %v1422_v0 = vld [vmem:[%s4090_s15 + $0x38] sm:$0xff] }
  0x4b   : > { %v2263_v59 = vsel %vm2199_vm5, %v2167_v53, %v2231_v8  ;;  %v2168_v18 = vsub.f32 1.0, %v2136_v61  ;;  %v1321_v16 = vsel %vm1257_vm6, %v1225_v22, %v1289_v9  ;;  %v970_v27 = vmul.f32 %v4252_v1, %v938_v31 }
  0x4c   : > { %v2295_v32 = vadd.f32 1.0, %v2263_v59  ;;  %v1785_v17 = vmul.f32 %v4283_v51, %v1753_v56  ;;  %3634 = vmatmul.mubr.msk.f32.vlgmr.msra.gmra.mrb[0].mxu0 %vm2357_vm3, %v1384_v24  ;;  %v1353_v30 = vadd.f32 1.0, %v1321_v16  ;;  %3755 = vpow2.f32 %v2077_v12 }
  0x4d   : > { %v2232_v33 = vsub.f32 0.0, %v2168_v18  ;;  %v4330_v25 = vmul.f32 0.70710677, %v4222_v13  ;;  %v1002_v7 = vadd.f32 0.2548296, %v970_v27  ;;  %v517_v5 = vmul.f32 %v4100_v4, %v478_v52 }
  0x4e   : > { %v2327_v34 = vmul.f32 %v2295_v32, %v4180_v26  ;;  %v1817_v55 = vadd.f32 1.4214138, %v1785_v17  ;;  %v4335_v36 = vmul.f32 0.70710677, %v4316_v40  ;;  %v1385_v19 = vmul.f32 %v1353_v30, %v4204_v54 }
  0x4f   : > { %v2264_v37 = vsel %vm2200_vm7, %v2168_v18, %v2232_v33  ;;  %v651_v20 = vand.u32 2147483647, %v4330_v25  ;;  %v1034_v26 = vmul.f32 %v4252_v1, %v1002_v7  ;;  %v4353_v1 = vadd.f32 %v4112_v6, %v517_v5 }
  0x50   : > { %2360 = vst.msk [vmem:[%s4293_s30 + $0x10] sm:$0xff] %vm2357_vm3, %v2327_v34  ;;  %3586 = vmatprep.mubr.msk.f32.mxu1 %vm2357_vm3, %v2327_v34  ;;  %v2296_v39 = vadd.f32 1.0, %v2264_v37  ;;  %v1849_v21 = vmul.f32 %v4283_v51, %v1817_v55  ;;  %v1594_v41 = vand.u32 2147483647, %v4335_v36  ;;  %3636 = vmatprep.mubr.msk.f32.mxu0 %vm2357_vm3, %v1385_v19  ;;  %v1460_v49 = vmul.f32 %v4084_v2, %v1421_v28 }
  0x51   : > { %v683_v54 = vmul.f32 0.3275911, %v651_v20  ;;  %v1194_v23 = vmul.f32 %v4269_v60, %v1034_v26  ;;  %vm1258_vm8 = vcmp.ge.f32.partialorder %v4173_v15, 0.0  ;;  %v1067_v60 = vsub.f32 0.0, %v651_v20 }
  0x52   : > { %v2328_v42 = vmul.f32 %v2296_v39, %v4206_v58  ;;  %v1881_v29 = vadd.f32 -0.28449672, %v1849_v21  ;;  %v1626_v38 = vmul.f32 0.3275911, %v1594_v41  ;;  %v479_v58 = vld [vmem:[%s4107_s24 + $0x30] sm:$0xff]  ;;  %v586_v57 = vmul.f32 0.5, %v4167_v63 }
  0x53   : > { %v715_v43 = vadd.f32 1.0, %v683_v54  ;;  %v1226_v44 = vsub.f32 1.0, %v1194_v23  ;;  %v4363_v50 = vmul.f32 0.70710677, %v4353_v1  ;;  %v4367_v22 = vadd.f32 %v4095_v3, %v1460_v49 }
  0x54   : > { %2361 = vst.msk [vmem:[%s4293_s30 + $0x18] sm:$0xff] %vm2357_vm3, %v2328_v42  ;;  %3587 = vmatmul.mubr.msk.f32.gmra.mrb[2].mxu1 %vm2357_vm3, %v2328_v42  ;;  %v1913_v46 = vmul.f32 %v4283_v51, %v1881_v29  ;;  %v1658_v47 = vadd.f32 1.0, %v1626_v38  ;;  %v518_v45 = vmul.f32 %v4100_v4, %v479_v58  ;;  %v2010_v61 = vsub.f32 0.0, %v1594_v41 }
  0x55   : > { %3757 = vrcp.f32 %v715_v43  ;;  %v1290_v14 = vsub.f32 0.0, %v1226_v44  ;;  %v652_v62 = vand.u32 2147483647, %v4363_v50  ;;  %v4374_v9 = vmul.f32 0.70710677, %v4367_v22 }
  0x56   : > { %v1945_v53 = vadd.f32 0.2548296, %v1913_v46  ;;  %3759 = vrcp.f32 %v1658_v47  ;;  %v3756_v35 = vpop.eup %3755  ;;  %v1099_v56 = vmul.f32 %v1067_v60, %v651_v20  ;;  %v4377_v24 = vadd.f32 %v4112_v6, %v518_v45  ;;  %v1423_v46 = vld [vmem:[%s4090_s15 + $0x40] sm:$0xff] }
  0x57   : > { %v1322_v11 = vsel %vm1258_vm8, %v1226_v44, %v1290_v14  ;;  %v684_v63 = vmul.f32 0.3275911, %v652_v62  ;;  %v1595_v18 = vand.u32 2147483647, %v4374_v9  ;;  %v1461_v12 = vmul.f32 %v4084_v2, %v1422_v0 }
  0x58   : > { %v1977_v15 = vmul.f32 %v4283_v51, %v1945_v53  ;;  %v1354_v8 = vadd.f32 1.0, %v1322_v11  ;;  %v480_v51 = vld [vmem:[%s4107_s24 + $0x38] sm:$0xff]  ;;  %v1529_v32 = vmul.f32 0.5, %v4197_v48  ;;  %vm2201_vm9 = vcmp.ge.f32.partialorder %v4215_v10, 0.0 }
  0x59   : > { %v716_v27 = vadd.f32 1.0, %v684_v63  ;;  %v2042_v17 = vmul.f32 %v2010_v61, %v1594_v41  ;;  %v1627_v30 = vmul.f32 0.3275911, %v1595_v18  ;;  %v4386_v33 = vmul.f32 0.70710677, %v4377_v24 }
  0x5a   : > { %v2137_v31 = vmul.f32 %v3756_v35, %v1977_v15  ;;  %v1386_v59 = vmul.f32 %v1354_v8, %v586_v57  ;;  %v1135_v34 = vmul.f32 1.442695, %v1099_v56  ;;  %v519_v7 = vmul.f32 %v4100_v4, %v480_v51 }
  0x5b   : > { %3761 = vrcp.f32 %v716_v27  ;;  %v4392_v48 = vmul.f32 0.5, %v4222_v13  ;;  %v1659_v19 = vadd.f32 1.0, %v1627_v30  ;;  %v653_v37 = vand.u32 2147483647, %v4386_v33 }
  0x5c   : > { %v2169_v16 = vsub.f32 1.0, %v2137_v31  ;;  %3637 = vmatmul.mubr.msk.f32.gmra.mrb[2].mxu0 %vm2357_vm3, %v1386_v59  ;;  %v4396_v10 = vadd.f32 %v4095_v3, %v1461_v12  ;;  %v1068_v21 = vsub.f32 0.0, %v652_v62  ;;  %v2011_v41 = vsub.f32 0.0, %v1595_v18 }
  0x5d   : > { %v2079_v13 = vmul.f32 1.442695, %v2042_v17  ;;  %3763 = vrcp.f32 %v1659_v19  ;;  %v685_v42 = vmul.f32 0.3275911, %v653_v37  ;;  %v4403_v23 = vadd.f32 %v4112_v6, %v519_v7 }
  0x5e   : > { %v2233_v52 = vsub.f32 0.0, %v2169_v16  ;;  %3765 = vpow2.f32 %v1135_v34  ;;  %v1069_v43 = vsub.f32 0.0, %v653_v37  ;;  %v4406_v44 = vmul.f32 0.70710677, %v4396_v10 }
  0x5f   : > { %v4389_v55 = vpop.eup %3757  ;;  %v1100_v49 = vmul.f32 %v1068_v21, %v652_v62  ;;  %v2043_v58 = vmul.f32 %v2011_v41, %v1595_v18  ;;  %v717_v60 = vadd.f32 1.0, %v685_v42  ;;  %3767 = vpow2.f32 %v2079_v13 }
  0x60   : > { %v4398_v20 = vpop.eup %3759  ;;  %v2265_v39 = vsel %vm2201_vm9, %v2169_v16, %v2233_v52  ;;  %v779_v26 = vmul.f32 1.0614054, %v4389_v55  ;;  %v1596_v53 = vand.u32 2147483647, %v4406_v44  ;;  %v4416_v35 = vmul.f32 0.70710677, %v4403_v23 }
  0x61   : > { %v2297_v54 = vadd.f32 1.0, %v2265_v39  ;;  %v1722_v5 = vmul.f32 1.0614054, %v4398_v20  ;;  %v4419_v45 = vmul.f32 0.5, %v4316_v40  ;;  %3769 = vrcp.f32 %v717_v60 }
  0x62   : > { %v811_v28 = vadd.f32 -1.4531521, %v779_v26  ;;  %v1462_v11 = vmul.f32 %v4084_v2, %v1423_v46  ;;  %v4423_v62 = vmul.f32 0.5, %v4353_v1  ;;  %v1101_v0 = vmul.f32 %v1069_v43, %v653_v37 }
  0x63   : > { %v2329_v29 = vmul.f32 %v2297_v54, %v1529_v32  ;;  %v1754_v38 = vadd.f32 -1.4531521, %v1722_v5  ;;  %v1628_v8 = vmul.f32 0.3275911, %v1596_v53  ;;  %v1137_v56 = vmul.f32 1.442695, %v1100_v49 }
  0x64   : > { %v843_v47 = vmul.f32 %v4389_v55, %v811_v28  ;;  %v2081_v63 = vmul.f32 1.442695, %v2043_v58  ;;  %v654_v59 = vand.u32 2147483647, %v4416_v35  ;;  %v4432_v51 = vadd.f32 %v4095_v3, %v1462_v11  ;;  %v481_v28 = vld [vmem:[%s4107_s24 + $0x40] sm:$0xff] }
  0x65   : > { %2362 = vst.msk [vmem:[%s4293_s30 + $0x20] sm:$0xff] %vm2357_vm3, %v2329_v29  ;;  %3589 = vmatprep.mubr.msk.f32.mxu1 %vm2357_vm3, %v2329_v29  ;;  %v1786_v14 = vmul.f32 %v4398_v20, %v1754_v38  ;;  %v4425_v61 = vpop.eup %3761  ;;  %v1660_v12 = vadd.f32 1.0, %v1628_v8  ;;  %v4435_v32 = vmul.f32 0.5, %v4367_v22  ;;  %v2012_v16 = vsub.f32 0.0, %v1596_v53 }
  0x66   : > { %v875_v57 = vadd.f32 1.4214138, %v843_v47  ;;  %v780_v18 = vmul.f32 1.0614054, %v4425_v61  ;;  %v686_v27 = vmul.f32 0.3275911, %v654_v59  ;;  %v520_v8 = vmul.f32 %v4100_v4, %v481_v28 }
  0x67   : > { %v1818_v15 = vadd.f32 1.4214138, %v1786_v14  ;;  %v4437_v17 = vpop.eup %3763  ;;  %v1139_v34 = vmul.f32 1.442695, %v1101_v0  ;;  %3771 = vrcp.f32 %v1660_v12  ;;  %v1070_v26 = vsub.f32 0.0, %v654_v59  ;;  %v1424_v28 = vld [vmem:[%s4090_s15 + $0x48] sm:$0xff] }
  0x68   : > { %v907_v31 = vmul.f32 %v4389_v55, %v875_v57  ;;  %v812_v52 = vadd.f32 -1.4531521, %v780_v18  ;;  %v3766_v7 = vpop.eup %3765  ;;  %v1723_v37 = vmul.f32 1.0614054, %v4437_v17  ;;  %v718_v39 = vadd.f32 1.0, %v686_v27 }
  0x69   : > { %v1850_v40 = vmul.f32 %v4398_v20, %v1818_v15  ;;  %vm1259_vm10 = vcmp.ge.f32.partialorder %v4330_v25, 0.0  ;;  %3773 = vpow2.f32 %v1137_v56  ;;  %v4445_v41 = vmul.f32 0.70710677, %v4432_v51  ;;  %v3768_v42 = vpop.eup %3767 }
  0x6a   : > { %v939_v1 = vadd.f32 -0.28449672, %v907_v31  ;;  %v844_v21 = vmul.f32 %v4425_v61, %v812_v52  ;;  %vm2202_vm11 = vcmp.ge.f32.partialorder %v4335_v36, 0.0  ;;  %v1755_v5 = vadd.f32 -1.4531521, %v1723_v37 }
  0x6b   : > { %v1882_v30 = vadd.f32 -0.28449672, %v1850_v40  ;;  %v2044_v13 = vmul.f32 %v2012_v16, %v1596_v53  ;;  %3775 = vrcp.f32 %v718_v39  ;;  %v1597_v43 = vand.u32 2147483647, %v4445_v41  ;;  %v4450_v46 = vpop.eup %3769 }
  0x6c   : > { %v971_v19 = vmul.f32 %v4389_v55, %v939_v1  ;;  %v876_v38 = vadd.f32 1.4214138, %v844_v21  ;;  %3777 = vpow2.f32 %v2081_v63  ;;  %v1787_v49 = vmul.f32 %v4437_v17, %v1755_v5 }
  0x6d   : > { %v1914_v22 = vmul.f32 %v4398_v20, %v1882_v30  ;;  %3779 = vpow2.f32 %v1139_v34  ;;  %v1102_v58 = vmul.f32 %v1070_v26, %v654_v59  ;;  %v781_v53 = vmul.f32 1.0614054, %v4450_v46 }
  0x6e   : > { %v1003_v54 = vadd.f32 0.2548296, %v971_v19  ;;  %v908_v14 = vmul.f32 %v4425_v61, %v876_v38  ;;  %v1629_v57 = vmul.f32 0.3275911, %v1597_v43  ;;  %v1819_v15 = vadd.f32 1.4214138, %v1787_v49 }
  0x6f   : > { %v1946_v29 = vadd.f32 0.2548296, %v1914_v22  ;;  %v2083_v0 = vmul.f32 1.442695, %v2044_v13  ;;  %v813_v63 = vadd.f32 -1.4531521, %v781_v53  ;;  %v4466_v26 = vadd.f32 %v4112_v6, %v520_v8 }
  0x70   : > { %v1035_v47 = vmul.f32 %v4389_v55, %v1003_v54  ;;  %v940_v56 = vadd.f32 -0.28449672, %v908_v14  ;;  %v1661_v55 = vadd.f32 1.0, %v1629_v57  ;;  %v1851_v18 = vmul.f32 %v4437_v17, %v1819_v15 }
  0x71   : > { %v1978_v60 = vmul.f32 %v4398_v20, %v1946_v29  ;;  %v1141_v59 = vmul.f32 1.442695, %v1102_v58  ;;  %v2013_v12 = vsub.f32 0.0, %v1597_v43  ;;  %v4459_v20 = vpop.eup %3771  ;;  %v845_v27 = vmul.f32 %v4450_v46, %v813_v63 }
  0x72   : > { %v1195_v11 = vmul.f32 %v3766_v7, %v1035_v47  ;;  %v972_v16 = vmul.f32 %v4425_v61, %v940_v56  ;;  %3781 = vrcp.f32 %v1661_v55  ;;  %vm1260_vm12 = vcmp.ge.f32.partialorder %v4363_v50, 0.0 }
  0x73   : > { %v2138_v31 = vmul.f32 %v3768_v42, %v1978_v60  ;;  %v1883_v52 = vadd.f32 -0.28449672, %v1851_v18  ;;  %v1724_v34 = vmul.f32 1.0614054, %v4459_v20  ;;  %3783 = vpow2.f32 %v2083_v0  ;;  %v3774_v7 = vpop.eup %3773 }
  0x74   : > { %v1227_v40 = vsub.f32 1.0, %v1195_v11  ;;  %v1004_v37 = vadd.f32 0.2548296, %v972_v16  ;;  %v877_v39 = vadd.f32 1.4214138, %v845_v27  ;;  %v2045_v13 = vmul.f32 %v2013_v12, %v1597_v43 }
  0x75   : > { %v2170_v1 = vsub.f32 1.0, %v2138_v31  ;;  %v4468_v22 = vpop.eup %3775  ;;  %v1915_v54 = vmul.f32 %v4437_v17, %v1883_v52  ;;  %v1756_v5 = vadd.f32 -1.4531521, %v1724_v34  ;;  %vm2203_vm13 = vcmp.ge.f32.partialorder %v4374_v9, 0.0  ;;  %v482_v31 = vld [vmem:[%s4107_s24 + $0x48] sm:$0xff] }
  0x76   : > { %v1291_v30 = vsub.f32 0.0, %v1227_v40  ;;  %v3778_v42 = vpop.eup %3777  ;;  %v1036_v47 = vmul.f32 %v4425_v61, %v1004_v37  ;;  %v909_v49 = vmul.f32 %v4450_v46, %v877_v39  ;;  %v782_v43 = vmul.f32 1.0614054, %v4468_v22 }
  0x77   : > { %v2234_v19 = vsub.f32 0.0, %v2170_v1  ;;  %v3780_v58 = vpop.eup %3779  ;;  %v1947_v60 = vadd.f32 0.2548296, %v1915_v54  ;;  %v1788_v14 = vmul.f32 %v4459_v20, %v1756_v5  ;;  %v1463_v11 = vmul.f32 %v4084_v2, %v1424_v28 }
  0x78   : > { %v1323_v21 = vsel %vm1259_vm10, %v1227_v40, %v1291_v30  ;;  %v1196_v57 = vmul.f32 %v3774_v7, %v1036_v47  ;;  %v941_v36 = vadd.f32 -0.28449672, %v909_v49  ;;  %v814_v8 = vadd.f32 -1.4531521, %v782_v43 }
  0x79   : > { %v1355_v29 = vadd.f32 1.0, %v1323_v21  ;;  %v2266_v38 = vsel %vm2202_vm11, %v2170_v1, %v2234_v19  ;;  %v1979_v15 = vmul.f32 %v4437_v17, %v1947_v60  ;;  %v1820_v0 = vadd.f32 1.4214138, %v1788_v14 }
  0x7a   : > { %v2298_v25 = vadd.f32 1.0, %v2266_v38  ;;  %v1228_v56 = vsub.f32 1.0, %v1196_v57  ;;  %v973_v63 = vmul.f32 %v4450_v46, %v941_v36  ;;  %3785 = vpow2.f32 %v1141_v59 }
  0x7b   : > { %v1387_v53 = vmul.f32 %v1355_v29, %v4392_v48  ;;  %v4489_v55 = vmul.f32 0.70710677, %v4466_v26  ;;  %v2139_v2 = vmul.f32 %v3778_v42, %v1979_v15  ;;  %vm1261_vm14 = vcmp.ge.f32.partialorder %v4386_v33, 0.0 }
  0x7c   : > { %v2330_v61 = vmul.f32 %v2298_v25, %v4419_v45  ;;  %v1852_v48 = vmul.f32 %v4459_v20, %v1820_v0  ;;  %v846_v45 = vmul.f32 %v4468_v22, %v814_v8  ;;  %v2085_v17 = vmul.f32 1.442695, %v2045_v13  ;;  %v4497_v40 = vpop.eup %3781 }
  0x7d   : > { %3639 = vmatprep.mubr.msk.f32.mxu0 %vm2357_vm3, %v1387_v53  ;;  %v1292_v18 = vsub.f32 0.0, %v1228_v56  ;;  %v1005_v12 = vadd.f32 0.2548296, %v973_v63  ;;  %v655_v59 = vand.u32 2147483647, %v4489_v55  ;;  %v521_v1 = vmul.f32 %v4100_v4, %v482_v31  ;;  %v3784_v16 = vpop.eup %3783  ;;  %v1425_v31 = vld [vmem:[%s4090_s15 + $0x50] sm:$0xff] }
  0x7e   : > { %2363 = vst.msk [vmem:[%s4293_s30 + $0x28] sm:$0xff] %vm2357_vm3, %v2330_v61  ;;  %3590 = vmatmul.mubr.msk.f32.gmra.mrb[4].mxu1 %vm2357_vm3, %v2330_v61  ;;  %v2171_v27 = vsub.f32 1.0, %v2139_v2  ;;  %v1884_v30 = vadd.f32 -0.28449672, %v1852_v48  ;;  %v878_v52 = vadd.f32 1.4214138, %v846_v45  ;;  %v4502_v34 = vadd.f32 %v4095_v3, %v1463_v11 }
  0x7f   : > { %v1324_v7 = vsel %vm1260_vm12, %v1228_v56, %v1292_v18  ;;  %v1037_v19 = vmul.f32 %v4450_v46, %v1005_v12  ;;  %v1725_v37 = vmul.f32 1.0614054, %v4497_v40  ;;  %v687_v39 = vmul.f32 0.3275911, %v655_v59 }
  0x80   : > { %v1356_v21 = vadd.f32 1.0, %v1324_v7  ;;  %v2235_v54 = vsub.f32 0.0, %v2171_v27  ;;  %v1916_v5 = vmul.f32 %v4459_v20, %v1884_v30  ;;  %v910_v4 = vmul.f32 %v4468_v22, %v878_v52 }
  0x81   : > { %v1197_v13 = vmul.f32 %v3780_v58, %v1037_v19  ;;  %v1757_v28 = vadd.f32 -1.4531521, %v1725_v37  ;;  %v719_v42 = vadd.f32 1.0, %v687_v39  ;;  %v4511_v3 = vadd.f32 %v4112_v6, %v521_v1 }
  0x82   : > { %v1388_v50 = vmul.f32 %v1356_v21, %v4423_v62  ;;  %v2267_v46 = vsel %vm2203_vm13, %v2171_v27, %v2235_v54  ;;  %v1948_v29 = vadd.f32 0.2548296, %v1916_v5  ;;  %v942_v38 = vadd.f32 -0.28449672, %v910_v4 }
  0x83   : > { %v2299_v47 = vadd.f32 1.0, %v2267_v46  ;;  %v1229_v49 = vsub.f32 1.0, %v1197_v13  ;;  %v1789_v25 = vmul.f32 %v4497_v40, %v1757_v28  ;;  %3787 = vrcp.f32 %v719_v42  ;;  %v4557_v28 = vld [vmem:[%s6026_s5] ss:$0 sm:$0xff]  ;;  %v1426_v46 = vld [vmem:[%s4090_s15 + $0x58] sm:$0xff] }
  0x84   : > { %3640 = vmatmul.mubr.msk.f32.gmra.mrb[4].mxu0 %vm2357_vm3, %v1388_v50  ;;  %v1980_v58 = vmul.f32 %v4459_v20, %v1948_v29  ;;  %v974_v6 = vmul.f32 %v4468_v22, %v942_v38  ;;  %3789 = vpow2.f32 %v2085_v17  ;;  %v4521_v62 = vmul.f32 0.70710677, %v4502_v34  ;;  %v3786_v9 = vpop.eup %3785  ;;  %v483_v50 = vld [vmem:[%s4107_s24 + $0x50] sm:$0xff] }
  0x85   : > { %v2331_v60 = vmul.f32 %v2299_v47, %v4435_v32  ;;  %v1293_v14 = vsub.f32 0.0, %v1229_v49  ;;  %v1821_v43 = vadd.f32 1.4214138, %v1789_v25  ;;  %v1071_v53 = vsub.f32 0.0, %v655_v59 }
  0x86   : > { %v589_v57 = vmul.f32 0.5, %v4377_v24  ;;  %v2140_v36 = vmul.f32 %v3784_v16, %v1980_v58  ;;  %v1006_v11 = vadd.f32 0.2548296, %v974_v6  ;;  %v1598_v61 = vand.u32 2147483647, %v4521_v62 }
  0x87   : > { %2364 = vst.msk [vmem:[%s4293_s30 + $0x30] sm:$0xff] %vm2357_vm3, %v2331_v60  ;;  %3592 = vmatprep.mubr.msk.f32.mxu1 %vm2357_vm3, %v2331_v60  ;;  %v1325_v20 = vsel %vm1261_vm14, %v1229_v49, %v1293_v14  ;;  %v1853_v15 = vmul.f32 %v4497_v40, %v1821_v43  ;;  %v4533_v32 = vmul.f32 0.70710677, %v4511_v3  ;;  %vm2204_vm15 = vcmp.ge.f32.partialorder %v4406_v44, 0.0 }
  0x88   : > { %v1357_v0 = vadd.f32 1.0, %v1325_v20  ;;  %v2172_v8 = vsub.f32 1.0, %v2140_v36  ;;  %v1038_v24 = vmul.f32 %v4468_v22, %v1006_v11  ;;  %v1103_v63 = vmul.f32 %v1071_v53, %v655_v59  ;;  %v4544_v22 = vld [vmem:[%s6025_s4] ss:$0 sm:$0xff] }
  0x89   : > { %v1885_v56 = vadd.f32 -0.28449672, %v1853_v15  ;;  %v1630_v2 = vmul.f32 0.3275911, %v1598_v61  ;;  %v656_v33 = vand.u32 2147483647, %v4533_v32  ;;  %v1464_v44 = vmul.f32 %v4544_v22, %v1425_v31 }
  0x8a   : > { %v1389_v48 = vmul.f32 %v1357_v0, %v589_v57  ;;  %v2236_v45 = vsub.f32 0.0, %v2172_v8  ;;  %v1198_v17 = vmul.f32 %v3786_v9, %v1038_v24  ;;  %v1532_v18 = vmul.f32 0.5, %v4396_v10  ;;  %v4585_v57 = vld [vmem:[%s6024_s3] ss:$0 sm:$0xff]  ;;  %v484_v31 = vld [vmem:[%s4107_s24 + $0x58] sm:$0xff] }
  0x8b   : > { %v1917_v12 = vmul.f32 %v4497_v40, %v1885_v56  ;;  %v1662_v1 = vadd.f32 1.0, %v1630_v2  ;;  %vm1262_vm0 = vcmp.ge.f32.partialorder %v4416_v35, 0.0  ;;  %v688_v27 = vmul.f32 0.3275911, %v656_v33  ;;  %v4576_v35 = vld [vmem:[%s6023_s2] ss:$0 sm:$0xff] }
  0x8c   : > { %3642 = vmatprep.mubr.msk.f32.mxu0 %vm2357_vm3, %v1389_v48  ;;  %v2268_v59 = vsel %vm2204_vm15, %v2172_v8, %v2236_v45  ;;  %v1230_v16 = vsub.f32 1.0, %v1198_v17  ;;  %v1143_v7 = vmul.f32 1.442695, %v1103_v63  ;;  %v590_v37 = vmul.f32 0.5, %v4403_v23 }
  0x8d   : > { %v4549_v30 = vpop.eup %3787  ;;  %v2300_v10 = vadd.f32 1.0, %v2268_v59  ;;  %v1949_v52 = vadd.f32 0.2548296, %v1917_v12  ;;  %3791 = vrcp.f32 %v1662_v1  ;;  %v720_v54 = vadd.f32 1.0, %v688_v27 }
  0x8e   : > { %v3790_v19 = vpop.eup %3789  ;;  %v1294_v39 = vsub.f32 0.0, %v1230_v16  ;;  %v783_v21 = vmul.f32 1.0614054, %v4549_v30  ;;  %v2014_v13 = vsub.f32 0.0, %v1598_v61  ;;  %v4560_v42 = vadd.f32 %v4557_v28, %v1464_v44 }
  0x8f   : > { %v2332_v5 = vmul.f32 %v2300_v10, %v1532_v18  ;;  %v1981_v4 = vmul.f32 %v4497_v40, %v1949_v52  ;;  %3793 = vrcp.f32 %v720_v54  ;;  %v1072_v25 = vsub.f32 0.0, %v656_v33  ;;  %v1427_v52 = vld [vmem:[%s4090_s15 + $0x60] sm:$0xff] }
  0x90   : > { %v1326_v23 = vsel %vm1262_vm0, %v1230_v16, %v1294_v39  ;;  %v815_v29 = vadd.f32 -1.4531521, %v783_v21  ;;  %3795 = vpow2.f32 %v1143_v7  ;;  %v4570_v47 = vmul.f32 0.70710677, %v4560_v42 }
  0x91   : > { %2365 = vst.msk [vmem:[%s4293_s30 + $0x38] sm:$0xff] %vm2357_vm3, %v2332_v5  ;;  %3593 = vmatmul.mubr.msk.f32.gmra.mrb[6].mxu1 %vm2357_vm3, %v2332_v5  ;;  %v1358_v40 = vadd.f32 1.0, %v1326_v23  ;;  %v2141_v38 = vmul.f32 %v3790_v19, %v1981_v4  ;;  %v522_v58 = vmul.f32 %v4576_v35, %v483_v50  ;;  %v1465_v6 = vmul.f32 %v4544_v22, %v1426_v46 }
  0x92   : > { %v847_v49 = vmul.f32 %v4549_v30, %v815_v29  ;;  %v2046_v14 = vmul.f32 %v2014_v13, %v1598_v61  ;;  %v1599_v43 = vand.u32 2147483647, %v4570_v47  ;;  %vm2205_vm1 = vcmp.ge.f32.partialorder %v4445_v41, 0.0 }
  0x93   : > { %v1390_v9 = vmul.f32 %v1358_v40, %v590_v37  ;;  %v2173_v60 = vsub.f32 1.0, %v2141_v38  ;;  %v4588_v36 = vadd.f32 %v4585_v57, %v522_v58  ;;  %v4591_v11 = vadd.f32 %v4557_v28, %v1465_v6 }
  0x94   : > { %v879_v53 = vadd.f32 1.4214138, %v847_v49  ;;  %v1533_v61 = vmul.f32 0.5, %v4432_v51  ;;  %v1631_v15 = vmul.f32 0.3275911, %v1599_v43  ;;  %v4596_v41 = vmul.f32 0.5, %v4466_v26 }
  0x95   : > { %3643 = vmatmul.mubr.msk.f32.gmra.mrb[6].mxu0 %vm2357_vm3, %v1390_v9  ;;  %v2237_v20 = vsub.f32 0.0, %v2173_v60  ;;  %v1104_v8 = vmul.f32 %v1072_v25, %v656_v33  ;;  %v4600_v24 = vmul.f32 0.70710677, %v4588_v36  ;;  %v2087_v2 = vmul.f32 1.442695, %v2046_v14 }
  0x96   : > { %v911_v0 = vmul.f32 %v4549_v30, %v879_v53  ;;  %v1663_v48 = vadd.f32 1.0, %v1631_v15  ;;  %v4606_v51 = vmul.f32 0.70710677, %v4591_v11  ;;  %v2015_v18 = vsub.f32 0.0, %v1599_v43 }
  0x97   : > { %v4603_v56 = vpop.eup %3791  ;;  %v2269_v63 = vsel %vm2205_vm1, %v2173_v60, %v2237_v20  ;;  %v657_v33 = vand.u32 2147483647, %v4600_v24  ;;  %v523_v1 = vmul.f32 %v4576_v35, %v484_v31  ;;  %v1145_v10 = vmul.f32 1.442695, %v1104_v8 }
  0x98   : > { %v2301_v45 = vadd.f32 1.0, %v2269_v63  ;;  %v943_v17 = vadd.f32 -0.28449672, %v911_v0  ;;  %v1726_v26 = vmul.f32 1.0614054, %v4603_v56  ;;  %3797 = vrcp.f32 %v1663_v48 }
  0x99   : > { %v1600_v12 = vand.u32 2147483647, %v4606_v51  ;;  %v4612_v44 = vpop.eup %3793  ;;  %3799 = vpow2.f32 %v2087_v2  ;;  %v689_v37 = vmul.f32 0.3275911, %v657_v33  ;;  %v1073_v39 = vsub.f32 0.0, %v657_v33 }
  0x9a   : > { %v2333_v59 = vmul.f32 %v2301_v45, %v1533_v61  ;;  %v975_v16 = vmul.f32 %v4549_v30, %v943_v17  ;;  %v1758_v27 = vadd.f32 -1.4531521, %v1726_v26  ;;  %v3796_v7 = vpop.eup %3795  ;;  %v784_v19 = vmul.f32 1.0614054, %v4612_v44 }
  0x9b   : > { %v2047_v5 = vmul.f32 %v2015_v18, %v1599_v43  ;;  %v1632_v4 = vmul.f32 0.3275911, %v1600_v12  ;;  %v721_v50 = vadd.f32 1.0, %v689_v37  ;;  %v4622_v46 = vadd.f32 %v4585_v57, %v523_v1 }
  0x9c   : > { %2366 = vst.msk [vmem:[%s4293_s30 + $0x40] sm:$0xff] %vm2357_vm3, %v2333_v59  ;;  %3595 = vmatprep.mubr.msk.f32.mxu1 %vm2357_vm3, %v2333_v59  ;;  %v1007_v21 = vadd.f32 0.2548296, %v975_v16  ;;  %v1790_v54 = vmul.f32 %v4603_v56, %v1758_v27  ;;  %v816_v13 = vadd.f32 -1.4531521, %v784_v19  ;;  %v1466_v23 = vmul.f32 %v4544_v22, %v1427_v52 }
  0x9d   : > { %3801 = vpow2.f32 %v1145_v10  ;;  %v1664_v38 = vadd.f32 1.0, %v1632_v4  ;;  %vm1263_vm2 = vcmp.ge.f32.partialorder %v4489_v55, 0.0  ;;  %v1105_v25 = vmul.f32 %v1073_v39, %v657_v33 }
  0x9e   : > { %v1039_v29 = vmul.f32 %v4549_v30, %v1007_v21  ;;  %v1822_v40 = vadd.f32 1.4214138, %v1790_v54  ;;  %v848_v49 = vmul.f32 %v4612_v44, %v816_v13  ;;  %3803 = vrcp.f32 %v721_v50 }
  0x9f   : > { %v2089_v9 = vmul.f32 1.442695, %v2047_v5  ;;  %3805 = vrcp.f32 %v1664_v38  ;;  %v2016_v14 = vsub.f32 0.0, %v1600_v12  ;;  %v4630_v43 = vmul.f32 0.70710677, %v4622_v46 }
  0xa0   : > { %v1199_v58 = vmul.f32 %v3796_v7, %v1039_v29  ;;  %v1854_v6 = vmul.f32 %v4603_v56, %v1822_v40  ;;  %v880_v60 = vadd.f32 1.4214138, %v848_v49  ;;  %v4633_v30 = vadd.f32 %v4557_v28, %v1466_v23 }
  0xa1   : > { %v4636_v61 = vmul.f32 0.5, %v4502_v34  ;;  %v4639_v15 = vmul.f32 0.5, %v4511_v3  ;;  %v4645_v31 = vmul.f32 0.5, %v4560_v42  ;;  %v1147_v63 = vmul.f32 1.442695, %v1105_v25  ;;  %v485_v3 = vld [vmem:[%s4107_s24 + $0x60] sm:$0xff] }
  0xa2   : > { %v1231_v53 = vsub.f32 1.0, %v1199_v58  ;;  %v1886_v20 = vadd.f32 -0.28449672, %v1854_v6  ;;  %v4641_v0 = vpop.eup %3797  ;;  %v912_v8 = vmul.f32 %v4612_v44, %v880_v60  ;;  %v658_v2 = vand.u32 2147483647, %v4630_v43 }
  0xa3   : > { %v1727_v34 = vmul.f32 1.0614054, %v4641_v0  ;;  %v4651_v17 = vmul.f32 0.70710677, %v4633_v30  ;;  %v3800_v26 = vpop.eup %3799  ;;  %vm2206_vm4 = vcmp.ge.f32.partialorder %v4521_v62, 0.0  ;;  %3807 = vpow2.f32 %v2089_v9 }
  0xa4   : > { %v1295_v48 = vsub.f32 0.0, %v1231_v53  ;;  %v1918_v45 = vmul.f32 %v4603_v56, %v1886_v20  ;;  %v944_v18 = vadd.f32 -0.28449672, %v912_v8  ;;  %v2048_v33 = vmul.f32 %v2016_v14, %v1600_v12 }
  0xa5   : > { %v690_v42 = vmul.f32 0.3275911, %v658_v2  ;;  %v1759_v16 = vadd.f32 -1.4531521, %v1727_v34  ;;  %v1601_v27 = vand.u32 2147483647, %v4651_v17  ;;  %v524_v19 = vmul.f32 %v4576_v35, %v485_v3 }
  0xa6   : > { %v1327_v1 = vsel %vm1263_vm2, %v1231_v53, %v1295_v48  ;;  %v1950_v59 = vadd.f32 0.2548296, %v1918_v45  ;;  %v976_v52 = vmul.f32 %v4612_v44, %v944_v18  ;;  %vm1264_vm5 = vcmp.ge.f32.partialorder %v4533_v32, 0.0  ;;  %v1428_v53 = vld [vmem:[%s4090_s15 + $0x68] sm:$0xff] }
  0xa7   : > { %v1359_v10 = vadd.f32 1.0, %v1327_v1  ;;  %v722_v7 = vadd.f32 1.0, %v690_v42  ;;  %v3802_v37 = vpop.eup %3801  ;;  %v1791_v12 = vmul.f32 %v4641_v0, %v1759_v16  ;;  %3809 = vpow2.f32 %v1147_v63 }
  0xa8   : > { %v1982_v39 = vmul.f32 %v4603_v56, %v1950_v59  ;;  %v1633_v55 = vmul.f32 0.3275911, %v1601_v27  ;;  %v4663_v21 = vpop.eup %3803  ;;  %v1008_v5 = vadd.f32 0.2548296, %v976_v52  ;;  %v2091_v4 = vmul.f32 1.442695, %v2048_v33 }
  0xa9   : > { %v1391_v54 = vmul.f32 %v1359_v10, %v4596_v41  ;;  %3811 = vrcp.f32 %v722_v7  ;;  %v4666_v13 = vpop.eup %3805  ;;  %v1823_v23 = vadd.f32 1.4214138, %v1791_v12  ;;  %v785_v56 = vmul.f32 1.0614054, %v4663_v21 }
  0xaa   : > { %v2142_v50 = vmul.f32 %v3800_v26, %v1982_v39  ;;  %v1665_v29 = vadd.f32 1.0, %v1633_v55  ;;  %v1040_v40 = vmul.f32 %v4612_v44, %v1008_v5  ;;  %v1728_v38 = vmul.f32 1.0614054, %v4666_v13 }
  0xab   : > { %3645 = vmatprep.mubr.msk.f32.mxu0 %vm2357_vm3, %v1391_v54  ;;  %v1074_v49 = vsub.f32 0.0, %v658_v2  ;;  %v4673_v41 = vadd.f32 %v4585_v57, %v524_v19  ;;  %v1855_v58 = vmul.f32 %v4641_v0, %v1823_v23  ;;  %v817_v6 = vadd.f32 -1.4531521, %v785_v56 }
  0xac   : > { %v2174_v25 = vsub.f32 1.0, %v2142_v50  ;;  %3813 = vrcp.f32 %v1665_v29  ;;  %v1200_v9 = vmul.f32 %v3802_v37, %v1040_v40  ;;  %v4677_v60 = vmul.f32 0.5, %v4588_v36 }
  0xad   : > { %v1760_v14 = vadd.f32 -1.4531521, %v1728_v38  ;;  %3815 = vpow2.f32 %v2091_v4  ;;  %v1887_v44 = vadd.f32 -0.28449672, %v1855_v58  ;;  %v849_v8 = vmul.f32 %v4663_v21, %v817_v6  ;;  %v3808_v48 = vpop.eup %3807 }
  0xae   : > { %v2238_v20 = vsub.f32 0.0, %v2174_v25  ;;  %v2017_v63 = vsub.f32 0.0, %v1601_v27  ;;  %v1232_v45 = vsub.f32 1.0, %v1200_v9  ;;  %v1106_v3 = vmul.f32 %v1074_v49, %v658_v2 }
  0xaf   : > { %v1792_v34 = vmul.f32 %v4666_v13, %v1760_v14  ;;  %v4683_v26 = vmul.f32 0.70710677, %v4673_v41  ;;  %v1919_v18 = vmul.f32 %v4641_v0, %v1887_v44  ;;  %v881_v33 = vadd.f32 1.4214138, %v849_v8 }
  0xb0   : > { %v2270_v36 = vsel %vm2206_vm4, %v2174_v25, %v2238_v20  ;;  %v1467_v42 = vmul.f32 %v4544_v22, %v1428_v53  ;;  %v1296_v59 = vsub.f32 0.0, %v1232_v45  ;;  %vm2207_vm6 = vcmp.ge.f32.partialorder %v4570_v47, 0.0  ;;  %v486_v25 = vld [vmem:[%s4107_s24 + $0x68] sm:$0xff] }
  0xb1   : > { %v2302_v1 = vadd.f32 1.0, %v2270_v36  ;;  %v1824_v16 = vadd.f32 1.4214138, %v1792_v34  ;;  %v4691_v10 = vand.u32 2147483647, %v4683_v26  ;;  %v3810_v2 = vpop.eup %3809  ;;  %v913_v7 = vmul.f32 %v4663_v21, %v881_v33 }
  0xb2   : > { %v1951_v52 = vadd.f32 0.2548296, %v1919_v18  ;;  %v2049_v62 = vmul.f32 %v2017_v63, %v1601_v27  ;;  %v4695_v19 = vadd.f32 %v4557_v28, %v1467_v42  ;;  %v1328_v12 = vsel %vm1264_vm5, %v1232_v45, %v1296_v59 }
  0xb3   : > { %v4697_v37 = vpop.eup %3811  ;;  %v2334_v39 = vmul.f32 %v2302_v1, %v4636_v61  ;;  %v1856_v55 = vmul.f32 %v4666_v13, %v1824_v16  ;;  %v691_v54 = vmul.f32 0.3275911, %v4691_v10  ;;  %v1360_v5 = vadd.f32 1.0, %v1328_v12 }
  0xb4   : > { %v1983_v4 = vmul.f32 %v4641_v0, %v1951_v52  ;;  %v945_v50 = vadd.f32 -0.28449672, %v913_v7  ;;  %v786_v27 = vmul.f32 1.0614054, %v4697_v37  ;;  %v4710_v61 = vmul.f32 0.5, %v4591_v11 }
  0xb5   : > { %2367 = vst.msk [vmem:[%s4293_s30 + $0x48] sm:$0xff] %vm2357_vm3, %v2334_v39  ;;  %3596 = vmatmul.mubr.msk.f32.gmra.mrb[8].mxu1 %vm2357_vm3, %v2334_v39  ;;  %v1888_v32 = vadd.f32 -0.28449672, %v1856_v55  ;;  %v1149_v23 = vmul.f32 1.442695, %v1106_v3  ;;  %v723_v56 = vadd.f32 1.0, %v691_v54  ;;  %v1392_v40 = vmul.f32 %v1360_v5, %v4639_v15 }
  0xb6   : > { %v4712_v29 = vpop.eup %3813  ;;  %v2143_v38 = vmul.f32 %v3808_v48, %v1983_v4  ;;  %v977_v0 = vmul.f32 %v4663_v21, %v945_v50  ;;  %v818_v49 = vadd.f32 -1.4531521, %v786_v27  ;;  %v2093_v14 = vmul.f32 1.442695, %v2049_v62  ;;  %v1429_v55 = vld [vmem:[%s4090_s15 + $0x70] sm:$0xff] }
  0xb7   : > { %v3816_v58 = vpop.eup %3815  ;;  %v1920_v6 = vmul.f32 %v4666_v13, %v1888_v32  ;;  %v1729_v9 = vmul.f32 1.0614054, %v4712_v29  ;;  %3817 = vrcp.f32 %v723_v56  ;;  %3646 = vmatmul.mubr.msk.f32.gmra.mrb[8].mxu0 %vm2357_vm3, %v1392_v40  ;;  %v4722_v15 = vmul.f32 0.70710677, %v4695_v19 }
  0xb8   : > { %v2175_v11 = vsub.f32 1.0, %v2143_v38  ;;  %v1009_v53 = vadd.f32 0.2548296, %v977_v0  ;;  %v850_v20 = vmul.f32 %v4697_v37, %v818_v49  ;;  %3819 = vpow2.f32 %v1149_v23 }
  0xb9   : > { %v1952_v44 = vadd.f32 0.2548296, %v1920_v6  ;;  %v1761_v8 = vadd.f32 -1.4531521, %v1729_v9  ;;  %v525_v63 = vmul.f32 %v4576_v35, %v486_v25  ;;  %v1602_v3 = vand.u32 2147483647, %v4722_v15 }
  0xba   : > { %v2239_v48 = vsub.f32 0.0, %v2175_v11  ;;  %v1041_v45 = vmul.f32 %v4663_v21, %v1009_v53  ;;  %v882_v34 = vadd.f32 1.4214138, %v850_v20  ;;  %3821 = vpow2.f32 %v2093_v14 }
  0xbb   : > { %v1984_v36 = vmul.f32 %v4666_v13, %v1952_v44  ;;  %v1793_v18 = vmul.f32 %v4712_v29, %v1761_v8  ;;  %v1075_v33 = vsub.f32 0.0, %v4691_v10  ;;  %v1634_v16 = vmul.f32 0.3275911, %v1602_v3 }
  0xbc   : > { %v2271_v42 = vsel %vm2207_vm6, %v2175_v11, %v2239_v48  ;;  %v1201_v1 = vmul.f32 %v3810_v2, %v1041_v45  ;;  %v914_v59 = vmul.f32 %v4697_v37, %v882_v34  ;;  %vm1265_vm7 = vcmp.ge.f32.partialorder %v4600_v24, 0.0 }
  0xbd   : > { %v2303_v52 = vadd.f32 1.0, %v2271_v42  ;;  %v2144_v21 = vmul.f32 %v3816_v58, %v1984_v36  ;;  %v1825_v7 = vadd.f32 1.4214138, %v1793_v18  ;;  %v1666_v39 = vadd.f32 1.0, %v1634_v16 }
  0xbe   : > { %v1233_v13 = vsub.f32 1.0, %v1201_v1  ;;  %v946_v62 = vadd.f32 -0.28449672, %v914_v59  ;;  %v4735_v12 = vadd.f32 %v4585_v57, %v525_v63  ;;  %v1107_v5 = vmul.f32 %v1075_v33, %v4691_v10 }
  0xbf   : > { %v2335_v47 = vmul.f32 %v2303_v52, %v4645_v31  ;;  %v2176_v54 = vsub.f32 1.0, %v2144_v21  ;;  %v1857_v2 = vmul.f32 %v4712_v29, %v1825_v7  ;;  %vm2208_vm8 = vcmp.ge.f32.partialorder %v4606_v51, 0.0  ;;  %v487_v51 = vld [vmem:[%s4107_s24 + $0x70] sm:$0xff] }
  0xc0   : > { %v1297_v4 = vsub.f32 0.0, %v1233_v13  ;;  %v978_v50 = vmul.f32 %v4697_v37, %v946_v62  ;;  %3823 = vrcp.f32 %v1666_v39  ;;  %v2018_v31 = vsub.f32 0.0, %v1602_v3 }
  0xc1   : > { %v4743_v27 = vpop.eup %3817  ;;  %2368 = vst.msk [vmem:[%s4293_s30 + $0x50] sm:$0xff] %vm2357_vm3, %v2335_v47  ;;  %3598 = vmatprep.mubr.msk.f32.mxu1 %vm2357_vm3, %v2335_v47  ;;  %v2240_v32 = vsub.f32 0.0, %v2176_v54  ;;  %v1889_v23 = vadd.f32 -0.28449672, %v1857_v2  ;;  %v1468_v56 = vmul.f32 %v4544_v22, %v1429_v55  ;;  %v4753_v0 = vmul.f32 0.70710677, %v4735_v12 }
  0xc2   : > { %v1329_v10 = vsel %vm1265_vm7, %v1233_v13, %v1297_v4  ;;  %v1010_v40 = vadd.f32 0.2548296, %v978_v50  ;;  %v787_v38 = vmul.f32 1.0614054, %v4743_v27  ;;  %v3820_v49 = vpop.eup %3819  ;;  %v1151_v9 = vmul.f32 1.442695, %v1107_v5 }
  0xc3   : > { %v1361_v25 = vadd.f32 1.0, %v1329_v10  ;;  %v2272_v58 = vsel %vm2208_vm8, %v2176_v54, %v2240_v32  ;;  %v1921_v6 = vmul.f32 %v4712_v29, %v1889_v23  ;;  %v660_v53 = vand.u32 2147483647, %v4753_v0  ;;  %v1430_v2 = vld [vmem:[%s4090_s15 + $0x78] sm:$0xff] }
  0xc4   : > { %v2304_v14 = vadd.f32 1.0, %v2272_v58  ;;  %v1042_v11 = vmul.f32 %v4697_v37, %v1010_v40  ;;  %v819_v24 = vadd.f32 -1.4531521, %v787_v38  ;;  %v3822_v20 = vpop.eup %3821  ;;  %v2050_v63 = vmul.f32 %v2018_v31, %v1602_v3 }
  0xc5   : > { %v1393_v44 = vmul.f32 %v1361_v25, %v4677_v60  ;;  %v1953_v8 = vadd.f32 0.2548296, %v1921_v6  ;;  %v4762_v48 = vadd.f32 %v4557_v28, %v1468_v56  ;;  %v692_v18 = vmul.f32 0.3275911, %v660_v53 }
  0xc6   : > { %v2336_v45 = vmul.f32 %v2304_v14, %v4710_v61  ;;  %v1202_v34 = vmul.f32 %v3820_v49, %v1042_v11  ;;  %v851_v36 = vmul.f32 %v4743_v27, %v819_v24  ;;  %3825 = vpow2.f32 %v1151_v9  ;;  %v488_v49 = vld [vmem:[%s4107_s24 + $0x78] sm:$0xff] }
  0xc7   : > { %3648 = vmatprep.mubr.msk.f32.mxu0 %vm2357_vm3, %v1393_v44  ;;  %v1985_v37 = vmul.f32 %v4712_v29, %v1953_v8  ;;  %v4770_v33 = vmul.f32 0.70710677, %v4762_v48  ;;  %v724_v42 = vadd.f32 1.0, %v692_v18  ;;  %v526_v61 = vmul.f32 %v4576_v35, %v487_v51 }
  0xc8   : > { %2369 = vst.msk [vmem:[%s4293_s30 + $0x58] sm:$0xff] %vm2357_vm3, %v2336_v45  ;;  %3599 = vmatmul.mubr.msk.f32.gmra.mrb[10].mxu1 %vm2357_vm3, %v2336_v45  ;;  %v1234_v60 = vsub.f32 1.0, %v1202_v34  ;;  %v883_v3 = vadd.f32 1.4214138, %v851_v36  ;;  %vm1266_vm9 = vcmp.ge.f32.partialorder %v4630_v43, 0.0  ;;  %v594_v13 = vmul.f32 0.5, %v4622_v46 }
  0xc9   : > { %v2145_v1 = vmul.f32 %v3822_v20, %v1985_v37  ;;  %v2095_v59 = vmul.f32 1.442695, %v2050_v63  ;;  %v1603_v29 = vand.u32 2147483647, %v4770_v33  ;;  %3827 = vrcp.f32 %v724_v42 }
  0xca   : > { %v4778_v16 = vpop.eup %3823  ;;  %v1298_v52 = vsub.f32 0.0, %v1234_v60  ;;  %v915_v21 = vmul.f32 %v4743_v27, %v883_v3  ;;  %v4782_v7 = vadd.f32 %v4585_v57, %v526_v61  ;;  %vm2209_vm10 = vcmp.ge.f32.partialorder %v4651_v17, 0.0 }
  0xcb   : > { %v2177_v62 = vsub.f32 1.0, %v2145_v1  ;;  %v1730_v43 = vmul.f32 1.0614054, %v4778_v16  ;;  %v1076_v47 = vsub.f32 0.0, %v660_v53  ;;  %v1635_v54 = vmul.f32 0.3275911, %v1603_v29 }
  0xcc   : > { %v1330_v39 = vsel %vm1266_vm9, %v1234_v60, %v1298_v52  ;;  %v947_v55 = vadd.f32 -0.28449672, %v915_v21  ;;  %v1537_v4 = vmul.f32 0.5, %v4633_v30  ;;  %3829 = vpow2.f32 %v2095_v59  ;;  %v1431_v60 = vld [vmem:[%s4090_s15 + $0x80] sm:$0xff] }
  0xcd   : > { %v1362_v5 = vadd.f32 1.0, %v1330_v39  ;;  %v2241_v50 = vsub.f32 0.0, %v2177_v62  ;;  %v1762_v32 = vadd.f32 -1.4531521, %v1730_v43  ;;  %v1667_v46 = vadd.f32 1.0, %v1635_v54 }
  0xce   : > { %v979_v23 = vmul.f32 %v4743_v27, %v947_v55  ;;  %v4791_v31 = vmul.f32 0.70710677, %v4782_v7  ;;  %v1469_v38 = vmul.f32 %v4544_v22, %v1430_v2  ;;  %v1108_v58 = vmul.f32 %v1076_v47, %v660_v53 }
  0xcf   : > { %v1394_v56 = vmul.f32 %v1362_v5, %v594_v13  ;;  %v2273_v10 = vsel %vm2209_vm10, %v2177_v62, %v2241_v50  ;;  %v1794_v40 = vmul.f32 %v4778_v16, %v1762_v32  ;;  %3831 = vrcp.f32 %v1667_v46 }
  0xd0   : > { %v2305_v25 = vadd.f32 1.0, %v2273_v10  ;;  %v1011_v30 = vadd.f32 0.2548296, %v979_v23  ;;  %v3826_v6 = vpop.eup %3825  ;;  %v661_v14 = vand.u32 2147483647, %v4791_v31  ;;  %v4801_v11 = vadd.f32 %v4557_v28, %v1469_v38 }
  0xd1   : > { %3649 = vmatmul.mubr.msk.f32.gmra.mrb[10].mxu0 %vm2357_vm3, %v1394_v56  ;;  %v1826_v9 = vadd.f32 1.4214138, %v1794_v40  ;;  %v2019_v20 = vsub.f32 0.0, %v1603_v29  ;;  %v527_v44 = vmul.f32 %v4576_v35, %v488_v49  ;;  %v1153_v45 = vmul.f32 1.442695, %v1108_v58 }
  0xd2   : > { %v2337_v17 = vmul.f32 %v2305_v25, %v1537_v4  ;;  %v1043_v24 = vmul.f32 %v4743_v27, %v1011_v30  ;;  %v693_v53 = vmul.f32 0.3275911, %v661_v14  ;;  %v4812_v34 = vmul.f32 0.70710677, %v4801_v11  ;;  %v489_v30 = vld [vmem:[%s4107_s24 + $0x80] sm:$0xff] }
  0xd3   : > { %v1858_v8 = vmul.f32 %v4778_v16, %v1826_v9  ;;  %v4806_v63 = vpop.eup %3827  ;;  %v4815_v36 = vadd.f32 %v4585_v57, %v527_v44  ;;  %vm1267_vm11 = vcmp.ge.f32.partialorder %v4683_v26, 0.0  ;;  %v2051_v42 = vmul.f32 %v2019_v20, %v1603_v29 }
  0xd4   : > { %2370 = vst.msk [vmem:[%s4293_s30 + $0x60] sm:$0xff] %vm2357_vm3, %v2337_v17  ;;  %3601 = vmatprep.mubr.msk.f32.mxu1 %vm2357_vm3, %v2337_v17  ;;  %v1203_v51 = vmul.f32 %v3826_v6, %v1043_v24  ;;  %v788_v18 = vmul.f32 1.0614054, %v4806_v63  ;;  %v725_v37 = vadd.f32 1.0, %v693_v53  ;;  %v1604_v61 = vand.u32 2147483647, %v4812_v34 }
  0xd5   : > { %v1890_v27 = vadd.f32 -0.28449672, %v1858_v8  ;;  %v1077_v52 = vsub.f32 0.0, %v661_v14  ;;  %v4823_v43 = vmul.f32 0.70710677, %v4815_v36  ;;  %v1470_v39 = vmul.f32 %v4544_v22, %v1431_v60 }
  0xd6   : > { %v1235_v3 = vsub.f32 1.0, %v1203_v51  ;;  %v820_v59 = vadd.f32 -1.4531521, %v788_v18  ;;  %3833 = vrcp.f32 %v725_v37  ;;  %v3830_v21 = vpop.eup %3829  ;;  %v1636_v62 = vmul.f32 0.3275911, %v1604_v61 }
  0xd7   : > { %v1922_v1 = vmul.f32 %v4778_v16, %v1890_v27  ;;  %v595_v55 = vmul.f32 0.5, %v4673_v41  ;;  %3835 = vpow2.f32 %v1153_v45  ;;  %v2097_v5 = vmul.f32 1.442695, %v2051_v42 }
  0xd8   : > { %v1299_v13 = vsub.f32 0.0, %v1235_v3  ;;  %v852_v29 = vmul.f32 %v4806_v63, %v820_v59  ;;  %v1668_v4 = vadd.f32 1.0, %v1636_v62  ;;  %v4833_v50 = vand.u32 2147483647, %v4823_v43 }
  0xd9   : > { %v1954_v47 = vadd.f32 0.2548296, %v1922_v1  ;;  %v4828_v54 = vpop.eup %3831  ;;  %v1109_v56 = vmul.f32 %v1077_v52, %v661_v14  ;;  %v4839_v40 = vadd.f32 %v4557_v28, %v1470_v39  ;;  %v1538_v58 = vmul.f32 0.5, %v4695_v19  ;;  %v1432_v52 = vld [vmem:[%s4090_s15 + $0x88] sm:$0xff] }
  0xda   : > { %v1331_v2 = vsel %vm1267_vm11, %v1235_v3, %v1299_v13  ;;  %v884_v46 = vadd.f32 1.4214138, %v852_v29  ;;  %v1731_v41 = vmul.f32 1.0614054, %v4828_v54  ;;  %3837 = vrcp.f32 %v1668_v4 }
  0xdb   : > { %v1363_v32 = vadd.f32 1.0, %v1331_v2  ;;  %v1986_v23 = vmul.f32 %v4778_v16, %v1954_v47  ;;  %v694_v10 = vmul.f32 0.3275911, %v4833_v50  ;;  %vm2210_vm12 = vcmp.ge.f32.partialorder %v4722_v15, 0.0 }
  0xdc   : > { %v916_v49 = vmul.f32 %v4806_v63, %v884_v46  ;;  %v1763_v25 = vadd.f32 -1.4531521, %v1731_v41  ;;  %v2020_v16 = vsub.f32 0.0, %v1604_v61  ;;  %3839 = vpow2.f32 %v2097_v5 }
  0xdd   : > { %v1395_v26 = vmul.f32 %v1363_v32, %v595_v55  ;;  %v2146_v38 = vmul.f32 %v3830_v21, %v1986_v23  ;;  %v726_v6 = vadd.f32 1.0, %v694_v10  ;;  %v4848_v24 = vmul.f32 0.5, %v4735_v12 }
  0xde   : > { %v948_v14 = vadd.f32 -0.28449672, %v916_v49  ;;  %v1795_v17 = vmul.f32 %v4828_v54, %v1763_v25  ;;  %v4851_v20 = vmul.f32 0.70710677, %v4839_v40  ;;  %v528_v19 = vmul.f32 %v4576_v35, %v489_v30 }
  0xdf   : > { %3651 = vmatprep.mubr.msk.f32.mxu0 %vm2357_vm3, %v1395_v26  ;;  %v2178_v9 = vsub.f32 1.0, %v2146_v38  ;;  %3841 = vrcp.f32 %v726_v6  ;;  %v1155_v45 = vmul.f32 1.442695, %v1109_v56  ;;  %vm1268_vm13 = vcmp.ge.f32.partialorder %v4753_v0, 0.0 }
  0xe0   : > { %v4854_v44 = vpop.eup %3833  ;;  %v980_v53 = vmul.f32 %v4806_v63, %v948_v14  ;;  %v1827_v51 = vadd.f32 1.4214138, %v1795_v17  ;;  %v4859_v27 = vmul.f32 0.5, %v4762_v48  ;;  %v2052_v18 = vmul.f32 %v2020_v16, %v1604_v61 }
  0xe1   : > { %v2242_v8 = vsub.f32 0.0, %v2178_v9  ;;  %v789_v12 = vmul.f32 1.0614054, %v4854_v44  ;;  %v1605_v37 = vand.u32 2147483647, %v4851_v20  ;;  %v3836_v60 = vpop.eup %3835  ;;  %v4867_v59 = vadd.f32 %v4585_v57, %v528_v19 }
  0xe2   : > { %v1012_v42 = vadd.f32 0.2548296, %v980_v53  ;;  %v1859_v1 = vmul.f32 %v4828_v54, %v1827_v51  ;;  %v1078_v48 = vsub.f32 0.0, %v4833_v50  ;;  %3843 = vpow2.f32 %v1155_v45 }
  0xe3   : > { %v2274_v3 = vsel %vm2210_vm12, %v2178_v9, %v2242_v8  ;;  %v821_v13 = vadd.f32 -1.4531521, %v789_v12  ;;  %v1637_v62 = vmul.f32 0.3275911, %v1605_v37  ;;  %v4873_v15 = vmul.f32 0.70710677, %v4867_v59 }
  0xe4   : > { %v2306_v21 = vadd.f32 1.0, %v2274_v3  ;;  %v1044_v61 = vmul.f32 %v4806_v63, %v1012_v42  ;;  %v1891_v39 = vadd.f32 -0.28449672, %v1859_v1  ;;  %v4875_v55 = vpop.eup %3837  ;;  %v1471_v5 = vmul.f32 %v4544_v22, %v1432_v52 }
  0xe5   : > { %v853_v29 = vmul.f32 %v4854_v44, %v821_v13  ;;  %v1669_v2 = vadd.f32 1.0, %v1637_v62  ;;  %v1732_v23 = vmul.f32 1.0614054, %v4875_v55  ;;  %v4882_v63 = vand.u32 2147483647, %v4873_v15 }
  0xe6   : > { %v2338_v47 = vmul.f32 %v2306_v21, %v1538_v58  ;;  %v1204_v4 = vmul.f32 %v3836_v60, %v1044_v61  ;;  %v1923_v32 = vmul.f32 %v4828_v54, %v1891_v39  ;;  %vm2211_vm14 = vcmp.ge.f32.partialorder %v4770_v33, 0.0  ;;  %v3840_v10 = vpop.eup %3839  ;;  %v490_v60 = vld [vmem:[%s4107_s24 + $0x88] sm:$0xff] }
  0xe7   : > { %v885_v46 = vadd.f32 1.4214138, %v853_v29  ;;  %v2099_v41 = vmul.f32 1.442695, %v2052_v18  ;;  %v1110_v56 = vmul.f32 %v1078_v48, %v4833_v50  ;;  %3845 = vrcp.f32 %v1669_v2 }
  0xe8   : > { %2371 = vst.msk [vmem:[%s4293_s30 + $0x68] sm:$0xff] %vm2357_vm3, %v2338_v47  ;;  %3602 = vmatmul.mubr.msk.f32.gmra.mrb[12].mxu1 %vm2357_vm3, %v2338_v47  ;;  %v1236_v26 = vsub.f32 1.0, %v1204_v4  ;;  %v1955_v38 = vadd.f32 0.2548296, %v1923_v32  ;;  %v4890_v49 = vmul.f32 0.5, %v4782_v7  ;;  %v2021_v16 = vsub.f32 0.0, %v1605_v37 }
  0xe9   : > { %v1764_v25 = vadd.f32 -1.4531521, %v1732_v23  ;;  %v4892_v30 = vpop.eup %3841  ;;  %v917_v58 = vmul.f32 %v4854_v44, %v885_v46  ;;  %v695_v6 = vmul.f32 0.3275911, %v4882_v63  ;;  %v4897_v9 = vadd.f32 %v4557_v28, %v1471_v5 }
  0xea   : > { %v1300_v50 = vsub.f32 0.0, %v1236_v26  ;;  %v1987_v14 = vmul.f32 %v4828_v54, %v1955_v38  ;;  %v790_v7 = vmul.f32 1.0614054, %v4892_v30  ;;  %3847 = vpow2.f32 %v2099_v41 }
  0xeb   : > { %v1796_v17 = vmul.f32 %v4875_v55, %v1764_v25  ;;  %v949_v19 = vadd.f32 -0.28449672, %v917_v58  ;;  %v1157_v8 = vmul.f32 1.442695, %v1110_v56  ;;  %v727_v53 = vadd.f32 1.0, %v695_v6 }
  0xec   : > { %v1332_v51 = vsel %vm1268_vm13, %v1236_v26, %v1300_v50  ;;  %v2147_v45 = vmul.f32 %v3840_v10, %v1987_v14  ;;  %v822_v18 = vadd.f32 -1.4531521, %v790_v7  ;;  %v2053_v1 = vmul.f32 %v2021_v16, %v1605_v37  ;;  %v3844_v54 = vpop.eup %3843  ;;  %v1433_v10 = vld [vmem:[%s4090_s15 + $0x90] sm:$0xff] }
  0xed   : > { %v1828_v12 = vadd.f32 1.4214138, %v1796_v17  ;;  %v1364_v3 = vadd.f32 1.0, %v1332_v51  ;;  %v981_v42 = vmul.f32 %v4854_v44, %v949_v19  ;;  %3849 = vrcp.f32 %v727_v53 }
  0xee   : > { %v2179_v52 = vsub.f32 1.0, %v2147_v45  ;;  %vm1269_vm15 = vcmp.ge.f32.partialorder %v4791_v31, 0.0  ;;  %v854_v13 = vmul.f32 %v4892_v30, %v822_v18  ;;  %v4910_v0 = vmul.f32 0.70710677, %v4897_v9 }
  0xef   : > { %v1860_v21 = vmul.f32 %v4875_v55, %v1828_v12  ;;  %v1396_v48 = vmul.f32 %v1364_v3, %v4848_v24  ;;  %v1013_v62 = vadd.f32 0.2548296, %v981_v42  ;;  %3851 = vpow2.f32 %v1157_v8 }
  0xf0   : > { %v529_v61 = vmul.f32 %v4576_v35, %v490_v60  ;;  %v2243_v37 = vsub.f32 0.0, %v2179_v52  ;;  %v886_v47 = vadd.f32 1.4214138, %v854_v13  ;;  %v1079_v29 = vsub.f32 0.0, %v4882_v63 }
  0xf1   : > { %v1892_v39 = vadd.f32 -0.28449672, %v1860_v21  ;;  %v4915_v2 = vpop.eup %3845  ;;  %3652 = vmatmul.mubr.msk.f32.gmra.mrb[12].mxu0 %vm2357_vm3, %v1396_v48  ;;  %v1045_v5 = vmul.f32 %v4854_v44, %v1013_v62  ;;  %v4920_v4 = vmul.f32 0.5, %v4801_v11  ;;  %v2101_v24 = vmul.f32 1.442695, %v2053_v1  ;;  %v491_v48 = vld [vmem:[%s4107_s24 + $0x90] sm:$0xff] }
  0xf2   : > { %v4923_v32 = vand.u32 2147483647, %v4910_v0  ;;  %v2275_v23 = vsel %vm2211_vm14, %v2179_v52, %v2243_v37  ;;  %v918_v41 = vmul.f32 %v4892_v30, %v886_v47  ;;  %v1733_v56 = vmul.f32 1.0614054, %v4915_v2 }
  0xf3   : > { %v1924_v46 = vmul.f32 %v4875_v55, %v1892_v39  ;;  %v2307_v26 = vadd.f32 1.0, %v2275_v23  ;;  %v1205_v38 = vmul.f32 %v3844_v54, %v1045_v5  ;;  %v4933_v11 = vadd.f32 %v4585_v57, %v529_v61 }
  0xf4   : > { %v1638_v44 = vmul.f32 0.3275911, %v4923_v32  ;;  %v950_v58 = vadd.f32 -0.28449672, %v918_v41  ;;  %v1765_v16 = vadd.f32 -1.4531521, %v1733_v56  ;;  %v1111_v33 = vmul.f32 %v1079_v29, %v4882_v63  ;;  %v3848_v6 = vpop.eup %3847 }
  0xf5   : > { %v1956_v25 = vadd.f32 0.2548296, %v1924_v46  ;;  %v2339_v50 = vmul.f32 %v2307_v26, %v4859_v27  ;;  %v1237_v14 = vsub.f32 1.0, %v1205_v38  ;;  %v1472_v7 = vmul.f32 %v4544_v22, %v1433_v10 }
  0xf6   : > { %v1670_v17 = vadd.f32 1.0, %v1638_v44  ;;  %v982_v8 = vmul.f32 %v4892_v30, %v950_v58  ;;  %v1797_v53 = vmul.f32 %v4915_v2, %v1765_v16  ;;  %3853 = vpow2.f32 %v2101_v24 }
  0xf7   : > { %v1988_v19 = vmul.f32 %v4875_v55, %v1956_v25  ;;  %v4941_v51 = vpop.eup %3849  ;;  %2372 = vst.msk [vmem:[%s4293_s30 + $0x70] sm:$0xff] %vm2357_vm3, %v2339_v50  ;;  %3604 = vmatprep.mubr.msk.f32.mxu1 %vm2357_vm3, %v2339_v50  ;;  %v1301_v63 = vsub.f32 0.0, %v1237_v14  ;;  %vm2212_vm0 = vcmp.ge.f32.partialorder %v4812_v34, 0.0  ;;  %v4948_v22 = vmul.f32 0.70710677, %v4933_v11 }
  0xf8   : > { %3855 = vrcp.f32 %v1670_v17  ;;  %v1014_v55 = vadd.f32 0.2548296, %v982_v8  ;;  %v1829_v45 = vadd.f32 1.4214138, %v1797_v53  ;;  %v791_v12 = vmul.f32 1.0614054, %v4941_v51 }
  0xf9   : > { %v2148_v27 = vmul.f32 %v3848_v6, %v1988_v19  ;;  %v3852_v18 = vpop.eup %3851  ;;  %v1333_v60 = vsel %vm1269_vm15, %v1237_v14, %v1301_v63  ;;  %v1159_v3 = vmul.f32 1.442695, %v1111_v33  ;;  %v664_v42 = vand.u32 2147483647, %v4948_v22  ;;  %v1434_v17 = vld [vmem:[%s4090_s15 + $0x98] sm:$0xff] }
  0xfa   : > { %v4955_v1 = vadd.f32 %v4557_v28, %v1472_v7  ;;  %v1365_v54 = vadd.f32 1.0, %v1333_v60  ;;  %v1046_v21 = vmul.f32 %v4892_v30, %v1014_v55  ;;  %v1861_v13 = vmul.f32 %v4915_v2, %v1829_v45  ;;  %v5001_v45 = vld [vmem:[%s6025_s4] ss:$0 sm:$0xff] }
  0xfb   : > { %v2180_v52 = vsub.f32 1.0, %v2148_v27  ;;  %vm1270_vm1 = vcmp.ge.f32.partialorder %v4823_v43, 0.0  ;;  %v823_v62 = vadd.f32 -1.4531521, %v791_v12  ;;  %v2022_v61 = vsub.f32 0.0, %v4923_v32 }
  0xfc   : > { %v696_v31 = vmul.f32 0.3275911, %v664_v42  ;;  %v1397_v37 = vmul.f32 %v1365_v54, %v4890_v49  ;;  %v1206_v47 = vmul.f32 %v3852_v18, %v1046_v21  ;;  %v1893_v29 = vadd.f32 -0.28449672, %v1861_v13 }
  0xfd   : > { %v2244_v39 = vsub.f32 0.0, %v2180_v52  ;;  %v855_v28 = vmul.f32 %v4941_v51, %v823_v62  ;;  %3857 = vpow2.f32 %v1159_v3  ;;  %v4965_v30 = vmul.f32 0.70710677, %v4955_v1 }
  0xfe   : > { %v728_v5 = vadd.f32 1.0, %v696_v31  ;;  %3654 = vmatprep.mubr.msk.f32.mxu0 %vm2357_vm3, %v1397_v37  ;;  %v1238_v23 = vsub.f32 1.0, %v1206_v47  ;;  %v1925_v46 = vmul.f32 %v4915_v2, %v1893_v29  ;;  %v530_v49 = vmul.f32 %v4576_v35, %v491_v48 }
  0xff   : > { %v2276_v24 = vsel %vm2212_vm0, %v2180_v52, %v2244_v39  ;;  %v887_v56 = vadd.f32 1.4214138, %v855_v28  ;;  %v2054_v10 = vmul.f32 %v2022_v61, %v4923_v32  ;;  %v598_v38 = vmul.f32 0.5, %v4815_v36 }
 0x100   : > { %v2308_v41 = vadd.f32 1.0, %v2276_v24  ;;  %3859 = vrcp.f32 %v728_v5  ;;  %v3854_v26 = vpop.eup %3853  ;;  %v1302_v44 = vsub.f32 0.0, %v1238_v23  ;;  %v1957_v25 = vadd.f32 0.2548296, %v1925_v46 }
 0x101   : > { %v4975_v34 = vand.u32 2147483647, %v4965_v30  ;;  %v919_v35 = vmul.f32 %v4941_v51, %v887_v56  ;;  %v1080_v33 = vsub.f32 0.0, %v664_v42  ;;  %v4982_v32 = vadd.f32 %v4585_v57, %v530_v49  ;;  %v1435_v56 = vld [vmem:[%s4090_s15 + $0xa0] sm:$0xff] }
 0x102   : > { %v4977_v58 = vpop.eup %3855  ;;  %v2340_v16 = vmul.f32 %v2308_v41, %v4920_v4  ;;  %v1334_v6 = vsel %vm1270_vm1, %v1238_v23, %v1302_v44  ;;  %v1989_v36 = vmul.f32 %v4915_v2, %v1957_v25  ;;  %v1541_v7 = vmul.f32 0.5, %v4839_v40 }
 0x103   : > { %v1734_v50 = vmul.f32 1.0614054, %v4977_v58  ;;  %v1639_v14 = vmul.f32 0.3275911, %v4975_v34  ;;  %v1366_v4 = vadd.f32 1.0, %v1334_v6  ;;  %v1112_v55 = vmul.f32 %v1080_v33, %v664_v42 }
 0x104   : > { %2373 = vst.msk [vmem:[%s4293_s30 + $0x78] sm:$0xff] %vm2357_vm3, %v2340_v16  ;;  %3605 = vmatmul.mubr.msk.f32.gmra.mrb[14].mxu1 %vm2357_vm3, %v2340_v16  ;;  %v951_v19 = vadd.f32 -0.28449672, %v919_v35  ;;  %v2103_v57 = vmul.f32 1.442695, %v2054_v10  ;;  %v2149_v8 = vmul.f32 %v3854_v26, %v1989_v36  ;;  %v1473_v12 = vmul.f32 %v5001_v45, %v1434_v17 }
 0x105   : > { %v1766_v53 = vadd.f32 -1.4531521, %v1734_v50  ;;  %v1671_v43 = vadd.f32 1.0, %v1639_v14  ;;  %v4995_v63 = vmul.f32 0.70710677, %v4982_v32  ;;  %v1398_v2 = vmul.f32 %v1366_v4, %v598_v38 }
 0x106   : > { %v983_v27 = vmul.f32 %v4941_v51, %v951_v19  ;;  %v2181_v40 = vsub.f32 1.0, %v2149_v8  ;;  %vm2213_vm2 = vcmp.ge.f32.partialorder %v4851_v20, 0.0  ;;  %v5011_v42 = vld [vmem:[%s6026_s5] ss:$0 sm:$0xff]  ;;  %v599_v13 = vmul.f32 0.5, %v4867_v59 }
 0x107   : > { %v1798_v18 = vmul.f32 %v4977_v58, %v1766_v53  ;;  %3861 = vrcp.f32 %v1671_v43  ;;  %v665_v60 = vand.u32 2147483647, %v4995_v63  ;;  %v3858_v3 = vpop.eup %3857  ;;  %3655 = vmatmul.mubr.msk.f32.gmra.mrb[14].mxu0 %vm2357_vm3, %v1398_v2  ;;  %v5014_v52 = vadd.f32 %v5011_v42, %v1473_v12  ;;  %v5036_v35 = vld [vmem:[%s6023_s2] ss:$0 sm:$0xff] }
 0x108   : > { %v1015_v54 = vadd.f32 0.2548296, %v983_v27  ;;  %3863 = vpow2.f32 %v2103_v57  ;;  %v2245_v21 = vsub.f32 0.0, %v2181_v40  ;;  %v1161_v31 = vmul.f32 1.442695, %v1112_v55 }
 0x109   : > { %v1830_v48 = vadd.f32 1.4214138, %v1798_v18  ;;  %v697_v62 = vmul.f32 0.3275911, %v665_v60  ;;  %v2023_v37 = vsub.f32 0.0, %v4975_v34  ;;  %v1081_v23 = vsub.f32 0.0, %v665_v60 }
 0x10a   : > { %v5017_v61 = vpop.eup %3859  ;;  %v1047_v20 = vmul.f32 %v4941_v51, %v1015_v54  ;;  %v5022_v39 = vmul.f32 0.70710677, %v5014_v52  ;;  %v2277_v47 = vsel %vm2213_vm2, %v2181_v40, %v2245_v21  ;;  %v492_v51 = vld [vmem:[%s4107_s24 + $0x98] sm:$0xff]  ;;  %vm1271_vm4 = vcmp.ge.f32.partialorder %v4873_v15, 0.0  ;;  %v5048_v19 = vld [vmem:[%s6024_s3] ss:$0 sm:$0xff] }
 0x10b   : > { %v1862_v29 = vmul.f32 %v4977_v58, %v1830_v48  ;;  %v792_v28 = vmul.f32 1.0614054, %v5017_v61  ;;  %v729_v59 = vadd.f32 1.0, %v697_v62  ;;  %v2309_v5 = vadd.f32 1.0, %v2277_v47 }
 0x10c   : > { %v1207_v24 = vmul.f32 %v3858_v3, %v1047_v20  ;;  %v1608_v46 = vand.u32 2147483647, %v5022_v39  ;;  %v2055_v16 = vmul.f32 %v2023_v37, %v4975_v34  ;;  %v531_v33 = vmul.f32 %v5036_v35, %v492_v51 }
 0x10d   : > { %v1894_v49 = vadd.f32 -0.28449672, %v1862_v29  ;;  %v824_v41 = vadd.f32 -1.4531521, %v792_v28  ;;  %3865 = vrcp.f32 %v729_v59  ;;  %v2341_v10 = vmul.f32 %v2309_v5, %v1541_v7  ;;  %v493_v29 = vld [vmem:[%s4107_s24 + $0xa0] sm:$0xff] }
 0x10e   : > { %v1239_v26 = vsub.f32 1.0, %v1207_v24  ;;  %3867 = vpow2.f32 %v1161_v31  ;;  %v1640_v38 = vmul.f32 0.3275911, %v1608_v46  ;;  %v1113_v36 = vmul.f32 %v1081_v23, %v665_v60 }
 0x10f   : > { %v1926_v44 = vmul.f32 %v4977_v58, %v1894_v49  ;;  %v856_v25 = vmul.f32 %v5017_v61, %v824_v41  ;;  %2374 = vst.msk [vmem:[%s4293_s30 + $0x80] sm:$0xff] %vm2357_vm3, %v2341_v10  ;;  %3607 = vmatprep.mubr.msk.f32.mxu1 %vm2357_vm3, %v2341_v10  ;;  %v1474_v14 = vmul.f32 %v5001_v45, %v1435_v56  ;;  %v2024_v7 = vsub.f32 0.0, %v1608_v46 }
 0x110   : > { %v1303_v6 = vsub.f32 0.0, %v1239_v26  ;;  %v1672_v50 = vadd.f32 1.0, %v1640_v38  ;;  %v5051_v57 = vadd.f32 %v5048_v19, %v531_v33  ;;  %v2105_v40 = vmul.f32 1.442695, %v2055_v16 }
 0x111   : > { %v5043_v17 = vpop.eup %3861  ;;  %v1958_v4 = vadd.f32 0.2548296, %v1926_v44  ;;  %v888_v34 = vadd.f32 1.4214138, %v856_v25  ;;  %v5057_v2 = vadd.f32 %v5011_v42, %v1474_v14  ;;  %v1542_v18 = vmul.f32 0.5, %v4897_v9  ;;  %v1436_v25 = vld [vmem:[%s4090_s15 + $0xa8] sm:$0xff] }
 0x112   : > { %v3864_v8 = vpop.eup %3863  ;;  %v1335_v53 = vsel %vm1271_vm4, %v1239_v26, %v1303_v6  ;;  %v1735_v43 = vmul.f32 1.0614054, %v5043_v17  ;;  %3869 = vrcp.f32 %v1672_v50  ;;  %vm2214_vm5 = vcmp.ge.f32.partialorder %v4910_v0, 0.0 }
 0x113   : > { %v1367_v27 = vadd.f32 1.0, %v1335_v53  ;;  %v1990_v55 = vmul.f32 %v4977_v58, %v1958_v4  ;;  %v920_v12 = vmul.f32 %v5017_v61, %v888_v34  ;;  %v5064_v15 = vmul.f32 0.70710677, %v5051_v57 }
 0x114   : > { %v1767_v60 = vadd.f32 -1.4531521, %v1735_v43  ;;  %v1163_v48 = vmul.f32 1.442695, %v1113_v36  ;;  %v2056_v20 = vmul.f32 %v2024_v7, %v1608_v46  ;;  %v5069_v31 = vmul.f32 0.70710677, %v5057_v2 }
 0x115   : > { %v1399_v3 = vmul.f32 %v1367_v27, %v599_v13  ;;  %v2150_v54 = vmul.f32 %v3864_v8, %v1990_v55  ;;  %v952_v21 = vadd.f32 -0.28449672, %v920_v12  ;;  %v666_v58 = vand.u32 2147483647, %v5064_v15 }
 0x116   : > { %v1799_v62 = vmul.f32 %v5043_v17, %v1767_v60  ;;  %v5075_v47 = vmul.f32 0.5, %v4933_v11  ;;  %3871 = vpow2.f32 %v2105_v40  ;;  %vm1272_vm6 = vcmp.ge.f32.partialorder %v4948_v22, 0.0 }
 0x117   : > { %v5071_v9 = vpop.eup %3865  ;;  %3657 = vmatprep.mubr.msk.f32.mxu0 %vm2357_vm3, %v1399_v3  ;;  %v2182_v37 = vsub.f32 1.0, %v2150_v54  ;;  %v984_v13 = vmul.f32 %v5017_v61, %v952_v21  ;;  %v698_v24 = vmul.f32 0.3275911, %v666_v58  ;;  %3873 = vpow2.f32 %v1163_v48 }
 0x118   : > { %v3868_v28 = vpop.eup %3867  ;;  %v1831_v59 = vadd.f32 1.4214138, %v1799_v62  ;;  %v793_v5 = vmul.f32 1.0614054, %v5071_v9  ;;  %v5082_v51 = vand.u32 2147483647, %v5069_v31  ;;  %v532_v44 = vmul.f32 %v5036_v35, %v493_v29 }
 0x119   : > { %v2246_v23 = vsub.f32 0.0, %v2182_v37  ;;  %v1016_v46 = vadd.f32 0.2548296, %v984_v13  ;;  %v2107_v41 = vmul.f32 1.442695, %v2056_v20  ;;  %v730_v56 = vadd.f32 1.0, %v698_v24 }
 0x11a   : > { %v1863_v11 = vmul.f32 %v5043_v17, %v1831_v59  ;;  %v825_v49 = vadd.f32 -1.4531521, %v793_v5  ;;  %v1641_v38 = vmul.f32 0.3275911, %v5082_v51  ;;  %v1082_v0 = vsub.f32 0.0, %v666_v58 }
 0x11b   : > { %v2278_v10 = vsel %vm2214_vm5, %v2182_v37, %v2246_v23  ;;  %v1048_v26 = vmul.f32 %v5017_v61, %v1016_v46  ;;  %3875 = vrcp.f32 %v730_v56  ;;  %v1475_v8 = vmul.f32 %v5001_v45, %v1436_v25  ;;  %v494_v56 = vld [vmem:[%s4107_s24 + $0xa8] sm:$0xff] }
 0x11c   : > { %v5091_v16 = vpop.eup %3869  ;;  %v2310_v33 = vadd.f32 1.0, %v2278_v10  ;;  %v1895_v6 = vadd.f32 -0.28449672, %v1863_v11  ;;  %v857_v36 = vmul.f32 %v5071_v9, %v825_v49  ;;  %v1673_v4 = vadd.f32 1.0, %v1641_v38 }
 0x11d   : > { %v1208_v50 = vmul.f32 %v3868_v28, %v1048_v26  ;;  %v1736_v14 = vmul.f32 1.0614054, %v5091_v16  ;;  %v5098_v43 = vmul.f32 0.5, %v4955_v1  ;;  %v5101_v55 = vadd.f32 %v5048_v19, %v532_v44 }
 0x11e   : > { %v2342_v34 = vmul.f32 %v2310_v33, %v1542_v18  ;;  %v1927_v61 = vmul.f32 %v5043_v17, %v1895_v6  ;;  %v889_v7 = vadd.f32 1.4214138, %v857_v36  ;;  %vm2215_vm7 = vcmp.ge.f32.partialorder %v4965_v30, 0.0 }
 0x11f   : > { %v1240_v53 = vsub.f32 1.0, %v1208_v50  ;;  %v1768_v27 = vadd.f32 -1.4531521, %v1736_v14  ;;  %3877 = vrcp.f32 %v1673_v4  ;;  %v1114_v1 = vmul.f32 %v1082_v0, %v666_v58 }
 0x120   : > { %2375 = vst.msk [vmem:[%s4293_s30 + $0x88] sm:$0xff] %vm2357_vm3, %v2342_v34  ;;  %3608 = vmatmul.mubr.msk.f32.gmra.mrb[16].mxu1 %vm2357_vm3, %v2342_v34  ;;  %v1959_v12 = vadd.f32 0.2548296, %v1927_v61  ;;  %v921_v40 = vmul.f32 %v5071_v9, %v889_v7  ;;  %v3872_v18 = vpop.eup %3871  ;;  %v5110_v54 = vmul.f32 0.70710677, %v5101_v55  ;;  %3879 = vpow2.f32 %v2107_v41 }
 0x121   : > { %v1304_v60 = vsub.f32 0.0, %v1240_v53  ;;  %v1800_v3 = vmul.f32 %v5091_v16, %v1768_v27  ;;  %v5114_v62 = vadd.f32 %v5011_v42, %v1475_v8  ;;  %v3874_v20 = vpop.eup %3873  ;;  %v5119_v13 = vmul.f32 0.5, %v4982_v32 }
 0x122   : > { %v1991_v21 = vmul.f32 %v5043_v17, %v1959_v12  ;;  %v953_v48 = vadd.f32 -0.28449672, %v921_v40  ;;  %v667_v58 = vand.u32 2147483647, %v5110_v54  ;;  %v2025_v5 = vsub.f32 0.0, %v5082_v51 }
 0x123   : > { %v1336_v37 = vsel %vm1272_vm6, %v1240_v53, %v1304_v60  ;;  %v1832_v29 = vadd.f32 1.4214138, %v1800_v3  ;;  %vm1273_vm8 = vcmp.ge.f32.partialorder %v4995_v63, 0.0  ;;  %v1165_v23 = vmul.f32 1.442695, %v1114_v1 }
 0x124   : > { %v1368_v28 = vadd.f32 1.0, %v1336_v37  ;;  %v2151_v59 = vmul.f32 %v3872_v18, %v1991_v21  ;;  %v985_v17 = vmul.f32 %v5071_v9, %v953_v48  ;;  %v699_v22 = vmul.f32 0.3275911, %v667_v58  ;;  %v1437_v18 = vld [vmem:[%s4090_s15 + $0xb0] sm:$0xff] }
 0x125   : > { %v1864_v24 = vmul.f32 %v5091_v16, %v1832_v29  ;;  %v5126_v46 = vpop.eup %3875  ;;  %v5130_v41 = vmul.f32 0.70710677, %v5114_v62  ;;  %v5134_v10 = vmul.f32 0.5, %v5014_v52  ;;  %v533_v52 = vmul.f32 %v5036_v35, %v494_v56 }
 0x126   : > { %v1400_v32 = vmul.f32 %v1368_v28, %v5075_v47  ;;  %v2183_v11 = vsub.f32 1.0, %v2151_v59  ;;  %v1017_v49 = vadd.f32 0.2548296, %v985_v17  ;;  %v794_v38 = vmul.f32 1.0614054, %v5126_v46 }
 0x127   : > { %v1896_v26 = vadd.f32 -0.28449672, %v1864_v24  ;;  %v731_v44 = vadd.f32 1.0, %v699_v22  ;;  %v2057_v47 = vmul.f32 %v2025_v5, %v5082_v51  ;;  %v1610_v6 = vand.u32 2147483647, %v5130_v41 }
 0x128   : > { %3658 = vmatmul.mubr.msk.f32.gmra.mrb[16].mxu0 %vm2357_vm3, %v1400_v32  ;;  %v2247_v25 = vsub.f32 0.0, %v2183_v11  ;;  %v1049_v33 = vmul.f32 %v5071_v9, %v1017_v49  ;;  %v826_v50 = vadd.f32 -1.4531521, %v794_v38  ;;  %v1083_v34 = vsub.f32 0.0, %v667_v58 }
 0x129   : > { %v1928_v36 = vmul.f32 %v5091_v16, %v1896_v26  ;;  %3881 = vrcp.f32 %v731_v44  ;;  %v5143_v14 = vpop.eup %3877  ;;  %v1642_v61 = vmul.f32 0.3275911, %v1610_v6  ;;  %v2109_v12 = vmul.f32 1.442695, %v2057_v47  ;;  %v495_v44 = vld [vmem:[%s4107_s24 + $0xb0] sm:$0xff] }
 0x12a   : > { %v2279_v0 = vsel %vm2215_vm7, %v2183_v11, %v2247_v25  ;;  %v1209_v4 = vmul.f32 %v3874_v20, %v1049_v33  ;;  %v858_v51 = vmul.f32 %v5126_v46, %v826_v50  ;;  %v1737_v8 = vmul.f32 1.0614054, %v5143_v14  ;;  %v3880_v53 = vpop.eup %3879 }
 0x12b   : > { %v2311_v9 = vadd.f32 1.0, %v2279_v0  ;;  %v1960_v7 = vadd.f32 0.2548296, %v1928_v36  ;;  %3883 = vpow2.f32 %v1165_v23  ;;  %v1674_v40 = vadd.f32 1.0, %v1642_v61 }
 0x12c   : > { %v1241_v27 = vsub.f32 1.0, %v1209_v4  ;;  %v890_v3 = vadd.f32 1.4214138, %v858_v51  ;;  %v1769_v1 = vadd.f32 -1.4531521, %v1737_v8  ;;  %v1115_v48 = vmul.f32 %v1083_v34, %v667_v58 }
 0x12d   : > { %v2343_v60 = vmul.f32 %v2311_v9, %v5098_v43  ;;  %v1992_v30 = vmul.f32 %v5091_v16, %v1960_v7  ;;  %3885 = vrcp.f32 %v1674_v40  ;;  %v5153_v20 = vadd.f32 %v5048_v19, %v533_v52 }
 0x12e   : > { %v1305_v21 = vsub.f32 0.0, %v1241_v27  ;;  %v922_v29 = vmul.f32 %v5126_v46, %v890_v3  ;;  %v1801_v28 = vmul.f32 %v5143_v14, %v1769_v1  ;;  %v1476_v43 = vmul.f32 %v5001_v45, %v1437_v18 }
 0x12f   : > { %2376 = vst.msk [vmem:[%s4293_s30 + $0x90] sm:$0xff] %vm2357_vm3, %v2343_v60  ;;  %3610 = vmatprep.mubr.msk.f32.mxu1 %vm2357_vm3, %v2343_v60  ;;  %v2152_v37 = vmul.f32 %v3880_v53, %v1992_v30  ;;  %3887 = vpow2.f32 %v2109_v12  ;;  %v2026_v58 = vsub.f32 0.0, %v1610_v6  ;;  %v5164_v59 = vmul.f32 0.70710677, %v5153_v20 }
 0x130   : > { %v1337_v16 = vsel %vm1273_vm8, %v1241_v27, %v1305_v21  ;;  %v954_v24 = vadd.f32 -0.28449672, %v922_v29  ;;  %v1833_v23 = vadd.f32 1.4214138, %v1801_v28  ;;  %vm2216_vm9 = vcmp.ge.f32.partialorder %v5022_v39, 0.0 }
 0x131   : > { %v1369_v17 = vadd.f32 1.0, %v1337_v16  ;;  %v2184_v5 = vsub.f32 1.0, %v2152_v37  ;;  %v1167_v22 = vmul.f32 1.442695, %v1115_v48  ;;  %v5168_v32 = vand.u32 2147483647, %v5164_v59 }
 0x132   : > { %v5171_v11 = vadd.f32 %v5011_v42, %v1476_v43  ;;  %v986_v26 = vmul.f32 %v5126_v46, %v954_v24  ;;  %v1865_v38 = vmul.f32 %v5143_v14, %v1833_v23  ;;  %v5180_v25 = vmul.f32 0.5, %v5051_v57  ;;  %v1438_v37 = vld [vmem:[%s4090_s15 + $0xb8] sm:$0xff] }
 0x133   : > { %v5173_v63 = vpop.eup %3881  ;;  %v1401_v49 = vmul.f32 %v1369_v17, %v5119_v13  ;;  %v2248_v56 = vsub.f32 0.0, %v2184_v5  ;;  %v2058_v33 = vmul.f32 %v2026_v58, %v1610_v6  ;;  %v700_v47 = vmul.f32 0.3275911, %v5168_v32 }
 0x134   : > { %v795_v39 = vmul.f32 1.0614054, %v5173_v63  ;;  %v1018_v50 = vadd.f32 0.2548296, %v986_v26  ;;  %v1897_v52 = vadd.f32 -0.28449672, %v1865_v38  ;;  %v534_v57 = vmul.f32 %v5036_v35, %v495_v44 }
 0x135   : > { %3660 = vmatprep.mubr.msk.f32.mxu0 %vm2357_vm3, %v1401_v49  ;;  %v2280_v36 = vsel %vm2216_vm9, %v2184_v5, %v2248_v56  ;;  %v5186_v13 = vmul.f32 0.70710677, %v5171_v11  ;;  %v3884_v0 = vpop.eup %3883  ;;  %v732_v61 = vadd.f32 1.0, %v700_v47  ;;  %3889 = vpow2.f32 %v1167_v22  ;;  %v496_v26 = vld [vmem:[%s4107_s24 + $0xb8] sm:$0xff] }
 0x136   : > { %v2312_v4 = vadd.f32 1.0, %v2280_v36  ;;  %v827_v34 = vadd.f32 -1.4531521, %v795_v39  ;;  %v1050_v9 = vmul.f32 %v5126_v46, %v1018_v50  ;;  %v1929_v6 = vmul.f32 %v5143_v14, %v1897_v52 }
 0x137   : > { %v1611_v7 = vand.u32 2147483647, %v5186_v13  ;;  %v5192_v51 = vpop.eup %3885  ;;  %v5196_v53 = vmul.f32 0.5, %v5057_v2  ;;  %3891 = vrcp.f32 %v732_v61  ;;  %vm1274_vm10 = vcmp.ge.f32.partialorder %v5064_v15, 0.0 }
 0x138   : > { %v2344_v8 = vmul.f32 %v2312_v4, %v5134_v10  ;;  %v859_v27 = vmul.f32 %v5173_v63, %v827_v34  ;;  %v1210_v12 = vmul.f32 %v3884_v0, %v1050_v9  ;;  %v1961_v40 = vadd.f32 0.2548296, %v1929_v6 }
 0x139   : > { %v1738_v46 = vmul.f32 1.0614054, %v5192_v51  ;;  %v1643_v18 = vmul.f32 0.3275911, %v1611_v7  ;;  %v3888_v60 = vpop.eup %3887  ;;  %v2111_v30 = vmul.f32 1.442695, %v2058_v33  ;;  %v5205_v2 = vadd.f32 %v5048_v19, %v534_v57 }
 0x13a   : > { %2377 = vst.msk [vmem:[%s4293_s30 + $0x98] sm:$0xff] %vm2357_vm3, %v2344_v8  ;;  %3611 = vmatmul.mubr.msk.f32.gmra.mrb[18].mxu1 %vm2357_vm3, %v2344_v8  ;;  %v891_v10 = vadd.f32 1.4214138, %v859_v27  ;;  %v1242_v3 = vsub.f32 1.0, %v1210_v12  ;;  %v1993_v1 = vmul.f32 %v5143_v14, %v1961_v40  ;;  %vm2217_vm11 = vcmp.ge.f32.partialorder %v5069_v31, 0.0 }
 0x13b   : > { %v1770_v21 = vadd.f32 -1.4531521, %v1738_v46  ;;  %v1675_v48 = vadd.f32 1.0, %v1643_v18  ;;  %v1084_v28 = vsub.f32 0.0, %v5168_v32  ;;  %v5213_v43 = vmul.f32 0.70710677, %v5205_v2 }
 0x13c   : > { %v923_v29 = vmul.f32 %v5173_v63, %v891_v10  ;;  %v1306_v16 = vsub.f32 0.0, %v1242_v3  ;;  %v2153_v58 = vmul.f32 %v3888_v60, %v1993_v1  ;;  %v1477_v24 = vmul.f32 %v5001_v45, %v1438_v37 }
 0x13d   : > { %v1802_v17 = vmul.f32 %v5192_v51, %v1770_v21  ;;  %3893 = vrcp.f32 %v1675_v48  ;;  %v5217_v14 = vand.u32 2147483647, %v5213_v43  ;;  %v2027_v56 = vsub.f32 0.0, %v1611_v7 }
 0x13e   : > { %v955_v5 = vadd.f32 -0.28449672, %v923_v29  ;;  %3895 = vpow2.f32 %v2111_v30  ;;  %v1338_v23 = vsel %vm1274_vm10, %v1242_v3, %v1306_v16  ;;  %v2185_v22 = vsub.f32 1.0, %v2153_v58 }
 0x13f   : > { %v1834_v49 = vadd.f32 1.4214138, %v1802_v17  ;;  %v1370_v38 = vadd.f32 1.0, %v1338_v23  ;;  %v1116_v39 = vmul.f32 %v1084_v28, %v5168_v32  ;;  %v701_v33 = vmul.f32 0.3275911, %v5217_v14  ;;  %v3890_v47 = vpop.eup %3889 }
 0x140   : > { %v987_v44 = vmul.f32 %v5173_v63, %v955_v5  ;;  %v2249_v36 = vsub.f32 0.0, %v2185_v22  ;;  %v5227_v50 = vmul.f32 0.5, %v5101_v55  ;;  %v5231_v15 = vadd.f32 %v5011_v42, %v1477_v24 }
 0x141   : > { %v1866_v52 = vmul.f32 %v5192_v51, %v1834_v49  ;;  %v5233_v0 = vpop.eup %3891  ;;  %v1402_v4 = vmul.f32 %v1370_v38, %v5180_v25  ;;  %v733_v61 = vadd.f32 1.0, %v701_v33  ;;  %v535_v32 = vmul.f32 %v5036_v35, %v496_v26 }
 0x142   : > { %v1019_v34 = vadd.f32 0.2548296, %v987_v44  ;;  %v2281_v57 = vsel %vm2217_vm11, %v2185_v22, %v2249_v36  ;;  %v796_v55 = vmul.f32 1.0614054, %v5233_v0  ;;  %v2059_v6 = vmul.f32 %v2027_v56, %v1611_v7  ;;  %v497_v56 = vld [vmem:[%s4107_s24 + $0xc0] sm:$0xff] }
 0x143   : > { %v1898_v9 = vadd.f32 -0.28449672, %v1866_v52  ;;  %3661 = vmatmul.mubr.msk.f32.gmra.mrb[18].mxu0 %vm2357_vm3, %v1402_v4  ;;  %v2313_v8 = vadd.f32 1.0, %v2281_v57  ;;  %v1169_v12 = vmul.f32 1.442695, %v1116_v39  ;;  %3897 = vrcp.f32 %v733_v61 }
 0x144   : > { %v1051_v27 = vmul.f32 %v5173_v63, %v1019_v34  ;;  %vm1275_vm12 = vcmp.ge.f32.partialorder %v5110_v54, 0.0  ;;  %v828_v40 = vadd.f32 -1.4531521, %v796_v55  ;;  %v5245_v31 = vmul.f32 0.70710677, %v5231_v15  ;;  %v1439_v63 = vld [vmem:[%s4090_s15 + $0xc0] sm:$0xff] }
 0x145   : > { %v1930_v25 = vmul.f32 %v5192_v51, %v1898_v9  ;;  %v2345_v46 = vmul.f32 %v2313_v8, %v5196_v53  ;;  %v5249_v7 = vmul.f32 0.5, %v5114_v62  ;;  %v5252_v60 = vadd.f32 %v5048_v19, %v535_v32 }
 0x146   : > { %v1211_v18 = vmul.f32 %v3890_v47, %v1051_v27  ;;  %v860_v3 = vmul.f32 %v5233_v0, %v828_v40  ;;  %v2113_v1 = vmul.f32 1.442695, %v2059_v6  ;;  %v1612_v21 = vand.u32 2147483647, %v5245_v31 }
 0x147   : > { %v5255_v10 = vpop.eup %3893  ;;  %v1962_v30 = vadd.f32 0.2548296, %v1930_v25  ;;  %2378 = vst.msk [vmem:[%s4293_s30 + $0xa0] sm:$0xff] %vm2357_vm3, %v2345_v46  ;;  %3613 = vmatprep.mubr.msk.f32.mxu1 %vm2357_vm3, %v2345_v46  ;;  %3899 = vpow2.f32 %v1169_v12  ;;  %v1085_v37 = vsub.f32 0.0, %v5217_v14  ;;  %vm2218_vm13 = vcmp.ge.f32.partialorder %v5130_v41, 0.0 }
 0x148   : > { %v3896_v48 = vpop.eup %3895  ;;  %v1243_v53 = vsub.f32 1.0, %v1211_v18  ;;  %v1739_v62 = vmul.f32 1.0614054, %v5255_v10  ;;  %v892_v28 = vadd.f32 1.4214138, %v860_v3  ;;  %v1478_v24 = vmul.f32 %v5001_v45, %v1439_v63 }
 0x149   : > { %v1994_v29 = vmul.f32 %v5192_v51, %v1962_v30  ;;  %v1644_v16 = vmul.f32 0.3275911, %v1612_v21  ;;  %v5267_v5 = vmul.f32 0.70710677, %v5252_v60  ;;  %3901 = vpow2.f32 %v2113_v1 }
 0x14a   : > { %v1307_v58 = vsub.f32 0.0, %v1243_v53  ;;  %v1771_v17 = vadd.f32 -1.4531521, %v1739_v62  ;;  %v924_v22 = vmul.f32 %v5233_v0, %v892_v28  ;;  %v1117_v38 = vmul.f32 %v1085_v37, %v5217_v14 }
 0x14b   : > { %v2154_v23 = vmul.f32 %v3896_v48, %v1994_v29  ;;  %v1676_v49 = vadd.f32 1.0, %v1644_v16  ;;  %v670_v44 = vand.u32 2147483647, %v5267_v5  ;;  %v5280_v34 = vadd.f32 %v5011_v42, %v1478_v24 }
 0x14c   : > { %v1339_v51 = vsel %vm1275_vm12, %v1243_v53, %v1307_v58  ;;  %v1803_v26 = vmul.f32 %v5255_v10, %v1771_v17  ;;  %v956_v47 = vadd.f32 -0.28449672, %v924_v22  ;;  %v536_v54 = vmul.f32 %v5036_v35, %v497_v56  ;;  %v1440_v22 = vld [vmem:[%s4090_s15 + $0xc8] sm:$0xff] }
 0x14d   : > { %v1371_v39 = vadd.f32 1.0, %v1339_v51  ;;  %v2186_v33 = vsub.f32 1.0, %v2154_v23  ;;  %3903 = vrcp.f32 %v1676_v49  ;;  %v5277_v36 = vpop.eup %3897  ;;  %v702_v4 = vmul.f32 0.3275911, %v670_v44 }
 0x14e   : > { %v1835_v52 = vadd.f32 1.4214138, %v1803_v26  ;;  %v988_v14 = vmul.f32 %v5233_v0, %v956_v47  ;;  %v797_v57 = vmul.f32 1.0614054, %v5277_v36  ;;  %v1171_v55 = vmul.f32 1.442695, %v1117_v38 }
 0x14f   : > { %v1403_v61 = vmul.f32 %v1371_v39, %v5227_v50  ;;  %v2250_v32 = vsub.f32 0.0, %v2186_v33  ;;  %v2028_v6 = vsub.f32 0.0, %v1612_v21  ;;  %v734_v8 = vadd.f32 1.0, %v702_v4 }
 0x150   : > { %v1867_v9 = vmul.f32 %v5255_v10, %v1835_v52  ;;  %v1020_v12 = vadd.f32 0.2548296, %v988_v14  ;;  %v829_v25 = vadd.f32 -1.4531521, %v797_v57  ;;  %v1086_v40 = vsub.f32 0.0, %v670_v44 }
 0x151   : > { %3663 = vmatprep.mubr.msk.f32.mxu0 %vm2357_vm3, %v1403_v61  ;;  %v2282_v27 = vsel %vm2218_vm13, %v2186_v33, %v2250_v32  ;;  %v3900_v46 = vpop.eup %3899  ;;  %v604_v18 = vmul.f32 0.5, %v5153_v20  ;;  %3905 = vrcp.f32 %v734_v8  ;;  %v5294_v1 = vmul.f32 0.70710677, %v5280_v34 }
 0x152   : > { %v2314_v50 = vadd.f32 1.0, %v2282_v27  ;;  %v1899_v63 = vadd.f32 -0.28449672, %v1867_v9  ;;  %v1052_v30 = vmul.f32 %v5233_v0, %v1020_v12  ;;  %v861_v3 = vmul.f32 %v5277_v36, %v829_v25  ;;  %v498_v12 = vld [vmem:[%s4107_s24 + $0xc8] sm:$0xff] }
 0x153   : > { %v5297_v41 = vadd.f32 %v5048_v19, %v536_v54  ;;  %3907 = vpow2.f32 %v1171_v55  ;;  %v2060_v62 = vmul.f32 %v2028_v6, %v1612_v21  ;;  %v3902_v20 = vpop.eup %3901  ;;  %v1118_v28 = vmul.f32 %v1086_v40, %v670_v44 }
 0x154   : > { %v2346_v48 = vmul.f32 %v2314_v50, %v5249_v7  ;;  %v1931_v53 = vmul.f32 %v5255_v10, %v1899_v63  ;;  %v1212_v37 = vmul.f32 %v3900_v46, %v1052_v30  ;;  %v893_v29 = vadd.f32 1.4214138, %v861_v3 }
 0x155   : > { %v1613_v0 = vand.u32 2147483647, %v5294_v1  ;;  %vm1276_vm14 = vcmp.ge.f32.partialorder %v5164_v59, 0.0  ;;  %v1547_v16 = vmul.f32 0.5, %v5171_v11  ;;  %v5308_v58 = vmul.f32 0.70710677, %v5297_v41 }
 0x156   : > { %2379 = vst.msk [vmem:[%s4293_s30 + $0xa8] sm:$0xff] %vm2357_vm3, %v2346_v48  ;;  %3614 = vmatmul.mubr.msk.f32.gmra.mrb[20].mxu1 %vm2357_vm3, %v2346_v48  ;;  %v1963_v7 = vadd.f32 0.2548296, %v1931_v53  ;;  %v1244_v17 = vsub.f32 1.0, %v1212_v37  ;;  %vm2219_vm15 = vcmp.ge.f32.partialorder %v5186_v13, 0.0  ;;  %v925_v24 = vmul.f32 %v5277_v36, %v893_v29 }
 0x157   : > { %v5310_v21 = vpop.eup %3903  ;;  %v1645_v23 = vmul.f32 0.3275911, %v1613_v0  ;;  %v2115_v51 = vmul.f32 1.442695, %v2060_v62  ;;  %v671_v11 = vand.u32 2147483647, %v5308_v58  ;;  %v1479_v4 = vmul.f32 %v5001_v45, %v1440_v22 }
 0x158   : > { %v1995_v49 = vmul.f32 %v5255_v10, %v1963_v7  ;;  %v1740_v56 = vmul.f32 1.0614054, %v5310_v21  ;;  %v1308_v26 = vsub.f32 0.0, %v1244_v17  ;;  %v957_v38 = vadd.f32 -0.28449672, %v925_v24  ;;  %v1441_v24 = vld [vmem:[%s4090_s15 + $0xd0] sm:$0xff] }
 0x159   : > { %v1173_v44 = vmul.f32 1.442695, %v1118_v28  ;;  %v1677_v39 = vadd.f32 1.0, %v1645_v23  ;;  %v703_v52 = vmul.f32 0.3275911, %v671_v11  ;;  %v2029_v61 = vsub.f32 0.0, %v1613_v0 }
 0x15a   : > { %v2155_v33 = vmul.f32 %v3902_v20, %v1995_v49  ;;  %v1772_v47 = vadd.f32 -1.4531521, %v1740_v56  ;;  %v1340_v54 = vsel %vm1276_vm14, %v1244_v17, %v1308_v26  ;;  %v989_v10 = vmul.f32 %v5277_v36, %v957_v38 }
 0x15b   : > { %3909 = vrcp.f32 %v1677_v39  ;;  %v5322_v32 = vpop.eup %3905  ;;  %v1372_v14 = vadd.f32 1.0, %v1340_v54  ;;  %v735_v55 = vadd.f32 1.0, %v703_v52  ;;  %v1087_v27 = vsub.f32 0.0, %v671_v11 }
 0x15c   : > { %v2187_v57 = vsub.f32 1.0, %v2155_v33  ;;  %v1804_v9 = vmul.f32 %v5310_v21, %v1772_v47  ;;  %v1021_v6 = vadd.f32 0.2548296, %v989_v10  ;;  %3911 = vpow2.f32 %v2115_v51  ;;  %v499_v51 = vld [vmem:[%s4107_s24 + $0xd0] sm:$0xff] }
 0x15d   : > { %v798_v8 = vmul.f32 1.0614054, %v5322_v32  ;;  %v3908_v25 = vpop.eup %3907  ;;  %v1404_v59 = vmul.f32 %v1372_v14, %v604_v18  ;;  %3913 = vrcp.f32 %v735_v55  ;;  %v605_v50 = vmul.f32 0.5, %v5205_v2 }
 0x15e   : > { %v2251_v40 = vsub.f32 0.0, %v2187_v57  ;;  %v1836_v46 = vadd.f32 1.4214138, %v1804_v9  ;;  %v1053_v63 = vmul.f32 %v5277_v36, %v1021_v6  ;;  %v5330_v3 = vadd.f32 %v5011_v42, %v1479_v4 }
 0x15f   : > { %v830_v30 = vadd.f32 -1.4531521, %v798_v8  ;;  %3664 = vmatmul.mubr.msk.f32.gmra.mrb[20].mxu0 %vm2357_vm3, %v1404_v59  ;;  %v2061_v18 = vmul.f32 %v2029_v61, %v1613_v0  ;;  %v537_v62 = vmul.f32 %v5036_v35, %v498_v12  ;;  %v1119_v36 = vmul.f32 %v1087_v27, %v671_v11  ;;  %v5376_v27 = vpop.f32.mrb[0].mxu1  ;;  %v5378_v12 = vpop.f32.mrb[0].mxu0 }
 0x160   : > { %v2283_v48 = vsel %vm2219_vm15, %v2187_v57, %v2251_v40  ;;  %v1868_v53 = vmul.f32 %v5310_v21, %v1836_v46  ;;  %v1213_v37 = vmul.f32 %v3908_v25, %v1053_v63  ;;  %3915 = vpow2.f32 %v1173_v44  ;;  %v5381_v40 = vpop.f32.mrb[1].mxu1 }
 0x161   : > { %v2315_v20 = vadd.f32 1.0, %v2283_v48  ;;  %v862_v2 = vmul.f32 %v5322_v32, %v830_v30  ;;  %v5339_v28 = vmul.f32 0.70710677, %v5330_v3  ;;  %v5342_v13 = vadd.f32 %v5048_v19, %v537_v62 }
 0x162   : > { %v1900_v29 = vadd.f32 -0.28449672, %v1868_v53  ;;  %v1245_v17 = vsub.f32 1.0, %v1213_v37  ;;  %vm1277_vm0 = vcmp.ge.f32.partialorder %v5213_v43, 0.0  ;;  %v5347_v23 = vmul.f32 0.5, %v5231_v15  ;;  %v5392_v37 = vpop.f32.mrb[2].mxu1 }
 0x163   : > { %v2347_v7 = vmul.f32 %v2315_v20, %v1547_v16  ;;  %v894_v0 = vadd.f32 1.4214138, %v862_v2  ;;  %v2117_v49 = vmul.f32 1.442695, %v2061_v18  ;;  %v1614_v56 = vand.u32 2147483647, %v5339_v28 }
 0x164   : > { %v1932_v22 = vmul.f32 %v5310_v21, %v1900_v29  ;;  %v1309_v16 = vsub.f32 0.0, %v1245_v17  ;;  %vm2220_vm1 = vcmp.ge.f32.partialorder %v5245_v31, 0.0  ;;  %v1175_v38 = vmul.f32 1.442695, %v1119_v36 }
 0x165   : > { %v5352_v11 = vpop.eup %3909  ;;  %2380 = vst.msk [vmem:[%s4293_s30 + $0xb0] sm:$0xff] %vm2357_vm3, %v2347_v7  ;;  %3616 = vmatprep.mubr.msk.f32.mxu1 %vm2357_vm3, %v2347_v7  ;;  %v926_v26 = vmul.f32 %v5322_v32, %v894_v0  ;;  %v5360_v15 = vmul.f32 0.70710677, %v5342_v13  ;;  %v1646_v33 = vmul.f32 0.3275911, %v1614_v56  ;;  %v1480_v47 = vmul.f32 %v5001_v45, %v1441_v24 }
 0x166   : > { %v1964_v44 = vadd.f32 0.2548296, %v1932_v22  ;;  %v1741_v39 = vmul.f32 1.0614054, %v5352_v11  ;;  %v3912_v52 = vpop.eup %3911  ;;  %v1341_v4 = vsel %vm1277_vm0, %v1245_v17, %v1309_v16  ;;  %v538_v61 = vmul.f32 %v5036_v35, %v499_v51  ;;  %v5401_v7 = vpop.f32.mrb[3].mxu1 }
 0x167   : > { %v958_v54 = vadd.f32 -0.28449672, %v926_v26  ;;  %v5367_v10 = vand.u32 2147483647, %v5360_v15  ;;  %v5370_v14 = vpop.eup %3913  ;;  %v1373_v57 = vadd.f32 1.0, %v1341_v4  ;;  %v1678_v6 = vadd.f32 1.0, %v1646_v33 }
 0x168   : > { %v1996_v9 = vmul.f32 %v5310_v21, %v1964_v44  ;;  %v1773_v55 = vadd.f32 -1.4531521, %v1741_v39  ;;  %3917 = vpow2.f32 %v2117_v49  ;;  %v799_v45 = vmul.f32 1.0614054, %v5370_v14  ;;  %v5383_v21 = vpop.f32.mrb[1].mxu0  ;;  %v5407_v24 = vpop.f32.mrb[4].mxu1 }
 0x169   : > { %v990_v8 = vmul.f32 %v5322_v32, %v958_v54  ;;  %v704_v43 = vmul.f32 0.3275911, %v5367_v10  ;;  %v1405_v25 = vmul.f32 %v1373_v57, %v605_v50  ;;  %3919 = vrcp.f32 %v1678_v6 }
 0x16a   : > { %v2156_v35 = vmul.f32 %v3912_v52, %v1996_v9  ;;  %v1805_v59 = vmul.f32 %v5352_v11, %v1773_v55  ;;  %v831_v63 = vadd.f32 -1.4531521, %v799_v45  ;;  %v2030_v30 = vsub.f32 0.0, %v1614_v56  ;;  %v3916_v53 = vpop.eup %3915  ;;  %v5422_v52 = vpop.f32.mrb[5].mxu1 }
 0x16b   : > { %v1022_v46 = vadd.f32 0.2548296, %v990_v8  ;;  %v5386_v48 = vadd.f32 %v5011_v42, %v1480_v47  ;;  %3666 = vmatprep.mubr.msk.f32.mxu0 %vm2357_vm3, %v1405_v25  ;;  %v736_v50 = vadd.f32 1.0, %v704_v43  ;;  %v5390_v20 = vadd.f32 %v5048_v19, %v538_v61  ;;  %v5399_v42 = vpop.f32.mrb[2].mxu0  ;;  %v5434_v9 = vpop.f32.mrb[6].mxu1 }
 0x16c   : > { %v2188_v18 = vsub.f32 1.0, %v2156_v35  ;;  %v1837_v62 = vadd.f32 1.4214138, %v1805_v59  ;;  %v5395_v2 = vmul.f32 0.5, %v5252_v60  ;;  %v863_v29 = vmul.f32 %v5370_v14, %v831_v63  ;;  %v5405_v0 = vpop.f32.mrb[3].mxu0  ;;  %v5440_v25 = vpop.f32.mrb[7].mxu1 }
 0x16d   : > { %v1054_v36 = vmul.f32 %v5322_v32, %v1022_v46  ;;  %3921 = vpow2.f32 %v1175_v38  ;;  %vm1278_vm2 = vcmp.ge.f32.partialorder %v5267_v5, 0.0  ;;  %v2062_v32 = vmul.f32 %v2030_v30, %v1614_v56  ;;  %v5412_v51 = vpop.f32.mrb[4].mxu0 }
 0x16e   : > { %v2252_v17 = vsub.f32 0.0, %v2188_v18  ;;  %v1869_v19 = vmul.f32 %v5352_v11, %v1837_v62  ;;  %3923 = vrcp.f32 %v736_v50  ;;  %v895_v22 = vadd.f32 1.4214138, %v863_v29  ;;  %v5424_v4 = vpop.f32.mrb[5].mxu0 }
 0x16f   : > { %v1214_v60 = vmul.f32 %v3916_v53, %v1054_v36  ;;  %v5410_v49 = vmul.f32 0.70710677, %v5386_v48  ;;  %v1088_v38 = vsub.f32 0.0, %v5367_v10  ;;  %v5418_v44 = vmul.f32 0.70710677, %v5390_v20  ;;  %v5436_v55 = vpop.f32.mrb[6].mxu0 }
 0x170   : > { %v2284_v16 = vsel %vm2220_vm1, %v2188_v18, %v2252_v17  ;;  %v1901_v26 = vadd.f32 -0.28449672, %v1869_v19  ;;  %v927_v47 = vmul.f32 %v5370_v14, %v895_v22  ;;  %v5427_v54 = vmul.f32 0.5, %v5280_v34  ;;  %v5452_v62 = vpop.f32.mrb[7].mxu0  ;;  %v1442_v22 = vld [vmem:[%s4090_s15 + $0xd8] sm:$0xff] }
 0x171   : > { %v2316_v39 = vadd.f32 1.0, %v2284_v16  ;;  %v1246_v33 = vsub.f32 1.0, %v1214_v60  ;;  %v1615_v56 = vand.u32 2147483647, %v5410_v49  ;;  %v5431_v61 = vmul.f32 0.5, %v5297_v41 }
 0x172   : > { %v1933_v31 = vmul.f32 %v5352_v11, %v1901_v26  ;;  %v673_v57 = vand.u32 2147483647, %v5418_v44  ;;  %v3918_v6 = vpop.eup %3917  ;;  %vm2221_vm4 = vcmp.ge.f32.partialorder %v5294_v1, 0.0  ;;  %v959_v34 = vadd.f32 -0.28449672, %v927_v47 }
 0x173   : > { %v2348_v8 = vmul.f32 %v2316_v39, %v5347_v23  ;;  %v1310_v45 = vsub.f32 0.0, %v1246_v33  ;;  %v1647_v43 = vmul.f32 0.3275911, %v1615_v56  ;;  %v5442_v35 = vpop.eup %3919  ;;  %v2119_v59 = vmul.f32 1.442695, %v2062_v32 }
 0x174   : > { %v1965_v41 = vadd.f32 0.2548296, %v1933_v31  ;;  %v1120_v46 = vmul.f32 %v1088_v38, %v5367_v10  ;;  %v705_v63 = vmul.f32 0.3275911, %v673_v57  ;;  %v991_v30 = vmul.f32 %v5370_v14, %v959_v34  ;;  %v500_v31 = vld [vmem:[%s4107_s24 + $0xd8] sm:$0xff] }
 0x175   : > { %2381 = vst.msk [vmem:[%s4293_s30 + $0xb8] sm:$0xff] %vm2357_vm3, %v2348_v8  ;;  %3617 = vmatmul.mubr.msk.f32.gmra.mrb[22].mxu1 %vm2357_vm3, %v2348_v8  ;;  %v1342_v23 = vsel %vm1278_vm2, %v1246_v33, %v1310_v45  ;;  %v1742_v53 = vmul.f32 1.0614054, %v5442_v35  ;;  %v1679_v18 = vadd.f32 1.0, %v1647_v43  ;;  %vm1279_vm5 = vcmp.ge.f32.partialorder %v5308_v58, 0.0 }
 0x176   : > { %v1374_v50 = vadd.f32 1.0, %v1342_v23  ;;  %v1997_v36 = vmul.f32 %v5352_v11, %v1965_v41  ;;  %v2031_v10 = vsub.f32 0.0, %v1615_v56  ;;  %v737_v29 = vadd.f32 1.0, %v705_v63  ;;  %v5488_v63 = vld [vmem:[%s6023_s2] ss:$0 sm:$0xff] }
 0x177   : > { %v3922_v17 = vpop.eup %3921  ;;  %v1023_v19 = vadd.f32 0.2548296, %v991_v30  ;;  %v5457_v5 = vmul.f32 0.5, %v5330_v3  ;;  %v1774_v60 = vadd.f32 -1.4531521, %v1742_v53  ;;  %3925 = vrcp.f32 %v1679_v18 }
 0x178   : > { %v5460_v32 = vpop.eup %3923  ;;  %v1406_v16 = vmul.f32 %v1374_v50, %v5395_v2  ;;  %v2157_v26 = vmul.f32 %v3918_v6, %v1997_v36  ;;  %3927 = vrcp.f32 %v737_v29  ;;  %v1089_v11 = vsub.f32 0.0, %v673_v57  ;;  %v5471_v2 = vld [vmem:[%s6025_s4] ss:$0 sm:$0xff] }
 0x179   : > { %v1055_v38 = vmul.f32 %v5370_v14, %v1023_v19  ;;  %v1806_v39 = vmul.f32 %v5442_v35, %v1774_v60  ;;  %v800_v33 = vmul.f32 1.0614054, %v5460_v32  ;;  %v1177_v47 = vmul.f32 1.442695, %v1120_v46  ;;  %v5501_v36 = vld [vmem:[%s6024_s3] ss:$0 sm:$0xff] }
 0x17a   : > { %3667 = vmatmul.mubr.msk.f32.gmra.mrb[22].mxu0 %vm2357_vm3, %v1406_v16  ;;  %v2189_v3 = vsub.f32 1.0, %v2157_v26  ;;  %3929 = vpow2.f32 %v2119_v59  ;;  %v2063_v8 = vmul.f32 %v2031_v10, %v1615_v56  ;;  %v1481_v6 = vmul.f32 %v5471_v2, %v1442_v22  ;;  %v5480_v56 = vld [vmem:[%s6026_s5] ss:$0 sm:$0xff] }
 0x17b   : > { %v1215_v45 = vmul.f32 %v3922_v17, %v1055_v38  ;;  %v1838_v14 = vadd.f32 1.4214138, %v1806_v39  ;;  %v5475_v34 = vmul.f32 0.5, %v5342_v13  ;;  %v832_v43 = vadd.f32 -1.4531521, %v800_v33  ;;  %v1443_v29 = vld [vmem:[%s4090_s15 + $0xe0] sm:$0xff] }
 0x17c   : > { %v2253_v41 = vsub.f32 0.0, %v2189_v3  ;;  %v1121_v46 = vmul.f32 %v1089_v11, %v673_v57  ;;  %v5483_v59 = vadd.f32 %v5480_v56, %v1481_v6  ;;  %v539_v13 = vmul.f32 %v5488_v63, %v500_v31 }
 0x17d   : > { %v1247_v23 = vsub.f32 1.0, %v1215_v45  ;;  %v1870_v30 = vmul.f32 %v5442_v35, %v1838_v14  ;;  %v864_v57 = vmul.f32 %v5460_v32, %v832_v43  ;;  %3931 = vpow2.f32 %v1177_v47 }
 0x17e   : > { %v2285_v53 = vsel %vm2221_vm4, %v2189_v3, %v2253_v41  ;;  %v2121_v18 = vmul.f32 1.442695, %v2063_v8  ;;  %v5496_v50 = vmul.f32 0.70710677, %v5483_v59  ;;  %v5504_v10 = vadd.f32 %v5501_v36, %v539_v13 }
 0x17f   : > { %v2317_v17 = vadd.f32 1.0, %v2285_v53  ;;  %v1311_v19 = vsub.f32 0.0, %v1247_v23  ;;  %v1902_v60 = vadd.f32 -0.28449672, %v1870_v30  ;;  %v896_v22 = vadd.f32 1.4214138, %v864_v57 }
 0x180   : > { %v1179_v1 = vmul.f32 1.442695, %v1121_v46  ;;  %v1616_v16 = vand.u32 2147483647, %v5496_v50  ;;  %v5509_v26 = vmul.f32 0.70710677, %v5504_v10  ;;  %v1482_v45 = vmul.f32 %v5471_v2, %v1443_v29 }
 0x181   : > { %v5511_v11 = vpop.eup %3925  ;;  %v2349_v38 = vmul.f32 %v2317_v17, %v5427_v54  ;;  %v1343_v39 = vsel %vm1279_vm5, %v1247_v23, %v1311_v19  ;;  %v1934_v33 = vmul.f32 %v5442_v35, %v1902_v60  ;;  %v928_v47 = vmul.f32 %v5460_v32, %v896_v22  ;;  %v501_v29 = vld [vmem:[%s4107_s24 + $0xe0] sm:$0xff] }
 0x182   : > { %v5518_v31 = vpop.eup %3927  ;;  %v1375_v3 = vadd.f32 1.0, %v1343_v39  ;;  %vm2222_vm6 = vcmp.ge.f32.partialorder %v5339_v28, 0.0  ;;  %v1743_v8 = vmul.f32 1.0614054, %v5511_v11  ;;  %v1648_v6 = vmul.f32 0.3275911, %v1616_v16 }
 0x183   : > { %2382 = vst.msk [vmem:[%s4293_s30 + $0xc0] sm:$0xff] %vm2357_vm3, %v2349_v38  ;;  %3619 = vmatprep.mubr.msk.f32.mxu1 %vm2357_vm3, %v2349_v38  ;;  %v1966_v58 = vadd.f32 0.2548296, %v1934_v33  ;;  %v960_v54 = vadd.f32 -0.28449672, %v928_v47  ;;  %3933 = vpow2.f32 %v2121_v18  ;;  %v2032_v19 = vsub.f32 0.0, %v1616_v16 }
 0x184   : > { %v801_v14 = vmul.f32 1.0614054, %v5518_v31  ;;  %v3930_v43 = vpop.eup %3929  ;;  %v1407_v41 = vmul.f32 %v1375_v3, %v5431_v61  ;;  %v1775_v46 = vadd.f32 -1.4531521, %v1743_v8  ;;  %v1680_v13 = vadd.f32 1.0, %v1648_v6 }
 0x185   : > { %v1998_v23 = vmul.f32 %v5442_v35, %v1966_v58  ;;  %v992_v30 = vmul.f32 %v5460_v32, %v960_v54  ;;  %v674_v53 = vand.u32 2147483647, %v5509_v26  ;;  %v5535_v60 = vadd.f32 %v5480_v56, %v1482_v45 }
 0x186   : > { %v833_v57 = vadd.f32 -1.4531521, %v801_v14  ;;  %3669 = vmatprep.mubr.msk.f32.mxu0 %vm2357_vm3, %v1407_v41  ;;  %v1807_v17 = vmul.f32 %v5511_v11, %v1775_v46  ;;  %3935 = vrcp.f32 %v1680_v13  ;;  %v5539_v39 = vmul.f32 0.5, %v5386_v48 }
 0x187   : > { %v3932_v61 = vpop.eup %3931  ;;  %v2158_v18 = vmul.f32 %v3930_v43, %v1998_v23  ;;  %v1024_v22 = vadd.f32 0.2548296, %v992_v30  ;;  %v706_v38 = vmul.f32 0.3275911, %v674_v53  ;;  %3937 = vpow2.f32 %v1179_v1 }
 0x188   : > { %v865_v35 = vmul.f32 %v5518_v31, %v833_v57  ;;  %v1839_v33 = vadd.f32 1.4214138, %v1807_v17  ;;  %v540_v47 = vmul.f32 %v5488_v63, %v501_v29  ;;  %v5542_v3 = vpop.f32.mrb[8].mxu1  ;;  %v2064_v43 = vmul.f32 %v2032_v19, %v1616_v16  ;;  %v1444_v16 = vld [vmem:[%s4090_s15 + $0xe8] sm:$0xff] }
 0x189   : > { %v2190_v8 = vsub.f32 1.0, %v2158_v18  ;;  %v1056_v6 = vmul.f32 %v5460_v32, %v1024_v22  ;;  %v738_v58 = vadd.f32 1.0, %v706_v38  ;;  %v5545_v54 = vpop.f32.mrb[9].mxu1  ;;  %v1090_v41 = vsub.f32 0.0, %v674_v53 }
 0x18a   : > { %v897_v45 = vadd.f32 1.4214138, %v865_v35  ;;  %v1871_v14 = vmul.f32 %v5511_v11, %v1839_v33  ;;  %v5549_v48 = vmul.f32 0.70710677, %v5535_v60  ;;  %v5552_v23 = vpop.f32.mrb[8].mxu0  ;;  %vm1280_vm7 = vcmp.ge.f32.partialorder %v5360_v15, 0.0 }
 0x18b   : > { %v2254_v1 = vsub.f32 0.0, %v2190_v8  ;;  %v1216_v46 = vmul.f32 %v3932_v61, %v1056_v6  ;;  %3939 = vrcp.f32 %v738_v58  ;;  %v5557_v57 = vadd.f32 %v5501_v36, %v540_v47  ;;  %v5565_v18 = vpop.f32.mrb[9].mxu0 }
 0x18c   : > { %v929_v13 = vmul.f32 %v5518_v31, %v897_v45  ;;  %v1903_v32 = vadd.f32 -0.28449672, %v1871_v14  ;;  %v1617_v30 = vand.u32 2147483647, %v5549_v48  ;;  %v5563_v19 = vmul.f32 0.5, %v5390_v20  ;;  %6034 = vst [vmem:[#allocation2_spill] sm:$0xff] %v5565_v18 }
 0x18d   : > { %v2286_v29 = vsel %vm2222_vm6, %v2190_v8, %v2254_v1  ;;  %v1248_v17 = vsub.f32 1.0, %v1216_v46  ;;  %v3934_v22 = vpop.eup %3933  ;;  %v2123_v33 = vmul.f32 1.442695, %v2064_v43  ;;  %vm2223_vm8 = vcmp.ge.f32.partialorder %v5410_v49, 0.0 }
 0x18e   : > { %v961_v61 = vadd.f32 -0.28449672, %v929_v13  ;;  %v2318_v35 = vadd.f32 1.0, %v2286_v29  ;;  %v1935_v38 = vmul.f32 %v5511_v11, %v1903_v32  ;;  %v1649_v6 = vmul.f32 0.3275911, %v1617_v30 }
 0x18f   : > { %v1312_v45 = vsub.f32 0.0, %v1248_v17  ;;  %v1122_v47 = vmul.f32 %v1090_v41, %v674_v53  ;;  %v1483_v8 = vmul.f32 %v5471_v2, %v1444_v16  ;;  %vm1281_vm9 = vcmp.ge.f32.partialorder %v5418_v44, 0.0 }
 0x190   : > { %v993_v28 = vmul.f32 %v5518_v31, %v961_v61  ;;  %v5571_v20 = vpop.eup %3935  ;;  %v2350_v58 = vmul.f32 %v2318_v35, %v5457_v5  ;;  %v1967_v14 = vadd.f32 0.2548296, %v1935_v38  ;;  %v1681_v1 = vadd.f32 1.0, %v1649_v6 }
 0x191   : > { %v5576_v43 = vmul.f32 0.70710677, %v5557_v57  ;;  %v1344_v46 = vsel %vm1280_vm7, %v1248_v17, %v1312_v45  ;;  %v1744_v32 = vmul.f32 1.0614054, %v5571_v20  ;;  %v2033_v53 = vsub.f32 0.0, %v1617_v30  ;;  %v3938_v41 = vpop.eup %3937 }
 0x192   : > { %v1025_v13 = vadd.f32 0.2548296, %v993_v28  ;;  %2383 = vst.msk [vmem:[%s4293_s30 + $0xc8] sm:$0xff] %vm2357_vm3, %v2350_v58  ;;  %3620 = vmatmul.mubr.msk.f32.gmra.mrb[24].mxu1 %vm2357_vm3, %v2350_v58  ;;  %v1376_v5 = vadd.f32 1.0, %v1344_v46  ;;  %v1999_v16 = vmul.f32 %v5511_v11, %v1967_v14  ;;  %3941 = vrcp.f32 %v1681_v1 }
 0x193   : > { %v675_v29 = vand.u32 2147483647, %v5576_v43  ;;  %v5588_v15 = vmul.f32 0.5, %v5483_v59  ;;  %v1776_v17 = vadd.f32 -1.4531521, %v1744_v32  ;;  %v5592_v45 = vmul.f32 0.5, %v5504_v10 }
 0x194   : > { %v1057_v61 = vmul.f32 %v5518_v31, %v1025_v13  ;;  %v1181_v35 = vmul.f32 1.442695, %v1122_v47  ;;  %v1408_v38 = vmul.f32 %v1376_v5, %v5475_v34  ;;  %v2159_v6 = vmul.f32 %v3934_v22, %v1999_v16  ;;  %v502_v13 = vld [vmem:[%s4107_s24 + $0xe8] sm:$0xff] }
 0x195   : > { %v707_v28 = vmul.f32 0.3275911, %v675_v29  ;;  %v5594_v58 = vpop.eup %3939  ;;  %v1808_v14 = vmul.f32 %v5571_v20, %v1776_v17  ;;  %v2065_v1 = vmul.f32 %v2033_v53, %v1617_v30  ;;  %v1522_v31 = vadd.f32 %v5480_v56, %v1483_v8 }
 0x196   : > { %v1217_v11 = vmul.f32 %v3938_v41, %v1057_v61  ;;  %3670 = vmatmul.mubr.msk.f32.gmra.mrb[24].mxu0 %vm2357_vm3, %v1408_v38  ;;  %v2191_v59 = vsub.f32 1.0, %v2159_v6  ;;  %3943 = vpow2.f32 %v2123_v33  ;;  %v802_v34 = vmul.f32 1.0614054, %v5594_v58 }
 0x197   : > { %v739_v22 = vadd.f32 1.0, %v707_v28  ;;  %v1840_v10 = vadd.f32 1.4214138, %v1808_v14  ;;  %3945 = vpow2.f32 %v1181_v35  ;;  %v5600_v46 = vmul.f32 0.70710677, %v1522_v31 }
 0x198   : > { %v1249_v47 = vsub.f32 1.0, %v1217_v11  ;;  %v2255_v32 = vsub.f32 0.0, %v2191_v59  ;;  %v834_v41 = vadd.f32 -1.4531521, %v802_v34  ;;  %v5604_v5 = vmul.f32 0.5, %v5535_v60 }
 0x199   : > { %3947 = vrcp.f32 %v739_v22  ;;  %v1872_v8 = vmul.f32 %v5571_v20, %v1840_v10  ;;  %v2125_v53 = vmul.f32 1.442695, %v2065_v1  ;;  %v1618_v33 = vand.u32 2147483647, %v5600_v46 }
 0x19a   : > { %v1313_v30 = vsub.f32 0.0, %v1249_v47  ;;  %v2287_v16 = vsel %vm2223_vm8, %v2191_v59, %v2255_v32  ;;  %v866_v61 = vmul.f32 %v5594_v58, %v834_v41  ;;  %v1091_v17 = vsub.f32 0.0, %v675_v29  ;;  %v1445_v32 = vld [vmem:[%s4090_s15 + $0xf0] sm:$0xff] }
 0x19b   : > { %v541_v35 = vmul.f32 %v5488_v63, %v502_v13  ;;  %v2319_v38 = vadd.f32 1.0, %v2287_v16  ;;  %v1904_v6 = vadd.f32 -0.28449672, %v1872_v8  ;;  %v1650_v28 = vmul.f32 0.3275911, %v1618_v33  ;;  %v5614_v11 = vpop.f32.mrb[10].mxu1 }
 0x19c   : > { %v1345_v60 = vsel %vm1281_vm9, %v1249_v47, %v1313_v30  ;;  %6035 = vst [vmem:[#allocation3_spill] sm:$0xff] %v5614_v11  ;;  %v5616_v14 = vpop.eup %3941  ;;  %v898_v49 = vadd.f32 1.4214138, %v866_v61  ;;  %v2034_v59 = vsub.f32 0.0, %v1618_v33  ;;  %v5619_v22 = vpop.f32.mrb[11].mxu1  ;;  %vm2224_vm10 = vcmp.ge.f32.partialorder %v5496_v50, 0.0 }
 0x19d   : > { %v1377_v1 = vadd.f32 1.0, %v1345_v60  ;;  %v580_v34 = vadd.f32 %v5501_v36, %v541_v35  ;;  %6036 = vst [vmem:[#allocation4_spill] sm:$0xff] %v5619_v22  ;;  %v2351_v10 = vmul.f32 %v2319_v38, %v5539_v39  ;;  %v1936_v13 = vmul.f32 %v5571_v20, %v1904_v6 }
 0x19e   : > { %v1745_v44 = vmul.f32 1.0614054, %v5616_v14  ;;  %v1682_v47 = vadd.f32 1.0, %v1650_v28  ;;  %v930_v30 = vmul.f32 %v5594_v58, %v898_v49  ;;  %v1123_v8 = vmul.f32 %v1091_v17, %v675_v29  ;;  %v503_v49 = vld [vmem:[%s4107_s24 + $0xf0] sm:$0xff] }
 0x19f   : > { %v1409_v41 = vmul.f32 %v1377_v1, %v5563_v19  ;;  %v2066_v16 = vmul.f32 %v2034_v59, %v1618_v33  ;;  %2384 = vst.msk [vmem:[%s4293_s30 + $0xd0] sm:$0xff] %vm2357_vm3, %v2351_v10  ;;  %3622 = vmatprep.mubr.msk.f32.mxu1 %vm2357_vm3, %v2351_v10  ;;  %v1968_v39 = vadd.f32 0.2548296, %v1936_v13  ;;  %v5631_v35 = vmul.f32 0.70710677, %v580_v34 }
 0x1a0   : > { %v1777_v61 = vadd.f32 -1.4531521, %v1745_v44  ;;  %3949 = vrcp.f32 %v1682_v47  ;;  %v3944_v38 = vpop.eup %3943  ;;  %v962_v19 = vadd.f32 -0.28449672, %v930_v30  ;;  %v5635_v60 = vmul.f32 0.5, %v5557_v57 }
 0x1a1   : > { %3672 = vmatprep.mubr.msk.f32.mxu0 %vm2357_vm3, %v1409_v41  ;;  %3951 = vpow2.f32 %v2125_v53  ;;  %v1484_v29 = vmul.f32 %v5471_v2, %v1445_v32  ;;  %v3946_v33 = vpop.eup %3945  ;;  %v2000_v17 = vmul.f32 %v5571_v20, %v1968_v39  ;;  %v5640_v28 = vmul.f32 0.5, %v1522_v31 }
 0x1a2   : > { %v1809_v6 = vmul.f32 %v5616_v14, %v1777_v61  ;;  %v676_v1 = vand.u32 2147483647, %v5631_v35  ;;  %v994_v10 = vmul.f32 %v5594_v58, %v962_v19  ;;  %v1183_v53 = vmul.f32 1.442695, %v1123_v8 }
 0x1a3   : > { %v5644_v59 = vpop.eup %3947  ;;  %v2127_v13 = vmul.f32 1.442695, %v2066_v16  ;;  %v1523_v57 = vadd.f32 %v5480_v56, %v1484_v29  ;;  %v2160_v44 = vmul.f32 %v3944_v38, %v2000_v17  ;;  %vm1282_vm11 = vcmp.ge.f32.partialorder %v5509_v26, 0.0 }
 0x1a4   : > { %v1841_v47 = vadd.f32 1.4214138, %v1809_v6  ;;  %v803_v20 = vmul.f32 1.0614054, %v5644_v59  ;;  %v708_v32 = vmul.f32 0.3275911, %v676_v1  ;;  %v542_v39 = vmul.f32 %v5488_v63, %v503_v49 }
 0x1a5   : > { %v1026_v31 = vadd.f32 0.2548296, %v994_v10  ;;  %v1092_v41 = vsub.f32 0.0, %v676_v1  ;;  %v5650_v30 = vmul.f32 0.70710677, %v1523_v57  ;;  %v2192_v61 = vsub.f32 1.0, %v2160_v44 }
 0x1a6   : > { %v1873_v19 = vmul.f32 %v5616_v14, %v1841_v47  ;;  %v835_v8 = vadd.f32 -1.4531521, %v803_v20  ;;  %v740_v16 = vadd.f32 1.0, %v708_v32  ;;  %v5654_v22 = vpop.f32.mrb[10].mxu0  ;;  %3953 = vpow2.f32 %v1183_v53 }
 0x1a7   : > { %v1058_v38 = vmul.f32 %v5594_v58, %v1026_v31  ;;  %v1124_v29 = vmul.f32 %v1092_v41, %v676_v1  ;;  %v1619_v17 = vand.u32 2147483647, %v5650_v30  ;;  %v5658_v6 = vpop.f32.mrb[11].mxu0  ;;  %v2256_v10 = vsub.f32 0.0, %v2192_v61 }
 0x1a8   : > { %v1905_v11 = vadd.f32 -0.28449672, %v1873_v19  ;;  %v867_v18 = vmul.f32 %v5644_v59, %v835_v8  ;;  %3955 = vrcp.f32 %v740_v16  ;;  %v5661_v44 = vmul.f32 0.5, %v580_v34 }
 0x1a9   : > { %v1218_v49 = vmul.f32 %v3946_v33, %v1058_v38  ;;  %v1651_v47 = vmul.f32 0.3275911, %v1619_v17  ;;  %v581_v20 = vadd.f32 %v5501_v36, %v542_v39  ;;  %v2288_v58 = vsel %vm2224_vm10, %v2192_v61, %v2256_v10 }
 0x1aa   : > { %v5664_v32 = vpop.eup %3949  ;;  %v1937_v1 = vmul.f32 %v5616_v14, %v1905_v11  ;;  %v899_v53 = vadd.f32 1.4214138, %v867_v18  ;;  %3957 = vpow2.f32 %v2127_v13  ;;  %v2320_v41 = vadd.f32 1.0, %v2288_v58  ;;  %v1446_v58 = vld [vmem:[%s4090_s15 + $0xf8] sm:$0xff] }
 0x1ab   : > { %v3952_v31 = vpop.eup %3951  ;;  %v1250_v19 = vsub.f32 1.0, %v1218_v49  ;;  %vm2225_vm12 = vcmp.ge.f32.partialorder %v5549_v48, 0.0  ;;  %v1746_v34 = vmul.f32 1.0614054, %v5664_v32  ;;  %v2035_v33 = vsub.f32 0.0, %v1619_v17 }
 0x1ac   : > { %v1969_v39 = vadd.f32 0.2548296, %v1937_v1  ;;  %v931_v8 = vmul.f32 %v5644_v59, %v899_v53  ;;  %v1185_v16 = vmul.f32 1.442695, %v1124_v29  ;;  %v1683_v50 = vadd.f32 1.0, %v1651_v47  ;;  %v504_v53 = vld [vmem:[%s4107_s24 + $0xf8] sm:$0xff] }
 0x1ad   : > { %v2352_v11 = vmul.f32 %v2320_v41, %v5588_v15  ;;  %v1314_v18 = vsub.f32 0.0, %v1250_v19  ;;  %v1778_v13 = vadd.f32 -1.4531521, %v1746_v34  ;;  %v5673_v61 = vmul.f32 0.70710677, %v581_v20 }
 0x1ae   : > { %v2001_v38 = vmul.f32 %v5616_v14, %v1969_v39  ;;  %v963_v10 = vadd.f32 -0.28449672, %v931_v8  ;;  %v5676_v49 = vmul.f32 0.5, %v1523_v57  ;;  %3959 = vrcp.f32 %v1683_v50 }
 0x1af   : > { %2385 = vst.msk [vmem:[%s4293_s30 + $0xd8] sm:$0xff] %vm2357_vm3, %v2352_v11  ;;  %3623 = vmatmul.mubr.msk.f32.gmra.mrb[26].mxu1 %vm2357_vm3, %v2352_v11  ;;  %v1346_v29 = vsel %vm1282_vm11, %v1250_v19, %v1314_v18  ;;  %v1810_v15 = vmul.f32 %v5664_v32, %v1778_v13  ;;  %v2067_v47 = vmul.f32 %v2035_v33, %v1619_v17  ;;  %v677_v1 = vand.u32 2147483647, %v5673_v61 }
 0x1b0   : > { %v1378_v41 = vadd.f32 1.0, %v1346_v29  ;;  %v2161_v14 = vmul.f32 %v3952_v31, %v2001_v38  ;;  %v995_v57 = vmul.f32 %v5644_v59, %v963_v10  ;;  %3961 = vpow2.f32 %v1185_v16  ;;  %v3954_v34 = vpop.eup %3953 }
 0x1b1   : > { %vm1283_vm13 = vcmp.ge.f32.partialorder %v5576_v43, 0.0  ;;  %v1842_v39 = vadd.f32 1.4214138, %v1810_v15  ;;  %v709_v8 = vmul.f32 0.3275911, %v677_v1  ;;  %v1093_v50 = vsub.f32 0.0, %v677_v1 }
 0x1b2   : > { %v1485_v26 = vmul.f32 %v5471_v2, %v1446_v58  ;;  %v5690_v19 = vpop.eup %3955  ;;  %v1410_v17 = vmul.f32 %v1378_v41, %v5592_v45  ;;  %v2193_v33 = vsub.f32 1.0, %v2161_v14  ;;  %v1027_v11 = vadd.f32 0.2548296, %v995_v57 }
 0x1b3   : > { %v543_v18 = vmul.f32 %v5488_v63, %v504_v53  ;;  %v1874_v31 = vmul.f32 %v5664_v32, %v1842_v39  ;;  %v804_v16 = vmul.f32 1.0614054, %v5690_v19  ;;  %v2129_v13 = vmul.f32 1.442695, %v2067_v47 }
 0x1b4   : > { %v741_v38 = vadd.f32 1.0, %v709_v8  ;;  %v3958_v10 = vpop.eup %3957  ;;  %3673 = vmatmul.mubr.msk.f32.gmra.mrb[26].mxu0 %vm2357_vm3, %v1410_v17  ;;  %v2257_v29 = vsub.f32 0.0, %v2193_v33  ;;  %v1059_v2 = vmul.f32 %v5644_v59, %v1027_v11  ;;  %v1125_v58 = vmul.f32 %v1093_v50, %v677_v1 }
 0x1b5   : > { %v1524_v15 = vadd.f32 %v5480_v56, %v1485_v26  ;;  %v1906_v45 = vadd.f32 -0.28449672, %v1874_v31  ;;  %v836_v41 = vadd.f32 -1.4531521, %v804_v16  ;;  %v5699_v14 = vmul.f32 0.5, %v581_v20 }
 0x1b6   : > { %3963 = vrcp.f32 %v741_v38  ;;  %v2289_v63 = vsel %vm2225_vm12, %v2193_v33, %v2257_v29  ;;  %v1219_v53 = vmul.f32 %v3954_v34, %v1059_v2  ;;  %v582_v57 = vadd.f32 %v5501_v36, %v543_v18 }
 0x1b7   : > { %v5703_v47 = vmul.f32 0.70710677, %v1524_v15  ;;  %v2321_v39 = vadd.f32 1.0, %v2289_v63  ;;  %v1938_v8 = vmul.f32 %v5664_v32, %v1906_v45  ;;  %v868_v59 = vmul.f32 %v5690_v19, %v836_v41 }
 0x1b8   : > { %3965 = vpow2.f32 %v2129_v13  ;;  %v5708_v56 = vpop.eup %3959  ;;  %v1251_v20 = vsub.f32 1.0, %v1219_v53  ;;  %vm2226_vm14 = vcmp.ge.f32.partialorder %v5600_v46, 0.0  ;;  %v1187_v1 = vmul.f32 1.442695, %v1125_v58 }
 0x1b9   : > { %v5711_v48 = vmul.f32 0.5, %v1524_v15  ;;  %v1620_v34 = vand.u32 2147483647, %v5703_v47  ;;  %v2353_v50 = vmul.f32 %v2321_v39, %v5604_v5  ;;  %v1970_v36 = vadd.f32 0.2548296, %v1938_v8 }
 0x1ba   : > { %v900_v26 = vadd.f32 1.4214138, %v868_v59  ;;  %v1747_v17 = vmul.f32 1.0614054, %v5708_v56  ;;  %v3962_v33 = vpop.eup %3961  ;;  %v1315_v11 = vsub.f32 0.0, %v1251_v20  ;;  %v2881_v5 = vadd.f32 %v5378_v12, %v5376_v27 }
 0x1bb   : > { %v1652_v18 = vmul.f32 0.3275911, %v1620_v34  ;;  %v2036_v31 = vsub.f32 0.0, %v1620_v34  ;;  %v5716_v16 = vmul.f32 0.70710677, %v582_v57  ;;  %2386 = vst.msk [vmem:[%s4293_s30 + $0xe0] sm:$0xff] %vm2357_vm3, %v2353_v50  ;;  %3625 = vmatprep.mubr.msk.f32.mxu1 %vm2357_vm3, %v2353_v50  ;;  %v2002_v13 = vmul.f32 %v5664_v32, %v1970_v36 }
 0x1bc   : > { %v932_v38 = vmul.f32 %v5690_v19, %v900_v26  ;;  %v1779_v29 = vadd.f32 -1.4531521, %v1747_v17  ;;  %v1347_v2 = vsel %vm1283_vm13, %v1251_v20, %v1315_v11  ;;  %v5728_v41 = vpop.f32.mrb[12].mxu1  ;;  %vm1284_vm15 = vcmp.ge.f32.partialorder %v5631_v35, 0.0 }
 0x1bd   : > { %v1684_v58 = vadd.f32 1.0, %v1652_v18  ;;  %v2068_v15 = vmul.f32 %v2036_v31, %v1620_v34  ;;  %v678_v45 = vand.u32 2147483647, %v5716_v16  ;;  %v1379_v63 = vadd.f32 1.0, %v1347_v2  ;;  %v5731_v8 = vpop.f32.mrb[13].mxu1 }
 0x1be   : > { %v2162_v53 = vmul.f32 %v3958_v10, %v2002_v13  ;;  %v964_v39 = vadd.f32 -0.28449672, %v932_v38  ;;  %v1811_v32 = vmul.f32 %v5708_v56, %v1779_v29  ;;  %v5740_v10 = vld [vmem:[%s6029_s8] ss:$0 sm:$0xff]  ;;  %v5752_v29 = vmul.f32 0.5, %v582_v57 }
 0x1bf   : > { %3967 = vrcp.f32 %v1684_v58  ;;  %v2131_v59 = vmul.f32 1.442695, %v2068_v15  ;;  %v710_v50 = vmul.f32 0.3275911, %v678_v45  ;;  %v1094_v27 = vsub.f32 0.0, %v678_v45 }
 0x1c0   : > { %v5733_v12 = vpop.eup %3963  ;;  %v1411_v43 = vmul.f32 %v1379_v63, %v5635_v60  ;;  %v2194_v20 = vsub.f32 1.0, %v2162_v53  ;;  %v996_v34 = vmul.f32 %v5690_v19, %v964_v39  ;;  %v1843_v36 = vadd.f32 1.4214138, %v1811_v32 }
 0x1c1   : > { %v805_v26 = vmul.f32 1.0614054, %v5733_v12  ;;  %3969 = vpow2.f32 %v1187_v1  ;;  %v742_v17 = vadd.f32 1.0, %v710_v50  ;;  %v1126_v11 = vmul.f32 %v1094_v27, %v678_v45 }
 0x1c2   : > { %v3966_v18 = vpop.eup %3965  ;;  %3675 = vmatprep.mubr.msk.f32.mxu0 %vm2357_vm3, %v1411_v43  ;;  %v2258_v60 = vsub.f32 0.0, %v2194_v20  ;;  %v1028_v31 = vadd.f32 0.2548296, %v996_v34  ;;  %v1875_v13 = vmul.f32 %v5708_v56, %v1843_v36  ;;  %3971 = vpow2.f32 %v2131_v59 }
 0x1c3   : > { %v837_v38 = vadd.f32 -1.4531521, %v805_v26  ;;  %3973 = vrcp.f32 %v742_v17  ;;  %v3042_v1 = vadd.f32 %v5740_v10, %v2881_v5  ;;  %v2876_v45 = vadd.f32 %v5383_v21, %v5381_v40 }
 0x1c4   : > { %v2290_v2 = vsel %vm2226_vm14, %v2194_v20, %v2258_v60  ;;  %v1060_v58 = vmul.f32 %v5690_v19, %v1028_v31  ;;  %v1907_v15 = vadd.f32 -0.28449672, %v1875_v13  ;;  %v1189_v39 = vmul.f32 1.442695, %v1126_v11  ;;  %v5772_v27 = vpop.f32.mrb[12].mxu0 }
 0x1c5   : > { %v2322_v63 = vadd.f32 1.0, %v2290_v2  ;;  %v869_v53 = vmul.f32 %v5733_v12, %v837_v38  ;;  %3074 = vst.msk [vmem:[%s5750_s16 + $0x8] sm:$0xff] %vm2357_vm3, %v3042_v1  ;;  %v3106_v57 = vsel %vm2357_vm3, %v3042_v1, 0.0  ;;  %v3169_v46 = vmul.f32 %v3042_v1, %v3042_v1 }
 0x1c6   : > { %v1220_v32 = vmul.f32 %v3962_v33, %v1060_v58  ;;  %v1939_v5 = vmul.f32 %v5708_v56, %v1907_v15  ;;  %v3041_v19 = vadd.f32 %v5740_v10, %v2876_v45  ;;  %vm2227_vm0 = vcmp.ge.f32.partialorder %v5650_v30, 0.0 }
 0x1c7   : > { %v2354_v59 = vmul.f32 %v2322_v63, %v5640_v28  ;;  %v901_v40 = vadd.f32 1.4214138, %v869_v53  ;;  %v2891_v21 = vadd.f32 %v5399_v42, %v5392_v37  ;;  %v2886_v50 = vadd.f32 %v5405_v0, %v5401_v7  ;;  %v5778_v28 = vpop.f32.mrb[13].mxu0 }
 0x1c8   : > { %v1252_v33 = vsub.f32 1.0, %v1220_v32  ;;  %v1971_v43 = vadd.f32 0.2548296, %v1939_v5  ;;  %v3201_v20 = vsel %vm2357_vm3, %v3169_v46, 0.0  ;;  %3073 = vst.msk [vmem:[%s5750_s16] sm:$0xff] %vm2357_vm3, %v3041_v19  ;;  %v3105_v34 = vsel %vm2357_vm3, %v3041_v19, 0.0 }
 0x1c9   : > { %v5780_v36 = vpop.eup %3967  ;;  %2387 = vst.msk [vmem:[%s4293_s30 + $0xe8] sm:$0xff] %vm2357_vm3, %v2354_v59  ;;  %3626 = vmatmul.mubr.msk.f32.gmra.mrb[28].mxu1 %vm2357_vm3, %v2354_v59  ;;  %v933_v37 = vmul.f32 %v5733_v12, %v901_v40  ;;  %v3107_v42 = vadd.f32 %v3106_v57, %v3105_v34  ;;  %v3168_v7 = vmul.f32 %v3041_v19, %v3041_v19  ;;  %3975 = vpow2.f32 %v1189_v39 }
 0x1ca   : > { %v3044_v0 = vadd.f32 %v5740_v10, %v2891_v21  ;;  %v1316_v26 = vsub.f32 0.0, %v1252_v33  ;;  %v2003_v17 = vmul.f32 %v5708_v56, %v1971_v43  ;;  %v1748_v11 = vmul.f32 1.0614054, %v5780_v36 }
 0x1cb   : > { %v3043_v60 = vadd.f32 %v5740_v10, %v2886_v50  ;;  %v3970_v31 = vpop.eup %3969  ;;  %v965_v13 = vadd.f32 -0.28449672, %v933_v37  ;;  %v3200_v38 = vsel %vm2357_vm3, %v3168_v7, 0.0  ;;  %vm1285_vm1 = vcmp.ge.f32.partialorder %v5673_v61, 0.0 }
 0x1cc   : > { %3076 = vst.msk [vmem:[%s5750_s16 + $0x18] sm:$0xff] %vm2357_vm3, %v3044_v0  ;;  %v3110_v1 = vsel %vm2357_vm3, %v3044_v0, 0.0  ;;  %v5794_v2 = vpop.eup %3971  ;;  %v1348_v58 = vsel %vm1284_vm15, %v1252_v33, %v1316_v26  ;;  %v2163_v15 = vmul.f32 %v3966_v18, %v2003_v17  ;;  %v1780_v56 = vadd.f32 -1.4531521, %v1748_v11 }
 0x1cd   : > { %v3202_v45 = vadd.f32 %v3201_v20, %v3200_v38  ;;  %3075 = vst.msk [vmem:[%s5750_s16 + $0x10] sm:$0xff] %vm2357_vm3, %v3043_v60  ;;  %v5800_v63 = vpop.eup %3973  ;;  %v1380_v53 = vadd.f32 1.0, %v1348_v58  ;;  %v997_v39 = vmul.f32 %v5733_v12, %v965_v13  ;;  %v3171_v57 = vmul.f32 %v3044_v0, %v3044_v0 }
 0x1ce   : > { %v3108_v32 = vsel %vm2357_vm3, %v3043_v60, 0.0  ;;  %v2195_v5 = vsub.f32 1.0, %v2163_v15  ;;  %v1812_v46 = vmul.f32 %v5780_v36, %v1780_v56  ;;  %v806_v35 = vmul.f32 1.0614054, %v5800_v63 }
 0x1cf   : > { %v3109_v18 = vadd.f32 %v3108_v32, %v3107_v42  ;;  %v1412_v19 = vmul.f32 %v1380_v53, %v5661_v44  ;;  %v1029_v59 = vadd.f32 0.2548296, %v997_v39  ;;  %v3170_v40 = vmul.f32 %v3043_v60, %v3043_v60 }
 0x1d0   : > { %v2901_v21 = vadd.f32 %v5412_v51, %v5407_v24  ;;  %v2259_v50 = vsub.f32 0.0, %v2195_v5  ;;  %v1844_v33 = vadd.f32 1.4214138, %v1812_v46  ;;  %v838_v43 = vadd.f32 -1.4531521, %v806_v35 }
 0x1d1   : > { %v2896_v20 = vadd.f32 %v5424_v4, %v5422_v52  ;;  %3676 = vmatmul.mubr.msk.f32.gmra.mrb[28].mxu0 %vm2357_vm3, %v1412_v19  ;;  %v1061_v34 = vmul.f32 %v5733_v12, %v1029_v59  ;;  %v3203_v37 = vsel %vm2357_vm3, %v3170_v40, 0.0  ;;  %v3111_v42 = vadd.f32 %v3110_v1, %v3109_v18 }
 0x1d2   : > { %v3046_v44 = vadd.f32 %v5740_v10, %v2901_v21  ;;  %v2291_v7 = vsel %vm2227_vm0, %v2195_v5, %v2259_v50  ;;  %v1876_v24 = vmul.f32 %v5780_v36, %v1844_v33  ;;  %v870_v51 = vmul.f32 %v5800_v63, %v838_v43 }
 0x1d3   : > { %v3204_v0 = vadd.f32 %v3203_v37, %v3202_v45  ;;  %v2323_v26 = vadd.f32 1.0, %v2291_v7  ;;  %v1221_v52 = vmul.f32 %v3970_v31, %v1061_v34  ;;  %v3205_v4 = vsel %vm2357_vm3, %v3171_v57, 0.0  ;;  %v3976_v13 = vpop.eup %3975 }
 0x1d4   : > { %3078 = vst.msk [vmem:[%s5750_s16 + $0x28] sm:$0xff] %vm2357_vm3, %v3046_v44  ;;  %v3114_v12 = vsel %vm2357_vm3, %v3046_v44, 0.0  ;;  %v1908_v17 = vadd.f32 -0.28449672, %v1876_v24  ;;  %v902_v11 = vadd.f32 1.4214138, %v870_v51  ;;  %v3045_v30 = vadd.f32 %v5740_v10, %v2896_v20 }
 0x1d5   : > { %v3206_v60 = vadd.f32 %v3205_v4, %v3204_v0  ;;  %v2355_v38 = vmul.f32 %v2323_v26, %v5676_v49  ;;  %v1253_v1 = vsub.f32 1.0, %v1221_v52  ;;  %v3173_v58 = vmul.f32 %v3046_v44, %v3046_v44  ;;  %v6038_v26 = vld [vmem:[#allocation3_spill] sm:$0xff] }
 0x1d6   : > { %v2911_v31 = vadd.f32 %v5436_v55, %v5434_v9  ;;  %v1940_v15 = vmul.f32 %v5780_v36, %v1908_v17  ;;  %v934_v56 = vmul.f32 %v5800_v63, %v902_v11  ;;  %3077 = vst.msk [vmem:[%s5750_s16 + $0x20] sm:$0xff] %vm2357_vm3, %v3045_v30  ;;  %v3112_v45 = vsel %vm2357_vm3, %v3045_v30, 0.0 }
 0x1d7   : > { %v3172_v53 = vmul.f32 %v3045_v30, %v3045_v30  ;;  %2388 = vst.msk [vmem:[%s4293_s30 + $0xf0] sm:$0xff] %vm2357_vm3, %v2355_v38  ;;  %3628 = vmatprep.mubr.msk.f32.mxu1 %vm2357_vm3, %v2355_v38  ;;  %v1317_v49 = vsub.f32 0.0, %v1253_v1  ;;  %vm2228_vm2 = vcmp.ge.f32.partialorder %v5703_v47, 0.0  ;;  %v3113_v39 = vadd.f32 %v3112_v45, %v3111_v42  ;;  %v5848_v40 = vpop.f32.mrb[14].mxu1  ;;  %v6039_v30 = vld [vmem:[#allocation4_spill] sm:$0xff] }
 0x1d8   : > { %v3048_v9 = vadd.f32 %v5740_v10, %v2911_v31  ;;  %v2906_v55 = vadd.f32 %v5452_v62, %v5440_v25  ;;  %v1972_v57 = vadd.f32 0.2548296, %v1940_v15  ;;  %v966_v32 = vadd.f32 -0.28449672, %v934_v56 }
 0x1d9   : > { %v3207_v5 = vsel %vm2357_vm3, %v3172_v53, 0.0  ;;  %v2921_v46 = vadd.f32 %v5552_v23, %v5542_v3  ;;  %v1349_v35 = vsel %vm1285_vm1, %v1253_v1, %v1317_v49  ;;  %v3209_v18 = vsel %vm2357_vm3, %v3173_v58, 0.0  ;;  %v5853_v23 = vpop.f32.mrb[15].mxu1 }
 0x1da   : > { %v3208_v19 = vadd.f32 %v3207_v5, %v3206_v60  ;;  %3080 = vst.msk [vmem:[%s5750_s16 + $0x38] sm:$0xff] %vm2357_vm3, %v3048_v9  ;;  %v3175_v59 = vmul.f32 %v3048_v9, %v3048_v9  ;;  %v1381_v25 = vadd.f32 1.0, %v1349_v35  ;;  %v2004_v62 = vmul.f32 %v5780_v36, %v1972_v57  ;;  %v3656_v24 = vpop.f32.mrb[14].mxu0 }
 0x1db   : > { %v998_v21 = vmul.f32 %v5800_v63, %v966_v32  ;;  %v3047_v3 = vadd.f32 %v5740_v10, %v2906_v55  ;;  %vm1286_vm4 = vcmp.ge.f32.partialorder %v5716_v16, 0.0  ;;  %v3115_v61 = vadd.f32 %v3114_v12, %v3113_v39  ;;  %v2945_v4 = vpop.f32.mrb[15].mxu0 }
 0x1dc   : > { %v3210_v50 = vadd.f32 %v3209_v18, %v3208_v19  ;;  %v3050_v33 = vadd.f32 %v5740_v10, %v2921_v46  ;;  %v1413_v43 = vmul.f32 %v1381_v25, %v5699_v14  ;;  %v2164_v20 = vmul.f32 %v5794_v2, %v2004_v62  ;;  %v6037_v2 = vld [vmem:[#allocation2_spill] sm:$0xff] }
 0x1dd   : > { %v1030_v34 = vadd.f32 0.2548296, %v998_v21  ;;  %3079 = vst.msk [vmem:[%s5750_s16 + $0x30] sm:$0xff] %vm2357_vm3, %v3047_v3  ;;  %v3116_v36 = vsel %vm2357_vm3, %v3047_v3, 0.0  ;;  %v3118_v37 = vsel %vm2357_vm3, %v3048_v9, 0.0  ;;  %v3213_v44 = vsel %vm2357_vm3, %v3175_v59, 0.0 }
 0x1de   : > { %v3117_v42 = vadd.f32 %v3116_v36, %v3115_v61  ;;  %v3174_v7 = vmul.f32 %v3047_v3, %v3047_v3  ;;  %3082 = vst.msk [vmem:[%s5750_s16 + $0x48] sm:$0xff] %vm2357_vm3, %v3050_v33  ;;  %3678 = vmatprep.mubr.msk.f32.mxu0 %vm2357_vm3, %v1413_v43  ;;  %v2196_v51 = vsub.f32 1.0, %v2164_v20  ;;  %v2916_v0 = vadd.f32 %v6037_v2, %v5545_v54 }
 0x1df   : > { %v1062_v14 = vmul.f32 %v5800_v63, %v1030_v34  ;;  %v2931_v52 = vadd.f32 %v5654_v22, %v6038_v26  ;;  %v3177_v17 = vmul.f32 %v3050_v33, %v3050_v33  ;;  %v2926_v60 = vadd.f32 %v5658_v6, %v6039_v30 }
 0x1e0   : > { %v3211_v12 = vsel %vm2357_vm3, %v3174_v7, 0.0  ;;  %v3119_v11 = vadd.f32 %v3118_v37, %v3117_v42  ;;  %v2260_v38 = vsub.f32 0.0, %v2196_v51  ;;  %v3049_v63 = vadd.f32 %v5740_v10, %v2916_v0 }
 0x1e1   : > { %v1222_v1 = vmul.f32 %v3976_v13, %v1062_v14  ;;  %v3212_v58 = vadd.f32 %v3211_v12, %v3210_v50  ;;  %v3052_v54 = vadd.f32 %v5740_v10, %v2931_v52  ;;  %v3051_v22 = vadd.f32 %v5740_v10, %v2926_v60 }
 0x1e2   : > { %v2941_v31 = vadd.f32 %v5772_v27, %v5728_v41  ;;  %v2936_v15 = vadd.f32 %v5778_v28, %v5731_v8  ;;  %v2292_v6 = vsel %vm2228_vm2, %v2196_v51, %v2260_v38  ;;  %3081 = vst.msk [vmem:[%s5750_s16 + $0x40] sm:$0xff] %vm2357_vm3, %v3049_v63  ;;  %v3120_v13 = vsel %vm2357_vm3, %v3049_v63, 0.0 }
 0x1e3   : > { %v1254_v56 = vsub.f32 1.0, %v1222_v1  ;;  %v3176_v45 = vmul.f32 %v3049_v63, %v3049_v63  ;;  %v2324_v53 = vadd.f32 1.0, %v2292_v6  ;;  %v3122_v49 = vsel %vm2357_vm3, %v3050_v33, 0.0  ;;  %3084 = vst.msk [vmem:[%s5750_s16 + $0x58] sm:$0xff] %vm2357_vm3, %v3052_v54  ;;  %3083 = vst.msk [vmem:[%s5750_s16 + $0x50] sm:$0xff] %vm2357_vm3, %v3051_v22 }
 0x1e4   : > { %v3121_v39 = vadd.f32 %v3120_v13, %v3119_v11  ;;  %v3214_v9 = vadd.f32 %v3213_v44, %v3212_v58  ;;  %v3217_v47 = vsel %vm2357_vm3, %v3177_v17, 0.0  ;;  %v3124_v27 = vsel %vm2357_vm3, %v3051_v22, 0.0 }
 0x1e5   : > { %v1318_v41 = vsub.f32 0.0, %v1254_v56  ;;  %v3215_v8 = vsel %vm2357_vm3, %v3176_v45, 0.0  ;;  %v2356_v28 = vmul.f32 %v2324_v53, %v5711_v48  ;;  %v3178_v32 = vmul.f32 %v3051_v22, %v3051_v22 }
 0x1e6   : > { %v3216_v55 = vadd.f32 %v3215_v8, %v3214_v9  ;;  %v3123_v57 = vadd.f32 %v3122_v49, %v3121_v39  ;;  %v3179_v46 = vmul.f32 %v3052_v54, %v3052_v54  ;;  %v3054_v35 = vadd.f32 %v5740_v10, %v2941_v31 }
 0x1e7   : > { %v1350_v5 = vsel %vm1286_vm4, %v1254_v56, %v1318_v41  ;;  %v3053_v18 = vadd.f32 %v5740_v10, %v2936_v15  ;;  %2389 = vst.msk [vmem:[%s4293_s30 + $0xf8] sm:$0xff] %vm2357_vm3, %v2356_v28  ;;  %3629 = vmatmul.mubr.msk.f32.gmra.mrb[30].mxu1 %vm2357_vm3, %v2356_v28  ;;  %v3219_v48 = vsel %vm2357_vm3, %v3178_v32, 0.0  ;;  %v3126_v62 = vsel %vm2357_vm3, %v3052_v54, 0.0 }
 0x1e8   : > { %v1382_v19 = vadd.f32 1.0, %v1350_v5  ;;  %v3125_v59 = vadd.f32 %v3124_v27, %v3123_v57  ;;  %v3218_v25 = vadd.f32 %v3217_v47, %v3216_v55  ;;  %3086 = vst.msk [vmem:[%s5750_s16 + $0x68] sm:$0xff] %vm2357_vm3, %v3054_v35  ;;  %v2951_v33 = vadd.f32 %v3656_v24, %v5848_v40 }
 0x1e9   : > { %3085 = vst.msk [vmem:[%s5750_s16 + $0x60] sm:$0xff] %vm2357_vm3, %v3053_v18  ;;  %v3128_v16 = vsel %vm2357_vm3, %v3053_v18, 0.0  ;;  %v3180_v21 = vmul.f32 %v3053_v18, %v3053_v18  ;;  %v3221_v43 = vsel %vm2357_vm3, %v3179_v46, 0.0  ;;  %v3181_v20 = vmul.f32 %v3054_v35, %v3054_v35 }
 0x1ea   : > { %v1414_v3 = vmul.f32 %v1382_v19, %v5752_v29  ;;  %v3220_v61 = vadd.f32 %v3219_v48, %v3218_v25  ;;  %v3127_v50 = vadd.f32 %v3126_v62, %v3125_v59  ;;  %v2946_v36 = vadd.f32 %v2945_v4, %v5853_v23 }
 0x1eb   : > { %v3223_v34 = vsel %vm2357_vm3, %v3180_v21, 0.0  ;;  %v3056_v42 = vadd.f32 %v5740_v10, %v2951_v33  ;;  %v3130_v29 = vsel %vm2357_vm3, %v3054_v35, 0.0  ;;  %v3225_v24 = vsel %vm2357_vm3, %v3181_v20, 0.0 }
 0x1ec   : > { %3679 = vmatmul.mubr.msk.f32.gmra.mrb[30].mxu0 %vm2357_vm3, %v1414_v3  ;;  %v3129_v37 = vadd.f32 %v3128_v16, %v3127_v50  ;;  %v3222_v44 = vadd.f32 %v3221_v43, %v3220_v61  ;;  %v3055_v7 = vadd.f32 %v5740_v10, %v2946_v36 }
 0x1ed   : > { %3088 = vst.msk [vmem:[%s5750_s16 + $0x78] sm:$0xff] %vm2357_vm3, %v3056_v42  ;;  %v3183_v14 = vmul.f32 %v3056_v42, %v3056_v42  ;;  %v3134_v52 = vsel %vm2357_vm3, %v3056_v42, 0.0 }
 0x1ee   : > { %v3224_v51 = vadd.f32 %v3223_v34, %v3222_v44  ;;  %v3131_v40 = vadd.f32 %v3130_v29, %v3129_v37  ;;  %3087 = vst.msk [vmem:[%s5750_s16 + $0x70] sm:$0xff] %vm2357_vm3, %v3055_v7  ;;  %v3132_v23 = vsel %vm2357_vm3, %v3055_v7, 0.0  ;;  %v3182_v2 = vmul.f32 %v3055_v7, %v3055_v7 }
 0x1ef   : > { %v3229_v11 = vsel %vm2357_vm3, %v3183_v14, 0.0 }
 0x1f0   : > { %v3133_v0 = vadd.f32 %v3132_v23, %v3131_v40  ;;  %v3226_v26 = vadd.f32 %v3225_v24, %v3224_v51  ;;  %v3227_v4 = vsel %vm2357_vm3, %v3182_v2, 0.0 }
 0x1f2   : > { %v3228_v12 = vadd.f32 %v3227_v4, %v3226_v26  ;;  %v3135_v17 = vadd.f32 %v3134_v52, %v3133_v0 }
 0x1f3   : > { %v3609_v60 = vpop.f32.mrb[16].mxu1 }
 0x1f4   : > { %v3230_v30 = vadd.f32 %v3229_v11, %v3228_v12  ;;  %v2634_v38 = vpop.f32.mrb[17].mxu1 }
 0x1fb   : > { %v3659_v1 = vpop.f32.mrb[16].mxu0 }
 0x1fc   : > { %v2961_v58 = vadd.f32 %v3659_v1, %v3609_v60  ;;  %v2955_v63 = vpop.f32.mrb[17].mxu0 }
 0x1fd   : > { %v2956_v54 = vadd.f32 %v2955_v63, %v2634_v38 }
 0x1fe   : > { %v3058_v22 = vadd.f32 %v5740_v10, %v2961_v58 }
 0x1ff   : > { %v3057_v31 = vadd.f32 %v5740_v10, %v2956_v54 }
 0x200   : > { %3090 = vst.msk [vmem:[%s5750_s16 + $0x88] sm:$0xff] %vm2357_vm3, %v3058_v22  ;;  %v3185_v15 = vmul.f32 %v3058_v22, %v3058_v22  ;;  %v3138_v45 = vsel %vm2357_vm3, %v3058_v22, 0.0 }
 0x201   : > { %3089 = vst.msk [vmem:[%s5750_s16 + $0x80] sm:$0xff] %vm2357_vm3, %v3057_v31  ;;  %v3136_v6 = vsel %vm2357_vm3, %v3057_v31, 0.0  ;;  %v3184_v56 = vmul.f32 %v3057_v31, %v3057_v31 }
 0x202   : > { %v3137_v13 = vadd.f32 %v3136_v6, %v3135_v17  ;;  %v3233_v9 = vsel %vm2357_vm3, %v3185_v15, 0.0 }
 0x203   : > { %v3231_v53 = vsel %vm2357_vm3, %v3184_v56, 0.0 }
 0x204   : > { %v3232_v49 = vadd.f32 %v3231_v53, %v3230_v30  ;;  %v3139_v39 = vadd.f32 %v3138_v45, %v3137_v13 }
 0x206   : > { %v3234_v41 = vadd.f32 %v3233_v9, %v3232_v49 }
 0x20d   : > { %v3612_v47 = vpop.f32.mrb[18].mxu1 }
 0x20e   : > { %v2644_v8 = vpop.f32.mrb[19].mxu1 }
 0x216   : > { %v3662_v27 = vpop.f32.mrb[18].mxu0 }
 0x217   : > { %v2971_v28 = vadd.f32 %v3662_v27, %v3612_v47  ;;  %v2965_v55 = vpop.f32.mrb[19].mxu0 }
 0x218   : > { %v2966_v57 = vadd.f32 %v2965_v55, %v2644_v8 }
 0x219   : > { %v3060_v32 = vadd.f32 %v5740_v10, %v2971_v28 }
 0x21a   : > { %v3059_v5 = vadd.f32 %v5740_v10, %v2966_v57 }
 0x21b   : > { %3092 = vst.msk [vmem:[%s5750_s16 + $0x98] sm:$0xff] %vm2357_vm3, %v3060_v32  ;;  %v3187_v46 = vmul.f32 %v3060_v32, %v3060_v32  ;;  %v3142_v59 = vsel %vm2357_vm3, %v3060_v32, 0.0 }
 0x21c   : > { %3091 = vst.msk [vmem:[%s5750_s16 + $0x90] sm:$0xff] %vm2357_vm3, %v3059_v5  ;;  %v3140_v35 = vsel %vm2357_vm3, %v3059_v5, 0.0  ;;  %v3186_v18 = vmul.f32 %v3059_v5, %v3059_v5 }
 0x21d   : > { %v3141_v19 = vadd.f32 %v3140_v35, %v3139_v39  ;;  %v3237_v16 = vsel %vm2357_vm3, %v3187_v46, 0.0 }
 0x21e   : > { %v3235_v25 = vsel %vm2357_vm3, %v3186_v18, 0.0 }
 0x21f   : > { %v3236_v48 = vadd.f32 %v3235_v25, %v3234_v41  ;;  %v3143_v62 = vadd.f32 %v3142_v59, %v3141_v19 }
 0x221   : > { %v3238_v21 = vadd.f32 %v3237_v16, %v3236_v48 }
 0x229   : > { %v3615_v3 = vpop.f32.mrb[20].mxu1 }
 0x22a   : > { %v2654_v61 = vpop.f32.mrb[21].mxu1 }
 0x232   : > { %v3665_v50 = vpop.f32.mrb[20].mxu0 }
 0x233   : > { %v2981_v33 = vadd.f32 %v3665_v50, %v3615_v3  ;;  %v2975_v43 = vpop.f32.mrb[21].mxu0 }
 0x234   : > { %v2976_v20 = vadd.f32 %v2975_v43, %v2654_v61 }
 0x235   : > { %v3062_v34 = vadd.f32 %v5740_v10, %v2981_v33 }
 0x236   : > { %v3061_v36 = vadd.f32 %v5740_v10, %v2976_v20 }
 0x237   : > { %3094 = vst.msk [vmem:[%s5750_s16 + $0xa8] sm:$0xff] %vm2357_vm3, %v3062_v34  ;;  %v3189_v37 = vmul.f32 %v3062_v34, %v3062_v34  ;;  %v3146_v7 = vsel %vm2357_vm3, %v3062_v34, 0.0 }
 0x238   : > { %3093 = vst.msk [vmem:[%s5750_s16 + $0xa0] sm:$0xff] %vm2357_vm3, %v3061_v36  ;;  %v3144_v44 = vsel %vm2357_vm3, %v3061_v36, 0.0  ;;  %v3188_v42 = vmul.f32 %v3061_v36, %v3061_v36 }
 0x239   : > { %v3145_v29 = vadd.f32 %v3144_v44, %v3143_v62  ;;  %v3241_v14 = vsel %vm2357_vm3, %v3189_v37, 0.0 }
 0x23a   : > { %v3239_v51 = vsel %vm2357_vm3, %v3188_v42, 0.0 }
 0x23b   : > { %v3240_v40 = vadd.f32 %v3239_v51, %v3238_v21  ;;  %v3147_v24 = vadd.f32 %v3146_v7, %v3145_v29 }
 0x23d   : > { %v3242_v23 = vadd.f32 %v3241_v14, %v3240_v40 }
 0x248   : > { %v3618_v2 = vpop.f32.mrb[22].mxu1 }
 0x249   : > { %v2664_v0 = vpop.f32.mrb[23].mxu1 }
 0x24d   : > { %v3668_v26 = vpop.f32.mrb[22].mxu0 }
 0x24e   : > { %v2991_v52 = vadd.f32 %v3668_v26, %v3618_v2  ;;  %v2985_v4 = vpop.f32.mrb[23].mxu0 }
 0x24f   : > { %v2986_v12 = vadd.f32 %v2985_v4, %v2664_v0 }
 0x250   : > { %v3064_v17 = vadd.f32 %v5740_v10, %v2991_v52 }
 0x251   : > { %v3063_v11 = vadd.f32 %v5740_v10, %v2986_v12 }
 0x252   : > { %3096 = vst.msk [vmem:[%s5750_s16 + $0xb8] sm:$0xff] %vm2357_vm3, %v3064_v17  ;;  %v3191_v30 = vmul.f32 %v3064_v17, %v3064_v17  ;;  %v3150_v58 = vsel %vm2357_vm3, %v3064_v17, 0.0 }
 0x253   : > { %3095 = vst.msk [vmem:[%s5750_s16 + $0xb0] sm:$0xff] %vm2357_vm3, %v3063_v11  ;;  %v3148_v60 = vsel %vm2357_vm3, %v3063_v11, 0.0  ;;  %v3190_v38 = vmul.f32 %v3063_v11, %v3063_v11 }
 0x254   : > { %v3149_v1 = vadd.f32 %v3148_v60, %v3147_v24  ;;  %v3245_v31 = vsel %vm2357_vm3, %v3191_v30, 0.0 }
 0x255   : > { %v3243_v63 = vsel %vm2357_vm3, %v3190_v38, 0.0 }
 0x256   : > { %v3244_v54 = vadd.f32 %v3243_v63, %v3242_v23  ;;  %v3151_v22 = vadd.f32 %v3150_v58, %v3149_v1 }
 0x258   : > { %v3246_v15 = vadd.f32 %v3245_v31, %v3244_v54 }
 0x265   : > { %v3621_v6 = vpop.f32.mrb[24].mxu1 }
 0x266   : > { %v2674_v56 = vpop.f32.mrb[25].mxu1 }
 0x269   : > { %v3671_v13 = vpop.f32.mrb[24].mxu0 }
 0x26a   : > { %v3001_v45 = vadd.f32 %v3671_v13, %v3621_v6  ;;  %v2995_v53 = vpop.f32.mrb[25].mxu0 }
 0x26b   : > { %v2996_v49 = vadd.f32 %v2995_v53, %v2674_v56 }
 0x26c   : > { %v3066_v39 = vadd.f32 %v5740_v10, %v3001_v45 }
 0x26d   : > { %v3065_v9 = vadd.f32 %v5740_v10, %v2996_v49 }
 0x26e   : > { %3098 = vst.msk [vmem:[%s5750_s16 + $0xc8] sm:$0xff] %vm2357_vm3, %v3066_v39  ;;  %v3193_v41 = vmul.f32 %v3066_v39, %v3066_v39  ;;  %v3154_v28 = vsel %vm2357_vm3, %v3066_v39, 0.0 }
 0x26f   : > { %3097 = vst.msk [vmem:[%s5750_s16 + $0xc0] sm:$0xff] %vm2357_vm3, %v3065_v9  ;;  %v3152_v47 = vsel %vm2357_vm3, %v3065_v9, 0.0  ;;  %v3192_v8 = vmul.f32 %v3065_v9, %v3065_v9 }
 0x270   : > { %v3153_v27 = vadd.f32 %v3152_v47, %v3151_v22  ;;  %v3249_v5 = vsel %vm2357_vm3, %v3193_v41, 0.0 }
 0x271   : > { %v3247_v55 = vsel %vm2357_vm3, %v3192_v8, 0.0 }
 0x272   : > { %v3248_v57 = vadd.f32 %v3247_v55, %v3246_v15  ;;  %v3155_v32 = vadd.f32 %v3154_v28, %v3153_v27 }
 0x274   : > { %v3250_v46 = vadd.f32 %v3249_v5, %v3248_v57 }
 0x282   : > { %v3624_v35 = vpop.f32.mrb[26].mxu1 }
 0x283   : > { %v2684_v18 = vpop.f32.mrb[27].mxu1 }
 0x287   : > { %v3674_v19 = vpop.f32.mrb[26].mxu0 }
 0x288   : > { %v3011_v59 = vadd.f32 %v3674_v19, %v3624_v35  ;;  %v3005_v25 = vpop.f32.mrb[27].mxu0 }
 0x289   : > { %v3006_v48 = vadd.f32 %v3005_v25, %v2684_v18 }
 0x28a   : > { %v3068_v62 = vadd.f32 %v5740_v10, %v3011_v59 }
 0x28b   : > { %v3067_v16 = vadd.f32 %v5740_v10, %v3006_v48 }
 0x28c   : > { %3100 = vst.msk [vmem:[%s5750_s16 + $0xd8] sm:$0xff] %vm2357_vm3, %v3068_v62  ;;  %v3195_v21 = vmul.f32 %v3068_v62, %v3068_v62  ;;  %v3158_v33 = vsel %vm2357_vm3, %v3068_v62, 0.0 }
 0x28d   : > { %3099 = vst.msk [vmem:[%s5750_s16 + $0xd0] sm:$0xff] %vm2357_vm3, %v3067_v16  ;;  %v3156_v3 = vsel %vm2357_vm3, %v3067_v16, 0.0  ;;  %v3194_v61 = vmul.f32 %v3067_v16, %v3067_v16 }
 0x28e   : > { %v3157_v50 = vadd.f32 %v3156_v3, %v3155_v32  ;;  %v3253_v36 = vsel %vm2357_vm3, %v3195_v21, 0.0 }
 0x28f   : > { %v3251_v43 = vsel %vm2357_vm3, %v3194_v61, 0.0 }
 0x290   : > { %v3252_v20 = vadd.f32 %v3251_v43, %v3250_v46  ;;  %v3159_v34 = vadd.f32 %v3158_v33, %v3157_v50 }
 0x292   : > { %v3254_v37 = vadd.f32 %v3253_v36, %v3252_v20 }
 0x29c   : > { %v3627_v44 = vpop.f32.mrb[28].mxu1 }
 0x29d   : > { %v2694_v42 = vpop.f32.mrb[29].mxu1 }
 0x2a4   : > { %v3677_v29 = vpop.f32.mrb[28].mxu0 }
 0x2a5   : > { %v3021_v7 = vadd.f32 %v3677_v29, %v3627_v44  ;;  %v3015_v51 = vpop.f32.mrb[29].mxu0 }
 0x2a6   : > { %v3016_v40 = vadd.f32 %v3015_v51, %v2694_v42 }
 0x2a7   : > { %v3070_v24 = vadd.f32 %v5740_v10, %v3021_v7 }
 0x2a8   : > { %v3069_v14 = vadd.f32 %v5740_v10, %v3016_v40 }
 0x2a9   : > { %3102 = vst.msk [vmem:[%s5750_s16 + $0xe8] sm:$0xff] %vm2357_vm3, %v3070_v24  ;;  %v3197_v23 = vmul.f32 %v3070_v24, %v3070_v24  ;;  %v3162_v52 = vsel %vm2357_vm3, %v3070_v24, 0.0 }
 0x2aa   : > { %3101 = vst.msk [vmem:[%s5750_s16 + $0xe0] sm:$0xff] %vm2357_vm3, %v3069_v14  ;;  %v3160_v2 = vsel %vm2357_vm3, %v3069_v14, 0.0  ;;  %v3196_v0 = vmul.f32 %v3069_v14, %v3069_v14 }
 0x2ab   : > { %v3161_v26 = vadd.f32 %v3160_v2, %v3159_v34  ;;  %v3257_v11 = vsel %vm2357_vm3, %v3197_v23, 0.0 }
 0x2ac   : > { %v3255_v4 = vsel %vm2357_vm3, %v3196_v0, 0.0 }
 0x2ad   : > { %v3256_v12 = vadd.f32 %v3255_v4, %v3254_v37  ;;  %v3163_v17 = vadd.f32 %v3162_v52, %v3161_v26 }
 0x2af   : > { %v3258_v30 = vadd.f32 %v3257_v11, %v3256_v12 }
 0x2ba   : > { %v3630_v60 = vpop.f32.mrb[30].mxu1 }
 0x2bb   : > { %v2704_v38 = vpop.f32.mrb[31].mxu1 }
 0x2bf   : > { %v3680_v1 = vpop.f32.mrb[30].mxu0 }
 0x2c0   : > { %v3031_v58 = vadd.f32 %v3680_v1, %v3630_v60  ;;  %v3025_v63 = vpop.f32.mrb[31].mxu0 }
 0x2c1   : > { %v3026_v54 = vadd.f32 %v3025_v63, %v2704_v38 }
 0x2c2   : > { %v3072_v22 = vadd.f32 %v5740_v10, %v3031_v58 }
 0x2c3   : > { %v3071_v31 = vadd.f32 %v5740_v10, %v3026_v54 }
 0x2c4   : > { %3104 = vst.msk [vmem:[%s5750_s16 + $0xf8] sm:$0xff] %vm2357_vm3, %v3072_v22  ;;  %v3199_v15 = vmul.f32 %v3072_v22, %v3072_v22  ;;  %v3166_v45 = vsel %vm2357_vm3, %v3072_v22, 0.0 }
 0x2c5   : > { %3103 = vst.msk [vmem:[%s5750_s16 + $0xf0] sm:$0xff] %vm2357_vm3, %v3071_v31  ;;  %v3164_v6 = vsel %vm2357_vm3, %v3071_v31, 0.0  ;;  %v3198_v56 = vmul.f32 %v3071_v31, %v3071_v31 }
 0x2c6   : > { %v3165_v13 = vadd.f32 %v3164_v6, %v3163_v17  ;;  %v3261_v39 = vsel %vm2357_vm3, %v3199_v15, 0.0 }
 0x2c7   : > { %v3259_v53 = vsel %vm2357_vm3, %v3198_v56, 0.0 }
 0x2c8   : > { %v3167_v49 = vadd.f32 %v3166_v45, %v3165_v13  ;;  %v3260_v10 = vadd.f32 %v3259_v53, %v3258_v30 }
 0x2ca   : > { %v3262_v9 = vadd.f32 %v3261_v39, %v3260_v10  ;;  %3263 = vst.msk [vmem:[%s468_s18] sm:$0xff] %vm2357_vm3, %v3167_v49 }
 0x2cc   : > { %3264 = vst.msk [vmem:[%s472_s20] sm:$0xff] %vm2357_vm3, %v3262_v9 }
 0x2cd PF: > { %s23_s21 = sadd.s32 1, %s3995_s21  }
 0x2ce   : > { %p20_p5 = scmp.ge.s32.totalorder %s23_s21, 4  }
 0x2d0   :  { %22 = sbr.rel (!%p20_p5) target bundleno = 1 (0x1), region = 125 }

// kernel: down2_forward.5
= control target key start
LH: loop header
LB: loop body
LE: loop exit
PB: predicated region body
PF: predicated region fallthrough
CT: control target
= control target key end

     0   :  { %s6959_s27 = smov 0   ;;  %s9817_s0 = inlined_call_operand.vmem [shape: f32[2,18,18,8], index: 0, kind: input, shape index: {}]   ;;  %s9818_s1 = inlined_call_operand.vmem [shape: f32[9,8,8], index: 1, kind: input, shape index: {}]   ;;  %s9819_s2 = inlined_call_operand.vmem [shape: f32[1,8], index: 2, kind: input, shape index: {}]   ;;  %s9820_s3 = inlined_call_operand.vmem [shape: f32[1,8], index: 3, kind: input, shape index: {}]   ;;  %s9821_s4 = inlined_call_operand.vmem [shape: f32[1,8], index: 4, kind: input, shape index: {}]   ;;  %s9822_s5 = inlined_call_operand.vmem [shape: f32[1,18,18,1], index: 5, kind: input, shape index: {}]   ;;  %s9823_s6 = inlined_call_operand.vmem [shape: f32[512,8], index: 6, kind: output, shape index: {0}]   ;;  %s9824_s7 = inlined_call_operand.vmem [shape: f32[16,8], index: 7, kind: output, shape index: {1}]   ;;  %s9825_s8 = inlined_call_operand.vmem [shape: f32[16,8], index: 8, kind: output, shape index: {2}]  }
   0x1 LB: > { %s6965_s28 = sadd.s32 4294967295, %s6911_s27   ;;  %p5358_p0 = scmp.ge.s32.totalorder %s6911_s27, 1  ;;  %s6911_s27 = sphi %s6959_s27, %s19_s27  }
   0x2   : > { %p267_p1 = scmp.lt.s32.totalorder %s6911_s27, 3 }
   0x4   : > { %p268_p2 = pnand %p5358_p0, %p267_p1 }
   0x6   : > { %271 = sbr.rel (%p268_p2) target bundleno = 892 (0x37c), region = 44 }
   0xd   : > { %v1911_v0 = vld [vmem:[%s9822_s5 + $0x18] sm:$0xff]  ;;  %v1908_v1 = vld [vmem:[%s9822_s5] sm:$0xff]  ;;  %v6913_v2 = vmov 0   ;;  %v1909_v4 = vld [vmem:[%s9822_s5 + $0x8] sm:$0xff]  ;;  %p309_p3 = scmp.lt.s32.totalorder %s6965_s28, 1  ;;  %vm2335_vm11 = vcmask 1046528  }
   0xe   : > { %6681 = vset.pattern.permute.xlu1 %v6913_v2  ;;  %6680 = vset.pattern.permute.xlu0 %v6913_v2  ;;  %v1912_v3 = vld [vmem:[%s9822_s5 + $0x20] sm:$0xff]  ;;  %v1913_v5 = vld [vmem:[%s9822_s5 + $0x28] sm:$0x3]  ;;  %v1910_v6 = vld [vmem:[%s9822_s5 + $0x10] sm:$0x3]  ;;  %vm2418_vm12 = vcmask 64512  }
   0xf   : > { %1979 = vperm.xlu1 %6681, %v1911_v0   ;;  %1964 = vperm.xlu0 %6680, %v1908_v1   ;;  %s6989_s19 = scalar_select %p309_p3, %s6965_s28, 1  ;;  %v1915_v7 = vld [vmem:[%s9822_s5 + $0x38] sm:$0xff]  ;;  %v1914_v8 = vld [vmem:[%s9822_s5 + $0x30] sm:$0xff]  ;;  %v1917_v9 = vld [vmem:[%s9822_s5 + $0x48] sm:$0xff] }
  0x10   : > { %v1916_v10 = vld [vmem:[%s9822_s5 + $0x40] sm:$0x3]  ;;  %v1919_v11 = vld [vmem:[%s9822_s5 + $0x58] sm:$0x3]  ;;  %v1918_v12 = vld [vmem:[%s9822_s5 + $0x50] sm:$0xff]  ;;  %s5360_s30 = sshll.u32 %s6965_s28, 5 }
  0x11   : > { %s6670_s24 = smul.u32 432, %s6989_s19  ;;  %v7019_v14 = vld [vmem:[%s9820_s3] ss:$0 sm:$0xff]  ;;  %v5366_v23 = vld [vmem:[%s9818_s1 + $0x8] sm:$0xff]  ;;  %v1923_v39 = vld [vmem:[%s9822_s5 + $0x78] sm:$0xff]  ;;  %p315_p4 = scmp.lt.s32.totalorder %s5360_s30, 63 }
  0x12   : > { %v7024_v15 = vld [vmem:[%s9821_s4] ss:$0 sm:$0xff]  ;;  %5962 = vmatprep.subr.mxu1 %v5366_v23  ;;  %v1921_v30 = vld [vmem:[%s9822_s5 + $0x68] sm:$0xff]  ;;  %v1922_v43 = vld [vmem:[%s9822_s5 + $0x70] sm:$0x3]  ;;  %s5362_s15 = sshll.u32 %s6989_s19, 3 }
  0x13   : > { %1984 = vperm.xlu1 %6681, %v1912_v3   ;;  %1969 = vperm.xlu0 %6680, %v1909_v4   ;;  %s7007_s11 = scalar_lea.vmem %s9817_s0, %s6670_s24  ;;  %v5497_v25 = vld [vmem:[%s9818_s1 + $0x20] sm:$0xff]  ;;  %v1925_v51 = vld [vmem:[%s9822_s5 + $0x88] sm:$0x3]  ;;  %v1927_v0 = vld [vmem:[%s9822_s5 + $0x98] sm:$0xff]  ;;  %s10145_s30 = smov (!%p315_p4, %s5360_s30), 63 }
  0x14   : > { %v331_v13 = vld [vmem:[%s7007_s11 + $0x18] sm:$0xff]  ;;  %v328_v17 = vld [vmem:[%s7007_s11] sm:$0xff]  ;;  %v329_v19 = vld [vmem:[%s7007_s11 + $0x8] sm:$0xff]  ;;  %6162 = vmatprep.subr.mxu0 %v5497_v25  ;;  %5963 = vmatpush3.msra.mxu1 %v5366_v23  ;;  %s5361_s9 = sshll.u32 %s10145_s30, 3  ;;  %s323_s18 = scalar_lea.vmem %s9824_s7, %s5362_s15 }
  0x15   : > { %v393_v16 = vmul.f32 %v7019_v14, %v331_v13  ;;  %v332_v18 = vld [vmem:[%s7007_s11 + $0x20] sm:$0xff]  ;;  %v390_v20 = vmul.f32 %v7019_v14, %v328_v17  ;;  %v391_v22 = vmul.f32 %v7019_v14, %v329_v19  ;;  %v333_v29 = vld [vmem:[%s7007_s11 + $0x28] sm:$0x3]  ;;  %v330_v33 = vld [vmem:[%s7007_s11 + $0x10] sm:$0x3]  ;;  %6163 = vmatpush3.msra.mxu0 %v5497_v25  ;;  %s9635_s14 = scalar_lea.vmem %s9823_s6, %s5361_s9  ;;  %s327_s21 = scalar_lea.vmem %s9825_s8, %s5362_s15 }
  0x16   : > { %v394_v21 = vmul.f32 %v7019_v14, %v332_v18  ;;  %v1920_v31 = vld [vmem:[%s9822_s5 + $0x60] sm:$0xff]  ;;  %v395_v38 = vmul.f32 %v7019_v14, %v333_v29  ;;  %v392_v42 = vmul.f32 %v7019_v14, %v330_v33  ;;  %v335_v56 = vld [vmem:[%s7007_s11 + $0x38] sm:$0xff]  ;;  %v334_v57 = vld [vmem:[%s7007_s11 + $0x30] sm:$0xff] }
  0x17   : > { %1989 = vperm.xlu1 %6681, %v1913_v5   ;;  %1974 = vperm.xlu0 %6680, %v1910_v6   ;;  %v7037_v24 = vadd.f32 %v7024_v15, %v393_v16  ;;  %v7043_v26 = vadd.f32 %v7024_v15, %v390_v20  ;;  %v7049_v28 = vadd.f32 %v7024_v15, %v391_v22  ;;  %v1924_v54 = vld [vmem:[%s9822_s5 + $0x80] sm:$0xff]  ;;  %v1926_v1 = vld [vmem:[%s9822_s5 + $0x90] sm:$0xff]  ;;  %v1931_v23 = vld [vmem:[%s9822_s5 + $0xb8] sm:$0x3] }
  0x18   : > { %v7046_v27 = vadd.f32 %v7024_v15, %v394_v21  ;;  %v7087_v50 = vadd.f32 %v7024_v15, %v395_v38  ;;  %v7093_v53 = vadd.f32 %v7024_v15, %v392_v42  ;;  %v397_v62 = vmul.f32 %v7019_v14, %v335_v56  ;;  %v1928_v13 = vld [vmem:[%s9822_s5 + $0xa0] sm:$0x3] }
  0x19   : > { %v7059_v32 = vmul.f32 0.70710677, %v7037_v24  ;;  %v7063_v34 = vmul.f32 0.70710677, %v7043_v26  ;;  %v7070_v37 = vmul.f32 0.70710677, %v7049_v28  ;;  %v396_v63 = vmul.f32 %v7019_v14, %v334_v57 }
  0x1a   : > { %v7066_v35 = vmul.f32 0.70710677, %v7046_v27  ;;  %v7101_v59 = vmul.f32 0.70710677, %v7087_v50  ;;  %v7104_v61 = vmul.f32 0.70710677, %v7093_v53  ;;  %v7119_v5 = vadd.f32 %v7024_v15, %v397_v62 }
  0x1b   : > { %1999 = vperm.xlu1 %6681, %v1915_v7   ;;  %1994 = vperm.xlu0 %6680, %v1914_v8   ;;  %v615_v36 = vand.u32 2147483647, %v7059_v32  ;;  %v612_v40 = vand.u32 2147483647, %v7063_v34  ;;  %v7083_v45 = vand.u32 2147483647, %v7070_v37  ;;  %v7122_v8 = vadd.f32 %v7024_v15, %v396_v63 }
  0x1c   : > { %v616_v41 = vand.u32 2147483647, %v7066_v35  ;;  %v617_v2 = vand.u32 2147483647, %v7101_v59  ;;  %v7116_v4 = vand.u32 2147483647, %v7104_v61 }
  0x1d   : > { %v669_v44 = vmul.f32 0.3275911, %v615_v36  ;;  %v666_v46 = vmul.f32 0.3275911, %v612_v40  ;;  %v667_v49 = vmul.f32 0.3275911, %v7083_v45 }
  0x1e   : > { %v670_v47 = vmul.f32 0.3275911, %v616_v41  ;;  %v1317_v60 = vsub.f32 0.0, %v615_v36  ;;  %v1314_v3 = vsub.f32 0.0, %v612_v40  ;;  %v1318_v6 = vsub.f32 0.0, %v616_v41 }
  0x1f   : > { %2009 = vperm.xlu1 %6681, %v1917_v9   ;;  %2004 = vperm.xlu0 %6680, %v1916_v10   ;;  %v723_v48 = vadd.f32 1.0, %v669_v44  ;;  %v720_v52 = vadd.f32 1.0, %v666_v46  ;;  %v721_v58 = vadd.f32 1.0, %v667_v49  ;;  %v671_v7 = vmul.f32 0.3275911, %v617_v2  ;;  %v1929_v9 = vld [vmem:[%s9822_s5 + $0xa8] sm:$0xff] }
  0x20   : > { %v724_v55 = vadd.f32 1.0, %v670_v47  ;;  %v1371_v10 = vmul.f32 %v1317_v60, %v615_v36  ;;  %v1315_v16 = vsub.f32 0.0, %v7083_v45  ;;  %v7134_v18 = vmul.f32 0.70710677, %v7119_v5  ;;  %v1932_v60 = vld [vmem:[%s9822_s5 + $0xc0] sm:$0xff] }
  0x21   : > { %6682 = vrcp.f32 %v723_v48  ;;  %v725_v17 = vadd.f32 1.0, %v671_v7  ;;  %v1368_v19 = vmul.f32 %v1314_v3, %v612_v40  ;;  %v7137_v21 = vmul.f32 0.70710677, %v7122_v8 }
  0x22   : > { %6684 = vrcp.f32 %v720_v52  ;;  %v1372_v25 = vmul.f32 %v1318_v6, %v616_v41  ;;  %v7145_v29 = vand.u32 2147483647, %v7134_v18  ;;  %v1428_v36 = vmul.f32 1.442695, %v1371_v10 }
  0x23   : > { %2019 = vperm.xlu1 %6681, %v1919_v11   ;;  %2014 = vperm.xlu0 %6680, %v1918_v12   ;;  %6686 = vrcp.f32 %v724_v55  ;;  %v668_v11 = vmul.f32 0.3275911, %v7116_v4  ;;  %v337_v12 = vld [vmem:[%s7007_s11 + $0x48] sm:$0xff]  ;;  %v7152_v38 = vand.u32 2147483647, %v7137_v21  ;;  %v1369_v41 = vmul.f32 %v1315_v16, %v7083_v45 }
  0x24   : > { %6688 = vrcp.f32 %v721_v58  ;;  %v1319_v42 = vsub.f32 0.0, %v617_v2  ;;  %v1422_v46 = vmul.f32 1.442695, %v1368_v19  ;;  %v1933_v58 = vld [vmem:[%s9822_s5 + $0xc8] sm:$0xff]  ;;  %vm1641_vm0 = vcmp.ge.f32.partialorder %v7059_v32, 0.0 }
  0x25   : > { %v722_v20 = vadd.f32 1.0, %v668_v11  ;;  %6690 = vrcp.f32 %v725_v17  ;;  %v672_v47 = vmul.f32 0.3275911, %v7152_v38  ;;  %v1424_v63 = vmul.f32 1.442695, %v1369_v41  ;;  %v1935_v17 = vld [vmem:[%s9822_s5 + $0xd8] sm:$0xff] }
  0x26   : > { %v1934_v11 = vld [vmem:[%s9822_s5 + $0xd0] sm:$0x3]  ;;  %vm1638_vm1 = vcmp.ge.f32.partialorder %v7063_v34, 0.0  ;;  %vm1642_vm2 = vcmp.ge.f32.partialorder %v7066_v35, 0.0  ;;  %vm1639_vm3 = vcmp.ge.f32.partialorder %v7070_v37, 0.0  ;;  %vm1643_vm4 = vcmp.ge.f32.partialorder %v7101_v59, 0.0 }
  0x27   : > { %2029 = vperm.xlu1 %6681, %v1921_v30   ;;  %2024 = vperm.xlu0 %6680, %v1920_v31   ;;  %v399_v30 = vmul.f32 %v7019_v14, %v337_v12  ;;  %6692 = vrcp.f32 %v722_v20  ;;  %v726_v56 = vadd.f32 1.0, %v672_v47  ;;  %vm1640_vm5 = vcmp.ge.f32.partialorder %v7104_v61, 0.0  ;;  %v1951_v34 = vld [vmem:[%s9822_s5 + $0x158] sm:$0xff]  ;;  %v1953_v37 = vld [vmem:[%s9822_s5 + $0x168] sm:$0xff] }
  0x28   : > { %6694 = vpow2.f32 %v1428_v36  ;;  %vm1645_vm6 = vcmp.ge.f32.partialorder %v7134_v18, 0.0  ;;  %vm1644_vm7 = vcmp.ge.f32.partialorder %v7137_v21, 0.0 }
  0x2b   : > { %2039 = vperm.xlu1 %6681, %v1923_v39   ;;  %2034 = vperm.xlu0 %6680, %v1922_v43   ;;  %v7139_v22 = vpop.eup %6682  ;;  %v1930_v39 = vld [vmem:[%s9822_s5 + $0xb0] sm:$0xff]  ;;  %v673_v43 = vmul.f32 0.3275911, %v7145_v29 }
  0x2c   : > { %v7148_v31 = vpop.eup %6684  ;;  %v831_v33 = vmul.f32 1.0614054, %v7139_v22 }
  0x2d   : > { %v828_v40 = vmul.f32 1.0614054, %v7148_v31  ;;  %v7161_v48 = vpop.eup %6686  ;;  %v727_v52 = vadd.f32 1.0, %v673_v43 }
  0x2e   : > { %v885_v44 = vadd.f32 -1.4531521, %v831_v33  ;;  %v832_v45 = vmul.f32 1.0614054, %v7161_v48  ;;  %v7168_v57 = vpop.eup %6688 }
  0x2f   : > { %2049 = vperm.xlu1 %6681, %v1925_v51   ;;  %2044 = vperm.xlu0 %6680, %v1924_v54   ;;  %v882_v49 = vadd.f32 -1.4531521, %v828_v40  ;;  %v1430_v51 = vmul.f32 1.442695, %v1372_v25  ;;  %v7164_v54 = vadd.f32 %v7024_v15, %v399_v30  ;;  %6696 = vrcp.f32 %v727_v52  ;;  %v7187_v16 = vpop.eup %6690  ;;  %v1937_v52 = vld [vmem:[%s9822_s5 + $0xe8] sm:$0x3] }
  0x30   : > { %v939_v55 = vmul.f32 %v7139_v22, %v885_v44  ;;  %v886_v3 = vadd.f32 -1.4531521, %v832_v45  ;;  %v829_v6 = vmul.f32 1.0614054, %v7168_v57  ;;  %6698 = vrcp.f32 %v726_v56 }
  0x31   : > { %v936_v62 = vmul.f32 %v7148_v31, %v882_v49  ;;  %6700 = vpow2.f32 %v1422_v46  ;;  %v7180_v10 = vmul.f32 0.70710677, %v7164_v54  ;;  %v7197_v30 = vpop.eup %6692  ;;  %v833_v40 = vmul.f32 1.0614054, %v7187_v16 }
  0x32   : > { %v940_v12 = vmul.f32 %v7161_v48, %v886_v3  ;;  %6702 = vpow2.f32 %v1430_v51 }
  0x33   : > { %2059 = vperm.xlu1 %6681, %v1927_v0   ;;  %2054 = vperm.xlu0 %6680, %v1926_v1   ;;  %v1373_v0 = vmul.f32 %v1319_v42, %v617_v2  ;;  %v993_v1 = vadd.f32 1.4214138, %v939_v55  ;;  %v990_v7 = vadd.f32 1.4214138, %v936_v62  ;;  %v7195_v25 = vand.u32 2147483647, %v7180_v10 }
  0x34   : > { %v994_v36 = vadd.f32 1.4214138, %v940_v12  ;;  %v830_v42 = vmul.f32 1.0614054, %v7197_v30  ;;  %v887_v51 = vadd.f32 -1.4531521, %v833_v40  ;;  %6704 = vpow2.f32 %v1424_v63 }
  0x35   : > { %v1047_v2 = vmul.f32 %v7139_v22, %v993_v1  ;;  %v1044_v19 = vmul.f32 %v7148_v31, %v990_v7  ;;  %v1432_v20 = vmul.f32 1.442695, %v1373_v0  ;;  %v675_v44 = vmul.f32 0.3275911, %v7195_v25  ;;  %v1936_v55 = vld [vmem:[%s9822_s5 + $0xe0] sm:$0xff]  ;;  %v1939_v63 = vld [vmem:[%s9822_s5 + $0xf8] sm:$0xff] }
  0x36   : > { %v1048_v47 = vmul.f32 %v7161_v48, %v994_v36  ;;  %v884_v45 = vadd.f32 -1.4531521, %v830_v42  ;;  %v941_v1 = vmul.f32 %v7187_v16, %v887_v51  ;;  %vm1647_vm8 = vcmp.ge.f32.partialorder %v7180_v10, 0.0  ;;  %v7619_v10 = vld [vmem:[%s9821_s4] ss:$0 sm:$0xff] }
  0x37   : > { %2069 = vperm.xlu1 %6681, %v1929_v9   ;;  %2064 = vperm.xlu0 %6680, %v1928_v13   ;;  %v1316_v9 = vsub.f32 0.0, %v7116_v4  ;;  %v883_v13 = vadd.f32 -1.4531521, %v829_v6  ;;  %v1101_v33 = vadd.f32 -0.28449672, %v1047_v2  ;;  %v729_v56 = vadd.f32 1.0, %v675_v44 }
  0x38   : > { %v1098_v41 = vadd.f32 -0.28449672, %v1044_v19  ;;  %v1102_v62 = vadd.f32 -0.28449672, %v1048_v47  ;;  %6706 = vpow2.f32 %v1432_v20  ;;  %v938_v6 = vmul.f32 %v7197_v30, %v884_v45  ;;  %v1938_v2 = vld [vmem:[%s9822_s5 + $0xf0] sm:$0xff] }
  0x39   : > { %v1370_v43 = vmul.f32 %v1316_v9, %v7116_v4  ;;  %v1155_v46 = vmul.f32 %v7139_v22, %v1101_v33  ;;  %v1320_v9 = vsub.f32 0.0, %v7152_v38  ;;  %6708 = vrcp.f32 %v729_v56 }
  0x3a   : > { %v1152_v4 = vmul.f32 %v7148_v31, %v1098_v41  ;;  %v1156_v12 = vmul.f32 %v7161_v48, %v1102_v62  ;;  %v992_v33 = vadd.f32 1.4214138, %v938_v6  ;;  %v336_v6 = vld [vmem:[%s7007_s11 + $0x40] sm:$0x3] }
  0x3b   : > { %2079 = vperm.xlu1 %6681, %v1931_v23   ;;  %2074 = vperm.xlu0 %6680, %v1930_v39   ;;  %v1321_v23 = vsub.f32 0.0, %v7145_v29  ;;  %v937_v39 = vmul.f32 %v7168_v57, %v883_v13  ;;  %v1426_v7 = vmul.f32 1.442695, %v1370_v43  ;;  %v1374_v56 = vmul.f32 %v1320_v9, %v7152_v38  ;;  %v1943_v38 = vld [vmem:[%s9822_s5 + $0x118] sm:$0x3]  ;;  %v1942_v9 = vld [vmem:[%s9822_s5 + $0x110] sm:$0xff] }
  0x3c   : > { %v1206_v42 = vadd.f32 0.2548296, %v1152_v4  ;;  %v1210_v43 = vadd.f32 0.2548296, %v1156_v12  ;;  %v1046_v47 = vmul.f32 %v7197_v30, %v992_v33 }
  0x3d   : > { %v991_v49 = vadd.f32 1.4214138, %v937_v39  ;;  %v1375_v19 = vmul.f32 %v1321_v23, %v7145_v29  ;;  %6710 = vpow2.f32 %v1426_v7 }
  0x3e   : > { %v1260_v62 = vmul.f32 %v7148_v31, %v1206_v42  ;;  %v398_v42 = vmul.f32 %v7019_v14, %v336_v6  ;;  %v339_v6 = vld [vmem:[%s7007_s11 + $0x58] sm:$0x3] }
  0x3f   : > { %2089 = vperm.xlu1 %6681, %v1933_v58   ;;  %2084 = vperm.xlu0 %6680, %v1932_v60   ;;  %v6695_v58 = vpop.eup %6694  ;;  %v1209_v60 = vadd.f32 0.2548296, %v1155_v46  ;;  %v1045_v0 = vmul.f32 %v7168_v57, %v991_v49  ;;  %v1436_v51 = vmul.f32 1.442695, %v1375_v19  ;;  %v7264_v19 = vmul.f32 0.5, %v7046_v27 }
  0x40   : > { %v7215_v3 = vpop.eup %6696 }
  0x41   : > { %v1099_v13 = vadd.f32 -0.28449672, %v1045_v0  ;;  %v835_v36 = vmul.f32 1.0614054, %v7215_v3  ;;  %v1263_v41 = vmul.f32 %v7139_v22, %v1209_v60  ;;  %v1941_v22 = vld [vmem:[%s9822_s5 + $0x108] sm:$0xff]  ;;  %v1264_v0 = vmul.f32 %v7161_v48, %v1210_v43 }
  0x42   : > { %6712 = vpow2.f32 %v1436_v51 }
  0x43   : > { %2099 = vperm.xlu1 %6681, %v1935_v17   ;;  %2094 = vperm.xlu0 %6680, %v1934_v11   ;;  %v7219_v11 = vpop.eup %6698  ;;  %v995_v17 = vadd.f32 1.4214138, %v941_v1  ;;  %v1153_v46 = vmul.f32 %v7168_v57, %v1099_v13  ;;  %v889_v49 = vadd.f32 -1.4531521, %v835_v36  ;;  %v7244_v60 = vmul.f32 %v6695_v58, %v1263_v41 }
  0x44   : > { %v6701_v20 = vpop.eup %6700  ;;  %v834_v39 = vmul.f32 1.0614054, %v7219_v11  ;;  %v7255_v58 = vmul.f32 0.5, %v7037_v24  ;;  %v1434_v36 = vmul.f32 1.442695, %v1374_v56 }
  0x45   : > { %v6703_v40 = vpop.eup %6702  ;;  %v1049_v44 = vmul.f32 %v7187_v16, %v995_v17  ;;  %v943_v4 = vmul.f32 %v7215_v3, %v889_v49  ;;  %v7261_v17 = vmul.f32 0.5, %v7043_v26  ;;  %v7268_v24 = vmul.f32 %v6701_v20, %v1260_v62 }
  0x46   : > { %v888_v29 = vadd.f32 -1.4531521, %v834_v39  ;;  %v6705_v7 = vpop.eup %6704  ;;  %v1587_v39 = vsub.f32 1.0, %v7244_v60  ;;  %v7270_v41 = vmul.f32 %v6703_v40, %v1264_v0  ;;  %v7280_v20 = vmul.f32 0.5, %v7049_v28  ;;  %v1946_v60 = vld [vmem:[%s9822_s5 + $0x130] sm:$0x3] }
  0x47   : > { %2109 = vperm.xlu1 %6681, %v1937_v52   ;;  %2104 = vperm.xlu0 %6680, %v1936_v55   ;;  %v1103_v23 = vadd.f32 -0.28449672, %v1049_v44  ;;  %v1940_v52 = vld [vmem:[%s9822_s5 + $0x100] sm:$0x3]  ;;  %v1100_v55 = vadd.f32 -0.28449672, %v1046_v47  ;;  %v6707_v48 = vpop.eup %6706  ;;  %6714 = vpow2.f32 %v1434_v36 }
  0x48   : > { %v942_v45 = vmul.f32 %v7219_v11, %v888_v29  ;;  %v997_v12 = vadd.f32 1.4214138, %v943_v4  ;;  %v7273_v43 = vpop.eup %6708  ;;  %v1945_v47 = vld [vmem:[%s9822_s5 + $0x128] sm:$0xff]  ;;  %v1695_v51 = vsub.f32 0.0, %v1587_v39  ;;  %v1584_v28 = vsub.f32 1.0, %v7268_v24 }
  0x49   : > { %v1157_v1 = vmul.f32 %v7187_v16, %v1103_v23  ;;  %v6711_v23 = vpop.eup %6710  ;;  %v7308_v62 = vmul.f32 0.5, %v7087_v50  ;;  %v7327_v50 = vld [vmem:[%s9818_s1 + $0x28] sm:$0xff]  ;;  %v7343_v36 = vmul.f32 0.5, %v7119_v5 }
  0x4a   : > { %v996_v13 = vadd.f32 1.4214138, %v942_v45  ;;  %v1051_v33 = vmul.f32 %v7215_v3, %v997_v12  ;;  %6212 = vmatprep.subr.mxu0 %v7327_v50 }
  0x4b   : > { %2119 = vperm.xlu1 %6681, %v1939_v63   ;;  %2114 = vperm.xlu0 %6680, %v1938_v2   ;;  %v1207_v63 = vadd.f32 0.2548296, %v1153_v46  ;;  %v1154_v2 = vmul.f32 %v7197_v30, %v1100_v55  ;;  %v1211_v31 = vadd.f32 0.2548296, %v1157_v1  ;;  %v1588_v55 = vsub.f32 1.0, %v7270_v41 }
  0x4c   : > { %v1105_v46 = vadd.f32 -0.28449672, %v1051_v33  ;;  %v1050_v27 = vmul.f32 %v7219_v11, %v996_v13  ;;  %v6713_v12 = vpop.eup %6712  ;;  %v1749_v13 = vsel %vm1641_vm0, %v1587_v39, %v1695_v51  ;;  %v401_v33 = vmul.f32 %v7019_v14, %v339_v6  ;;  %v1949_v41 = vld [vmem:[%s9822_s5 + $0x148] sm:$0x3] }
  0x4d   : > { %v1261_v44 = vmul.f32 %v7168_v57, %v1207_v63  ;;  %v1208_v26 = vadd.f32 0.2548296, %v1154_v2  ;;  %v1265_v40 = vmul.f32 %v7187_v16, %v1211_v31  ;;  %v1944_v57 = vld [vmem:[%s9822_s5 + $0x120] sm:$0xff]  ;;  %v837_v16 = vmul.f32 1.0614054, %v7273_v43 }
  0x4e   : > { %v1159_v49 = vmul.f32 %v7215_v3, %v1105_v46  ;;  %v1104_v29 = vadd.f32 -0.28449672, %v1050_v27  ;;  %v7322_v2 = vld [vmem:[%s9818_s1] sm:$0xff]  ;;  %v1696_v31 = vsub.f32 0.0, %v1588_v55  ;;  %v7362_v46 = vadd.f32 %v7024_v15, %v401_v33  ;;  %v338_v27 = vld [vmem:[%s7007_s11 + $0x50] sm:$0xff] }
  0x4f   : > { %2129 = vperm.xlu1 %6681, %v1941_v22   ;;  %2124 = vperm.xlu0 %6680, %v1940_v52   ;;  %v7294_v22 = vadd.f32 %v7024_v15, %v398_v42  ;;  %v1947_v52 = vld [vmem:[%s9822_s5 + $0x138] sm:$0xff]  ;;  %v7300_v4 = vmul.f32 %v6705_v7, %v1261_v44  ;;  %v1262_v45 = vmul.f32 %v7197_v30, %v1208_v26  ;;  %v7316_v30 = vmul.f32 0.5, %v7093_v53  ;;  %v1948_v42 = vld [vmem:[%s9822_s5 + $0x140] sm:$0xff] }
  0x50   : > { %v1213_v56 = vadd.f32 0.2548296, %v1159_v49  ;;  %v7310_v0 = vmul.f32 %v6707_v48, %v1265_v40  ;;  %v1158_v1 = vmul.f32 %v7219_v11, %v1104_v29  ;;  %v891_v63 = vadd.f32 -1.4531521, %v837_v16  ;;  %6012 = vmatprep.subr.mxu1 %v7322_v2 }
  0x51   : > { %v1323_v53 = vsub.f32 0.0, %v7195_v25  ;;  %v1585_v48 = vsub.f32 1.0, %v7300_v4  ;;  %v7358_v26 = vmul.f32 0.5, %v7122_v8  ;;  %v1803_v40 = vadd.f32 1.0, %v1749_v13  ;;  %v6715_v29 = vpop.eup %6714  ;;  %v341_v4 = vld [vmem:[%s7007_s11 + $0x68] sm:$0xff] }
  0x52   : > { %v1267_v7 = vmul.f32 %v7215_v3, %v1213_v56  ;;  %v7333_v3 = vmul.f32 0.70710677, %v7294_v22  ;;  %v1589_v32 = vsub.f32 1.0, %v7310_v0  ;;  %v1212_v39 = vadd.f32 0.2548296, %v1158_v1 }
  0x53   : > { %2139 = vperm.xlu1 %6681, %v1943_v38   ;;  %2134 = vperm.xlu0 %6680, %v1942_v9   ;;  %v1692_v38 = vsub.f32 0.0, %v1584_v28  ;;  %v7338_v9 = vmul.f32 %v6711_v23, %v1262_v45  ;;  %v945_v5 = vmul.f32 %v7273_v43, %v891_v63  ;;  %v1750_v8 = vsel %vm1642_vm2, %v1588_v55, %v1696_v31  ;;  %v340_v31 = vld [vmem:[%s7007_s11 + $0x60] sm:$0xff] }
  0x54   : > { %v7346_v24 = vand.u32 2147483647, %v7333_v3  ;;  %v7355_v44 = vmul.f32 %v6713_v12, %v1267_v7  ;;  %v1693_v23 = vsub.f32 0.0, %v1585_v48  ;;  %v7374_v16 = vmul.f32 0.70710677, %v7362_v46 }
  0x55   : > { %v1586_v51 = vsub.f32 1.0, %v7338_v9  ;;  %v1266_v35 = vmul.f32 %v7219_v11, %v1212_v39  ;;  %v400_v55 = vmul.f32 %v7019_v14, %v338_v27  ;;  %v7390_v1 = vmul.f32 %v1803_v40, %v7255_v58  ;;  %v343_v27 = vld [vmem:[%s7007_s11 + $0x78] sm:$0xff] }
  0x56   : > { %v674_v49 = vmul.f32 0.3275911, %v7346_v24  ;;  %v1591_v56 = vsub.f32 1.0, %v7355_v44  ;;  %v7387_v0 = vand.u32 2147483647, %v7374_v16  ;;  %v7393_v6 = vmul.f32 0.5, %v7164_v54 }
  0x57   : > { %2149 = vperm.xlu1 %6681, %v1945_v47   ;;  %2144 = vperm.xlu0 %6680, %v1944_v57   ;;  %v1746_v47 = vsel %vm1638_vm1, %v1584_v28, %v1692_v38  ;;  %v1377_v57 = vmul.f32 %v1323_v53, %v7195_v25  ;;  %v1950_v25 = vld [vmem:[%s9822_s5 + $0x150] sm:$0xff]  ;;  %v1697_v28 = vsub.f32 0.0, %v1589_v32  ;;  %v1804_v11 = vadd.f32 1.0, %v1750_v8  ;;  %v1955_v40 = vld [vmem:[%s9822_s5 + $0x178] sm:$0x3] }
  0x58   : > { %v1800_v45 = vadd.f32 1.0, %v1746_v47  ;;  %v1747_v63 = vsel %vm1639_vm3, %v1585_v48, %v1693_v23  ;;  %v677_v12 = vmul.f32 0.3275911, %v7387_v0  ;;  %v7399_v13 = vadd.f32 %v7024_v15, %v400_v55  ;;  %v1952_v48 = vld [vmem:[%s9822_s5 + $0x160] sm:$0x3] }
  0x59   : > { %v1440_v7 = vmul.f32 1.442695, %v1377_v57  ;;  %v1751_v58 = vsel %vm1643_vm4, %v1589_v32, %v1697_v28  ;;  %v1694_v38 = vsub.f32 0.0, %v1586_v51  ;;  %v7403_v53 = vmul.f32 %v6715_v29, %v1266_v35  ;;  %v1954_v29 = vld [vmem:[%s9822_s5 + $0x170] sm:$0xff] }
  0x5a   : > { %v403_v54 = vmul.f32 %v7019_v14, %v341_v4  ;;  %v7414_v9 = vmul.f32 %v1800_v45, %v7261_v17  ;;  %v1699_v59 = vsub.f32 0.0, %v1591_v56  ;;  %v731_v32 = vadd.f32 1.0, %v677_v12 }
  0x5b   : > { %2159 = vperm.xlu1 %6681, %v1947_v52   ;;  %2154 = vperm.xlu0 %6680, %v1946_v60   ;;  %v728_v52 = vadd.f32 1.0, %v674_v49  ;;  %v999_v60 = vadd.f32 1.4214138, %v945_v5  ;;  %v1801_v39 = vadd.f32 1.0, %v1747_v63  ;;  %v7424_v44 = vmul.f32 %v1804_v11, %v7264_v19  ;;  %v342_v11 = vld [vmem:[%s7007_s11 + $0x70] sm:$0x3] }
  0x5c   : > { %v1805_v5 = vadd.f32 1.0, %v1751_v58  ;;  %v402_v17 = vmul.f32 %v7019_v14, %v340_v31  ;;  %v1748_v47 = vsel %vm1640_vm5, %v1586_v51, %v1694_v38  ;;  %v1590_v57 = vsub.f32 1.0, %v7403_v53  ;;  %v1956_v63 = vld [vmem:[%s9822_s5 + $0x180] sm:$0xff] }
  0x5d   : > { %6716 = vrcp.f32 %v728_v52  ;;  %v1053_v33 = vmul.f32 %v7273_v43, %v999_v60  ;;  %v1322_v19 = vsub.f32 0.0, %v7346_v24  ;;  %v1753_v8 = vsel %vm1645_vm6, %v1591_v56, %v1699_v59 }
  0x5e   : > { %6718 = vpow2.f32 %v1440_v7  ;;  %v7446_v61 = vadd.f32 %v7024_v15, %v402_v17  ;;  %v7449_v51 = vmul.f32 %v1801_v39, %v7280_v20  ;;  %v405_v35 = vmul.f32 %v7019_v14, %v343_v27  ;;  %v1957_v20 = vld [vmem:[%s9822_s5 + $0x188] sm:$0xff] }
  0x5f   : > { %2169 = vperm.xlu1 %6681, %v1949_v41   ;;  %2164 = vperm.xlu0 %6680, %v1948_v42   ;;  %v7418_v41 = vmul.f32 0.70710677, %v7399_v13  ;;  %v7421_v42 = vadd.f32 %v7024_v15, %v403_v54  ;;  %6720 = vrcp.f32 %v731_v32  ;;  %v1107_v23 = vadd.f32 -0.28449672, %v1053_v33 }
  0x60   : > { %v1802_v52 = vadd.f32 1.0, %v1748_v47  ;;  %v7454_v18 = vmul.f32 0.5, %v7294_v22  ;;  %v7460_v4 = vmul.f32 0.70710677, %v7446_v61  ;;  %v7468_v56 = vmul.f32 %v1805_v5, %v7308_v62 }
  0x61   : > { %v622_v49 = vand.u32 2147483647, %v7418_v41  ;;  %v1807_v60 = vadd.f32 1.0, %v1753_v8  ;;  %v1376_v22 = vmul.f32 %v1322_v19, %v7346_v24  ;;  %v1698_v12 = vsub.f32 0.0, %v1590_v57 }
  0x62   : > { %v1161_v58 = vmul.f32 %v7273_v43, %v1107_v23  ;;  %v7480_v62 = vand.u32 2147483647, %v7460_v4  ;;  %v7483_v24 = vadd.f32 %v7024_v15, %v405_v35  ;;  %v404_v59 = vmul.f32 %v7019_v14, %v342_v11 }
  0x63   : > { %2179 = vperm.xlu1 %6681, %v1951_v34   ;;  %2174 = vperm.xlu0 %6680, %v1950_v25   ;;  %v7443_v34 = vmul.f32 0.70710677, %v7421_v42  ;;  %v1325_v25 = vsub.f32 0.0, %v7387_v0  ;;  %v676_v28 = vmul.f32 0.3275911, %v622_v49  ;;  %v7490_v32 = vmul.f32 %v1802_v52, %v7316_v30 }
  0x64   : > { %v1438_v39 = vmul.f32 1.442695, %v1376_v22  ;;  %v7493_v5 = vmul.f32 0.5, %v7362_v46  ;;  %v678_v17 = vmul.f32 0.3275911, %v7480_v62  ;;  %v7502_v47 = vmul.f32 %v1807_v60, %v7343_v36 }
  0x65   : > { %v7457_v55 = vand.u32 2147483647, %v7443_v34  ;;  %v730_v7 = vadd.f32 1.0, %v676_v28  ;;  %v1379_v54 = vmul.f32 %v1325_v25, %v7387_v0  ;;  %v1959_v0 = vld [vmem:[%s9822_s5 + $0x198] sm:$0xff]  ;;  %v1215_v19 = vadd.f32 0.2548296, %v1161_v58 }
  0x66   : > { %v345_v30 = vld [vmem:[%s7007_s11 + $0x88] sm:$0x3]  ;;  %v1752_v46 = vsel %vm1644_vm7, %v1590_v57, %v1698_v12  ;;  %v732_v23 = vadd.f32 1.0, %v678_v17  ;;  %v7510_v25 = vmul.f32 0.70710677, %v7483_v24  ;;  %v7513_v36 = vadd.f32 %v7024_v15, %v404_v59 }
  0x67   : > { %2189 = vperm.xlu1 %6681, %v1953_v37   ;;  %2184 = vperm.xlu0 %6680, %v1952_v48   ;;  %v7462_v45 = vpop.eup %6716  ;;  %v679_v53 = vmul.f32 0.3275911, %v7457_v55  ;;  %6722 = vrcp.f32 %v730_v7  ;;  %v1324_v37 = vsub.f32 0.0, %v622_v49  ;;  %v1444_v35 = vmul.f32 1.442695, %v1379_v54 }
  0x68   : > { %v836_v38 = vmul.f32 1.0614054, %v7462_v45  ;;  %v6719_v33 = vpop.eup %6718  ;;  %v7519_v57 = vand.u32 2147483647, %v7510_v25  ;;  %v407_v60 = vmul.f32 %v7019_v14, %v345_v30  ;;  %v1806_v22 = vadd.f32 1.0, %v1752_v46 }
  0x69   : > { %v733_v48 = vadd.f32 1.0, %v679_v53  ;;  %v7496_v27 = vpop.eup %6720  ;;  %v1378_v52 = vmul.f32 %v1324_v37, %v622_v49  ;;  %v1960_v49 = vld [vmem:[%s9822_s5 + $0x1a0] sm:$0xff]  ;;  %v1327_v11 = vsub.f32 0.0, %v7457_v55  ;;  %v1269_v12 = vmul.f32 %v7273_v43, %v1215_v19 }
  0x6a   : > { %v890_v31 = vadd.f32 -1.4531521, %v836_v38  ;;  %v839_v8 = vmul.f32 1.0614054, %v7496_v27  ;;  %v681_v38 = vmul.f32 0.3275911, %v7519_v57  ;;  %v7540_v43 = vadd.f32 %v7024_v15, %v407_v60 }
  0x6b   : > { %2199 = vperm.xlu1 %6681, %v1955_v40   ;;  %2194 = vperm.xlu0 %6680, %v1954_v29   ;;  %v1958_v40 = vld [vmem:[%s9822_s5 + $0x190] sm:$0x3]  ;;  %6724 = vrcp.f32 %v733_v48  ;;  %v1326_v53 = vsub.f32 0.0, %v7480_v62  ;;  %v1442_v48 = vmul.f32 1.442695, %v1378_v52  ;;  %v1381_v17 = vmul.f32 %v1327_v11, %v7457_v55 }
  0x6c   : > { %v944_v29 = vmul.f32 %v7462_v45, %v890_v31  ;;  %v893_v21 = vadd.f32 -1.4531521, %v839_v8  ;;  %6726 = vrcp.f32 %v732_v23  ;;  %v735_v59 = vadd.f32 1.0, %v681_v38 }
  0x6d   : > { %6728 = vpow2.f32 %v1438_v39  ;;  %v7546_v19 = vmul.f32 %v6719_v33, %v1269_v12  ;;  %v7550_v30 = vmul.f32 0.5, %v7399_v13  ;;  %v1380_v23 = vmul.f32 %v1326_v53, %v7480_v62 }
  0x6e   : > { %v998_v28 = vadd.f32 1.4214138, %v944_v29  ;;  %v947_v58 = vmul.f32 %v7496_v27, %v893_v21  ;;  %6730 = vpow2.f32 %v1444_v35  ;;  %v7557_v33 = vmul.f32 0.70710677, %v7540_v43 }
  0x6f   : > { %2209 = vperm.xlu1 %6681, %v1957_v20   ;;  %2204 = vperm.xlu0 %6680, %v1956_v63   ;;  %v1961_v20 = vld [vmem:[%s9822_s5 + $0x1a8] sm:$0x3]  ;;  %v7528_v63 = vmul.f32 0.70710677, %v7513_v36  ;;  %6732 = vrcp.f32 %v735_v59  ;;  %v7560_v52 = vmul.f32 %v1806_v22, %v7358_v26  ;;  %v1446_v12 = vmul.f32 1.442695, %v1380_v23 }
  0x70   : > { %v1052_v7 = vmul.f32 %v7462_v45, %v998_v28  ;;  %v1001_v37 = vadd.f32 1.4214138, %v947_v58  ;;  %6734 = vpow2.f32 %v1442_v48  ;;  %v1593_v38 = vsub.f32 1.0, %v7546_v19 }
  0x71   : > { %v7535_v54 = vand.u32 2147483647, %v7528_v63  ;;  %v7537_v31 = vpop.eup %6722  ;;  %vm1646_vm9 = vcmp.ge.f32.partialorder %v7333_v3, 0.0  ;;  %vm1649_vm10 = vcmp.ge.f32.partialorder %v7374_v16, 0.0  ;;  %vm1648_vm13 = vcmp.ge.f32.partialorder %v7418_v41, 0.0 }
  0x72   : > { %v1106_v14 = vadd.f32 -0.28449672, %v1052_v7  ;;  %v838_v39 = vmul.f32 1.0614054, %v7537_v31  ;;  %v1055_v29 = vmul.f32 %v7496_v27, %v1001_v37  ;;  %v7569_v7 = vand.u32 2147483647, %v7557_v33 }
  0x73   : > { %2219 = vperm.xlu1 %6681, %v1959_v0   ;;  %2214 = vperm.xlu0 %6680, %v1958_v40   ;;  %v680_v40 = vmul.f32 0.3275911, %v7535_v54  ;;  %vm1651_vm14 = vcmp.ge.f32.partialorder %v7443_v34, 0.0  ;;  %vm1650_vm15 = vcmp.ge.f32.partialorder %v7460_v4, 0.0  ;;  %vm1652_vm0 = vcmp.ge.f32.partialorder %v7528_v63, 0.0 }
  0x74   : > { %v1160_v0 = vmul.f32 %v7462_v45, %v1106_v14  ;;  %v892_v8 = vadd.f32 -1.4531521, %v838_v39  ;;  %v1109_v35 = vadd.f32 -0.28449672, %v1055_v29  ;;  %v7575_v14 = vmul.f32 0.5, %v7421_v42 }
  0x75   : > { %v7552_v46 = vpop.eup %6724  ;;  %v734_v28 = vadd.f32 1.0, %v680_v40  ;;  %v683_v37 = vmul.f32 0.3275911, %v7569_v7  ;;  %vm1653_vm1 = vcmp.ge.f32.partialorder %v7510_v25, 0.0  ;;  %vm1655_vm2 = vcmp.ge.f32.partialorder %v7557_v33, 0.0 }
  0x76   : > { %v1214_v15 = vadd.f32 0.2548296, %v1160_v0  ;;  %v841_v55 = vmul.f32 1.0614054, %v7552_v46  ;;  %v946_v13 = vmul.f32 %v7537_v31, %v892_v8  ;;  %v7564_v21 = vpop.eup %6726  ;;  %v1163_v62 = vmul.f32 %v7496_v27, %v1109_v35  ;;  %v344_v8 = vld [vmem:[%s7007_s11 + $0x80] sm:$0xff] }
  0x77   : > { %2229 = vperm.xlu1 %6681, %v1961_v20   ;;  %2224 = vperm.xlu0 %6680, %v1960_v49   ;;  %v1448_v20 = vmul.f32 1.442695, %v1381_v17  ;;  %6736 = vrcp.f32 %v734_v28  ;;  %v1329_v49 = vsub.f32 0.0, %v7519_v57  ;;  %v840_v22 = vmul.f32 1.0614054, %v7564_v21  ;;  %v6729_v58 = vpop.eup %6728 }
  0x78   : > { %v895_v60 = vadd.f32 -1.4531521, %v841_v55  ;;  %v1268_v11 = vmul.f32 %v7462_v45, %v1214_v15  ;;  %v1000_v26 = vadd.f32 1.4214138, %v946_v13  ;;  %v6731_v48 = vpop.eup %6730  ;;  %v1328_v0 = vsub.f32 0.0, %v7535_v54 }
  0x79   : > { %6738 = vpow2.f32 %v1448_v20  ;;  %v894_v45 = vadd.f32 -1.4531521, %v840_v22  ;;  %v1217_v39 = vadd.f32 0.2548296, %v1163_v62  ;;  %v1383_v40 = vmul.f32 %v1329_v49, %v7519_v57  ;;  %v7586_v23 = vpop.eup %6732  ;;  %v7600_v22 = vld [vmem:[%s9820_s3] ss:$0 sm:$0xff] }
  0x7a   : > { %v949_v53 = vmul.f32 %v7552_v46, %v895_v60  ;;  %v1054_v59 = vmul.f32 %v7537_v31, %v1000_v26  ;;  %v737_v19 = vadd.f32 1.0, %v683_v37  ;;  %v7582_v29 = vmul.f32 %v6729_v58, %v1268_v11  ;;  %v6735_v60 = vpop.eup %6734 }
  0x7b   : > { %v948_v15 = vmul.f32 %v7564_v21, %v894_v45  ;;  %6740 = vpow2.f32 %v1446_v12  ;;  %v1701_v28 = vsub.f32 0.0, %v1593_v38  ;;  %v7591_v55 = vmul.f32 0.5, %v7446_v61 }
  0x7c   : > { %v1003_v17 = vadd.f32 1.4214138, %v949_v53  ;;  %v1108_v42 = vadd.f32 -0.28449672, %v1054_v59  ;;  %6742 = vrcp.f32 %v737_v19  ;;  %v843_v20 = vmul.f32 1.0614054, %v7586_v23 }
  0x7d   : > { %v1002_v13 = vadd.f32 1.4214138, %v948_v15  ;;  %v1382_v62 = vmul.f32 %v1328_v0, %v7535_v54  ;;  %v1271_v49 = vmul.f32 %v7496_v27, %v1217_v39  ;;  %v1452_v26 = vmul.f32 1.442695, %v1383_v40 }
  0x7e   : > { %v1057_v35 = vmul.f32 %v7552_v46, %v1003_v17  ;;  %v1162_v57 = vmul.f32 %v7537_v31, %v1108_v42  ;;  %v406_v61 = vmul.f32 %v7600_v22, %v344_v8  ;;  %v1592_v58 = vsub.f32 1.0, %v7582_v29 }
  0x7f   : > { %v1056_v37 = vmul.f32 %v7564_v21, %v1002_v13  ;;  %v897_v54 = vadd.f32 -1.4531521, %v843_v20  ;;  %v1755_v27 = vsel %vm1647_vm8, %v1593_v38, %v1701_v28  ;;  %v1331_v0 = vsub.f32 0.0, %v7569_v7 }
  0x80   : > { %v1111_v11 = vadd.f32 -0.28449672, %v1057_v35  ;;  %v1216_v53 = vadd.f32 0.2548296, %v1162_v57  ;;  %v1450_v19 = vmul.f32 1.442695, %v1382_v62  ;;  %v7614_v29 = vmul.f32 %v6731_v48, %v1271_v49 }
  0x81   : > { %v7603_v12 = vpop.eup %6736  ;;  %v1110_v17 = vadd.f32 -0.28449672, %v1056_v37  ;;  %v951_v40 = vmul.f32 %v7586_v23, %v897_v54  ;;  %v7622_v38 = vadd.f32 %v7619_v10, %v406_v61  ;;  %v1700_v28 = vsub.f32 0.0, %v1592_v58 }
  0x82   : > { %v1165_v59 = vmul.f32 %v7552_v46, %v1111_v11  ;;  %v842_v45 = vmul.f32 1.0614054, %v7603_v12  ;;  %v1270_v39 = vmul.f32 %v7537_v31, %v1216_v53  ;;  %6744 = vpow2.f32 %v1452_v26 }
  0x83   : > { %v6739_v8 = vpop.eup %6738  ;;  %v1164_v31 = vmul.f32 %v7564_v21, %v1110_v17  ;;  %v1005_v35 = vadd.f32 1.4214138, %v951_v40  ;;  %v1385_v20 = vmul.f32 %v1331_v0, %v7569_v7  ;;  %v1809_v49 = vadd.f32 1.0, %v1755_v27 }
  0x84   : > { %v1219_v42 = vadd.f32 0.2548296, %v1165_v59  ;;  %v896_v15 = vadd.f32 -1.4531521, %v842_v45  ;;  %v7626_v48 = vmul.f32 %v6735_v60, %v1270_v39  ;;  %6746 = vpow2.f32 %v1450_v19 }
  0x85   : > { %v6741_v62 = vpop.eup %6740  ;;  %v1218_v11 = vadd.f32 0.2548296, %v1164_v31  ;;  %v1059_v61 = vmul.f32 %v7586_v23, %v1005_v35  ;;  %v1595_v26 = vsub.f32 1.0, %v7614_v29  ;;  %v7638_v7 = vmul.f32 0.70710677, %v7622_v38 }
  0x86   : > { %v1273_v57 = vmul.f32 %v7552_v46, %v1219_v42  ;;  %v950_v13 = vmul.f32 %v7603_v12, %v896_v15  ;;  %v7632_v53 = vpop.eup %6742  ;;  %v1754_v27 = vsel %vm1646_vm9, %v1592_v58, %v1700_v28  ;;  %v1594_v39 = vsub.f32 1.0, %v7626_v48 }
  0x87   : > { %v1272_v59 = vmul.f32 %v7564_v21, %v1218_v11  ;;  %v1113_v45 = vadd.f32 -0.28449672, %v1059_v61  ;;  %v845_v0 = vmul.f32 1.0614054, %v7632_v53  ;;  %v7646_v17 = vmul.f32 0.5, %v7513_v36 }
  0x88   : > { %v1543_v60 = vmul.f32 %v6739_v8, %v1273_v57  ;;  %v1004_v46 = vadd.f32 1.4214138, %v950_v13  ;;  %v1456_v19 = vmul.f32 1.442695, %v1385_v20  ;;  %v1808_v58 = vadd.f32 1.0, %v1754_v27 }
  0x89   : > { %v7652_v15 = vmul.f32 %v6741_v62, %v1272_v59  ;;  %v1167_v3 = vmul.f32 %v7586_v23, %v1113_v45  ;;  %v1703_v8 = vsub.f32 0.0, %v1595_v26  ;;  %v7660_v36 = vand.u32 2147483647, %v7638_v7 }
  0x8a   : > { %v1058_v40 = vmul.f32 %v7603_v12, %v1004_v46  ;;  %v1597_v42 = vsub.f32 1.0, %v1543_v60  ;;  %v899_v57 = vadd.f32 -1.4531521, %v845_v0  ;;  %v1702_v20 = vsub.f32 0.0, %v1594_v39 }
  0x8b   : > { %v1221_v35 = vadd.f32 0.2548296, %v1167_v3  ;;  %6748 = vpow2.f32 %v1456_v19  ;;  %v1596_v60 = vsub.f32 1.0, %v7652_v15  ;;  %v1757_v59 = vsel %vm1649_vm10, %v1595_v26, %v1703_v8 }
  0x8c   : > { %v1112_v48 = vadd.f32 -0.28449672, %v1058_v40  ;;  %v6745_v62 = vpop.eup %6744  ;;  %v1705_v61 = vsub.f32 0.0, %v1597_v42  ;;  %v953_v0 = vmul.f32 %v7632_v53, %v899_v57  ;;  %v682_v40 = vmul.f32 0.3275911, %v7660_v36 }
  0x8d   : > { %v1756_v16 = vsel %vm1648_vm13, %v1594_v39, %v1702_v20  ;;  %v1704_v8 = vsub.f32 0.0, %v1596_v60  ;;  %vm1654_vm3 = vcmp.ge.f32.partialorder %v7638_v7, 0.0  ;;  %vm2997_vm13 = vcmask 1045504  }
  0x8e   : > { %v1980_v37 = vpop.permute.xlu1 %1979  ;;  %v1965_v54 = vpop.permute.xlu0 %1964  ;;  %v1759_v26 = vsel %vm1651_vm14, %v1597_v42, %v1705_v61  ;;  %v1007_v39 = vadd.f32 1.4214138, %v953_v0  ;;  %v736_v20 = vadd.f32 1.0, %v682_v40  ;;  %v1810_v42 = vadd.f32 1.0, %v1756_v16 }
  0x8f   : > { %v7650_v29 = vmul.f32 %v1965_v54, %v7414_v9  ;;  %v7656_v21 = vmul.f32 %v1980_v37, %v7390_v1  ;;  %v7663_v9 = vmul.f32 %v1809_v49, %v7393_v6  ;;  %v1166_v6 = vmul.f32 %v7603_v12, %v1112_v48 }
  0x90   : > { %v1275_v37 = vmul.f32 %v7586_v23, %v1221_v35  ;;  %v1813_v61 = vadd.f32 1.0, %v1759_v26  ;;  %6750 = vrcp.f32 %v736_v20  ;;  %v1864_v0 = vmul.f32 %v1810_v42, %v7550_v30 }
  0x91   : > { %9962 = vst [vmem:[#allocation2_spill] sm:$0xff] %v7650_v29  ;;  %9963 = vst [vmem:[#allocation3_spill] sm:$0xff] %v7656_v21  ;;  %v2336_v11 = vrot.slane %v7650_v29, 1  ;;  %v2341_v46 = vrot.slane %v7656_v21, 1  ;;  %v1220_v45 = vadd.f32 0.2548296, %v1166_v6 }
  0x92   : > { %v1985_v28 = vpop.permute.xlu1 %1984  ;;  %v1970_v31 = vpop.permute.xlu0 %1969  ;;  %v7701_v35 = vmul.f32 %v6745_v62, %v1275_v37  ;;  %v347_v6 = vld [vmem:[%s7007_s11 + $0x98] sm:$0xff]  ;;  %v1758_v62 = vsel %vm1650_vm15, %v1596_v60, %v1704_v8 }
  0x93   : > { %v7666_v13 = vmul.f32 %v1985_v28, %v7424_v44  ;;  %v7669_v1 = vmul.f32 %v1970_v31, %v7449_v51  ;;  %v6747_v51 = vpop.eup %6746  ;;  %v1862_v31 = vmul.f32 %v1808_v58, %v7454_v18  ;;  %v1812_v40 = vadd.f32 1.0, %v1758_v62 }
  0x95   : > { %9964 = vst [vmem:[#allocation4_spill] sm:$0xff] %v7666_v13  ;;  %9965 = vst [vmem:[#allocation5_spill] sm:$0xff] %v7669_v1  ;;  %v2337_v49 = vrot.slane %v7669_v1, 1  ;;  %v2342_v44 = vrot.slane %v7666_v13, 1  ;;  %v7715_v37 = vpop.eup %6748  ;;  %v361_v1 = vld [vmem:[%s7007_s11 + $0x108] sm:$0xff] }
  0x96   : > { %v1990_v54 = vpop.permute.xlu1 %1989  ;;  %v1975_v27 = vpop.permute.xlu0 %1974 }
  0x97   : > { %v7684_v19 = vmul.f32 %v1990_v54, %v7468_v56  ;;  %v7687_v15 = vmul.f32 %v1975_v27, %v7490_v32  ;;  %v2338_v23 = vsel %vm2335_vm11, %v2336_v11, %v2337_v49  ;;  %v2343_v3 = vsel %vm2335_vm11, %v2341_v46, %v2342_v44 }
  0x98   : > { %5964 = vmatprep.mubr.msk.f32.mxu1 %vm2418_vm12, %v2338_v23  ;;  %6164 = vmatprep.mubr.msk.f32.mxu0 %vm2418_vm12, %v2343_v3  ;;  %v1274_v56 = vmul.f32 %v7603_v12, %v1220_v45  ;;  %v1811_v11 = vadd.f32 1.0, %v1757_v59  ;;  %v409_v27 = vmul.f32 %v7600_v22, %v347_v6  ;;  %v346_v23 = vld [vmem:[%s7007_s11 + $0x90] sm:$0xff]  ;;  %v349_v6 = vld [vmem:[%s7007_s11 + $0xa8] sm:$0xff] }
  0x99   : > { %9966 = vst [vmem:[#allocation6_spill] sm:$0xff] %v7687_v15  ;;  %v2344_v32 = vrot.slane %v7684_v19, 1  ;;  %v2339_v28 = vrot.slane %v7687_v15, 1 }
  0x9a   : > { %v2000_v48 = vpop.permute.xlu1 %1999  ;;  %v1995_v57 = vpop.permute.xlu0 %1994  ;;  %v1544_v41 = vmul.f32 %v6747_v51, %v1274_v56  ;;  %v1599_v51 = vsub.f32 1.0, %v7701_v35  ;;  %v7741_v16 = vadd.f32 %v7619_v10, %v409_v27 }
  0x9b   : > { %v7704_v34 = vmul.f32 %v2000_v48, %v7502_v47  ;;  %v7707_v12 = vmul.f32 %v1995_v57, %v7560_v52  ;;  %v2340_v18 = vsel %vm2335_vm11, %v2337_v49, %v2339_v28  ;;  %v2345_v58 = vsel %vm2335_vm11, %v2342_v44, %v2344_v32 }
  0x9c   : > { %v1598_v46 = vsub.f32 1.0, %v1544_v41  ;;  %5965 = vmatmul.mubr.msk.f32.vlgmr.msra.gmra.mrb[0].mxu1 %vm2418_vm12, %v2340_v18  ;;  %6165 = vmatmul.mubr.msk.f32.vlgmr.msra.gmra.mrb[0].mxu0 %vm2418_vm12, %v2345_v58  ;;  %v1061_v49 = vmul.f32 %v7632_v53, %v1007_v39  ;;  %v1865_v44 = vmul.f32 %v1811_v11, %v7493_v5  ;;  %v1707_v8 = vsub.f32 0.0, %v1599_v51 }
  0x9d   : > { %9967 = vst [vmem:[#allocation7_spill] sm:$0xff] %v7704_v34  ;;  %9968 = vst [vmem:[#allocation8_spill] sm:$0xff] %v7707_v12  ;;  %v2346_v47 = vrot.slane %v7707_v12, 1  ;;  %v2347_v52 = vrot.slane %v7704_v34, 1  ;;  %5967 = vmatprep.mubr.msk.f32.mxu1 %vm2418_vm12, %v2343_v3  ;;  %6013 = vmatpush3.msra.mxu1 %v7322_v2  ;;  %v1330_v2 = vsub.f32 0.0, %v7660_v36  ;;  %v1866_v57 = vmul.f32 %v1812_v40, %v7591_v55 }
  0x9e   : > { %v2010_v4 = vpop.permute.xlu1 %2009  ;;  %v2005_v60 = vpop.permute.xlu0 %2004  ;;  %v1706_v54 = vsub.f32 0.0, %v1598_v46  ;;  %6213 = vmatpush3.msra.mxu0 %v7327_v50  ;;  %v1115_v3 = vadd.f32 -0.28449672, %v1061_v49  ;;  %v1867_v50 = vmul.f32 %v1813_v61, %v7575_v14  ;;  %v1761_v62 = vsel %vm1653_vm1, %v1599_v51, %v1707_v8 }
  0x9f   : > { %v7727_v59 = vmul.f32 %v2005_v60, %v1862_v31  ;;  %v7730_v45 = vsel %vm2335_vm11, %v2346_v47, %v2347_v52  ;;  %v7744_v26 = vmul.f32 %v2010_v4, %v7663_v9  ;;  %v7753_v31 = vmul.f32 0.70710677, %v7741_v16 }
  0xa0   : > { %9969 = vst [vmem:[#allocation9_spill] sm:$0xff] %v7730_v45  ;;  %6167 = vmatprep.mubr.msk.f32.mxu0 %vm2418_vm12, %v7730_v45  ;;  %v1760_v5 = vsel %vm1652_vm0, %v1598_v46, %v1706_v54  ;;  %5968 = vmatmul.mubr.msk.f32.gmra.mrb[2].mxu1 %vm2418_vm12, %v2345_v58  ;;  %v1169_v28 = vmul.f32 %v7632_v53, %v1115_v3  ;;  %v519_v54 = vmul.f32 0.5, %v7483_v24  ;;  %v1815_v40 = vadd.f32 1.0, %v1761_v62 }
  0xa1   : > { %v2349_v30 = vrot.slane %v7727_v59, 1  ;;  %5970 = vmatprep.mubr.msk.f32.mxu1 %vm2418_vm12, %v7730_v45  ;;  %v1814_v32 = vadd.f32 1.0, %v1760_v5  ;;  %v408_v9 = vmul.f32 %v7600_v22, %v346_v23  ;;  %v631_v41 = vand.u32 2147483647, %v7753_v31 }
  0xa2   : > { %v2020_v63 = vpop.permute.xlu1 %2019  ;;  %v2015_v56 = vpop.permute.xlu0 %2014  ;;  %v1223_v11 = vadd.f32 0.2548296, %v1169_v28  ;;  %v2351_v42 = vrot.slane %v7744_v26, 1  ;;  %v1384_v55 = vmul.f32 %v1330_v2, %v7660_v36  ;;  %v411_v51 = vmul.f32 %v7600_v22, %v349_v6 }
  0xa3   : > { %v7756_v35 = vmul.f32 %v2020_v63, %v1865_v44  ;;  %v7758_v48 = vmul.f32 %v2015_v56, %v1864_v0  ;;  %v7761_v14 = vsel %vm2335_vm11, %v2347_v52, %v2349_v30  ;;  %v7768_v39 = vadd.f32 %v7619_v10, %v408_v9  ;;  %v7791_v44 = vpop.eup %6750  ;;  %v348_v9 = vld [vmem:[%s7007_s11 + $0xa0] sm:$0x3] }
  0xa4   : > { %9970 = vst [vmem:[#allocation10_spill] sm:$0xff] %v7761_v14  ;;  %6168 = vmatmul.mubr.msk.f32.gmra.mrb[2].mxu0 %vm2418_vm12, %v7761_v14  ;;  %5971 = vmatmul.mubr.msk.f32.gmra.mrb[4].mxu1 %vm2418_vm12, %v7761_v14  ;;  %v1868_v46 = vmul.f32 %v1814_v32, %v7646_v17  ;;  %v1277_v47 = vmul.f32 %v7632_v53, %v1223_v11  ;;  %v685_v52 = vmul.f32 0.3275911, %v631_v41  ;;  %v1454_v5 = vmul.f32 1.442695, %v1384_v55 }
  0xa5   : > { %v2354_v20 = vrot.slane %v7756_v35, 1  ;;  %v2352_v61 = vrot.slane %v7758_v48, 1  ;;  %v7799_v17 = vmul.f32 0.70710677, %v7768_v39  ;;  %v471_v56 = vadd.f32 %v7619_v10, %v411_v51 }
  0xa6   : > { %v2030_v18 = vpop.permute.xlu1 %2029  ;;  %v2025_v58 = vpop.permute.xlu0 %2024  ;;  %v1547_v25 = vmul.f32 %v7715_v37, %v1277_v47  ;;  %v739_v53 = vadd.f32 1.0, %v685_v52  ;;  %v844_v37 = vmul.f32 1.0614054, %v7791_v44  ;;  %vm1657_vm4 = vcmp.ge.f32.partialorder %v7753_v31, 0.0 }
  0xa7   : > { %v7781_v49 = vmul.f32 %v2030_v18, %v1867_v50  ;;  %v7783_v4 = vmul.f32 %v2025_v58, %v1866_v57  ;;  %v7786_v60 = vsel %vm2335_vm11, %v2351_v42, %v2352_v61  ;;  %v7789_v36 = vsel %vm2335_vm11, %v2352_v61, %v2354_v20  ;;  %v351_v20 = vld [vmem:[%s7007_s11 + $0xb8] sm:$0x3]  ;;  %v350_v42 = vld [vmem:[%s7007_s11 + $0xb0] sm:$0xff] }
  0xa8   : > { %9971 = vst [vmem:[#allocation11_spill] sm:$0xff] %v7786_v60  ;;  %9972 = vst [vmem:[#allocation12_spill] sm:$0xff] %v7789_v36  ;;  %5973 = vmatprep.mubr.msk.f32.mxu1 %vm2418_vm12, %v7786_v60  ;;  %6170 = vmatprep.mubr.msk.f32.mxu0 %vm2418_vm12, %v7786_v60  ;;  %6752 = vrcp.f32 %v739_v53  ;;  %v630_v3 = vand.u32 2147483647, %v7799_v17  ;;  %v898_v24 = vadd.f32 -1.4531521, %v844_v37  ;;  %v1869_v61 = vmul.f32 %v1815_v40, %v519_v54 }
  0xa9   : > { %5974 = vmatmul.mubr.msk.f32.gmra.mrb[6].mxu1 %vm2418_vm12, %v7789_v36  ;;  %6171 = vmatmul.mubr.msk.f32.gmra.mrb[4].mxu0 %vm2418_vm12, %v7789_v36  ;;  %v2356_v27 = vrot.slane %v7783_v4, 1  ;;  %v2357_v0 = vrot.slane %v7781_v49, 1  ;;  %v1333_v50 = vsub.f32 0.0, %v631_v41  ;;  %v1601_v8 = vsub.f32 1.0, %v1547_v25 }
  0xaa   : > { %v2035_v23 = vpop.permute.xlu0 %2034  ;;  %v684_v63 = vmul.f32 0.3275911, %v630_v3  ;;  %v952_v28 = vmul.f32 %v7791_v44, %v898_v24  ;;  %6754 = vpow2.f32 %v1454_v5  ;;  %v1332_v11 = vsub.f32 0.0, %v630_v3  ;;  %v2040_v47 = vpop.permute.xlu1 %2039 }
  0xab   : > { %v7811_v2 = vmul.f32 %v2035_v23, %v1868_v46  ;;  %v7814_v30 = vsel %vm2335_vm11, %v2356_v27, %v2357_v0  ;;  %v1387_v18 = vmul.f32 %v1333_v50, %v631_v41  ;;  %v1709_v58 = vsub.f32 0.0, %v1601_v8 }
  0xac   : > { %9973 = vst [vmem:[#allocation13_spill] sm:$0xff] %v7814_v30  ;;  %5976 = vmatprep.mubr.msk.f32.mxu1 %vm2418_vm12, %v7814_v30  ;;  %6173 = vmatprep.mubr.msk.f32.mxu0 %vm2418_vm12, %v7814_v30  ;;  %v738_v57 = vadd.f32 1.0, %v684_v63  ;;  %v1006_v55 = vadd.f32 1.4214138, %v952_v28  ;;  %v7833_v62 = vmul.f32 0.70710677, %v471_v56  ;;  %v410_v46 = vmul.f32 %v7600_v22, %v348_v9 }
  0xad   : > { %v2359_v32 = vrot.slane %v7811_v2, 1  ;;  %v413_v25 = vmul.f32 %v7600_v22, %v351_v20  ;;  %v412_v41 = vmul.f32 %v7600_v22, %v350_v42  ;;  %v1386_v53 = vmul.f32 %v1332_v11, %v630_v3 }
  0xae   : > { %6756 = vrcp.f32 %v738_v57  ;;  %v1060_v52 = vmul.f32 %v7791_v44, %v1006_v55  ;;  %v633_v51 = vand.u32 2147483647, %v7833_v62  ;;  %v7842_v54 = vadd.f32 %v7619_v10, %v410_v46 }
  0xaf   : > { %v7827_v6 = vsel %vm2335_vm11, %v2357_v0, %v2359_v32  ;;  %v521_v27 = vmul.f32 0.5, %v7540_v43  ;;  %v7846_v0 = vmul.f32 0.5, %v7622_v38  ;;  %v1460_v40 = vmul.f32 1.442695, %v1387_v18 }
  0xb0   : > { %9974 = vst [vmem:[#allocation14_spill] sm:$0xff] %v7827_v6  ;;  %5977 = vmatmul.mubr.msk.f32.gmra.mrb[8].mxu1 %vm2418_vm12, %v7827_v6  ;;  %6174 = vmatmul.mubr.msk.f32.gmra.mrb[6].mxu0 %vm2418_vm12, %v7827_v6  ;;  %v1114_v37 = vadd.f32 -0.28449672, %v1060_v52  ;;  %v7850_v23 = vmul.f32 %v2040_v47, %v1869_v61  ;;  %v1763_v5 = vsel %vm1655_vm2, %v1601_v8, %v1709_v58  ;;  %v687_v24 = vmul.f32 0.3275911, %v633_v51 }
  0xb1   : > { %v7853_v3 = vmul.f32 0.70710677, %v7842_v54  ;;  %v7858_v43 = vadd.f32 %v7619_v10, %v413_v25  ;;  %v7861_v38 = vadd.f32 %v7619_v10, %v412_v41  ;;  %v7865_v32 = vmul.f32 0.5, %v7741_v16 }
  0xb2   : > { %v7848_v33 = vpop.eup %6752  ;;  %v1168_v50 = vmul.f32 %v7791_v44, %v1114_v37  ;;  %v1458_v8 = vmul.f32 1.442695, %v1386_v53  ;;  %v741_v28 = vadd.f32 1.0, %v687_v24  ;;  %6758 = vpow2.f32 %v1460_v40  ;;  %v353_v53 = vld [vmem:[%s7007_s11 + $0xc8] sm:$0xff] }
  0xb3   : > { %v847_v63 = vmul.f32 1.0614054, %v7848_v33  ;;  %v632_v9 = vand.u32 2147483647, %v7853_v3  ;;  %v7869_v20 = vmul.f32 0.5, %v7768_v39  ;;  %v1817_v61 = vadd.f32 1.0, %v1763_v5 }
  0xb4   : > { %v1222_v57 = vadd.f32 0.2548296, %v1168_v50  ;;  %v6755_v42 = vpop.eup %6754  ;;  %6760 = vrcp.f32 %v741_v28  ;;  %v7875_v46 = vmul.f32 0.70710677, %v7858_v43  ;;  %v7878_v47 = vmul.f32 0.70710677, %v7861_v38  ;;  %v2050_v28 = vpop.permute.xlu1 %2049 }
  0xb5   : > { %v901_v11 = vadd.f32 -1.4531521, %v847_v63  ;;  %v686_v18 = vmul.f32 0.3275911, %v632_v9  ;;  %6762 = vpow2.f32 %v1458_v8  ;;  %v7882_v39 = vmul.f32 0.5, %v471_v56 }
  0xb6   : > { %v1276_v16 = vmul.f32 %v7791_v44, %v1222_v57  ;;  %v1335_v25 = vsub.f32 0.0, %v633_v51  ;;  %v635_v5 = vand.u32 2147483647, %v7875_v46  ;;  %v1871_v24 = vmul.f32 %v1817_v61, %v521_v27 }
  0xb7   : > { %v955_v58 = vmul.f32 %v7848_v33, %v901_v11  ;;  %v740_v41 = vadd.f32 1.0, %v686_v18  ;;  %v1334_v50 = vsub.f32 0.0, %v632_v9  ;;  %v634_v63 = vand.u32 2147483647, %v7878_v47 }
  0xb8   : > { %v7880_v52 = vpop.eup %6756  ;;  %v1546_v37 = vmul.f32 %v6755_v42, %v1276_v16  ;;  %v689_v11 = vmul.f32 0.3275911, %v635_v5  ;;  %v1389_v55 = vmul.f32 %v1335_v25, %v633_v51  ;;  %v1337_v18 = vsub.f32 0.0, %v635_v5 }
  0xb9   : > { %v1009_v40 = vadd.f32 1.4214138, %v955_v58  ;;  %v846_v44 = vmul.f32 1.0614054, %v7880_v52  ;;  %6764 = vrcp.f32 %v740_v41  ;;  %v688_v42 = vmul.f32 0.3275911, %v634_v63 }
  0xba   : > { %v1600_v57 = vsub.f32 1.0, %v1546_v37  ;;  %v415_v16 = vmul.f32 %v7600_v22, %v353_v53  ;;  %v743_v61 = vadd.f32 1.0, %v689_v11  ;;  %v7891_v41 = vmul.f32 %v2050_v28, %v1871_v24 }
  0xbb   : > { %v1063_v8 = vmul.f32 %v7848_v33, %v1009_v40  ;;  %v900_v56 = vadd.f32 -1.4531521, %v846_v44  ;;  %v1388_v30 = vmul.f32 %v1334_v50, %v632_v9  ;;  %v742_v36 = vadd.f32 1.0, %v688_v42  ;;  %v352_v44 = vld [vmem:[%s7007_s11 + $0xc0] sm:$0xff]  ;;  %v2045_v9 = vpop.permute.xlu0 %2044 }
  0xbc   : > { %v1708_v58 = vsub.f32 0.0, %v1600_v57  ;;  %v1336_v37 = vsub.f32 0.0, %v634_v63  ;;  %v6759_v60 = vpop.eup %6758  ;;  %6766 = vrcp.f32 %v743_v61  ;;  %v1391_v24 = vmul.f32 %v1337_v18, %v635_v5 }
  0xbd   : > { %v1117_v6 = vadd.f32 -0.28449672, %v1063_v8  ;;  %v954_v27 = vmul.f32 %v7880_v52, %v900_v56  ;;  %v1464_v56 = vmul.f32 1.442695, %v1389_v55  ;;  %6768 = vrcp.f32 %v742_v36 }
  0xbe   : > { %v1762_v40 = vsel %vm1654_vm3, %v1600_v57, %v1708_v58  ;;  %v7897_v53 = vpop.eup %6760  ;;  %v7903_v57 = vadd.f32 %v7619_v10, %v415_v16  ;;  %v2364_v11 = vrot.slane %v7891_v41, 1  ;;  %v1390_v58 = vmul.f32 %v1336_v37, %v634_v63 }
  0xbf   : > { %v1171_v51 = vmul.f32 %v7848_v33, %v1117_v6  ;;  %v1008_v25 = vadd.f32 1.4214138, %v954_v27  ;;  %v1816_v8 = vadd.f32 1.0, %v1762_v40  ;;  %v849_v7 = vmul.f32 1.0614054, %v7897_v53  ;;  %v6763_v6 = vpop.eup %6762 }
  0xc0   : > { %v414_v27 = vmul.f32 %v7600_v22, %v352_v44  ;;  %v1462_v18 = vmul.f32 1.442695, %v1388_v30  ;;  %6770 = vpow2.f32 %v1464_v56  ;;  %v1468_v16 = vmul.f32 1.442695, %v1391_v24 }
  0xc1   : > { %v1225_v50 = vadd.f32 0.2548296, %v1171_v51  ;;  %v1062_v28 = vmul.f32 %v7880_v52, %v1008_v25  ;;  %v1870_v42 = vmul.f32 %v1816_v8, %v7846_v0  ;;  %v903_v5 = vadd.f32 -1.4531521, %v849_v7 }
  0xc2   : > { %v7914_v51 = vmul.f32 0.70710677, %v7903_v57  ;;  %vm1656_vm5 = vcmp.ge.f32.partialorder %v7799_v17, 0.0  ;;  %v7923_v8 = vadd.f32 %v7619_v10, %v414_v27  ;;  %6772 = vpow2.f32 %v1462_v18 }
  0xc3   : > { %v1279_v55 = vmul.f32 %v7848_v33, %v1225_v50  ;;  %v1116_v36 = vadd.f32 -0.28449672, %v1062_v28  ;;  %v7909_v61 = vpop.eup %6764  ;;  %v7911_v40 = vmul.f32 %v2045_v9, %v1870_v42  ;;  %v957_v63 = vmul.f32 %v7897_v53, %v903_v5 }
  0xc4   : > { %v848_v37 = vmul.f32 1.0614054, %v7909_v61  ;;  %v1466_v33 = vmul.f32 1.442695, %v1390_v58  ;;  %v637_v44 = vand.u32 2147483647, %v7914_v51  ;;  %6774 = vpow2.f32 %v1468_v16 }
  0xc5   : > { %v1549_v25 = vmul.f32 %v6759_v60, %v1279_v55  ;;  %v1170_v0 = vmul.f32 %v7880_v52, %v1116_v36  ;;  %v2362_v30 = vrot.slane %v7911_v40, 1  ;;  %v1011_v9 = vadd.f32 1.4214138, %v957_v63 }
  0xc6   : > { %v9975_v60 = vrot.slane %v7850_v23, 1  ;;  %v902_v7 = vadd.f32 -1.4531521, %v848_v37  ;;  %v691_v42 = vmul.f32 0.3275911, %v637_v44  ;;  %v7933_v58 = vpop.eup %6766  ;;  %vm1659_vm6 = vcmp.ge.f32.partialorder %v7833_v62, 0.0 }
  0xc7   : > { %v1603_v56 = vsub.f32 1.0, %v1549_v25  ;;  %v1224_v24 = vadd.f32 0.2548296, %v1170_v0  ;;  %v7931_v28 = vsel %vm2335_vm11, %v2362_v30, %v2364_v11  ;;  %v1065_v36 = vmul.f32 %v7897_v53, %v1011_v9  ;;  %v7941_v5 = vpop.eup %6768 }
  0xc8   : > { %v7928_v50 = vsel %vm2335_vm11, %v9975_v60, %v2362_v30  ;;  %9977 = vst [vmem:[#allocation16_spill] sm:$0xff] %v7931_v28  ;;  %v851_v11 = vmul.f32 1.0614054, %v7933_v58  ;;  %v745_v18 = vadd.f32 1.0, %v691_v42  ;;  %v7950_v25 = vmul.f32 0.70710677, %v7923_v8 }
  0xc9   : > { %9976 = vst [vmem:[#allocation15_spill] sm:$0xff] %v7928_v50  ;;  %v1711_v55 = vsub.f32 0.0, %v1603_v56  ;;  %v1278_v27 = vmul.f32 %v7880_v52, %v1224_v24  ;;  %5979 = vmatprep.mubr.msk.f32.mxu1 %vm2418_vm12, %v7928_v50  ;;  %6176 = vmatprep.mubr.msk.f32.mxu0 %vm2418_vm12, %v7928_v50  ;;  %v956_v52 = vmul.f32 %v7909_v61, %v902_v7  ;;  %v1119_v63 = vadd.f32 -0.28449672, %v1065_v36  ;;  %v355_v60 = vld [vmem:[%s7007_s11 + $0xd8] sm:$0xff] }
  0xca   : > { %5980 = vmatmul.mubr.msk.f32.gmra.mrb[10].mxu1 %vm2418_vm12, %v7931_v28  ;;  %6177 = vmatmul.mubr.msk.f32.gmra.mrb[8].mxu0 %vm2418_vm12, %v7931_v28  ;;  %v850_v37 = vmul.f32 1.0614054, %v7941_v5  ;;  %v905_v9 = vadd.f32 -1.4531521, %v851_v11  ;;  %6776 = vrcp.f32 %v745_v18  ;;  %v1339_v42 = vsub.f32 0.0, %v637_v44  ;;  %v6771_v14 = vpop.eup %6770 }
  0xcb   : > { %v1765_v16 = vsel %vm1657_vm4, %v1603_v56, %v1711_v55  ;;  %v1548_v0 = vmul.f32 %v6763_v6, %v1278_v27  ;;  %v1010_v24 = vadd.f32 1.4214138, %v956_v52  ;;  %v1173_v7 = vmul.f32 %v7897_v53, %v1119_v63  ;;  %v2060_v55 = vpop.permute.xlu1 %2059 }
  0xcc   : > { %v1819_v30 = vadd.f32 1.0, %v1765_v16  ;;  %v904_v50 = vadd.f32 -1.4531521, %v850_v37  ;;  %v959_v6 = vmul.f32 %v7933_v58, %v905_v9  ;;  %v7961_v56 = vand.u32 2147483647, %v7950_v25 }
  0xcd   : > { %v1602_v28 = vsub.f32 1.0, %v1548_v0  ;;  %v1064_v31 = vmul.f32 %v7909_v61, %v1010_v24  ;;  %v1227_v36 = vadd.f32 0.2548296, %v1173_v7  ;;  %v417_v11 = vmul.f32 %v7600_v22, %v355_v60  ;;  %v6773_v0 = vpop.eup %6772 }
  0xce   : > { %v1873_v45 = vmul.f32 %v1819_v30, %v7865_v32  ;;  %v958_v52 = vmul.f32 %v7941_v5, %v904_v50  ;;  %v1013_v16 = vadd.f32 1.4214138, %v959_v6  ;;  %6778 = vpow2.f32 %v1466_v33  ;;  %v7973_v50 = vld [vmem:[%s9818_s1 + $0x30] sm:$0xff]  ;;  %v6775_v17 = vpop.eup %6774 }
  0xcf   : > { %v1710_v27 = vsub.f32 0.0, %v1602_v28  ;;  %v1118_v18 = vadd.f32 -0.28449672, %v1064_v31  ;;  %v690_v32 = vmul.f32 0.3275911, %v7961_v56  ;;  %v1281_v37 = vmul.f32 %v7897_v53, %v1227_v36  ;;  %6262 = vmatprep.subr.mxu0 %v7973_v50 }
  0xd0   : > { %v1012_v30 = vadd.f32 1.4214138, %v958_v52  ;;  %v1393_v24 = vmul.f32 %v1339_v42, %v637_v44  ;;  %v7975_v9 = vmul.f32 %v2060_v55, %v1873_v45  ;;  %v1067_v7 = vmul.f32 %v7933_v58, %v1013_v16 }
  0xd1   : > { %v1764_v63 = vsel %vm1656_vm5, %v1602_v28, %v1710_v27  ;;  %v1172_v33 = vmul.f32 %v7909_v61, %v1118_v18  ;;  %v2055_v28 = vpop.permute.xlu0 %2054  ;;  %v1551_v31 = vmul.f32 %v6771_v14, %v1281_v37  ;;  %v7981_v53 = vmul.f32 0.5, %v7842_v54 }
  0xd2   : > { %9978 = vst [vmem:[#allocation17_spill] sm:$0xff] %v7975_v9  ;;  %v1818_v60 = vadd.f32 1.0, %v1764_v63  ;;  %v1066_v44 = vmul.f32 %v7941_v5, %v1012_v30  ;;  %v744_v42 = vadd.f32 1.0, %v690_v32  ;;  %v1121_v55 = vadd.f32 -0.28449672, %v1067_v7 }
  0xd3   : > { %v1226_v45 = vadd.f32 0.2548296, %v1172_v33  ;;  %v7986_v27 = vadd.f32 %v7619_v10, %v417_v11  ;;  %v1605_v36 = vsub.f32 1.0, %v1551_v31  ;;  %v1472_v18 = vmul.f32 1.442695, %v1393_v24 }
  0xd4   : > { %v1872_v6 = vmul.f32 %v1818_v60, %v7869_v20  ;;  %v1120_v52 = vadd.f32 -0.28449672, %v1066_v44  ;;  %6780 = vrcp.f32 %v744_v42  ;;  %v7988_v16 = vpop.eup %6776  ;;  %v2367_v32 = vrot.slane %v7975_v9, 1  ;;  %v354_v60 = vld [vmem:[%s7007_s11 + $0xd0] sm:$0x3] }
  0xd5   : > { %v1280_v54 = vmul.f32 %v7909_v61, %v1226_v45  ;;  %v1175_v20 = vmul.f32 %v7933_v58, %v1121_v55  ;;  %v1713_v63 = vsub.f32 0.0, %v1605_v36  ;;  %v853_v11 = vmul.f32 1.0614054, %v7988_v16 }
  0xd6   : > { %v7990_v14 = vmul.f32 %v2055_v28, %v1872_v6  ;;  %v1174_v37 = vmul.f32 %v7941_v5, %v1120_v52  ;;  %v1338_v30 = vsub.f32 0.0, %v7961_v56  ;;  %v8001_v28 = vmul.f32 0.70710677, %v7986_v27 }
  0xd7   : > { %v1550_v24 = vmul.f32 %v6773_v0, %v1280_v54  ;;  %v1229_v7 = vadd.f32 0.2548296, %v1175_v20  ;;  %vm1658_vm7 = vcmp.ge.f32.partialorder %v7853_v3, 0.0  ;;  %v527_v61 = vmul.f32 0.5, %v7858_v43 }
  0xd8   : > { %9979 = vst [vmem:[#allocation18_spill] sm:$0xff] %v7990_v14  ;;  %v2366_v33 = vrot.slane %v7990_v14, 1  ;;  %v1228_v31 = vadd.f32 0.2548296, %v1174_v37  ;;  %v907_v44 = vadd.f32 -1.4531521, %v853_v11  ;;  %v6779_v42 = vpop.eup %6778  ;;  %6782 = vpow2.f32 %v1472_v18  ;;  %v2070_v11 = vpop.permute.xlu1 %2069 }
  0xd9   : > { %v1604_v6 = vsub.f32 1.0, %v1550_v24  ;;  %v1283_v0 = vmul.f32 %v7933_v58, %v1229_v7  ;;  %v1767_v55 = vsel %vm1659_vm6, %v1605_v36, %v1713_v63  ;;  %v8020_v54 = vand.u32 2147483647, %v8001_v28 }
  0xda   : > { %v8008_v45 = vsel %vm2335_vm11, %v2366_v33, %v2367_v32  ;;  %v1282_v43 = vmul.f32 %v7941_v5, %v1228_v31  ;;  %v961_v52 = vmul.f32 %v7988_v16, %v907_v44  ;;  %v1392_v58 = vmul.f32 %v1338_v30, %v7961_v56 }
  0xdb   : > { %9980 = vst [vmem:[#allocation19_spill] sm:$0xff] %v8008_v45  ;;  %5982 = vmatprep.mubr.msk.f32.mxu1 %vm2418_vm12, %v8008_v45  ;;  %6179 = vmatprep.mubr.msk.f32.mxu0 %vm2418_vm12, %v8008_v45  ;;  %v1712_v20 = vsub.f32 0.0, %v1604_v6  ;;  %v1553_v37 = vmul.f32 %v6775_v17, %v1283_v0  ;;  %v416_v62 = vmul.f32 %v7600_v22, %v354_v60  ;;  %vm1661_vm8 = vcmp.ge.f32.partialorder %v7875_v46, 0.0  ;;  %v2065_v17 = vpop.permute.xlu0 %2064 }
  0xdc   : > { %v1552_v36 = vmul.f32 %v6779_v42, %v1282_v43  ;;  %v1015_v18 = vadd.f32 1.4214138, %v961_v52  ;;  %v693_v63 = vmul.f32 0.3275911, %v8020_v54  ;;  %v1821_v24 = vadd.f32 1.0, %v1767_v55 }
  0xdd   : > { %v1766_v5 = vsel %vm1658_vm7, %v1604_v6, %v1712_v20  ;;  %v1607_v33 = vsub.f32 1.0, %v1553_v37  ;;  %vm1660_vm9 = vcmp.ge.f32.partialorder %v7878_v47, 0.0  ;;  %v1470_v0 = vmul.f32 1.442695, %v1392_v58 }
  0xde   : > { %v8029_v7 = vpop.eup %6780  ;;  %v1820_v56 = vadd.f32 1.0, %v1766_v5  ;;  %v1606_v30 = vsub.f32 1.0, %v1552_v36  ;;  %v1069_v60 = vmul.f32 %v7988_v16, %v1015_v18  ;;  %v747_v31 = vadd.f32 1.0, %v693_v63  ;;  %v2080_v5 = vpop.permute.xlu1 %2079 }
  0xdf   : > { %v1715_v44 = vsub.f32 0.0, %v1607_v33  ;;  %v852_v42 = vmul.f32 1.0614054, %v8029_v7  ;;  %v8034_v55 = vadd.f32 %v7619_v10, %v416_v62  ;;  %v1875_v52 = vmul.f32 %v1821_v24, %v7882_v39  ;;  %v357_v39 = vld [vmem:[%s7007_s11 + $0xe8] sm:$0x3] }
  0xe0   : > { %v1874_v3 = vmul.f32 %v1820_v56, %v7981_v53  ;;  %v1714_v6 = vsub.f32 0.0, %v1606_v30  ;;  %v1123_v43 = vadd.f32 -0.28449672, %v1069_v60  ;;  %6784 = vrcp.f32 %v747_v31 }
  0xe1   : > { %v1769_v20 = vsel %vm1661_vm8, %v1607_v33, %v1715_v44  ;;  %v526_v37 = vmul.f32 0.5, %v7861_v38  ;;  %v906_v36 = vadd.f32 -1.4531521, %v852_v42  ;;  %6786 = vpow2.f32 %v1470_v0  ;;  %v2075_v33 = vpop.permute.xlu0 %2074 }
  0xe2   : > { %v8041_v18 = vmul.f32 %v2065_v17, %v1874_v3  ;;  %v1823_v58 = vadd.f32 1.0, %v1769_v20  ;;  %v1768_v62 = vsel %vm1660_vm9, %v1606_v30, %v1714_v6  ;;  %v1177_v53 = vmul.f32 %v7988_v16, %v1123_v43  ;;  %v6783_v63 = vpop.eup %6782  ;;  %v356_v20 = vld [vmem:[%s7007_s11 + $0xe0] sm:$0xff] }
  0xe3   : > { %v1822_v56 = vadd.f32 1.0, %v1768_v62  ;;  %v960_v60 = vmul.f32 %v8029_v7, %v906_v36  ;;  %v8048_v46 = vmul.f32 0.70710677, %v8034_v55  ;;  %v1341_v47 = vsub.f32 0.0, %v8020_v54 }
  0xe4   : > { %v2369_v38 = vrot.slane %v8041_v18, 1  ;;  %v1877_v24 = vmul.f32 %v1823_v58, %v527_v61  ;;  %v1231_v17 = vadd.f32 0.2548296, %v1177_v53  ;;  %v8053_v30 = vmul.f32 %v2070_v11, %v1875_v52 }
  0xe5   : > { %v1876_v31 = vmul.f32 %v1822_v56, %v526_v37  ;;  %v1014_v44 = vadd.f32 1.4214138, %v960_v60  ;;  %v638_v42 = vand.u32 2147483647, %v8048_v46  ;;  %v419_v6 = vmul.f32 %v7600_v22, %v357_v39 }
  0xe6   : > { %9981 = vst [vmem:[#allocation20_spill] sm:$0xff] %v8053_v30  ;;  %v8056_v3 = vmul.f32 %v2080_v5, %v1877_v24  ;;  %v8061_v0 = vsel %vm2335_vm11, %v2367_v32, %v2369_v38  ;;  %v1285_v61 = vmul.f32 %v7988_v16, %v1231_v17  ;;  %v1395_v36 = vmul.f32 %v1341_v47, %v8020_v54  ;;  %v8089_v54 = vld [vmem:[%s9820_s3] ss:$0 sm:$0xff] }
  0xe7   : > { %9982 = vst [vmem:[#allocation21_spill] sm:$0xff] %v8061_v0  ;;  %v8065_v43 = vmul.f32 %v2075_v33, %v1876_v31  ;;  %5983 = vmatmul.mubr.msk.f32.gmra.mrb[12].mxu1 %vm2418_vm12, %v8061_v0  ;;  %6180 = vmatmul.mubr.msk.f32.gmra.mrb[10].mxu0 %vm2418_vm12, %v8061_v0  ;;  %v1068_v11 = vmul.f32 %v8029_v7, %v1014_v44  ;;  %v692_v52 = vmul.f32 0.3275911, %v638_v42  ;;  %v2371_v58 = vrot.slane %v8053_v30, 1 }
  0xe8   : > { %v2374_v37 = vrot.slane %v8056_v3, 1  ;;  %v1555_v32 = vmul.f32 %v6783_v63, %v1285_v61  ;;  %v8076_v16 = vadd.f32 %v7619_v10, %v419_v6  ;;  %vm1663_vm10 = vcmp.ge.f32.partialorder %v7914_v51, 0.0 }
  0xe9   : > { %9983 = vst [vmem:[#allocation22_spill] sm:$0xff] %v8065_v43  ;;  %v1122_v22 = vadd.f32 -0.28449672, %v1068_v11  ;;  %v2372_v62 = vrot.slane %v8065_v43, 1  ;;  %v746_v53 = vadd.f32 1.0, %v692_v52  ;;  %v418_v10 = vmul.f32 %v8089_v54, %v356_v20 }
  0xea   : > { %v8080_v5 = vpop.eup %6784  ;;  %v1609_v56 = vsub.f32 1.0, %v1555_v32  ;;  %v8084_v60 = vmul.f32 0.70710677, %v8076_v16  ;;  %v1476_v17 = vmul.f32 1.442695, %v1395_v36  ;;  %v3006_v44 = vrot.slane %v7684_v19, 2 }
  0xeb   : > { %v1176_v63 = vmul.f32 %v8029_v7, %v1122_v22  ;;  %v8094_v39 = vsel %vm2335_vm11, %v2371_v58, %v2372_v62  ;;  %v8097_v38 = vsel %vm2335_vm11, %v2372_v62, %v2374_v37  ;;  %v855_v24 = vmul.f32 1.0614054, %v8080_v5  ;;  %v6787_v31 = vpop.eup %6786  ;;  %v8113_v11 = vld [vmem:[%s9821_s4] ss:$0 sm:$0xff]  ;;  %v359_v32 = vld [vmem:[%s7007_s11 + $0xf8] sm:$0xff] }
  0xec   : > { %9984 = vst [vmem:[#allocation23_spill] sm:$0xff] %v8094_v39  ;;  %9985 = vst [vmem:[#allocation24_spill] sm:$0xff] %v8097_v38  ;;  %v1717_v33 = vsub.f32 0.0, %v1609_v56  ;;  %5985 = vmatprep.mubr.msk.f32.mxu1 %vm2418_vm12, %v8094_v39  ;;  %6182 = vmatprep.mubr.msk.f32.mxu0 %vm2418_vm12, %v8094_v39  ;;  %6788 = vrcp.f32 %v746_v53  ;;  %v641_v47 = vand.u32 2147483647, %v8084_v60  ;;  %v8116_v52 = vadd.f32 %v8113_v11, %v418_v10 }
  0xed   : > { %v1230_v61 = vadd.f32 0.2548296, %v1176_v63  ;;  %5986 = vmatmul.mubr.msk.f32.gmra.mrb[14].mxu1 %vm2418_vm12, %v8097_v38  ;;  %6183 = vmatmul.mubr.msk.f32.gmra.mrb[12].mxu0 %vm2418_vm12, %v8097_v38  ;;  %v909_v6 = vadd.f32 -1.4531521, %v855_v24  ;;  %v1340_v20 = vsub.f32 0.0, %v638_v42  ;;  %v9836_v36 = vrot.slane %v7666_v13, 2 }
  0xee   : > { %v1771_v19 = vsel %vm1663_vm10, %v1609_v56, %v1717_v33  ;;  %v695_v37 = vmul.f32 0.3275911, %v641_v47  ;;  %v529_v22 = vmul.f32 0.5, %v7903_v57  ;;  %6790 = vpow2.f32 %v1476_v17 }
  0xef   : > { %v1284_v58 = vmul.f32 %v8029_v7, %v1230_v61  ;;  %v963_v62 = vmul.f32 %v8080_v5, %v909_v6  ;;  %v1825_v53 = vadd.f32 1.0, %v1771_v19  ;;  %v8126_v63 = vmul.f32 0.70710677, %v8116_v52  ;;  %v358_v6 = vld [vmem:[%s7007_s11 + $0xf0] sm:$0xff] }
  0xf0   : > { %v749_v10 = vadd.f32 1.0, %v695_v37  ;;  %v8131_v51 = vsel %vm2997_vm13, %v9836_v36, %v3006_v44  ;;  %v421_v33 = vmul.f32 %v8089_v54, %v359_v32  ;;  %v1394_v57 = vmul.f32 %v1340_v20, %v638_v42  ;;  %v2090_v42 = vpop.permute.xlu1 %2089 }
  0xf1   : > { %9986 = vst [vmem:[#allocation25_spill] sm:$0xff] %v8131_v51  ;;  %v1554_v56 = vmul.f32 %v6787_v31, %v1284_v58  ;;  %v1017_v24 = vadd.f32 1.4214138, %v963_v62  ;;  %v1343_v7 = vsub.f32 0.0, %v641_v47  ;;  %v640_v61 = vand.u32 2147483647, %v8126_v63 }
  0xf2   : > { %6792 = vrcp.f32 %v749_v10  ;;  %v1879_v39 = vmul.f32 %v1825_v53, %v529_v22  ;;  %vm1662_vm14 = vcmp.ge.f32.partialorder %v7950_v25, 0.0  ;;  %v8141_v44 = vadd.f32 %v8113_v11, %v421_v33 }
  0xf3   : > { %v1608_v37 = vsub.f32 1.0, %v1554_v56  ;;  %v1071_v38 = vmul.f32 %v8080_v5, %v1017_v24  ;;  %v694_v31 = vmul.f32 0.3275911, %v640_v61  ;;  %v528_v20 = vmul.f32 0.5, %v7923_v8 }
  0xf4   : > { %v420_v62 = vmul.f32 %v8089_v54, %v358_v6  ;;  %v1474_v19 = vmul.f32 1.442695, %v1394_v57  ;;  %v1397_v56 = vmul.f32 %v1343_v7, %v641_v47  ;;  %v8148_v22 = vmul.f32 0.70710677, %v8141_v44  ;;  %v2085_v57 = vpop.permute.xlu0 %2084 }
  0xf5   : > { %v1716_v32 = vsub.f32 0.0, %v1608_v37  ;;  %v1125_v58 = vadd.f32 -0.28449672, %v1071_v38  ;;  %v748_v17 = vadd.f32 1.0, %v694_v31  ;;  %v8155_v8 = vmul.f32 %v2090_v42, %v1879_v39 }
  0xf6   : > { %v8145_v10 = vpop.eup %6788  ;;  %v8153_v33 = vadd.f32 %v8113_v11, %v420_v62  ;;  %v643_v6 = vand.u32 2147483647, %v8148_v22  ;;  %v8159_v47 = vmul.f32 0.5, %v7986_v27  ;;  %v1342_v62 = vsub.f32 0.0, %v640_v61 }
  0xf7   : > { %v1770_v25 = vsel %vm1662_vm14, %v1608_v37, %v1716_v32  ;;  %v1179_v53 = vmul.f32 %v8080_v5, %v1125_v58  ;;  %v854_v24 = vmul.f32 1.0614054, %v8145_v10  ;;  %9987 = vst [vmem:[#allocation26_spill] sm:$0xff] %v8155_v8  ;;  %6794 = vrcp.f32 %v748_v17 }
  0xf8   : > { %v1824_v38 = vadd.f32 1.0, %v1770_v25  ;;  %v8162_v37 = vmul.f32 0.5, %v8034_v55  ;;  %v6791_v32 = vpop.eup %6790  ;;  %6796 = vpow2.f32 %v1474_v19  ;;  %v697_v36 = vmul.f32 0.3275911, %v643_v6 }
  0xf9   : > { %v1233_v7 = vadd.f32 0.2548296, %v1179_v53  ;;  %v908_v31 = vadd.f32 -1.4531521, %v854_v24  ;;  %v3003_v42 = vrot.slane %v7656_v21, 2  ;;  %vm1665_vm15 = vcmp.ge.f32.partialorder %v8001_v28, 0.0 }
  0xfa   : > { %v1878_v58 = vmul.f32 %v1824_v38, %v528_v20  ;;  %v8168_v27 = vmul.f32 0.70710677, %v8153_v33  ;;  %v1480_v20 = vmul.f32 1.442695, %v1397_v56  ;;  %v751_v53 = vadd.f32 1.0, %v697_v36 }
  0xfb   : > { %v1287_v39 = vmul.f32 %v8080_v5, %v1233_v7  ;;  %v962_v17 = vmul.f32 %v8145_v10, %v908_v31  ;;  %v1396_v0 = vmul.f32 %v1342_v62, %v640_v61  ;;  %v1345_v45 = vsub.f32 0.0, %v643_v6 }
  0xfc   : > { %v8170_v25 = vpop.eup %6792  ;;  %v8172_v55 = vmul.f32 %v2085_v57, %v1878_v58  ;;  %v642_v7 = vand.u32 2147483647, %v8168_v27  ;;  %6798 = vrcp.f32 %v751_v53  ;;  %v360_v57 = vld [vmem:[%s7007_s11 + $0x100] sm:$0x3]  ;;  %v9989_v36 = vrot.slane %v8155_v8, 1 }
  0xfd   : > { %v1557_v5 = vmul.f32 %v6791_v32, %v1287_v39  ;;  %v1016_v24 = vadd.f32 1.4214138, %v962_v17  ;;  %v857_v38 = vmul.f32 1.0614054, %v8170_v25  ;;  %v8188_v32 = vmul.f32 0.5, %v8076_v16 }
  0xfe   : > { %9988 = vst [vmem:[#allocation27_spill] sm:$0xff] %v8172_v55  ;;  %v2376_v31 = vrot.slane %v8172_v55, 1  ;;  %v696_v19 = vmul.f32 0.3275911, %v642_v7  ;;  %v8191_v39 = vmul.f32 0.5, %v8116_v52  ;;  %v9991_v61 = vrot.slane %v7666_v13, 2 }
  0xff   : > { %v1611_v58 = vsub.f32 1.0, %v1557_v5  ;;  %v1070_v15 = vmul.f32 %v8145_v10, %v1016_v24  ;;  %v911_v21 = vadd.f32 -1.4531521, %v857_v38  ;;  %6800 = vpow2.f32 %v1480_v20 }
 0x100   : > { %v8185_v56 = vsel %vm2335_vm11, %v2376_v31, %v9989_v36  ;;  %v8196_v62 = vsel %vm2997_vm13, %v3003_v42, %v9991_v61  ;;  %v750_v16 = vadd.f32 1.0, %v696_v19  ;;  %v1478_v52 = vmul.f32 1.442695, %v1396_v0 }
 0x101   : > { %9990 = vst [vmem:[#allocation28_spill] sm:$0xff] %v8185_v56  ;;  %9992 = vst [vmem:[#allocation29_spill] sm:$0xff] %v8196_v62  ;;  %v1124_v17 = vadd.f32 -0.28449672, %v1070_v15  ;;  %5988 = vmatprep.mubr.msk.f32.mxu1 %vm2418_vm12, %v8185_v56  ;;  %6185 = vmatprep.mubr.msk.f32.mxu0 %vm2418_vm12, %v8185_v56  ;;  %v965_v53 = vmul.f32 %v8170_v25, %v911_v21  ;;  %v8203_v5 = vpop.eup %6794  ;;  %v1399_v24 = vmul.f32 %v1345_v45, %v643_v6 }
 0x102   : > { %v423_v38 = vmul.f32 %v8089_v54, %v361_v1  ;;  %v422_v42 = vmul.f32 %v8089_v54, %v360_v57  ;;  %v1719_v31 = vsub.f32 0.0, %v1611_v58  ;;  %v856_v61 = vmul.f32 1.0614054, %v8203_v5  ;;  %v6797_v13 = vpop.eup %6796 }
 0x103   : > { %v1178_v15 = vmul.f32 %v8145_v10, %v1124_v17  ;;  %v1019_v36 = vadd.f32 1.4214138, %v965_v53  ;;  %vm1664_vm0 = vcmp.ge.f32.partialorder %v8048_v46, 0.0  ;;  %v8211_v21 = vmul.f32 0.5, %v8141_v44  ;;  %v2095_v46 = vpop.permute.xlu0 %2094 }
 0x104   : > { %6802 = vrcp.f32 %v750_v16  ;;  %v1344_v19 = vsub.f32 0.0, %v642_v7  ;;  %v8214_v45 = vadd.f32 %v8113_v11, %v423_v38  ;;  %v910_v6 = vadd.f32 -1.4531521, %v856_v61 }
 0x105   : > { %v1232_v1 = vadd.f32 0.2548296, %v1178_v15  ;;  %v1073_v0 = vmul.f32 %v8170_v25, %v1019_v36  ;;  %v8218_v20 = vadd.f32 %v8113_v11, %v422_v42  ;;  %6804 = vpow2.f32 %v1478_v52 }
 0x106   : > { %v1484_v57 = vmul.f32 1.442695, %v1399_v24  ;;  %v3008_v17 = vrot.slane %v7707_v12, 2  ;;  %v8222_v53 = vmul.f32 0.70710677, %v8214_v45  ;;  %v1773_v44 = vsel %vm1665_vm15, %v1611_v58, %v1719_v31  ;;  %v8228_v36 = vpop.eup %6798 }
 0x107   : > { %v1286_v16 = vmul.f32 %v8145_v10, %v1232_v1  ;;  %v1127_v38 = vadd.f32 -0.28449672, %v1073_v0  ;;  %v964_v15 = vmul.f32 %v8203_v5, %v910_v6  ;;  %v1398_v61 = vmul.f32 %v1344_v19, %v642_v7 }
 0x108   : > { %v3009_v42 = vrot.slane %v7704_v34, 2  ;;  %v645_v52 = vand.u32 2147483647, %v8222_v53  ;;  %v8233_v24 = vmul.f32 0.70710677, %v8218_v20  ;;  %v1827_v10 = vadd.f32 1.0, %v1773_v44 }
 0x109   : > { %v1556_v56 = vmul.f32 %v6797_v13, %v1286_v16  ;;  %v1181_v12 = vmul.f32 %v8170_v25, %v1127_v38  ;;  %v1018_v28 = vadd.f32 1.4214138, %v964_v15  ;;  %v859_v58 = vmul.f32 1.0614054, %v8228_v36  ;;  %v6801_v19 = vpop.eup %6800 }
 0x10a   : > { %vm1667_vm1 = vcmp.ge.f32.partialorder %v8084_v60, 0.0  ;;  %6806 = vpow2.f32 %v1484_v57  ;;  %v699_v31 = vmul.f32 0.3275911, %v645_v52  ;;  %v644_v7 = vand.u32 2147483647, %v8233_v24 }
 0x10b   : > { %v1610_v1 = vsub.f32 1.0, %v1556_v56  ;;  %v1235_v0 = vadd.f32 0.2548296, %v1181_v12  ;;  %v1072_v6 = vmul.f32 %v8203_v5, %v1018_v28  ;;  %v913_v34 = vadd.f32 -1.4531521, %v859_v58 }
 0x10c   : > { %v1482_v29 = vmul.f32 1.442695, %v1398_v61  ;;  %v8241_v13 = vsel %vm2997_vm13, %v3008_v17, %v3009_v42  ;;  %v753_v16 = vadd.f32 1.0, %v699_v31  ;;  %v698_v38 = vmul.f32 0.3275911, %v644_v7 }
 0x10d   : > { %9993 = vst [vmem:[#allocation30_spill] sm:$0xff] %v8241_v13  ;;  %v1718_v15 = vsub.f32 0.0, %v1610_v1  ;;  %v1289_v44 = vmul.f32 %v8170_v25, %v1235_v0  ;;  %v1126_v55 = vadd.f32 -0.28449672, %v1072_v6  ;;  %v967_v57 = vmul.f32 %v8228_v36, %v913_v34  ;;  %v2100_v25 = vpop.permute.xlu1 %2099 }
 0x10e   : > { %v8245_v43 = vpop.eup %6802  ;;  %v1881_v56 = vmul.f32 %v1827_v10, %v8159_v47  ;;  %6808 = vrcp.f32 %v753_v16  ;;  %v1347_v12 = vsub.f32 0.0, %v645_v52  ;;  %v752_v28 = vadd.f32 1.0, %v698_v38  ;;  %v363_v16 = vld [vmem:[%s7007_s11 + $0x118] sm:$0x3] }
 0x10f   : > { %v1772_v61 = vsel %vm1664_vm0, %v1610_v1, %v1718_v15  ;;  %v1559_v17 = vmul.f32 %v6801_v19, %v1289_v44  ;;  %v1180_v58 = vmul.f32 %v8203_v5, %v1126_v55  ;;  %v1021_v31 = vadd.f32 1.4214138, %v967_v57  ;;  %v6805_v30 = vpop.eup %6804  ;;  %v362_v57 = vld [vmem:[%s7007_s11 + $0x110] sm:$0xff] }
 0x110   : > { %v1826_v0 = vadd.f32 1.0, %v1772_v61  ;;  %vm1666_vm2 = vcmp.ge.f32.partialorder %v8126_v63, 0.0  ;;  %v858_v34 = vmul.f32 1.0614054, %v8245_v43  ;;  %v1346_v47 = vsub.f32 0.0, %v644_v7 }
 0x111   : > { %v9994_v10 = vrot.slane %v7727_v59, 2  ;;  %v1613_v1 = vsub.f32 1.0, %v1559_v17  ;;  %v1234_v19 = vadd.f32 0.2548296, %v1180_v58  ;;  %v1075_v55 = vmul.f32 %v8228_v36, %v1021_v31 }
 0x112   : > { %6810 = vrcp.f32 %v752_v28  ;;  %v1880_v38 = vmul.f32 %v1826_v0, %v8162_v37  ;;  %v912_v15 = vadd.f32 -1.4531521, %v858_v34  ;;  %v1401_v44 = vmul.f32 %v1347_v12, %v645_v52 }
 0x113   : > { %v8256_v6 = vsel %vm2997_vm13, %v3009_v42, %v9994_v10  ;;  %6812 = vpow2.f32 %v1482_v29  ;;  %v8262_v61 = vmul.f32 %v2100_v25, %v1881_v56  ;;  %v1721_v9 = vsub.f32 0.0, %v1613_v1 }
 0x114   : > { %9995 = vst [vmem:[#allocation31_spill] sm:$0xff] %v8256_v6  ;;  %v1288_v59 = vmul.f32 %v8203_v5, %v1234_v19  ;;  %v1129_v42 = vadd.f32 -0.28449672, %v1075_v55  ;;  %v6807_v10 = vpop.eup %6806  ;;  %v8265_v14 = vmul.f32 %v2095_v46, %v1880_v38  ;;  %v966_v17 = vmul.f32 %v8245_v43, %v912_v15  ;;  %v2110_v55 = vpop.permute.xlu1 %2109 }
 0x115   : > { %9996 = vst [vmem:[#allocation32_spill] sm:$0xff] %v8262_v61  ;;  %v1400_v58 = vmul.f32 %v1346_v47, %v644_v7  ;;  %v425_v28 = vmul.f32 %v8089_v54, %v363_v16  ;;  %v1775_v37 = vsel %vm1667_vm1, %v1613_v1, %v1721_v9  ;;  %v424_v56 = vmul.f32 %v8089_v54, %v362_v57 }
 0x116   : > { %v1558_v29 = vmul.f32 %v6805_v30, %v1288_v59  ;;  %v1183_v52 = vmul.f32 %v8228_v36, %v1129_v42  ;;  %v2379_v12 = vrot.slane %v8265_v14, 1  ;;  %v1829_v5 = vadd.f32 1.0, %v1775_v37 }
 0x117   : > { %vm1669_vm3 = vcmp.ge.f32.partialorder %v8148_v22, 0.0  ;;  %v1020_v31 = vadd.f32 1.4214138, %v966_v17  ;;  %v1488_v25 = vmul.f32 1.442695, %v1401_v44  ;;  %v2381_v7 = vrot.slane %v8262_v61, 1 }
 0x118   : > { %v1612_v0 = vsub.f32 1.0, %v1558_v29  ;;  %v1237_v34 = vadd.f32 0.2548296, %v1183_v52  ;;  %v8277_v47 = vadd.f32 %v8113_v11, %v425_v28  ;;  %v8279_v9 = vpop.eup %6808  ;;  %v1883_v30 = vmul.f32 %v1829_v5, %v8188_v32  ;;  %v2105_v5 = vpop.permute.xlu0 %2104 }
 0x119   : > { %v9997_v60 = vrot.slane %v8155_v8, 1  ;;  %v1074_v1 = vmul.f32 %v8245_v43, %v1020_v31  ;;  %v8289_v19 = vadd.f32 %v8113_v11, %v424_v56  ;;  %v861_v38 = vmul.f32 1.0614054, %v8279_v9 }
 0x11a   : > { %v1720_v16 = vsub.f32 0.0, %v1612_v0  ;;  %v1291_v32 = vmul.f32 %v8228_v36, %v1237_v34  ;;  %v1486_v15 = vmul.f32 1.442695, %v1400_v58  ;;  %6814 = vpow2.f32 %v1488_v25 }
 0x11b   : > { %v8285_v46 = vsel %vm2335_vm11, %v9997_v60, %v2379_v12  ;;  %v1128_v44 = vadd.f32 -0.28449672, %v1074_v1  ;;  %v3014_v57 = vrot.slane %v7758_v48, 2  ;;  %v8301_v59 = vmul.f32 0.70710677, %v8277_v47 }
 0x11c   : > { %9998 = vst [vmem:[#allocation33_spill] sm:$0xff] %v8285_v46  ;;  %5989 = vmatmul.mubr.msk.f32.gmra.mrb[16].mxu1 %vm2418_vm12, %v8285_v46  ;;  %6186 = vmatmul.mubr.msk.f32.gmra.mrb[14].mxu0 %vm2418_vm12, %v8285_v46  ;;  %v8303_v42 = vpop.eup %6810  ;;  %v1774_v17 = vsel %vm1666_vm2, %v1612_v0, %v1720_v16  ;;  %v1561_v28 = vmul.f32 %v6807_v10, %v1291_v32  ;;  %v915_v36 = vadd.f32 -1.4531521, %v861_v38  ;;  %v8308_v37 = vmul.f32 0.70710677, %v8289_v19 }
 0x11d   : > { %6214 = vmatprep.mubr.msk.f32.mxu0 %vm2418_vm12, %v8196_v62  ;;  %v6813_v58 = vpop.eup %6812  ;;  %v8310_v29 = vmul.f32 %v2110_v55, %v1883_v30  ;;  %v1828_v52 = vadd.f32 1.0, %v1774_v17  ;;  %v1182_v56 = vmul.f32 %v8245_v43, %v1128_v44  ;;  %v3013_v12 = vrot.slane %v7744_v26, 2  ;;  %v366_v46 = vld [vmem:[%s7007_s11 + $0x130] sm:$0x3] }
 0x11e   : > { %v1615_v31 = vsub.f32 1.0, %v1561_v28  ;;  %v969_v63 = vmul.f32 %v8279_v9, %v915_v36  ;;  %v860_v10 = vmul.f32 1.0614054, %v8303_v42  ;;  %v647_v25 = vand.u32 2147483647, %v8301_v59 }
 0x11f   : > { %v1882_v0 = vmul.f32 %v1828_v52, %v8191_v39  ;;  %v1236_v34 = vadd.f32 0.2548296, %v1182_v56  ;;  %6816 = vpow2.f32 %v1486_v15  ;;  %v8323_v30 = vand.u32 2147483647, %v8308_v37 }
 0x120   : > { %6215 = vmatmul.mubr.msk.f32.vlgmr.msra.gmra.mrb[0].mxu0 %vm2418_vm12, %v8131_v51  ;;  %v1723_v60 = vsub.f32 0.0, %v1615_v31  ;;  %v1023_v1 = vadd.f32 1.4214138, %v969_v63  ;;  %v914_v55 = vadd.f32 -1.4531521, %v860_v10  ;;  %v8327_v16 = vsel %vm2997_vm13, %v3013_v12, %v3014_v57  ;;  %v2120_v10 = vpop.permute.xlu1 %2119 }
 0x121   : > { %6217 = vmatprep.mubr.msk.f32.mxu0 %vm2418_vm12, %v8241_v13  ;;  %6263 = vmatpush3.msra.mxu0 %v7973_v50  ;;  %9999 = vst [vmem:[#allocation34_spill] sm:$0xff] %v8327_v16  ;;  %v2384_v32 = vrot.slane %v8310_v29, 1  ;;  %v8330_v38 = vmul.f32 %v2105_v5, %v1882_v0  ;;  %v1290_v39 = vmul.f32 %v8245_v43, %v1236_v34  ;;  %v701_v44 = vmul.f32 0.3275911, %v647_v25 }
 0x122   : > { %v1777_v15 = vsel %vm1669_vm3, %v1615_v31, %v1723_v60  ;;  %v1077_v17 = vmul.f32 %v8279_v9, %v1023_v1  ;;  %v968_v50 = vmul.f32 %v8303_v42, %v914_v55  ;;  %v700_v28 = vmul.f32 0.3275911, %v8323_v30 }
 0x123   : > { %10000 = vst [vmem:[#allocation35_spill] sm:$0xff] %v8330_v38  ;;  %v1831_v36 = vadd.f32 1.0, %v1777_v15  ;;  %v1560_v52 = vmul.f32 %v6813_v58, %v1290_v39  ;;  %v2382_v56 = vrot.slane %v8330_v38, 1  ;;  %v755_v43 = vadd.f32 1.0, %v701_v44 }
 0x124   : > { %6218 = vmatmul.mubr.msk.f32.gmra.mrb[2].mxu0 %vm2418_vm12, %v8256_v6  ;;  %vm1668_vm4 = vcmp.ge.f32.partialorder %v8168_v27, 0.0  ;;  %v1131_v22 = vadd.f32 -0.28449672, %v1077_v17  ;;  %v1022_v12 = vadd.f32 1.4214138, %v968_v50  ;;  %v10001_v5 = vrot.slane %v7756_v35, 2  ;;  %v6815_v63 = vpop.eup %6814 }
 0x125   : > { %6220 = vmatprep.mubr.msk.f32.mxu0 %vm2418_vm12, %v8327_v16  ;;  %v1885_v0 = vmul.f32 %v1831_v36, %v8211_v21  ;;  %v1614_v58 = vsub.f32 1.0, %v1560_v52  ;;  %v8353_v34 = vsel %vm2335_vm11, %v2381_v7, %v2382_v56  ;;  %v8356_v60 = vsel %vm2335_vm11, %v2382_v56, %v2384_v32  ;;  %v365_v17 = vld [vmem:[%s7007_s11 + $0x128] sm:$0xff]  ;;  %v364_v50 = vld [vmem:[%s7007_s11 + $0x120] sm:$0xff] }
 0x126   : > { %v8347_v31 = vsel %vm2997_vm13, %v3014_v57, %v10001_v5  ;;  %10003 = vst [vmem:[#allocation37_spill] sm:$0xff] %v8353_v34  ;;  %10004 = vst [vmem:[#allocation38_spill] sm:$0xff] %v8356_v60  ;;  %5991 = vmatprep.mubr.msk.f32.mxu1 %vm2418_vm12, %v8353_v34  ;;  %v1185_v35 = vmul.f32 %v8279_v9, %v1131_v22  ;;  %v1076_v57 = vmul.f32 %v8303_v42, %v1022_v12  ;;  %v2115_v5 = vpop.permute.xlu0 %2114 }
 0x127   : > { %10002 = vst [vmem:[#allocation36_spill] sm:$0xff] %v8347_v31  ;;  %6818 = vrcp.f32 %v755_v43  ;;  %v754_v21 = vadd.f32 1.0, %v700_v28  ;;  %v3021_v7 = vrot.slane %v7811_v2, 2  ;;  %v534_v1 = vmul.f32 0.5, %v8153_v33  ;;  %5992 = vmatmul.mubr.msk.f32.gmra.mrb[18].mxu1 %vm2418_vm12, %v8356_v60 }
 0x128   : > { %6221 = vmatmul.mubr.msk.f32.gmra.mrb[4].mxu0 %vm2418_vm12, %v8347_v31  ;;  %v1722_v55 = vsub.f32 0.0, %v1614_v58  ;;  %v1349_v32 = vsub.f32 0.0, %v647_v25  ;;  %v8368_v39 = vmul.f32 %v2120_v10, %v1885_v0  ;;  %v1239_v44 = vadd.f32 0.2548296, %v1185_v35 }
 0x129   : > { %v1130_v15 = vadd.f32 -0.28449672, %v1076_v57  ;;  %6820 = vrcp.f32 %v754_v21  ;;  %v6817_v28 = vpop.eup %6816  ;;  %v3018_v33 = vrot.slane %v7783_v4, 2  ;;  %v3019_v12 = vrot.slane %v7781_v49, 2 }
 0x12a   : > { %v1776_v2 = vsel %vm1668_vm4, %v1614_v58, %v1722_v55  ;;  %v1293_v43 = vmul.f32 %v8279_v9, %v1239_v44  ;;  %v1403_v10 = vmul.f32 %v1349_v32, %v647_v25  ;;  %v1348_v0 = vsub.f32 0.0, %v8323_v30 }
 0x12b   : > { %v1830_v56 = vadd.f32 1.0, %v1776_v2  ;;  %v1184_v22 = vmul.f32 %v8303_v42, %v1130_v15  ;;  %v427_v35 = vmul.f32 %v8089_v54, %v365_v17  ;;  %v426_v57 = vmul.f32 %v8089_v54, %v364_v50 }
 0x12c   : > { %v9863_v58 = vrot.slane %v8368_v39, 1  ;;  %v8385_v55 = vsel %vm2997_vm13, %v3018_v33, %v3019_v12  ;;  %v1563_v9 = vmul.f32 %v6815_v63, %v1293_v43  ;;  %v8396_v32 = vsel %vm2997_vm13, %v3019_v12, %v3021_v7 }
 0x12d   : > { %v1884_v21 = vmul.f32 %v1830_v56, %v534_v1  ;;  %v1238_v27 = vadd.f32 0.2548296, %v1184_v22  ;;  %10005 = vst [vmem:[#allocation39_spill] sm:$0xff] %v8385_v55  ;;  %6223 = vmatprep.mubr.msk.f32.mxu0 %vm2418_vm12, %v8385_v55  ;;  %v8390_v44 = vadd.f32 %v8113_v11, %v427_v35  ;;  %v8393_v25 = vadd.f32 %v8113_v11, %v426_v57 }
 0x12e   : > { %10006 = vst [vmem:[#allocation40_spill] sm:$0xff] %v8396_v32  ;;  %6224 = vmatmul.mubr.msk.f32.gmra.mrb[6].mxu0 %vm2418_vm12, %v8396_v32  ;;  %v3023_v63 = vrot.slane %v7850_v23, 2  ;;  %v9864_v17 = vrot.slane %v7911_v40, 2  ;;  %v1402_v2 = vmul.f32 %v1348_v0, %v8323_v30  ;;  %v1492_v22 = vmul.f32 1.442695, %v1403_v10  ;;  %v2125_v32 = vpop.permute.xlu0 %2124 }
 0x12f   : > { %v8398_v1 = vmul.f32 %v2115_v5, %v1884_v21  ;;  %v1292_v15 = vmul.f32 %v8303_v42, %v1238_v27  ;;  %v8408_v33 = vmul.f32 0.70710677, %v8390_v44  ;;  %v8411_v7 = vmul.f32 0.70710677, %v8393_v25 }
 0x130   : > { %v8419_v12 = vsel %vm2997_vm13, %v3023_v63, %v9864_v17  ;;  %v1617_v5 = vsub.f32 1.0, %v1563_v9  ;;  %v536_v30 = vmul.f32 0.5, %v8218_v20  ;;  %vm1670_vm5 = vcmp.ge.f32.partialorder %v8233_v24, 0.0 }
 0x131   : > { %10007 = vst [vmem:[#allocation41_spill] sm:$0xff] %v8398_v1  ;;  %v8413_v56 = vpop.eup %6818  ;;  %v1562_v42 = vmul.f32 %v6817_v28, %v1292_v15  ;;  %v2386_v43 = vrot.slane %v8398_v1, 1  ;;  %10008 = vst [vmem:[#allocation42_spill] sm:$0xff] %v8419_v12  ;;  %v649_v35 = vand.u32 2147483647, %v8408_v33  ;;  %6226 = vmatprep.mubr.msk.f32.mxu0 %vm2418_vm12, %v8419_v12  ;;  %vm1671_vm6 = vcmp.ge.f32.partialorder %v8222_v53, 0.0 }
 0x132   : > { %v863_v0 = vmul.f32 1.0614054, %v8413_v56  ;;  %v648_v20 = vand.u32 2147483647, %v8411_v7  ;;  %v1490_v9 = vmul.f32 1.442695, %v1402_v2  ;;  %6822 = vpow2.f32 %v1492_v22 }
 0x133   : > { %v8426_v57 = vpop.eup %6820  ;;  %v1616_v28 = vsub.f32 1.0, %v1562_v42  ;;  %v8432_v10 = vsel %vm2335_vm11, %v2386_v43, %v9863_v58  ;;  %v703_v63 = vmul.f32 0.3275911, %v649_v35  ;;  %v1725_v50 = vsub.f32 0.0, %v1617_v5  ;;  %v367_v58 = vld [vmem:[%s7007_s11 + $0x138] sm:$0xff] }
 0x134   : > { %10009 = vst [vmem:[#allocation43_spill] sm:$0xff] %v8432_v10  ;;  %5994 = vmatprep.mubr.msk.f32.mxu1 %vm2418_vm12, %v8432_v10  ;;  %v917_v21 = vadd.f32 -1.4531521, %v863_v0  ;;  %v862_v27 = vmul.f32 1.0614054, %v8426_v57  ;;  %v1351_v0 = vsub.f32 0.0, %v649_v35  ;;  %6824 = vpow2.f32 %v1490_v9 }
 0x135   : > { %v1724_v15 = vsub.f32 0.0, %v1616_v28  ;;  %v702_v42 = vmul.f32 0.3275911, %v648_v20  ;;  %v757_v36 = vadd.f32 1.0, %v703_v63  ;;  %v537_v12 = vmul.f32 0.5, %v8214_v45 }
 0x136   : > { %v971_v52 = vmul.f32 %v8413_v56, %v917_v21  ;;  %v916_v43 = vadd.f32 -1.4531521, %v862_v27  ;;  %v8447_v21 = vmul.f32 0.5, %v8277_v47  ;;  %v429_v22 = vmul.f32 %v8089_v54, %v367_v58 }
 0x137   : > { %v1778_v17 = vsel %vm1670_vm5, %v1616_v28, %v1724_v15  ;;  %v756_v10 = vadd.f32 1.0, %v702_v42  ;;  %6826 = vrcp.f32 %v757_v36  ;;  %v428_v45 = vmul.f32 %v8089_v54, %v366_v46 }
 0x138   : > { %v1832_v60 = vadd.f32 1.0, %v1778_v17  ;;  %v1025_v2 = vadd.f32 1.4214138, %v971_v52  ;;  %v970_v34 = vmul.f32 %v8426_v57, %v916_v43  ;;  %v1779_v52 = vsel %vm1671_vm6, %v1617_v5, %v1725_v50 }
 0x139   : > { %6828 = vrcp.f32 %v756_v10  ;;  %v1405_v17 = vmul.f32 %v1351_v0, %v649_v35  ;;  %v8454_v9 = vadd.f32 %v8113_v11, %v429_v22  ;;  %v8460_v36 = vmul.f32 0.5, %v8289_v19 }
 0x13a   : > { %v1886_v24 = vmul.f32 %v1832_v60, %v536_v30  ;;  %v1079_v28 = vmul.f32 %v8413_v56, %v1025_v2  ;;  %v1024_v27 = vadd.f32 1.4214138, %v970_v34  ;;  %v1350_v58 = vsub.f32 0.0, %v648_v20 }
 0x13b   : > { %v8464_v34 = vmul.f32 0.70710677, %v8454_v9  ;;  %v8467_v53 = vadd.f32 %v8113_v11, %v428_v45  ;;  %v10010_v50 = vrot.slane %v7891_v41, 2  ;;  %v10011_v5 = vrot.slane %v7911_v40, 2 }
 0x13c   : > { %v8457_v15 = vmul.f32 %v2125_v32, %v1886_v24  ;;  %v1133_v47 = vadd.f32 -0.28449672, %v1079_v28  ;;  %v1078_v60 = vmul.f32 %v8426_v57, %v1024_v27  ;;  %v1833_v32 = vadd.f32 1.0, %v1779_v52  ;;  %v6823_v42 = vpop.eup %6822  ;;  %v10015_v24 = vld [vmem:[#allocation18_spill] sm:$0xff]  ;;  %v369_v27 = vld [vmem:[%s7007_s11 + $0x148] sm:$0x3] }
 0x13d   : > { %v8474_v46 = vsel %vm2997_vm13, %v10011_v5, %v10010_v50  ;;  %vm1673_vm7 = vcmp.ge.f32.partialorder %v8301_v59, 0.0  ;;  %v1496_v10 = vmul.f32 1.442695, %v1405_v17  ;;  %v8482_v41 = vand.u32 2147483647, %v8464_v34 }
 0x13e   : > { %10012 = vst [vmem:[#allocation44_spill] sm:$0xff] %v8474_v46  ;;  %v2389_v19 = vrot.slane %v8457_v15, 1  ;;  %v1187_v30 = vmul.f32 %v8413_v56, %v1133_v47  ;;  %v1132_v35 = vadd.f32 -0.28449672, %v1078_v60  ;;  %6227 = vmatmul.mubr.msk.f32.gmra.mrb[8].mxu0 %vm2418_vm12, %v8474_v46  ;;  %v8485_v63 = vmul.f32 0.70710677, %v8467_v53  ;;  %v6825_v60 = vpop.eup %6824 }
 0x13f   : > { %v10013_v2 = vrot.slane %v8368_v39, 1  ;;  %v3028_v28 = vrot.slane %v10015_v24, 2  ;;  %vm1672_vm8 = vcmp.ge.f32.partialorder %v8308_v37, 0.0  ;;  %v8499_v52 = vmul.f32 0.5, %v8390_v44 }
 0x140   : > { %v1241_v43 = vadd.f32 0.2548296, %v1187_v30  ;;  %v1186_v0 = vmul.f32 %v8426_v57, %v1132_v35  ;;  %v1404_v17 = vmul.f32 %v1350_v58, %v648_v20  ;;  %v705_v45 = vmul.f32 0.3275911, %v8482_v41  ;;  %v10016_v30 = vld [vmem:[#allocation17_spill] sm:$0xff] }
 0x141   : > { %v8491_v22 = vsel %vm2335_vm11, %v10013_v2, %v2389_v19  ;;  %v650_v47 = vand.u32 2147483647, %v8485_v63  ;;  %v1887_v50 = vmul.f32 %v1833_v32, %v537_v12  ;;  %v3029_v35 = vrot.slane %v10016_v30, 2  ;;  %v8505_v2 = vpop.eup %6826 }
 0x142   : > { %10014 = vst [vmem:[#allocation45_spill] sm:$0xff] %v8491_v22  ;;  %5995 = vmatmul.mubr.msk.f32.gmra.mrb[20].mxu1 %vm2418_vm12, %v8491_v22  ;;  %v1295_v5 = vmul.f32 %v8413_v56, %v1241_v43  ;;  %v1240_v19 = vadd.f32 0.2548296, %v1186_v0  ;;  %6830 = vpow2.f32 %v1496_v10  ;;  %v759_v22 = vadd.f32 1.0, %v705_v45  ;;  %v368_v56 = vld [vmem:[%s7007_s11 + $0x140] sm:$0xff]  ;;  %v2130_v0 = vpop.permute.xlu1 %2129 }
 0x143   : > { %v704_v46 = vmul.f32 0.3275911, %v650_v47  ;;  %v431_v44 = vmul.f32 %v8089_v54, %v369_v27  ;;  %v8508_v20 = vpop.eup %6828  ;;  %v865_v31 = vmul.f32 1.0614054, %v8505_v2  ;;  %v8513_v12 = vsel %vm2997_vm13, %v3028_v28, %v3029_v35 }
 0x144   : > { %v1565_v58 = vmul.f32 %v6823_v42, %v1295_v5  ;;  %v1294_v55 = vmul.f32 %v8426_v57, %v1240_v19  ;;  %10017 = vst [vmem:[#allocation18_spill] sm:$0xff] %v8513_v12  ;;  %v864_v32 = vmul.f32 1.0614054, %v8508_v20  ;;  %v1494_v43 = vmul.f32 1.442695, %v1404_v17  ;;  %6229 = vmatprep.mubr.msk.f32.mxu0 %vm2418_vm12, %v8513_v12 }
 0x145   : > { %6832 = vrcp.f32 %v759_v22  ;;  %v758_v10 = vadd.f32 1.0, %v704_v46  ;;  %v919_v42 = vadd.f32 -1.4531521, %v865_v31  ;;  %v1353_v57 = vsub.f32 0.0, %v8482_v41 }
 0x146   : > { %v1619_v27 = vsub.f32 1.0, %v1565_v58  ;;  %v1564_v45 = vmul.f32 %v6825_v60, %v1294_v55  ;;  %v918_v5 = vadd.f32 -1.4531521, %v864_v32  ;;  %v1352_v19 = vsub.f32 0.0, %v650_v47 }
 0x147   : > { %v8521_v28 = vadd.f32 %v8113_v11, %v431_v44  ;;  %v430_v16 = vmul.f32 %v8089_v54, %v368_v56  ;;  %v973_v46 = vmul.f32 %v8505_v2, %v919_v42  ;;  %6834 = vrcp.f32 %v758_v10 }
 0x148   : > { %v1727_v6 = vsub.f32 0.0, %v1619_v27  ;;  %v1618_v17 = vsub.f32 1.0, %v1564_v45  ;;  %v8526_v22 = vmul.f32 0.5, %v8393_v25  ;;  %v972_v55 = vmul.f32 %v8508_v20, %v918_v5  ;;  %v2140_v45 = vpop.permute.xlu1 %2139 }
 0x149   : > { %6836 = vpow2.f32 %v1494_v43  ;;  %v8530_v31 = vmul.f32 0.70710677, %v8521_v28  ;;  %v1027_v58 = vadd.f32 1.4214138, %v973_v46  ;;  %v8535_v54 = vadd.f32 %v8113_v11, %v430_v16 }
 0x14a   : > { %v1781_v60 = vsel %vm1673_vm7, %v1619_v27, %v1727_v6  ;;  %v1726_v44 = vsub.f32 0.0, %v1618_v17  ;;  %v8537_v56 = vmul.f32 %v2130_v0, %v1887_v50  ;;  %v1026_v10 = vadd.f32 1.4214138, %v972_v55  ;;  %v2135_v0 = vpop.permute.xlu0 %2134 }
 0x14b   : > { %v1835_v32 = vadd.f32 1.0, %v1781_v60  ;;  %v653_v25 = vand.u32 2147483647, %v8530_v31  ;;  %v1081_v42 = vmul.f32 %v8505_v2, %v1027_v58  ;;  %v1407_v59 = vmul.f32 %v1353_v57, %v8482_v41 }
 0x14c   : > { %v1780_v43 = vsel %vm1672_vm8, %v1618_v17, %v1726_v44  ;;  %v1406_v6 = vmul.f32 %v1352_v19, %v650_v47  ;;  %v6831_v27 = vpop.eup %6830  ;;  %v1080_v16 = vmul.f32 %v8508_v20, %v1026_v10  ;;  %v8547_v60 = vmul.f32 0.70710677, %v8535_v54 }
 0x14d   : > { %v1889_v5 = vmul.f32 %v1835_v32, %v8447_v21  ;;  %v1834_v11 = vadd.f32 1.0, %v1780_v43  ;;  %v707_v50 = vmul.f32 0.3275911, %v653_v25  ;;  %v1135_v46 = vadd.f32 -0.28449672, %v1081_v42 }
 0x14e   : > { %v1355_v55 = vsub.f32 0.0, %v653_v25  ;;  %v10018_v37 = vrot.slane %v8041_v18, 2  ;;  %v1134_v57 = vadd.f32 -0.28449672, %v1080_v16  ;;  %v1500_v32 = vmul.f32 1.442695, %v1407_v59 }
 0x14f   : > { %v8554_v41 = vpop.eup %6832  ;;  %v8556_v47 = vmul.f32 %v2140_v45, %v1889_v5  ;;  %v1888_v21 = vmul.f32 %v1834_v11, %v8460_v36  ;;  %v761_v19 = vadd.f32 1.0, %v707_v50  ;;  %v1189_v44 = vmul.f32 %v8505_v2, %v1135_v46 }
 0x150   : > { %v8552_v17 = vsel %vm2997_vm13, %v3029_v35, %v10018_v37  ;;  %v867_v58 = vmul.f32 1.0614054, %v8554_v41  ;;  %v8564_v18 = vand.u32 2147483647, %v8547_v60  ;;  %vm1675_vm9 = vcmp.ge.f32.partialorder %v8408_v33, 0.0 }
 0x151   : > { %10019 = vst [vmem:[#allocation17_spill] sm:$0xff] %v8552_v17  ;;  %6230 = vmatmul.mubr.msk.f32.gmra.mrb[10].mxu0 %vm2418_vm12, %v8552_v17  ;;  %v2394_v35 = vrot.slane %v8556_v47, 1  ;;  %v8567_v10 = vmul.f32 %v2135_v0, %v1888_v21  ;;  %v1188_v36 = vmul.f32 %v8508_v20, %v1134_v57  ;;  %v2391_v45 = vrot.slane %v8537_v56, 1  ;;  %v8572_v43 = vpop.eup %6834 }
 0x152   : > { %v1243_v42 = vadd.f32 0.2548296, %v1189_v44  ;;  %v921_v5 = vadd.f32 -1.4531521, %v867_v58  ;;  %v1498_v11 = vmul.f32 1.442695, %v1406_v6  ;;  %6838 = vrcp.f32 %v761_v19 }
 0x153   : > { %10020 = vst [vmem:[#allocation46_spill] sm:$0xff] %v8567_v10  ;;  %v6837_v59 = vpop.eup %6836  ;;  %v1242_v16 = vadd.f32 0.2548296, %v1188_v36  ;;  %v2392_v50 = vrot.slane %v8567_v10, 1  ;;  %v866_v46 = vmul.f32 1.0614054, %v8572_v43  ;;  %v1409_v0 = vmul.f32 %v1355_v55, %v653_v25 }
 0x154   : > { %v1297_v37 = vmul.f32 %v8505_v2, %v1243_v42  ;;  %v975_v21 = vmul.f32 %v8554_v41, %v921_v5  ;;  %6840 = vpow2.f32 %v1500_v32  ;;  %v706_v57 = vmul.f32 0.3275911, %v8564_v18  ;;  %v8582_v6 = vld [vmem:[%s9818_s1 + $0x10] sm:$0xff]  ;;  %v371_v36 = vld [vmem:[%s7007_s11 + $0x158] sm:$0xff] }
 0x155   : > { %v1296_v19 = vmul.f32 %v8508_v20, %v1242_v16  ;;  %v8586_v44 = vsel %vm2335_vm11, %v2391_v45, %v2392_v50  ;;  %v8589_v25 = vsel %vm2335_vm11, %v2392_v50, %v2394_v35  ;;  %v920_v2 = vadd.f32 -1.4531521, %v866_v46  ;;  %6062 = vmatprep.subr.mxu1 %v8582_v6  ;;  %v370_v42 = vld [vmem:[%s7007_s11 + $0x150] sm:$0xff] }
 0x156   : > { %10021 = vst [vmem:[#allocation47_spill] sm:$0xff] %v8586_v44  ;;  %10022 = vst [vmem:[#allocation48_spill] sm:$0xff] %v8589_v25  ;;  %v1567_v55 = vmul.f32 %v6831_v27, %v1297_v37  ;;  %vm1674_vm10 = vcmp.ge.f32.partialorder %v8411_v7, 0.0  ;;  %5997 = vmatprep.mubr.msk.f32.mxu1 %vm2418_vm12, %v8586_v44  ;;  %v1029_v58 = vadd.f32 1.4214138, %v975_v21  ;;  %v760_v32 = vadd.f32 1.0, %v706_v57 }
 0x157   : > { %v1566_v20 = vmul.f32 %v6837_v59, %v1296_v19  ;;  %5998 = vmatmul.mubr.msk.f32.gmra.mrb[22].mxu1 %vm2418_vm12, %v8589_v25  ;;  %v974_v45 = vmul.f32 %v8572_v43, %v920_v2  ;;  %6842 = vpow2.f32 %v1498_v11  ;;  %v1504_v35 = vmul.f32 1.442695, %v1409_v0  ;;  %v10023_v16 = vld [vmem:[#allocation20_spill] sm:$0xff]  ;;  %v10024_v21 = vld [vmem:[#allocation22_spill] sm:$0xff] }
 0x158   : > { %v1621_v5 = vsub.f32 1.0, %v1567_v55  ;;  %v1083_v27 = vmul.f32 %v8554_v41, %v1029_v58  ;;  %6844 = vrcp.f32 %v760_v32  ;;  %v3033_v50 = vrot.slane %v10023_v16, 2  ;;  %v8606_v59 = vld [vmem:[%s9820_s3] ss:$0 sm:$0xff] }
 0x159   : > { %v1620_v46 = vsub.f32 1.0, %v1566_v20  ;;  %v1028_v37 = vadd.f32 1.4214138, %v974_v45  ;;  %v3034_v57 = vrot.slane %v10024_v21, 2  ;;  %v433_v19 = vmul.f32 %v8606_v59, %v371_v36  ;;  %v8618_v45 = vld [vmem:[%s9821_s4] ss:$0 sm:$0xff] }
 0x15a   : > { %v1729_v11 = vsub.f32 0.0, %v1621_v5  ;;  %v1137_v0 = vadd.f32 -0.28449672, %v1083_v27  ;;  %v1354_v2 = vsub.f32 0.0, %v8564_v18  ;;  %v432_v55 = vmul.f32 %v8606_v59, %v370_v42 }
 0x15b   : > { %v1728_v58 = vsub.f32 0.0, %v1620_v46  ;;  %v1082_v32 = vmul.f32 %v8572_v43, %v1028_v37  ;;  %v8613_v20 = vsel %vm2997_vm13, %v3033_v50, %v3034_v57  ;;  %v8621_v25 = vadd.f32 %v8618_v45, %v433_v19 }
 0x15c   : > { %10025 = vst [vmem:[#allocation20_spill] sm:$0xff] %v8613_v20  ;;  %v8623_v36 = vpop.eup %6838  ;;  %v1783_v27 = vsel %vm1675_vm9, %v1621_v5, %v1729_v11  ;;  %v1191_v42 = vmul.f32 %v8554_v41, %v1137_v0  ;;  %6232 = vmatprep.mubr.msk.f32.mxu0 %vm2418_vm12, %v8613_v20  ;;  %v8631_v50 = vadd.f32 %v8618_v45, %v432_v55  ;;  %v10026_v37 = vrot.slane %v8056_v3, 2  ;;  %v2150_v11 = vpop.permute.xlu1 %2149 }
 0x15d   : > { %v1837_v19 = vadd.f32 1.0, %v1783_v27  ;;  %v1782_v17 = vsel %vm1674_vm10, %v1620_v46, %v1728_v58  ;;  %v1136_v12 = vadd.f32 -0.28449672, %v1082_v32  ;;  %v869_v33 = vmul.f32 1.0614054, %v8623_v36 }
 0x15e   : > { %v8636_v44 = vsel %vm2997_vm13, %v3034_v57, %v10026_v37  ;;  %v6841_v5 = vpop.eup %6840  ;;  %v1836_v0 = vadd.f32 1.0, %v1782_v17  ;;  %v1245_v55 = vadd.f32 0.2548296, %v1191_v42  ;;  %v8644_v20 = vmul.f32 0.70710677, %v8621_v25  ;;  %v2145_v57 = vpop.permute.xlu0 %2144 }
 0x15f   : > { %10027 = vst [vmem:[#allocation22_spill] sm:$0xff] %v8636_v44  ;;  %6233 = vmatmul.mubr.msk.f32.gmra.mrb[12].mxu0 %vm2418_vm12, %v8636_v44  ;;  %v1891_v3 = vmul.f32 %v1837_v19, %v8499_v52  ;;  %v1190_v27 = vmul.f32 %v8572_v43, %v1136_v12  ;;  %v923_v7 = vadd.f32 -1.4531521, %v869_v33  ;;  %v1408_v32 = vmul.f32 %v1354_v2, %v8564_v18 }
 0x160   : > { %v1890_v46 = vmul.f32 %v1836_v0, %v8526_v22  ;;  %v1299_v58 = vmul.f32 %v8554_v41, %v1245_v55  ;;  %v655_v37 = vand.u32 2147483647, %v8644_v20  ;;  %v8656_v52 = vmul.f32 0.70710677, %v8631_v50 }
 0x161   : > { %v6843_v44 = vpop.eup %6842  ;;  %v8652_v17 = vmul.f32 %v2150_v11, %v1891_v3  ;;  %v1244_v42 = vadd.f32 0.2548296, %v1190_v27  ;;  %v977_v13 = vmul.f32 %v8623_v36, %v923_v7  ;;  %6846 = vpow2.f32 %v1504_v35 }
 0x162   : > { %v8658_v19 = vpop.eup %6844  ;;  %v8660_v12 = vmul.f32 %v2145_v57, %v1890_v46  ;;  %v1569_v22 = vmul.f32 %v6841_v5, %v1299_v58  ;;  %v709_v41 = vmul.f32 0.3275911, %v655_v37  ;;  %v1502_v55 = vmul.f32 1.442695, %v1408_v32 }
 0x163   : > { %v1298_v18 = vmul.f32 %v8572_v43, %v1244_v42  ;;  %v9903_v2 = vrot.slane %v8652_v17, 1  ;;  %v1031_v33 = vadd.f32 1.4214138, %v977_v13  ;;  %v868_v11 = vmul.f32 1.0614054, %v8658_v19 }
 0x164   : > { %v2396_v0 = vrot.slane %v8660_v12, 1  ;;  %v763_v3 = vadd.f32 1.0, %v709_v41  ;;  %v8668_v57 = vand.u32 2147483647, %v8656_v52  ;;  %v1623_v35 = vsub.f32 1.0, %v1569_v22 }
 0x165   : > { %v1568_v27 = vmul.f32 %v6843_v44, %v1298_v18  ;;  %v1085_v7 = vmul.f32 %v8623_v36, %v1031_v33  ;;  %v922_v51 = vadd.f32 -1.4531521, %v868_v11  ;;  %v1357_v13 = vsub.f32 0.0, %v655_v37 }
 0x166   : > { %v8673_v43 = vsel %vm2335_vm11, %v2396_v0, %v9903_v2  ;;  %6848 = vrcp.f32 %v763_v3  ;;  %v708_v58 = vmul.f32 0.3275911, %v8668_v57  ;;  %v3041_v32 = vrot.slane %v8265_v14, 2  ;;  %v373_v14 = vld [vmem:[%s7007_s11 + $0x168] sm:$0xff]  ;;  %v372_v2 = vld [vmem:[%s7007_s11 + $0x160] sm:$0x3] }
 0x167   : > { %10028 = vst [vmem:[#allocation49_spill] sm:$0xff] %v8673_v43  ;;  %v1622_v5 = vsub.f32 1.0, %v1568_v27  ;;  %6000 = vmatprep.mubr.msk.f32.mxu1 %vm2418_vm12, %v8673_v43  ;;  %v1139_v44 = vadd.f32 -0.28449672, %v1085_v7  ;;  %v976_v46 = vmul.f32 %v8658_v19, %v922_v51  ;;  %v8681_v42 = vmul.f32 0.5, %v8454_v9  ;;  %v10029_v51 = vld [vmem:[#allocation27_spill] sm:$0xff] }
 0x168   : > { %vm1676_vm14 = vcmp.ge.f32.partialorder %v8485_v63, 0.0  ;;  %6850 = vpow2.f32 %v1502_v55  ;;  %v542_v22 = vmul.f32 0.5, %v8467_v53  ;;  %v1411_v11 = vmul.f32 %v1357_v13, %v655_v37  ;;  %v8692_v9 = vld [vmem:[%s9818_s1 + $0x38] sm:$0xff] }
 0x169   : > { %v1730_v41 = vsub.f32 0.0, %v1622_v5  ;;  %v1193_v18 = vmul.f32 %v8623_v36, %v1139_v44  ;;  %v1030_v33 = vadd.f32 1.4214138, %v976_v46  ;;  %v762_v0 = vadd.f32 1.0, %v708_v58  ;;  %10030 = vst [vmem:[#allocation27_spill] sm:$0xff] %v8692_v9  ;;  %6312 = vmatprep.subr.mxu0 %v8692_v9  ;;  %v2155_v46 = vpop.permute.xlu0 %2154 }
 0x16a   : > { %v3038_v3 = vrot.slane %v10029_v51, 2  ;;  %v3039_v27 = vrot.slane %v8155_v8, 2  ;;  %v1731_v63 = vsub.f32 0.0, %v1623_v35  ;;  %vm1677_vm15 = vcmp.ge.f32.partialorder %v8464_v34, 0.0 }
 0x16b   : > { %v1784_v55 = vsel %vm1676_vm14, %v1622_v5, %v1730_v41  ;;  %v1247_v7 = vadd.f32 0.2548296, %v1193_v18  ;;  %v1084_v53 = vmul.f32 %v8658_v19, %v1030_v33  ;;  %v6847_v37 = vpop.eup %6846  ;;  %6852 = vrcp.f32 %v762_v0 }
 0x16c   : > { %v1838_v13 = vadd.f32 1.0, %v1784_v55  ;;  %v8699_v44 = vsel %vm2997_vm13, %v3038_v3, %v3039_v27  ;;  %v545_v58 = vmul.f32 0.5, %v8521_v28  ;;  %v435_v41 = vmul.f32 %v8606_v59, %v373_v14 }
 0x16d   : > { %10031 = vst [vmem:[#allocation50_spill] sm:$0xff] %v8699_v44  ;;  %v1301_v43 = vmul.f32 %v8623_v36, %v1247_v7  ;;  %v1138_v5 = vadd.f32 -0.28449672, %v1084_v53  ;;  %6235 = vmatprep.mubr.msk.f32.mxu0 %vm2418_vm12, %v8699_v44  ;;  %v1508_v33 = vmul.f32 1.442695, %v1411_v11  ;;  %v434_v34 = vmul.f32 %v8606_v59, %v372_v2 }
 0x16e   : > { %v1892_v18 = vmul.f32 %v1838_v13, %v542_v22  ;;  %v8708_v0 = vsel %vm2997_vm13, %v3039_v27, %v3041_v32  ;;  %v1785_v3 = vsel %vm1677_vm15, %v1623_v35, %v1731_v63  ;;  %v8712_v28 = vadd.f32 %v8618_v45, %v435_v41  ;;  %v2160_v13 = vpop.permute.xlu1 %2159 }
 0x16f   : > { %10032 = vst [vmem:[#allocation51_spill] sm:$0xff] %v8708_v0  ;;  %v1571_v55 = vmul.f32 %v6847_v37, %v1301_v43  ;;  %v1192_v62 = vmul.f32 %v8658_v19, %v1138_v5  ;;  %6236 = vmatmul.mubr.msk.f32.gmra.mrb[14].mxu0 %vm2418_vm12, %v8708_v0  ;;  %v1356_v22 = vsub.f32 0.0, %v8668_v57  ;;  %v8722_v2 = vadd.f32 %v8618_v45, %v434_v34 }
 0x170   : > { %v8716_v36 = vpop.eup %6848  ;;  %v8718_v14 = vmul.f32 %v2155_v46, %v1892_v18  ;;  %v9909_v35 = vrot.slane %v8330_v38, 2  ;;  %vm1679_vm0 = vcmp.ge.f32.partialorder %v8530_v31, 0.0  ;;  %v1839_v63 = vadd.f32 1.0, %v1785_v3 }
 0x171   : > { %v1625_v43 = vsub.f32 1.0, %v1571_v55  ;;  %v1246_v32 = vadd.f32 0.2548296, %v1192_v62  ;;  %v871_v11 = vmul.f32 1.0614054, %v8716_v36  ;;  %v3043_v37 = vrot.slane %v8262_v61, 2 }
 0x172   : > { %v6851_v27 = vpop.eup %6850  ;;  %v2399_v7 = vrot.slane %v8718_v14, 1  ;;  %v8729_v53 = vmul.f32 0.70710677, %v8712_v28  ;;  %v8734_v18 = vmul.f32 0.70710677, %v8722_v2  ;;  %v10033_v62 = vrot.slane %v8652_v17, 1 }
 0x173   : > { %v1733_v46 = vsub.f32 0.0, %v1625_v43  ;;  %v1300_v5 = vmul.f32 %v8658_v19, %v1246_v32  ;;  %v925_v41 = vadd.f32 -1.4531521, %v871_v11  ;;  %v1410_v3 = vmul.f32 %v1356_v22, %v8668_v57 }
 0x174   : > { %v8739_v34 = vsel %vm2335_vm11, %v10033_v62, %v2399_v7  ;;  %v657_v55 = vand.u32 2147483647, %v8729_v53  ;;  %v8746_v0 = vsel %vm2997_vm13, %v3043_v37, %v9909_v35  ;;  %v656_v7 = vand.u32 2147483647, %v8734_v18 }
 0x175   : > { %10034 = vst [vmem:[#allocation52_spill] sm:$0xff] %v8739_v34  ;;  %10035 = vst [vmem:[#allocation53_spill] sm:$0xff] %v8746_v0  ;;  %v1787_v19 = vsel %vm1679_vm0, %v1625_v43, %v1733_v46  ;;  %v1570_v32 = vmul.f32 %v6851_v27, %v1300_v5  ;;  %6001 = vmatmul.mubr.msk.f32.gmra.mrb[24].mxu1 %vm2418_vm12, %v8739_v34  ;;  %v979_v11 = vmul.f32 %v8716_v36, %v925_v41  ;;  %v8756_v57 = vpop.eup %6852 }
 0x176   : > { %6238 = vmatprep.mubr.msk.f32.mxu0 %vm2418_vm12, %v8746_v0  ;;  %v1841_v22 = vadd.f32 1.0, %v1787_v19  ;;  %vm1678_vm1 = vcmp.ge.f32.partialorder %v8547_v60, 0.0  ;;  %6854 = vpow2.f32 %v1508_v33  ;;  %v711_v37 = vmul.f32 0.3275911, %v657_v55  ;;  %v2170_v0 = vpop.permute.xlu1 %2169 }
 0x177   : > { %v1893_v31 = vmul.f32 %v1839_v63, %v8681_v42  ;;  %v1624_v43 = vsub.f32 1.0, %v1570_v32  ;;  %v1033_v27 = vadd.f32 1.4214138, %v979_v11  ;;  %v870_v46 = vmul.f32 1.0614054, %v8756_v57 }
 0x178   : > { %v1895_v5 = vmul.f32 %v1841_v22, %v545_v58  ;;  %v1506_v41 = vmul.f32 1.442695, %v1410_v3  ;;  %v765_v62 = vadd.f32 1.0, %v711_v37  ;;  %v710_v35 = vmul.f32 0.3275911, %v656_v7 }
 0x179   : > { %v3046_v34 = vrot.slane %v8310_v29, 2  ;;  %v1732_v19 = vsub.f32 0.0, %v1624_v43  ;;  %v1087_v44 = vmul.f32 %v8716_v36, %v1033_v27  ;;  %v924_v33 = vadd.f32 -1.4531521, %v870_v46  ;;  %v375_v32 = vld [vmem:[%s7007_s11 + $0x178] sm:$0x3]  ;;  %v2165_v46 = vpop.permute.xlu0 %2164 }
 0x17a   : > { %v544_v61 = vmul.f32 0.5, %v8535_v54  ;;  %6856 = vrcp.f32 %v765_v62  ;;  %v1359_v42 = vsub.f32 0.0, %v657_v55  ;;  %v764_v63 = vadd.f32 1.0, %v710_v35  ;;  %v374_v29 = vld [vmem:[%s7007_s11 + $0x170] sm:$0xff] }
 0x17b   : > { %v8765_v11 = vmul.f32 %v2160_v13, %v1893_v31  ;;  %v1786_v58 = vsel %vm1678_vm1, %v1624_v43, %v1732_v19  ;;  %v1141_v3 = vadd.f32 -0.28449672, %v1087_v44  ;;  %v978_v22 = vmul.f32 %v8756_v57, %v924_v33 }
 0x17c   : > { %v8771_v37 = vmul.f32 %v2170_v0, %v1895_v5  ;;  %v1840_v8 = vadd.f32 1.0, %v1786_v58  ;;  %6858 = vpow2.f32 %v1506_v41  ;;  %v1358_v27 = vsub.f32 0.0, %v656_v7 }
 0x17d   : > { %v1195_v54 = vmul.f32 %v8716_v36, %v1141_v3  ;;  %v1032_v62 = vadd.f32 1.4214138, %v978_v22  ;;  %6860 = vrcp.f32 %v764_v63  ;;  %v437_v35 = vmul.f32 %v8606_v59, %v375_v32  ;;  %v377_v3 = vld [vmem:[%s7007_s11 + $0x188] sm:$0xff] }
 0x17e   : > { %v1894_v13 = vmul.f32 %v1840_v8, %v544_v61  ;;  %v1413_v31 = vmul.f32 %v1359_v42, %v657_v55  ;;  %v436_v60 = vmul.f32 %v8606_v59, %v374_v29  ;;  %v10036_v44 = vrot.slane %v8330_v38, 2 }
 0x17f   : > { %v1249_v43 = vadd.f32 0.2548296, %v1195_v54  ;;  %v1086_v5 = vmul.f32 %v8756_v57, %v1032_v62  ;;  %v8783_v41 = vadd.f32 %v8618_v45, %v437_v35  ;;  %v3048_v8 = vrot.slane %v8398_v1, 2 }
 0x180   : > { %v8779_v0 = vsel %vm2997_vm13, %v10036_v44, %v3046_v34  ;;  %v6855_v61 = vpop.eup %6854  ;;  %v2404_v55 = vrot.slane %v8771_v37, 1  ;;  %v8789_v19 = vmul.f32 %v2165_v46, %v1894_v13  ;;  %v8792_v33 = vadd.f32 %v8618_v45, %v436_v60 }
 0x181   : > { %10037 = vst [vmem:[#allocation54_spill] sm:$0xff] %v8779_v0  ;;  %6239 = vmatmul.mubr.msk.f32.gmra.mrb[16].mxu0 %vm2418_vm12, %v8779_v0  ;;  %v9920_v34 = vrot.slane %v8368_v39, 2  ;;  %v1303_v42 = vmul.f32 %v8716_v36, %v1249_v43  ;;  %v1140_v63 = vadd.f32 -0.28449672, %v1086_v5  ;;  %v2401_v32 = vrot.slane %v8765_v11, 1 }
 0x182   : > { %v8798_v58 = vmul.f32 0.70710677, %v8783_v41  ;;  %v2402_v22 = vrot.slane %v8789_v19, 1  ;;  %v1412_v29 = vmul.f32 %v1358_v27, %v656_v7  ;;  %v8803_v46 = vmul.f32 0.70710677, %v8792_v33 }
 0x183   : > { %v8808_v54 = vsel %vm2997_vm13, %v3048_v8, %v9920_v34  ;;  %v1573_v62 = vmul.f32 %v6855_v61, %v1303_v42  ;;  %v1194_v36 = vmul.f32 %v8756_v57, %v1140_v63  ;;  %v1512_v35 = vmul.f32 1.442695, %v1413_v31 }
 0x184   : > { %10038 = vst [vmem:[#allocation55_spill] sm:$0xff] %v8808_v54  ;;  %v8812_v13 = vand.u32 2147483647, %v8798_v58  ;;  %6241 = vmatprep.mubr.msk.f32.mxu0 %vm2418_vm12, %v8808_v54  ;;  %v8816_v60 = vpop.eup %6856  ;;  %v8819_v7 = vsel %vm2335_vm11, %v2401_v32, %v2402_v22  ;;  %v8822_v27 = vsel %vm2335_vm11, %v2402_v22, %v2404_v55  ;;  %v658_v44 = vand.u32 2147483647, %v8803_v46 }
 0x185   : > { %10039 = vst [vmem:[#allocation56_spill] sm:$0xff] %v8819_v7  ;;  %10040 = vst [vmem:[#allocation57_spill] sm:$0xff] %v8822_v27  ;;  %v439_v43 = vmul.f32 %v8606_v59, %v377_v3  ;;  %v3051_v31 = vrot.slane %v8457_v15, 2  ;;  %v1627_v5 = vsub.f32 1.0, %v1573_v62  ;;  %v1248_v8 = vadd.f32 0.2548296, %v1194_v36  ;;  %6003 = vmatprep.mubr.msk.f32.mxu1 %vm2418_vm12, %v8819_v7 }
 0x186   : > { %v873_v61 = vmul.f32 1.0614054, %v8816_v60  ;;  %v6859_v42 = vpop.eup %6858  ;;  %v547_v63 = vmul.f32 0.5, %v8621_v25  ;;  %vm1681_vm2 = vcmp.ge.f32.partialorder %v8644_v20, 0.0  ;;  %6004 = vmatmul.mubr.msk.f32.gmra.mrb[26].mxu1 %vm2418_vm12, %v8822_v27  ;;  %v713_v55 = vmul.f32 0.3275911, %v8812_v13 }
 0x187   : > { %v712_v32 = vmul.f32 0.3275911, %v658_v44  ;;  %v8835_v3 = vpop.eup %6860  ;;  %v1735_v15 = vsub.f32 0.0, %v1627_v5  ;;  %v1302_v22 = vmul.f32 %v8756_v57, %v1248_v8  ;;  %v1510_v36 = vmul.f32 1.442695, %v1412_v29  ;;  %v376_v57 = vld [vmem:[%s7007_s11 + $0x180] sm:$0xff]  ;;  %v2180_v8 = vpop.permute.xlu1 %2179 }
 0x188   : > { %v927_v62 = vadd.f32 -1.4531521, %v873_v61  ;;  %v872_v34 = vmul.f32 1.0614054, %v8835_v3  ;;  %v767_v7 = vadd.f32 1.0, %v713_v55  ;;  %v8840_v20 = vadd.f32 %v8618_v45, %v439_v43 }
 0x189   : > { %v766_v25 = vadd.f32 1.0, %v712_v32  ;;  %v1789_v54 = vsel %vm1681_vm2, %v1627_v5, %v1735_v15  ;;  %v1572_v27 = vmul.f32 %v6859_v42, %v1302_v22  ;;  %6862 = vpow2.f32 %v1512_v35 }
 0x18a   : > { %v981_v0 = vmul.f32 %v8816_v60, %v927_v62  ;;  %v1843_v1 = vadd.f32 1.0, %v1789_v54  ;;  %v546_v38 = vmul.f32 0.5, %v8631_v50  ;;  %v926_v9 = vadd.f32 -1.4531521, %v872_v34 }
 0x18b   : > { %6864 = vrcp.f32 %v767_v7  ;;  %v1626_v29 = vsub.f32 1.0, %v1572_v27  ;;  %vm1680_vm3 = vcmp.ge.f32.partialorder %v8656_v52, 0.0  ;;  %v8848_v5 = vmul.f32 0.70710677, %v8840_v20 }
 0x18c   : > { %v1035_v61 = vadd.f32 1.4214138, %v981_v0  ;;  %6866 = vpow2.f32 %v1510_v36  ;;  %v1897_v55 = vmul.f32 %v1843_v1, %v547_v63  ;;  %v980_v43 = vmul.f32 %v8835_v3, %v926_v9  ;;  %v2175_v36 = vpop.permute.xlu0 %2174 }
 0x18d   : > { %6868 = vrcp.f32 %v766_v25  ;;  %v1734_v35 = vsub.f32 0.0, %v1626_v29  ;;  %v1361_v50 = vsub.f32 0.0, %v8812_v13  ;;  %v438_v34 = vmul.f32 %v8606_v59, %v376_v57 }
 0x18e   : > { %v1089_v54 = vmul.f32 %v8816_v60, %v1035_v61  ;;  %v8853_v7 = vmul.f32 %v2180_v8, %v1897_v55  ;;  %v1034_v27 = vadd.f32 1.4214138, %v980_v43  ;;  %v1360_v52 = vsub.f32 0.0, %v658_v44 }
 0x18f   : > { %v661_v0 = vand.u32 2147483647, %v8848_v5  ;;  %v1788_v1 = vsel %vm1680_vm3, %v1626_v29, %v1734_v35  ;;  %v8857_v9 = vadd.f32 %v8618_v45, %v438_v34  ;;  %v10041_v63 = vrot.slane %v8368_v39, 2 }
 0x190   : > { %v1143_v42 = vadd.f32 -0.28449672, %v1089_v54  ;;  %v1842_v15 = vadd.f32 1.0, %v1788_v1  ;;  %v1088_v22 = vmul.f32 %v8835_v3, %v1034_v27  ;;  %v1415_v57 = vmul.f32 %v1361_v50, %v8812_v13 }
 0x191   : > { %v8862_v32 = vsel %vm2997_vm13, %v10041_v63, %v3051_v31  ;;  %v715_v62 = vmul.f32 0.3275911, %v661_v0  ;;  %v8870_v8 = vmul.f32 0.70710677, %v8857_v9  ;;  %v1414_v55 = vmul.f32 %v1360_v52, %v658_v44 }
 0x192   : > { %10042 = vst [vmem:[#allocation58_spill] sm:$0xff] %v8862_v32  ;;  %6242 = vmatmul.mubr.msk.f32.gmra.mrb[18].mxu0 %vm2418_vm12, %v8862_v32  ;;  %v1197_v25 = vmul.f32 %v8816_v60, %v1143_v42  ;;  %v1896_v29 = vmul.f32 %v1842_v15, %v546_v38  ;;  %v1142_v61 = vadd.f32 -0.28449672, %v1088_v22  ;;  %v3053_v27 = vrot.slane %v8537_v56, 2  ;;  %v378_v22 = vld [vmem:[%s7007_s11 + $0x190] sm:$0x3] }
 0x193   : > { %v769_v31 = vadd.f32 1.0, %v715_v62  ;;  %v6863_v43 = vpop.eup %6862  ;;  %v8874_v34 = vand.u32 2147483647, %v8870_v8  ;;  %v3054_v38 = vrot.slane %v8567_v10, 2  ;;  %v1516_v63 = vmul.f32 1.442695, %v1415_v57 }
 0x194   : > { %v1251_v35 = vadd.f32 0.2548296, %v1197_v25  ;;  %v8879_v13 = vmul.f32 %v2175_v36, %v1896_v29  ;;  %v1196_v50 = vmul.f32 %v8835_v3, %v1142_v61  ;;  %v1514_v29 = vmul.f32 1.442695, %v1414_v55 }
 0x195   : > { %v8877_v1 = vpop.eup %6864  ;;  %6870 = vrcp.f32 %v769_v31  ;;  %v714_v15 = vmul.f32 0.3275911, %v8874_v34  ;;  %v8891_v61 = vsel %vm2997_vm13, %v3053_v27, %v3054_v38  ;;  %v3056_v31 = vrot.slane %v8556_v47, 2 }
 0x196   : > { %v6867_v44 = vpop.eup %6866  ;;  %v1305_v52 = vmul.f32 %v8816_v60, %v1251_v35  ;;  %v875_v42 = vmul.f32 1.0614054, %v8877_v1  ;;  %v1250_v25 = vadd.f32 0.2548296, %v1196_v50  ;;  %v2406_v36 = vrot.slane %v8879_v13, 1  ;;  %10043 = vst [vmem:[#allocation59_spill] sm:$0xff] %v8891_v61  ;;  %6244 = vmatprep.mubr.msk.f32.mxu0 %vm2418_vm12, %v8891_v61 }
 0x197   : > { %v8887_v62 = vpop.eup %6868  ;;  %v1363_v35 = vsub.f32 0.0, %v661_v0  ;;  %v10044_v50 = vrot.slane %v8853_v7, 1  ;;  %v768_v55 = vadd.f32 1.0, %v714_v15  ;;  %6872 = vpow2.f32 %v1516_v63 }
 0x198   : > { %v929_v54 = vadd.f32 -1.4531521, %v875_v42  ;;  %v874_v60 = vmul.f32 1.0614054, %v8887_v62  ;;  %v1575_v57 = vmul.f32 %v6863_v43, %v1305_v52  ;;  %v1304_v32 = vmul.f32 %v8835_v3, %v1250_v25 }
 0x199   : > { %v8901_v10 = vsel %vm2335_vm11, %v2406_v36, %v10044_v50  ;;  %6874 = vrcp.f32 %v768_v55  ;;  %v440_v61 = vmul.f32 %v8606_v59, %v378_v22  ;;  %v1417_v52 = vmul.f32 %v1363_v35, %v661_v0 }
 0x19a   : > { %10045 = vst [vmem:[#allocation60_spill] sm:$0xff] %v8901_v10  ;;  %6006 = vmatprep.mubr.msk.f32.mxu1 %vm2418_vm12, %v8901_v10  ;;  %v983_v47 = vmul.f32 %v8877_v1, %v929_v54  ;;  %v928_v27 = vadd.f32 -1.4531521, %v874_v60  ;;  %v1574_v42 = vmul.f32 %v6867_v44, %v1304_v32  ;;  %6876 = vpow2.f32 %v1514_v29 }
 0x19b   : > { %v1629_v25 = vsub.f32 1.0, %v1575_v57  ;;  %v8909_v15 = vadd.f32 %v8618_v45, %v440_v61  ;;  %v8912_v50 = vsel %vm2997_vm13, %v3054_v38, %v3056_v31  ;;  %vm1682_vm4 = vcmp.ge.f32.partialorder %v8734_v18, 0.0 }
 0x19c   : > { %v1037_v43 = vadd.f32 1.4214138, %v983_v47  ;;  %v982_v3 = vmul.f32 %v8887_v62, %v928_v27  ;;  %v1628_v36 = vsub.f32 1.0, %v1574_v42  ;;  %10046 = vst [vmem:[#allocation61_spill] sm:$0xff] %v8912_v50  ;;  %6245 = vmatmul.mubr.msk.f32.gmra.mrb[20].mxu0 %vm2418_vm12, %v8912_v50  ;;  %v8921_v0 = vmul.f32 0.5, %v8712_v28  ;;  %v2185_v42 = vpop.permute.xlu0 %2184 }
 0x19d   : > { %v548_v63 = vmul.f32 0.5, %v8722_v2  ;;  %v1362_v29 = vsub.f32 0.0, %v8874_v34  ;;  %v8928_v31 = vmul.f32 0.70710677, %v8909_v15  ;;  %vm1683_vm5 = vcmp.ge.f32.partialorder %v8729_v53, 0.0 }
 0x19e   : > { %v1091_v32 = vmul.f32 %v8877_v1, %v1037_v43  ;;  %v1036_v54 = vadd.f32 1.4214138, %v982_v3  ;;  %v1736_v22 = vsub.f32 0.0, %v1628_v36  ;;  %v1737_v60 = vsub.f32 0.0, %v1629_v25 }
 0x19f   : > { %v8918_v44 = vpop.eup %6870  ;;  %v1520_v57 = vmul.f32 1.442695, %v1417_v52  ;;  %v8934_v43 = vmul.f32 0.5, %v8783_v41  ;;  %v1416_v3 = vmul.f32 %v1362_v29, %v8874_v34  ;;  %v8945_v41 = vmul.f32 0.5, %v8792_v33 }
 0x1a0   : > { %v1145_v38 = vadd.f32 -0.28449672, %v1091_v32  ;;  %v1090_v61 = vmul.f32 %v8887_v62, %v1036_v54  ;;  %v877_v18 = vmul.f32 1.0614054, %v8918_v44  ;;  %v1790_v35 = vsel %vm1682_vm4, %v1628_v36, %v1736_v22 }
 0x1a1   : > { %v1844_v28 = vadd.f32 1.0, %v1790_v35  ;;  %v662_v32 = vand.u32 2147483647, %v8928_v31  ;;  %v6873_v54 = vpop.eup %6872  ;;  %6878 = vpow2.f32 %v1520_v57  ;;  %vm1685_vm6 = vcmp.ge.f32.partialorder %v8798_v58, 0.0 }
 0x1a2   : > { %v1199_v55 = vmul.f32 %v8877_v1, %v1145_v38  ;;  %v1144_v2 = vadd.f32 -0.28449672, %v1090_v61  ;;  %v931_v47 = vadd.f32 -1.4531521, %v877_v18  ;;  %v1791_v61 = vsel %vm1683_vm5, %v1629_v25, %v1737_v60 }
 0x1a3   : > { %v1898_v10 = vmul.f32 %v1844_v28, %v548_v63  ;;  %v8940_v38 = vpop.eup %6874  ;;  %v716_v34 = vmul.f32 0.3275911, %v662_v32  ;;  %v1518_v53 = vmul.f32 1.442695, %v1416_v3  ;;  %vm1684_vm7 = vcmp.ge.f32.partialorder %v8803_v46, 0.0 }
 0x1a4   : > { %v1253_v36 = vadd.f32 0.2548296, %v1199_v55  ;;  %v1198_v52 = vmul.f32 %v8887_v62, %v1144_v2  ;;  %v985_v22 = vmul.f32 %v8918_v44, %v931_v47  ;;  %v6877_v29 = vpop.eup %6876  ;;  %v379_v55 = vld [vmem:[%s7007_s11 + $0x198] sm:$0xff]  ;;  %v876_v2 = vmul.f32 1.0614054, %v8940_v38 }
 0x1a5   : > { %v8947_v18 = vmul.f32 %v2185_v42, %v1898_v10  ;;  %v770_v25 = vadd.f32 1.0, %v716_v34  ;;  %v1845_v10 = vadd.f32 1.0, %v1791_v61  ;;  %v441_v42 = vmul.f32 %v8606_v59, %v379_v55 }
 0x1a6   : > { %v1307_v63 = vmul.f32 %v8877_v1, %v1253_v36  ;;  %v1252_v35 = vadd.f32 0.2548296, %v1198_v52  ;;  %v1039_v28 = vadd.f32 1.4214138, %v985_v22  ;;  %v930_v47 = vadd.f32 -1.4531521, %v876_v2  ;;  %v2190_v36 = vpop.permute.xlu1 %2189 }
 0x1a7   : > { %v2409_v33 = vrot.slane %v8947_v18, 1  ;;  %v10047_v3 = vrot.slane %v8853_v7, 1  ;;  %6880 = vrcp.f32 %v770_v25  ;;  %v3059_v2 = vrot.slane %v8652_v17, 2 }
 0x1a8   : > { %v1577_v60 = vmul.f32 %v6873_v54, %v1307_v63  ;;  %v1306_v57 = vmul.f32 %v8887_v62, %v1252_v35  ;;  %v1093_v1 = vmul.f32 %v8918_v44, %v1039_v28  ;;  %v381_v54 = vld [vmem:[%s7007_s11 + $0x1a8] sm:$0x3]  ;;  %v984_v61 = vmul.f32 %v8940_v38, %v930_v47  ;;  %v380_v35 = vld [vmem:[%s7007_s11 + $0x1a0] sm:$0xff] }
 0x1a9   : > { %v8961_v34 = vsel %vm2335_vm11, %v10047_v3, %v2409_v33  ;;  %6882 = vpow2.f32 %v1518_v53  ;;  %v1364_v63 = vsub.f32 0.0, %v662_v32  ;;  %v1899_v33 = vmul.f32 %v1845_v10, %v8921_v0 }
 0x1aa   : > { %v1631_v52 = vsub.f32 1.0, %v1577_v60  ;;  %v1576_v22 = vmul.f32 %v6877_v29, %v1306_v57  ;;  %10048 = vst [vmem:[#allocation62_spill] sm:$0xff] %v8961_v34  ;;  %6007 = vmatmul.mubr.msk.f32.gmra.mrb[28].mxu1 %vm2418_vm12, %v8961_v34  ;;  %v1147_v62 = vadd.f32 -0.28449672, %v1093_v1  ;;  %v3058_v29 = vrot.slane %v8660_v12, 2  ;;  %v2200_v10 = vpop.permute.xlu1 %2199 }
 0x1ab   : > { %v1038_v60 = vadd.f32 1.4214138, %v984_v61  ;;  %v443_v57 = vmul.f32 %v8606_v59, %v381_v54  ;;  %v6879_v3 = vpop.eup %6878  ;;  %v8981_v0 = vadd.f32 %v8618_v45, %v441_v42  ;;  %v8999_v46 = vmul.f32 %v2190_v36, %v1899_v33 }
 0x1ac   : > { %v1739_v28 = vsub.f32 0.0, %v1631_v52  ;;  %v1630_v55 = vsub.f32 1.0, %v1576_v22  ;;  %v1201_v25 = vmul.f32 %v8918_v44, %v1147_v62  ;;  %v8976_v53 = vsel %vm2997_vm13, %v3058_v29, %v3059_v2 }
 0x1ad   : > { %v442_v22 = vmul.f32 %v8606_v59, %v380_v35  ;;  %v1092_v50 = vmul.f32 %v8940_v38, %v1038_v60  ;;  %6247 = vmatprep.mubr.msk.f32.mxu0 %vm2418_vm12, %v8976_v53  ;;  %v8988_v54 = vadd.f32 %v8618_v45, %v443_v57  ;;  %v10049_v59 = vrot.slane %v8718_v14, 2 }
 0x1ae   : > { %v1793_v1 = vsel %vm1685_vm6, %v1631_v52, %v1739_v28  ;;  %v1738_v47 = vsub.f32 0.0, %v1630_v55  ;;  %v1255_v34 = vadd.f32 0.2548296, %v1201_v25  ;;  %v1418_v52 = vmul.f32 %v1364_v63, %v662_v32  ;;  %v2195_v32 = vpop.permute.xlu0 %2194 }
 0x1af   : > { %v1847_v27 = vadd.f32 1.0, %v1793_v1  ;;  %v8993_v62 = vsel %vm2997_vm13, %v3059_v2, %v10049_v59  ;;  %v1146_v28 = vadd.f32 -0.28449672, %v1092_v50  ;;  %v9002_v63 = vmul.f32 0.70710677, %v8988_v54 }
 0x1b0   : > { %v1792_v58 = vsel %vm1684_vm7, %v1630_v55, %v1738_v47  ;;  %10050 = vst [vmem:[#allocation63_spill] sm:$0xff] %v8993_v62  ;;  %v1309_v35 = vmul.f32 %v8918_v44, %v1255_v34  ;;  %6248 = vmatmul.mubr.msk.f32.gmra.mrb[22].mxu0 %vm2418_vm12, %v8993_v62  ;;  %v9005_v14 = vadd.f32 %v8618_v45, %v442_v22  ;;  %vm1687_vm8 = vcmp.ge.f32.partialorder %v8848_v5, 0.0 }
 0x1b1   : > { %v1901_v61 = vmul.f32 %v1847_v27, %v8934_v43  ;;  %v1846_v42 = vadd.f32 1.0, %v1792_v58  ;;  %v1200_v44 = vmul.f32 %v8940_v38, %v1146_v28  ;;  %v9011_v50 = vpop.eup %6880  ;;  %v9015_v36 = vmul.f32 0.70710677, %v8981_v0 }
 0x1b2   : > { %v1579_v43 = vmul.f32 %v6879_v3, %v1309_v35  ;;  %v9018_v34 = vand.u32 2147483647, %v9002_v63  ;;  %v878_v60 = vmul.f32 1.0614054, %v9011_v50  ;;  %v2411_v47 = vrot.slane %v8999_v46, 1 }
 0x1b3   : > { %v9007_v55 = vmul.f32 %v2200_v10, %v1901_v61  ;;  %v1900_v27 = vmul.f32 %v1846_v42, %v8945_v41  ;;  %v6883_v29 = vpop.eup %6882  ;;  %v1522_v41 = vmul.f32 1.442695, %v1418_v52  ;;  %v1254_v25 = vadd.f32 0.2548296, %v1200_v44 }
 0x1b4   : > { %v1633_v33 = vsub.f32 1.0, %v1579_v43  ;;  %v719_v57 = vmul.f32 0.3275911, %v9018_v34  ;;  %v9028_v3 = vmul.f32 0.70710677, %v9005_v14  ;;  %v553_v61 = vmul.f32 0.5, %v8840_v20 }
 0x1b5   : > { %v2414_v45 = vrot.slane %v9007_v55, 1  ;;  %v9021_v2 = vmul.f32 %v2195_v32, %v1900_v27  ;;  %v1308_v10 = vmul.f32 %v8940_v38, %v1254_v25  ;;  %v932_v58 = vadd.f32 -1.4531521, %v878_v60 }
 0x1b6   : > { %v1741_v1 = vsub.f32 0.0, %v1633_v33  ;;  %v773_v59 = vadd.f32 1.0, %v719_v57  ;;  %6884 = vpow2.f32 %v1522_v41  ;;  %v9046_v20 = vand.u32 2147483647, %v9015_v36 }
 0x1b7   : > { %10051 = vst [vmem:[#allocation64_spill] sm:$0xff] %v9021_v2  ;;  %v2412_v22 = vrot.slane %v9021_v2, 1  ;;  %v1578_v32 = vmul.f32 %v6883_v29, %v1308_v10  ;;  %v986_v38 = vmul.f32 %v9011_v50, %v932_v58  ;;  %v9049_v5 = vand.u32 2147483647, %v9028_v3  ;;  %v10054_v29 = vld [vmem:[#allocation2_spill] sm:$0xff] }
 0x1b8   : > { %v1795_v52 = vsel %vm1687_vm8, %v1633_v33, %v1741_v1  ;;  %6886 = vrcp.f32 %v773_v59  ;;  %v3066_v27 = vrot.slane %v8771_v37, 2  ;;  %vm1686_vm9 = vcmp.ge.f32.partialorder %v8870_v8, 0.0  ;;  %v9063_v37 = vld [vmem:[%s9818_s1 + $0x18] sm:$0xff] }
 0x1b9   : > { %v9035_v42 = vsel %vm2335_vm11, %v2411_v47, %v2412_v22  ;;  %v9038_v35 = vsel %vm2335_vm11, %v2412_v22, %v2414_v45  ;;  %v1849_v28 = vadd.f32 1.0, %v1795_v52  ;;  %v1632_v43 = vsub.f32 1.0, %v1578_v32  ;;  %v10055_v22 = vld [vmem:[#allocation5_spill] sm:$0xff]  ;;  %v10056_v52 = vld [vmem:[#allocation3_spill] sm:$0xff] }
 0x1ba   : > { %10052 = vst [vmem:[#allocation65_spill] sm:$0xff] %v9035_v42  ;;  %10053 = vst [vmem:[#allocation66_spill] sm:$0xff] %v9038_v35  ;;  %6009 = vmatprep.mubr.msk.f32.mxu1 %vm2418_vm12, %v9035_v42  ;;  %v1040_v44 = vadd.f32 1.4214138, %v986_v38  ;;  %v552_v45 = vmul.f32 0.5, %v8857_v9  ;;  %v3064_v41 = vrot.slane %v8789_v19, 2  ;;  %v2210_v9 = vpop.permute.xlu1 %2209 }
 0x1bb   : > { %6010 = vmatmul.mubr.msk.f32.gmra.mrb[30].mxu1 %vm2418_vm12, %v9038_v35  ;;  %v718_v33 = vmul.f32 0.3275911, %v9049_v5  ;;  %v1903_v25 = vmul.f32 %v1849_v28, %v553_v61  ;;  %v1740_v60 = vsub.f32 0.0, %v1632_v43  ;;  %v3063_v1 = vrot.slane %v8765_v11, 2 }
 0x1bc   : > { %6014 = vmatprep.mubr.msk.f32.mxu1 %vm2418_vm12, %v10054_v29  ;;  %v1094_v57 = vmul.f32 %v9011_v50, %v1040_v44  ;;  %v3071_v47 = vrot.slane %v8947_v18, 2  ;;  %v717_v8 = vmul.f32 0.3275911, %v9046_v20  ;;  %v1367_v10 = vsub.f32 0.0, %v9018_v34  ;;  %v2205_v44 = vpop.permute.xlu0 %2204 }
 0x1bd   : > { %v772_v58 = vadd.f32 1.0, %v718_v33  ;;  %v1794_v59 = vsel %vm1686_vm9, %v1632_v43, %v1740_v60  ;;  %v9074_v28 = vsel %vm2997_vm13, %v3063_v1, %v3064_v41  ;;  %v3068_v18 = vrot.slane %v8879_v13, 2 }
 0x1be   : > { %v1148_v61 = vadd.f32 -0.28449672, %v1094_v57  ;;  %10057 = vst [vmem:[#allocation2_spill] sm:$0xff] %v9074_v28  ;;  %v1848_v32 = vadd.f32 1.0, %v1794_v59  ;;  %6250 = vmatprep.mubr.msk.f32.mxu0 %vm2418_vm12, %v9074_v28  ;;  %v9080_v38 = vsel %vm2997_vm13, %v3064_v41, %v3066_v27  ;;  %v3069_v43 = vrot.slane %v8853_v7, 2  ;;  %v10061_v59 = vld [vmem:[#allocation8_spill] sm:$0xff] }
 0x1bf   : > { %6015 = vmatmul.mubr.msk.f32.vlgmr.msra.gmra.mrb[0].mxu1 %vm2418_vm12, %v10055_v22  ;;  %6888 = vrcp.f32 %v772_v58  ;;  %10058 = vst [vmem:[#allocation5_spill] sm:$0xff] %v9080_v38  ;;  %6251 = vmatmul.mubr.msk.f32.gmra.mrb[24].mxu0 %vm2418_vm12, %v9080_v38  ;;  %v3074_v60 = vrot.slane %v9021_v2, 2  ;;  %v1421_v1 = vmul.f32 %v1367_v10, %v9018_v34  ;;  %v10059_v58 = vld [vmem:[#allocation4_spill] sm:$0xff]  ;;  %v3076_v34 = vrot.slane %v9007_v55, 2  ;;  %v10064_v55 = vld [vmem:[#allocation7_spill] sm:$0xff] }
 0x1c0   : > { %6063 = vmatpush3.msra.mxu1 %v8582_v6  ;;  %6017 = vmatprep.mubr.msk.f32.mxu1 %vm2418_vm12, %v10056_v52  ;;  %v9084_v6 = vmul.f32 %v2210_v9, %v1903_v25  ;;  %v1202_v33 = vmul.f32 %v9011_v50, %v1148_v61  ;;  %v1902_v57 = vmul.f32 %v1848_v32, %v552_v45  ;;  %v6885_v41 = vpop.eup %6884  ;;  %v771_v25 = vadd.f32 1.0, %v717_v8 }
 0x1c1   : > { %6112 = vmatprep.subr.mxu1 %v9063_v37  ;;  %v9094_v27 = vsel %vm2997_vm13, %v3068_v18, %v3069_v43  ;;  %v3073_v61 = vrot.slane %v8999_v46, 2  ;;  %v1366_v32 = vsub.f32 0.0, %v9049_v5  ;;  %v9106_v18 = vsel %vm2997_vm13, %v3069_v43, %v3071_v47 }
 0x1c2   : > { %10060 = vst [vmem:[#allocation67_spill] sm:$0xff] %v9094_v27  ;;  %v1256_v9 = vadd.f32 0.2548296, %v1202_v33  ;;  %6253 = vmatprep.mubr.msk.f32.mxu0 %vm2418_vm12, %v9094_v27  ;;  %v6887_v45 = vpop.eup %6886  ;;  %v9102_v10 = vmul.f32 %v2205_v44, %v1902_v57  ;;  %10062 = vst [vmem:[#allocation8_spill] sm:$0xff] %v9106_v18  ;;  %v3936_v42 = vrot.slane %v9084_v6, 2  ;;  %v9124_v57 = vsel %vm2997_vm13, %v3074_v60, %v3076_v34 }
 0x1c3   : > { %6018 = vmatmul.mubr.msk.f32.gmra.mrb[2].mxu1 %vm2418_vm12, %v10059_v58  ;;  %v881_v33 = vmul.f32 1.0614054, %v6887_v45  ;;  %6254 = vmatmul.mubr.msk.f32.gmra.mrb[26].mxu0 %vm2418_vm12, %v9106_v18  ;;  %v9112_v35 = vsel %vm2997_vm13, %v3073_v61, %v3074_v60  ;;  %v1528_v58 = vmul.f32 1.442695, %v1421_v1  ;;  %v1420_v44 = vmul.f32 %v1366_v32, %v9049_v5  ;;  %10065 = vst [vmem:[#allocation7_spill] sm:$0xff] %v9124_v57 }
 0x1c4   : > { %6020 = vmatprep.mubr.msk.f32.mxu1 %vm2418_vm12, %v10061_v59  ;;  %v1310_v8 = vmul.f32 %v9011_v50, %v1256_v9  ;;  %10063 = vst [vmem:[#allocation68_spill] sm:$0xff] %v9112_v35  ;;  %6256 = vmatprep.mubr.msk.f32.mxu0 %vm2418_vm12, %v9112_v35  ;;  %v3935_v47 = vrot.slane %v9102_v10, 2  ;;  %6890 = vrcp.f32 %v771_v25  ;;  %vm1688_vm10 = vcmp.ge.f32.partialorder %v8928_v31, 0.0 }
 0x1c5   : > { %v935_v50 = vadd.f32 -1.4531521, %v881_v33  ;;  %6892 = vpow2.f32 %v1528_v58  ;;  %v554_v25 = vmul.f32 0.5, %v8909_v15  ;;  %v1526_v34 = vmul.f32 1.442695, %v1420_v44  ;;  %v2215_v58 = vpop.permute.xlu0 %2214 }
 0x1c6   : > { %v1580_v43 = vmul.f32 %v6885_v41, %v1310_v8  ;;  %v9129_v61 = vsel %vm2997_vm13, %v3935_v47, %v3936_v42  ;;  %vm1691_vm14 = vcmp.ge.f32.partialorder %v9002_v63, 0.0  ;;  %v557_v63 = vmul.f32 0.5, %v8988_v54  ;;  %v10070_v54 = vld [vmem:[#allocation32_spill] sm:$0xff] }
 0x1c7   : > { %6021 = vmatmul.mubr.msk.f32.gmra.mrb[4].mxu1 %vm2418_vm12, %v10064_v55  ;;  %v989_v9 = vmul.f32 %v6887_v45, %v935_v50  ;;  %6257 = vmatmul.mubr.msk.f32.gmra.mrb[28].mxu0 %vm2418_vm12, %v9124_v57  ;;  %10066 = vst [vmem:[#allocation69_spill] sm:$0xff] %v9129_v61  ;;  %6894 = vpow2.f32 %v1526_v34  ;;  %vm1690_vm15 = vcmp.ge.f32.partialorder %v9028_v3, 0.0  ;;  %vm1689_vm0 = vcmp.ge.f32.partialorder %v9015_v36, 0.0  ;;  %v10081_v36 = vld [vmem:[#allocation36_spill] sm:$0xff] }
 0x1c8   : > { %6023 = vmatprep.mubr.msk.f32.mxu1 %vm2418_vm12, %v7744_v26  ;;  %v1634_v1 = vsub.f32 1.0, %v1580_v43  ;;  %6259 = vmatprep.mubr.msk.f32.mxu0 %vm2418_vm12, %v9129_v61 }
 0x1c9   : > { %v6889_v52 = vpop.eup %6888  ;;  %v1043_v60 = vadd.f32 1.4214138, %v989_v9 }
 0x1ca   : > { %v1742_v5 = vsub.f32 0.0, %v1634_v1  ;;  %v880_v41 = vmul.f32 1.0614054, %v6889_v52 }
 0x1cb   : > { %6024 = vmatmul.mubr.msk.f32.gmra.mrb[6].mxu1 %vm2418_vm12, %v7758_v48  ;;  %v1097_v8 = vmul.f32 %v6887_v45, %v1043_v60 }
 0x1cc   : > { %6026 = vmatprep.mubr.msk.f32.mxu1 %vm2418_vm12, %v7783_v4  ;;  %v1796_v32 = vsel %vm1688_vm10, %v1634_v1, %v1742_v5  ;;  %v934_v33 = vadd.f32 -1.4531521, %v880_v41 }
 0x1cd   : > { %v1850_v31 = vadd.f32 1.0, %v1796_v32  ;;  %v1151_v47 = vadd.f32 -0.28449672, %v1097_v8 }
 0x1ce   : > { %v988_v43 = vmul.f32 %v6889_v52, %v934_v33  ;;  %v9147_v15 = vpop.eup %6890 }
 0x1cf   : > { %6027 = vmatmul.mubr.msk.f32.gmra.mrb[8].mxu1 %vm2418_vm12, %v7781_v49  ;;  %v1904_v50 = vmul.f32 %v1850_v31, %v554_v25  ;;  %v1205_v9 = vmul.f32 %v6887_v45, %v1151_v47  ;;  %v6893_v5 = vpop.eup %6892  ;;  %v879_v32 = vmul.f32 1.0614054, %v9147_v15  ;;  %v9170_v31 = vld [vmem:[%s9818_s1 + $0x40] sm:$0xff] }
 0x1d0   : > { %6029 = vmatprep.mubr.msk.f32.mxu1 %vm2418_vm12, %v7850_v23  ;;  %v1042_v61 = vadd.f32 1.4214138, %v988_v43 }
 0x1d1   : > { %v9143_v57 = vmul.f32 %v2215_v58, %v1904_v50  ;;  %v1259_v44 = vadd.f32 0.2548296, %v1205_v9  ;;  %v9172_v58 = vpop.permute.xlu1 %2219  ;;  %v933_v47 = vadd.f32 -1.4531521, %v879_v32  ;;  %v10068_v9 = vld [vmem:[#allocation27_spill] sm:$0xff] }
 0x1d2   : > { %v1096_v1 = vmul.f32 %v6889_v52, %v1042_v61 }
 0x1d3   : > { %6030 = vmatmul.mubr.msk.f32.gmra.mrb[10].mxu1 %vm2418_vm12, %v7911_v40  ;;  %v3938_v60 = vrot.slane %v9143_v57, 2  ;;  %v1313_v41 = vmul.f32 %v6887_v45, %v1259_v44 }
 0x1d4   : > { %6032 = vmatprep.mubr.msk.f32.mxu1 %vm2418_vm12, %v10015_v24  ;;  %v1150_v25 = vadd.f32 -0.28449672, %v1096_v1 }
 0x1d5   : > { %v9153_v34 = vsel %vm2997_vm13, %v3936_v42, %v3938_v60  ;;  %v1583_v8 = vmul.f32 %v6893_v5, %v1313_v41  ;;  %v6895_v42 = vpop.eup %6894  ;;  %v10069_v60 = vld [vmem:[#allocation26_spill] sm:$0xff]  ;;  %v2230_v32 = vpop.permute.xlu1 %2229 }
 0x1d6   : > { %10067 = vst [vmem:[#allocation70_spill] sm:$0xff] %v9153_v34  ;;  %v1204_v33 = vmul.f32 %v6889_v52, %v1150_v25  ;;  %6260 = vmatmul.mubr.msk.f32.gmra.mrb[30].mxu0 %vm2418_vm12, %v9153_v34  ;;  %v10102_v34 = vld [vmem:[#allocation58_spill] sm:$0xff] }
 0x1d7   : > { %6033 = vmatmul.mubr.msk.f32.gmra.mrb[12].mxu1 %vm2418_vm12, %v10016_v30  ;;  %6264 = vmatprep.mubr.msk.f32.mxu0 %vm2418_vm12, %v10061_v59  ;;  %v1637_v45 = vsub.f32 1.0, %v1583_v8 }
 0x1d8   : > { %6035 = vmatprep.mubr.msk.f32.mxu1 %vm2418_vm12, %v10023_v16  ;;  %v1258_v61 = vadd.f32 0.2548296, %v1204_v33  ;;  %v1365_v33 = vsub.f32 0.0, %v9046_v20 }
 0x1d9   : > { %v1745_v43 = vsub.f32 0.0, %v1637_v45 }
 0x1da   : > { %v1312_v50 = vmul.f32 %v6889_v52, %v1258_v61  ;;  %6265 = vmatmul.mubr.msk.f32.vlgmr.msra.gmra.mrb[0].mxu0 %vm2418_vm12, %v10064_v55  ;;  %v987_v52 = vmul.f32 %v9147_v15, %v933_v47  ;;  %v10071_v61 = vld [vmem:[#allocation35_spill] sm:$0xff] }
 0x1db   : > { %6036 = vmatmul.mubr.msk.f32.gmra.mrb[14].mxu1 %vm2418_vm12, %v10024_v21  ;;  %6267 = vmatprep.mubr.msk.f32.mxu0 %vm2418_vm12, %v7744_v26  ;;  %v1799_v44 = vsel %vm1691_vm14, %v1637_v45, %v1745_v43  ;;  %v556_v45 = vmul.f32 0.5, %v9005_v14  ;;  %v10072_v43 = vld [vmem:[#allocation41_spill] sm:$0xff]  ;;  %v1419_v14 = vmul.f32 %v1365_v33, %v9046_v20 }
 0x1dc   : > { %6038 = vmatprep.mubr.msk.f32.mxu1 %vm2418_vm12, %v10029_v51  ;;  %6313 = vmatpush3.msra.mxu0 %v10068_v9  ;;  %v1582_v1 = vmul.f32 %v6895_v42, %v1312_v50  ;;  %v1853_v5 = vadd.f32 1.0, %v1799_v44  ;;  %v1041_v42 = vadd.f32 1.4214138, %v987_v52 }
 0x1dd   : > { %6362 = vmatprep.subr.mxu0 %v9170_v31  ;;  %v1524_v20 = vmul.f32 1.442695, %v1419_v14 }
 0x1de   : > { %v1636_v41 = vsub.f32 1.0, %v1582_v1  ;;  %6268 = vmatmul.mubr.msk.f32.gmra.mrb[2].mxu0 %vm2418_vm12, %v7758_v48  ;;  %v1907_v25 = vmul.f32 %v1853_v5, %v557_v63  ;;  %v2225_v63 = vpop.permute.xlu0 %2224  ;;  %v1095_v44 = vmul.f32 %v9147_v15, %v1041_v42 }
 0x1df   : > { %6039 = vmatmul.mubr.msk.f32.gmra.mrb[16].mxu1 %vm2418_vm12, %v10069_v60  ;;  %6270 = vmatprep.mubr.msk.f32.mxu0 %vm2418_vm12, %v7783_v4  ;;  %6896 = vpow2.f32 %v1524_v20  ;;  %v10077_v20 = vld [vmem:[#allocation25_spill] sm:$0xff] }
 0x1e0   : > { %6041 = vmatprep.mubr.msk.f32.mxu1 %vm2418_vm12, %v10070_v54  ;;  %v1744_v8 = vsub.f32 0.0, %v1636_v41  ;;  %v9201_v3 = vmul.f32 %v2230_v32, %v1907_v25  ;;  %v1149_v25 = vadd.f32 -0.28449672, %v1095_v44  ;;  %v10076_v44 = vld [vmem:[#allocation29_spill] sm:$0xff] }
 0x1e2   : > { %v1798_v47 = vsel %vm1690_vm15, %v1636_v41, %v1744_v8  ;;  %6271 = vmatmul.mubr.msk.f32.gmra.mrb[4].mxu0 %vm2418_vm12, %v7781_v49  ;;  %v4740_v1 = vrot.slane %v9201_v3, 2  ;;  %v10073_v41 = vld [vmem:[#allocation46_spill] sm:$0xff]  ;;  %v1203_v8 = vmul.f32 %v9147_v15, %v1149_v25 }
 0x1e3   : > { %6042 = vmatmul.mubr.msk.f32.gmra.mrb[18].mxu1 %vm2418_vm12, %v10071_v61  ;;  %v1852_v50 = vadd.f32 1.0, %v1798_v47  ;;  %6273 = vmatprep.mubr.msk.f32.mxu0 %vm2418_vm12, %v7850_v23 }
 0x1e4   : > { %6044 = vmatprep.mubr.msk.f32.mxu1 %vm2418_vm12, %v10072_v43  ;;  %v1257_v33 = vadd.f32 0.2548296, %v1203_v8  ;;  %v10079_v8 = vld [vmem:[#allocation31_spill] sm:$0xff] }
 0x1e5   : > { %v1906_v9 = vmul.f32 %v1852_v50, %v556_v45  ;;  %v2999_v45 = vrot.slane %v10055_v22, 2  ;;  %v2998_v50 = vrot.slane %v10054_v29, 2 }
 0x1e6   : > { %6274 = vmatmul.mubr.msk.f32.gmra.mrb[6].mxu0 %vm2418_vm12, %v7911_v40  ;;  %v1311_v42 = vmul.f32 %v9147_v15, %v1257_v33 }
 0x1e7   : > { %6045 = vmatmul.mubr.msk.f32.gmra.mrb[20].mxu1 %vm2418_vm12, %v8368_v39  ;;  %v9214_v5 = vmul.f32 %v2225_v63, %v1906_v9  ;;  %6276 = vmatprep.mubr.msk.f32.mxu0 %vm2418_vm12, %v10015_v24  ;;  %v10075_v63 = vld [vmem:[#allocation6_spill] sm:$0xff]  ;;  %v3000_v22 = vsel %vm2997_vm13, %v2998_v50, %v2999_v45  ;;  %v10082_v50 = vld [vmem:[#allocation39_spill] sm:$0xff] }
 0x1e8   : > { %6047 = vmatprep.mubr.msk.f32.mxu1 %vm2418_vm12, %v8537_v56  ;;  %v3001_v14 = vrot.slane %v10075_v63, 2 }
 0x1e9   : > { %v9953_v52 = vrot.slane %v9214_v5, 2  ;;  %v6897_v47 = vpop.eup %6896 }
 0x1ea   : > { %6277 = vmatmul.mubr.msk.f32.gmra.mrb[8].mxu0 %vm2418_vm12, %v10016_v30  ;;  %v1581_v15 = vmul.f32 %v6897_v47, %v1311_v42  ;;  %v3002_v29 = vsel %vm2997_vm13, %v2999_v45, %v3001_v14  ;;  %v10080_v45 = vld [vmem:[#allocation34_spill] sm:$0xff]  ;;  %v555_v42 = vmul.f32 0.5, %v8981_v0  ;;  %v10083_v14 = vld [vmem:[#allocation40_spill] sm:$0xff] }
 0x1eb   : > { %6048 = vmatmul.mubr.msk.f32.gmra.mrb[22].mxu1 %vm2418_vm12, %v10073_v41  ;;  %6279 = vmatprep.mubr.msk.f32.mxu0 %vm2418_vm12, %v10023_v16  ;;  %v9230_v32 = vsel %vm2997_vm13, %v9953_v52, %v4740_v1  ;;  %v9281_v1 = vld [vmem:[%s9818_s1 + $0x20] sm:$0xff]  ;;  %v10097_v52 = vld [vmem:[#allocation13_spill] sm:$0xff] }
 0x1ec   : > { %6050 = vmatprep.mubr.msk.f32.mxu1 %vm2418_vm12, %v8660_v12  ;;  %10074 = vst [vmem:[#allocation27_spill] sm:$0xff] %v9230_v32  ;;  %v1635_v9 = vsub.f32 1.0, %v1581_v15  ;;  %v10084_v0 = vld [vmem:[#allocation42_spill] sm:$0xff]  ;;  %v10085_v15 = vld [vmem:[#allocation44_spill] sm:$0xff] }
 0x1ed   : > { %v10099_v32 = vld [vmem:[#allocation14_spill] sm:$0xff] }
 0x1ee   : > { %6280 = vmatmul.mubr.msk.f32.gmra.mrb[10].mxu0 %vm2418_vm12, %v10024_v21  ;;  %v1743_v25 = vsub.f32 0.0, %v1635_v9 }
 0x1ef   : > { %6051 = vmatmul.mubr.msk.f32.gmra.mrb[24].mxu1 %vm2418_vm12, %v8652_v17  ;;  %6282 = vmatprep.mubr.msk.f32.mxu0 %vm2418_vm12, %v10029_v51 }
 0x1f0   : > { %6053 = vmatprep.mubr.msk.f32.mxu1 %vm2418_vm12, %v8765_v11  ;;  %v1797_v33 = vsel %vm1689_vm0, %v1635_v9, %v1743_v25  ;;  %v10087_v9 = vld [vmem:[#allocation17_spill] sm:$0xff]  ;;  %v10091_v25 = vld [vmem:[#allocation10_spill] sm:$0xff] }
 0x1f1   : > { %v1851_v47 = vadd.f32 1.0, %v1797_v33  ;;  %v10092_v33 = vld [vmem:[#allocation50_spill] sm:$0xff] }
 0x1f2   : > { %6283 = vmatmul.mubr.msk.f32.gmra.mrb[12].mxu0 %vm2418_vm12, %v10069_v60 }
 0x1f3   : > { %6054 = vmatmul.mubr.msk.f32.gmra.mrb[26].mxu1 %vm2418_vm12, %v8789_v19  ;;  %6285 = vmatprep.mubr.msk.f32.mxu0 %vm2418_vm12, %v10070_v54  ;;  %v1905_v63 = vmul.f32 %v1851_v47, %v555_v42  ;;  %v10093_v42 = vld [vmem:[#allocation11_spill] sm:$0xff] }
 0x1f4   : > { %6056 = vmatprep.mubr.msk.f32.mxu1 %vm2418_vm12, %v8879_v13  ;;  %v10094_v47 = vld [vmem:[#allocation51_spill] sm:$0xff] }
 0x1f6   : > { %6286 = vmatmul.mubr.msk.f32.gmra.mrb[14].mxu0 %vm2418_vm12, %v10071_v61 }
 0x1f7   : > { %6057 = vmatmul.mubr.msk.f32.gmra.mrb[28].mxu1 %vm2418_vm12, %v8853_v7  ;;  %6288 = vmatprep.mubr.msk.f32.mxu0 %vm2418_vm12, %v10072_v43 }
 0x1f8   : > { %6059 = vmatprep.mubr.msk.f32.mxu1 %vm2418_vm12, %v8999_v46 }
 0x1fa   : > { %6289 = vmatmul.mubr.msk.f32.gmra.mrb[16].mxu0 %vm2418_vm12, %v8368_v39 }
 0x1fb   : > { %6060 = vmatmul.mubr.msk.f32.gmra.mrb[30].mxu1 %vm2418_vm12, %v9021_v2  ;;  %6291 = vmatprep.mubr.msk.f32.mxu0 %vm2418_vm12, %v8537_v56 }
 0x1fc   : > { %6064 = vmatprep.mubr.msk.f32.mxu1 %vm2418_vm12, %v3000_v22  ;;  %v9319_v22 = vmul.f32 %v9172_v58, %v1905_v63  ;;  %v10088_v58 = vld [vmem:[#allocation20_spill] sm:$0xff] }
 0x1fd   : > { %v10095_v63 = vld [vmem:[#allocation12_spill] sm:$0xff] }
 0x1fe   : > { %6292 = vmatmul.mubr.msk.f32.gmra.mrb[18].mxu0 %vm2418_vm12, %v10073_v41 }
 0x1ff   : > { %6065 = vmatmul.mubr.msk.f32.vlgmr.msra.gmra.mrb[0].mxu1 %vm2418_vm12, %v3002_v29  ;;  %6294 = vmatprep.mubr.msk.f32.mxu0 %vm2418_vm12, %v8660_v12  ;;  %v10086_v29 = vld [vmem:[#allocation18_spill] sm:$0xff] }
 0x200   : > { %6113 = vmatpush3.msra.mxu1 %v9063_v37  ;;  %6067 = vmatprep.mubr.msk.f32.mxu1 %vm2418_vm12, %v10076_v44  ;;  %v10078_v37 = vld [vmem:[#allocation30_spill] sm:$0xff]  ;;  %v10089_v44 = vld [vmem:[#allocation9_spill] sm:$0xff] }
 0x201   : > { %6412 = vmatprep.subr.mxu1 %v9281_v1 }
 0x202   : > { %6295 = vmatmul.mubr.msk.f32.gmra.mrb[20].mxu0 %vm2418_vm12, %v8652_v17 }
 0x203   : > { %6068 = vmatmul.mubr.msk.f32.gmra.mrb[2].mxu1 %vm2418_vm12, %v10077_v20  ;;  %6297 = vmatprep.mubr.msk.f32.mxu0 %vm2418_vm12, %v8765_v11  ;;  %v10090_v20 = vld [vmem:[#allocation22_spill] sm:$0xff] }
 0x204   : > { %6070 = vmatprep.mubr.msk.f32.mxu1 %vm2418_vm12, %v10078_v37 }
 0x206   : > { %6298 = vmatmul.mubr.msk.f32.gmra.mrb[22].mxu0 %vm2418_vm12, %v8789_v19 }
 0x207   : > { %6071 = vmatmul.mubr.msk.f32.gmra.mrb[4].mxu1 %vm2418_vm12, %v10079_v8  ;;  %6300 = vmatprep.mubr.msk.f32.mxu0 %vm2418_vm12, %v8879_v13 }
 0x208   : > { %6073 = vmatprep.mubr.msk.f32.mxu1 %vm2418_vm12, %v10080_v45 }
 0x20a   : > { %6301 = vmatmul.mubr.msk.f32.gmra.mrb[24].mxu0 %vm2418_vm12, %v8853_v7 }
 0x20b   : > { %6074 = vmatmul.mubr.msk.f32.gmra.mrb[6].mxu1 %vm2418_vm12, %v10081_v36  ;;  %6303 = vmatprep.mubr.msk.f32.mxu0 %vm2418_vm12, %v8999_v46 }
 0x20c   : > { %6076 = vmatprep.mubr.msk.f32.mxu1 %vm2418_vm12, %v10082_v50 }
 0x20e   : > { %6304 = vmatmul.mubr.msk.f32.gmra.mrb[26].mxu0 %vm2418_vm12, %v9021_v2  ;;  %v10104_v2 = vld [vmem:[#allocation59_spill] sm:$0xff] }
 0x20f   : > { %6077 = vmatmul.mubr.msk.f32.gmra.mrb[8].mxu1 %vm2418_vm12, %v10083_v14  ;;  %6306 = vmatprep.mubr.msk.f32.mxu0 %vm2418_vm12, %v9102_v10 }
 0x210   : > { %6079 = vmatprep.mubr.msk.f32.mxu1 %vm2418_vm12, %v10084_v0 }
 0x212   : > { %6307 = vmatmul.mubr.msk.f32.gmra.mrb[28].mxu0 %vm2418_vm12, %v9084_v6 }
 0x213   : > { %6080 = vmatmul.mubr.msk.f32.gmra.mrb[10].mxu1 %vm2418_vm12, %v10085_v15  ;;  %6309 = vmatprep.mubr.msk.f32.mxu0 %vm2418_vm12, %v9319_v22 }
 0x214   : > { %6082 = vmatprep.mubr.msk.f32.mxu1 %vm2418_vm12, %v10086_v29 }
 0x216   : > { %6310 = vmatmul.mubr.msk.f32.gmra.mrb[30].mxu0 %vm2418_vm12, %v9214_v5 }
 0x217   : > { %6083 = vmatmul.mubr.msk.f32.gmra.mrb[12].mxu1 %vm2418_vm12, %v10087_v9  ;;  %6314 = vmatprep.mubr.msk.f32.mxu0 %vm2418_vm12, %v10089_v44  ;;  %v10096_v44 = vld [vmem:[#allocation53_spill] sm:$0xff] }
 0x218   : > { %6085 = vmatprep.mubr.msk.f32.mxu1 %vm2418_vm12, %v10088_v58 }
 0x21a   : > { %6315 = vmatmul.mubr.msk.f32.vlgmr.msra.gmra.mrb[0].mxu0 %vm2418_vm12, %v10091_v25  ;;  %v10098_v25 = vld [vmem:[#allocation54_spill] sm:$0xff] }
 0x21b   : > { %6086 = vmatmul.mubr.msk.f32.gmra.mrb[14].mxu1 %vm2418_vm12, %v10090_v20  ;;  %6317 = vmatprep.mubr.msk.f32.mxu0 %vm2418_vm12, %v10093_v42  ;;  %v10100_v42 = vld [vmem:[#allocation55_spill] sm:$0xff] }
 0x21c   : > { %6088 = vmatprep.mubr.msk.f32.mxu1 %vm2418_vm12, %v10092_v33  ;;  %6363 = vmatpush3.msra.mxu0 %v9170_v31  ;;  %v10101_v31 = vld [vmem:[#allocation15_spill] sm:$0xff] }
 0x21e   : > { %6318 = vmatmul.mubr.msk.f32.gmra.mrb[2].mxu0 %vm2418_vm12, %v10095_v63  ;;  %v10103_v63 = vld [vmem:[#allocation16_spill] sm:$0xff] }
 0x21f   : > { %6089 = vmatmul.mubr.msk.f32.gmra.mrb[16].mxu1 %vm2418_vm12, %v10094_v47  ;;  %6320 = vmatprep.mubr.msk.f32.mxu0 %vm2418_vm12, %v10097_v52  ;;  %v10105_v52 = vld [vmem:[#allocation19_spill] sm:$0xff] }
 0x220   : > { %6091 = vmatprep.mubr.msk.f32.mxu1 %vm2418_vm12, %v10096_v44 }
 0x222   : > { %6321 = vmatmul.mubr.msk.f32.gmra.mrb[4].mxu0 %vm2418_vm12, %v10099_v32  ;;  %v10107_v32 = vld [vmem:[#allocation21_spill] sm:$0xff] }
 0x223   : > { %6092 = vmatmul.mubr.msk.f32.gmra.mrb[18].mxu1 %vm2418_vm12, %v10098_v25  ;;  %6323 = vmatprep.mubr.msk.f32.mxu0 %vm2418_vm12, %v10101_v31  ;;  %v10106_v25 = vld [vmem:[#allocation61_spill] sm:$0xff]  ;;  %v10108_v31 = vld [vmem:[#allocation23_spill] sm:$0xff] }
 0x224   : > { %6094 = vmatprep.mubr.msk.f32.mxu1 %vm2418_vm12, %v10100_v42 }
 0x226   : > { %6324 = vmatmul.mubr.msk.f32.gmra.mrb[6].mxu0 %vm2418_vm12, %v10103_v63  ;;  %v10109_v63 = vld [vmem:[#allocation24_spill] sm:$0xff] }
 0x227   : > { %6095 = vmatmul.mubr.msk.f32.gmra.mrb[20].mxu1 %vm2418_vm12, %v10102_v34  ;;  %6326 = vmatprep.mubr.msk.f32.mxu0 %vm2418_vm12, %v10105_v52  ;;  %v10110_v52 = vld [vmem:[#allocation28_spill] sm:$0xff] }
 0x228   : > { %6097 = vmatprep.mubr.msk.f32.mxu1 %vm2418_vm12, %v10104_v2 }
 0x22a   : > { %6327 = vmatmul.mubr.msk.f32.gmra.mrb[8].mxu0 %vm2418_vm12, %v10107_v32  ;;  %v10111_v32 = vld [vmem:[#allocation33_spill] sm:$0xff] }
 0x22b   : > { %6098 = vmatmul.mubr.msk.f32.gmra.mrb[22].mxu1 %vm2418_vm12, %v10106_v25  ;;  %6329 = vmatprep.mubr.msk.f32.mxu0 %vm2418_vm12, %v10108_v31  ;;  %v10112_v31 = vld [vmem:[#allocation37_spill] sm:$0xff] }
 0x22c   : > { %6100 = vmatprep.mubr.msk.f32.mxu1 %vm2418_vm12, %v8976_v53 }
 0x22e   : > { %6330 = vmatmul.mubr.msk.f32.gmra.mrb[10].mxu0 %vm2418_vm12, %v10109_v63  ;;  %v10113_v63 = vld [vmem:[#allocation38_spill] sm:$0xff] }
 0x22f   : > { %6101 = vmatmul.mubr.msk.f32.gmra.mrb[24].mxu1 %vm2418_vm12, %v8993_v62  ;;  %6332 = vmatprep.mubr.msk.f32.mxu0 %vm2418_vm12, %v10110_v52  ;;  %v10114_v52 = vld [vmem:[#allocation43_spill] sm:$0xff]  ;;  %v10120_v62 = vld [vmem:[#allocation48_spill] sm:$0xff] }
 0x230   : > { %6103 = vmatprep.mubr.msk.f32.mxu1 %vm2418_vm12, %v9074_v28  ;;  %v10118_v28 = vld [vmem:[#allocation47_spill] sm:$0xff] }
 0x232   : > { %6333 = vmatmul.mubr.msk.f32.gmra.mrb[12].mxu0 %vm2418_vm12, %v10111_v32  ;;  %v10116_v32 = vld [vmem:[#allocation45_spill] sm:$0xff] }
 0x233   : > { %6104 = vmatmul.mubr.msk.f32.gmra.mrb[26].mxu1 %vm2418_vm12, %v9080_v38  ;;  %6335 = vmatprep.mubr.msk.f32.mxu0 %vm2418_vm12, %v10112_v31  ;;  %v10115_v38 = vld [vmem:[#allocation7_spill] sm:$0xff] }
 0x234   : > { %6106 = vmatprep.mubr.msk.f32.mxu1 %vm2418_vm12, %v9094_v27  ;;  %v10117_v27 = vld [vmem:[#allocation3_spill] sm:$0xff] }
 0x236   : > { %6336 = vmatmul.mubr.msk.f32.gmra.mrb[14].mxu0 %vm2418_vm12, %v10113_v63 }
 0x237   : > { %6107 = vmatmul.mubr.msk.f32.gmra.mrb[28].mxu1 %vm2418_vm12, %v9106_v18  ;;  %6338 = vmatprep.mubr.msk.f32.mxu0 %vm2418_vm12, %v10114_v52  ;;  %v10119_v18 = vld [vmem:[#allocation4_spill] sm:$0xff] }
 0x238   : > { %6109 = vmatprep.mubr.msk.f32.mxu1 %vm2418_vm12, %v9112_v35  ;;  %v10121_v35 = vld [vmem:[#allocation49_spill] sm:$0xff] }
 0x23a   : > { %6339 = vmatmul.mubr.msk.f32.gmra.mrb[16].mxu0 %vm2418_vm12, %v10116_v32 }
 0x23b   : > { %6110 = vmatmul.mubr.msk.f32.gmra.mrb[30].mxu1 %vm2418_vm12, %v10115_v38  ;;  %6341 = vmatprep.mubr.msk.f32.mxu0 %vm2418_vm12, %v10118_v28  ;;  %v3668_v38 = vrot.slane %v9084_v6, 1 }
 0x23c   : > { %6114 = vmatprep.mubr.msk.f32.mxu1 %vm2418_vm12, %v10117_v27  ;;  %v10122_v27 = vld [vmem:[#allocation52_spill] sm:$0xff] }
 0x23e   : > { %6342 = vmatmul.mubr.msk.f32.gmra.mrb[18].mxu0 %vm2418_vm12, %v10120_v62 }
 0x23f   : > { %6115 = vmatmul.mubr.msk.f32.vlgmr.msra.gmra.mrb[0].mxu1 %vm2418_vm12, %v10119_v18  ;;  %6344 = vmatprep.mubr.msk.f32.mxu0 %vm2418_vm12, %v10121_v35  ;;  %v10123_v18 = vld [vmem:[#allocation56_spill] sm:$0xff] }
 0x240   : > { %6413 = vmatpush3.msra.mxu1 %v9281_v1  ;;  %6117 = vmatprep.mubr.msk.f32.mxu1 %vm2418_vm12, %v10061_v59  ;;  %v10124_v1 = vld [vmem:[#allocation57_spill] sm:$0xff]  ;;  %v10125_v59 = vld [vmem:[#allocation60_spill] sm:$0xff] }
 0x242   : > { %6345 = vmatmul.mubr.msk.f32.gmra.mrb[20].mxu0 %vm2418_vm12, %v10122_v27 }
 0x243   : > { %6118 = vmatmul.mubr.msk.f32.gmra.mrb[2].mxu1 %vm2418_vm12, %v10064_v55  ;;  %6347 = vmatprep.mubr.msk.f32.mxu0 %vm2418_vm12, %v10123_v18  ;;  %v10126_v55 = vld [vmem:[#allocation62_spill] sm:$0xff] }
 0x244   : > { %6120 = vmatprep.mubr.msk.f32.mxu1 %vm2418_vm12, %v7744_v26  ;;  %v3667_v26 = vrot.slane %v9102_v10, 1 }
 0x246   : > { %6348 = vmatmul.mubr.msk.f32.gmra.mrb[22].mxu0 %vm2418_vm12, %v10124_v1 }
 0x247   : > { %6121 = vmatmul.mubr.msk.f32.gmra.mrb[4].mxu1 %vm2418_vm12, %v7758_v48  ;;  %6350 = vmatprep.mubr.msk.f32.mxu0 %vm2418_vm12, %v10125_v59  ;;  %v10127_v48 = vld [vmem:[#allocation65_spill] sm:$0xff]  ;;  %v10128_v59 = vld [vmem:[#allocation66_spill] sm:$0xff] }
 0x248   : > { %6123 = vmatprep.mubr.msk.f32.mxu1 %vm2418_vm12, %v7783_v4  ;;  %v3670_v4 = vrot.slane %v9143_v57, 1  ;;  %v4472_v57 = vrot.slane %v9201_v3, 1 }
 0x24a   : > { %6351 = vmatmul.mubr.msk.f32.gmra.mrb[24].mxu0 %vm2418_vm12, %v10126_v55  ;;  %v9452_v55 = vsel %vm2335_vm11, %v3667_v26, %v3668_v38 }
 0x24b   : > { %6124 = vmatmul.mubr.msk.f32.gmra.mrb[6].mxu1 %vm2418_vm12, %v7781_v49  ;;  %6353 = vmatprep.mubr.msk.f32.mxu0 %vm2418_vm12, %v10127_v48  ;;  %v4470_v49 = vrot.slane %v9214_v5, 1 }
 0x24c   : > { %6126 = vmatprep.mubr.msk.f32.mxu1 %vm2418_vm12, %v7850_v23  ;;  %v4469_v23 = vrot.slane %v9319_v22, 1 }
 0x24e   : > { %6354 = vmatmul.mubr.msk.f32.gmra.mrb[26].mxu0 %vm2418_vm12, %v10128_v59  ;;  %v4471_v26 = vsel %vm2335_vm11, %v4469_v23, %v4470_v49 }
 0x24f   : > { %6127 = vmatmul.mubr.msk.f32.gmra.mrb[8].mxu1 %vm2418_vm12, %v7911_v40  ;;  %6356 = vmatprep.mubr.msk.f32.mxu0 %vm2418_vm12, %v9452_v55  ;;  %v9461_v40 = vsel %vm2335_vm11, %v3668_v38, %v3670_v4 }
 0x250   : > { %6129 = vmatprep.mubr.msk.f32.mxu1 %vm2418_vm12, %v10015_v24  ;;  %v4473_v24 = vsel %vm2335_vm11, %v4470_v49, %v4472_v57 }
 0x252   : > { %6357 = vmatmul.mubr.msk.f32.gmra.mrb[28].mxu0 %vm2418_vm12, %v9461_v40 }
 0x253   : > { %6130 = vmatmul.mubr.msk.f32.gmra.mrb[10].mxu1 %vm2418_vm12, %v10016_v30  ;;  %6359 = vmatprep.mubr.msk.f32.mxu0 %vm2418_vm12, %v4471_v26  ;;  %v10130_v30 = vld [vmem:[#allocation54_spill] sm:$0xff] }
 0x254   : > { %6132 = vmatprep.mubr.msk.f32.mxu1 %vm2418_vm12, %v10023_v16  ;;  %v10132_v16 = vld [vmem:[#allocation2_spill] sm:$0xff] }
 0x256   : > { %6360 = vmatmul.mubr.msk.f32.gmra.mrb[30].mxu0 %vm2418_vm12, %v4473_v24 }
 0x257   : > { %6133 = vmatmul.mubr.msk.f32.gmra.mrb[12].mxu1 %vm2418_vm12, %v10024_v21  ;;  %6364 = vmatprep.mubr.msk.f32.mxu0 %vm2418_vm12, %v10078_v37  ;;  %v10133_v21 = vld [vmem:[#allocation5_spill] sm:$0xff] }
 0x258   : > { %6135 = vmatprep.mubr.msk.f32.mxu1 %vm2418_vm12, %v10029_v51  ;;  %v10136_v51 = vld [vmem:[#allocation68_spill] sm:$0xff] }
 0x25a   : > { %6365 = vmatmul.mubr.msk.f32.vlgmr.msra.gmra.mrb[0].mxu0 %vm2418_vm12, %v10079_v8 }
 0x25b   : > { %6136 = vmatmul.mubr.msk.f32.gmra.mrb[14].mxu1 %vm2418_vm12, %v10069_v60  ;;  %6367 = vmatprep.mubr.msk.f32.mxu0 %vm2418_vm12, %v10080_v45 }
 0x25c   : > { %6138 = vmatprep.mubr.msk.f32.mxu1 %vm2418_vm12, %v10070_v54 }
 0x25e   : > { %6368 = vmatmul.mubr.msk.f32.gmra.mrb[2].mxu0 %vm2418_vm12, %v10081_v36 }
 0x25f   : > { %6139 = vmatmul.mubr.msk.f32.gmra.mrb[16].mxu1 %vm2418_vm12, %v10071_v61  ;;  %6370 = vmatprep.mubr.msk.f32.mxu0 %vm2418_vm12, %v10082_v50  ;;  %v9628_v50 = vld [vmem:[%s9819_s2] ss:$0 sm:$0xff] }
 0x260   : > { %6141 = vmatprep.mubr.msk.f32.mxu1 %vm2418_vm12, %v10072_v43 }
 0x262   : > { %6371 = vmatmul.mubr.msk.f32.gmra.mrb[4].mxu0 %vm2418_vm12, %v10083_v14 }
 0x263   : > { %6142 = vmatmul.mubr.msk.f32.gmra.mrb[18].mxu1 %vm2418_vm12, %v8368_v39  ;;  %6373 = vmatprep.mubr.msk.f32.mxu0 %vm2418_vm12, %v10084_v0  ;;  %v10129_v39 = vld [vmem:[#allocation64_spill] sm:$0xff] }
 0x264   : > { %6144 = vmatprep.mubr.msk.f32.mxu1 %vm2418_vm12, %v8537_v56  ;;  %v10131_v56 = vld [vmem:[#allocation63_spill] sm:$0xff] }
 0x266   : > { %6374 = vmatmul.mubr.msk.f32.gmra.mrb[6].mxu0 %vm2418_vm12, %v10085_v15 }
 0x267   : > { %6145 = vmatmul.mubr.msk.f32.gmra.mrb[20].mxu1 %vm2418_vm12, %v10073_v41  ;;  %6376 = vmatprep.mubr.msk.f32.mxu0 %vm2418_vm12, %v10086_v29 }
 0x268   : > { %6147 = vmatprep.mubr.msk.f32.mxu1 %vm2418_vm12, %v8660_v12  ;;  %v10135_v12 = vld [vmem:[#allocation8_spill] sm:$0xff] }
 0x26a   : > { %6377 = vmatmul.mubr.msk.f32.gmra.mrb[8].mxu0 %vm2418_vm12, %v10087_v9 }
 0x26b   : > { %6148 = vmatmul.mubr.msk.f32.gmra.mrb[22].mxu1 %vm2418_vm12, %v8652_v17  ;;  %6379 = vmatprep.mubr.msk.f32.mxu0 %vm2418_vm12, %v10088_v58  ;;  %v10134_v17 = vld [vmem:[#allocation67_spill] sm:$0xff] }
 0x26c   : > { %6150 = vmatprep.mubr.msk.f32.mxu1 %vm2418_vm12, %v8765_v11  ;;  %v10137_v11 = vld [vmem:[#allocation7_spill] sm:$0xff] }
 0x26e   : > { %6380 = vmatmul.mubr.msk.f32.gmra.mrb[10].mxu0 %vm2418_vm12, %v10090_v20 }
 0x26f   : > { %6151 = vmatmul.mubr.msk.f32.gmra.mrb[24].mxu1 %vm2418_vm12, %v8789_v19  ;;  %6382 = vmatprep.mubr.msk.f32.mxu0 %vm2418_vm12, %v10092_v33  ;;  %v10138_v19 = vld [vmem:[#allocation60_spill] sm:$0xff] }
 0x270   : > { %6153 = vmatprep.mubr.msk.f32.mxu1 %vm2418_vm12, %v8879_v13  ;;  %v4737_v13 = vrot.slane %v9319_v22, 2 }
 0x272   : > { %6383 = vmatmul.mubr.msk.f32.gmra.mrb[12].mxu0 %vm2418_vm12, %v10094_v47 }
 0x273   : > { %6154 = vmatmul.mubr.msk.f32.gmra.mrb[26].mxu1 %vm2418_vm12, %v8853_v7  ;;  %6385 = vmatprep.mubr.msk.f32.mxu0 %vm2418_vm12, %v10096_v44  ;;  %v10139_v7 = vld [vmem:[#allocation69_spill] sm:$0xff] }
 0x274   : > { %6156 = vmatprep.mubr.msk.f32.mxu1 %vm2418_vm12, %v8999_v46  ;;  %v10142_v46 = vrot.slane %v9214_v5, 2 }
 0x276   : > { %6386 = vmatmul.mubr.msk.f32.gmra.mrb[14].mxu0 %vm2418_vm12, %v10130_v30 }
 0x277   : > { %6157 = vmatmul.mubr.msk.f32.gmra.mrb[28].mxu1 %vm2418_vm12, %v10129_v39  ;;  %6388 = vmatprep.mubr.msk.f32.mxu0 %vm2418_vm12, %v10100_v42 }
 0x278   : > { %6159 = vmatprep.mubr.msk.f32.mxu1 %vm2418_vm12, %v9102_v10 }
 0x27a   : > { %6389 = vmatmul.mubr.msk.f32.gmra.mrb[16].mxu0 %vm2418_vm12, %v10102_v34 }
 0x27b   : > { %6160 = vmatmul.mubr.msk.f32.gmra.mrb[30].mxu1 %vm2418_vm12, %v9084_v6  ;;  %6391 = vmatprep.mubr.msk.f32.mxu0 %vm2418_vm12, %v10104_v2  ;;  %v4739_v2 = vsel %vm2997_vm13, %v4737_v13, %v10142_v46 }
 0x27c   : > { %6188 = vmatprep.mubr.msk.f32.mxu1 %vm2418_vm12, %v10112_v31 }
 0x27e   : > { %6392 = vmatmul.mubr.msk.f32.gmra.mrb[18].mxu0 %vm2418_vm12, %v10106_v25 }
 0x27f   : > { %6189 = vmatmul.mubr.msk.f32.vlgmr.msra.gmra.mrb[16].mxu1 %vm2418_vm12, %v10113_v63  ;;  %6394 = vmatprep.mubr.msk.f32.mxu0 %vm2418_vm12, %v8976_v53  ;;  %v10140_v53 = vld [vmem:[#allocation62_spill] sm:$0xff] }
 0x280   : > { %6191 = vmatprep.mubr.msk.f32.mxu1 %vm2418_vm12, %v10114_v52 }
 0x282   : > { %6395 = vmatmul.mubr.msk.f32.gmra.mrb[20].mxu0 %vm2418_vm12, %v10131_v56 }
 0x283   : > { %6192 = vmatmul.mubr.msk.f32.gmra.mrb[18].mxu1 %vm2418_vm12, %v10116_v32  ;;  %6397 = vmatprep.mubr.msk.f32.mxu0 %vm2418_vm12, %v10132_v16 }
 0x284   : > { %6194 = vmatprep.mubr.msk.f32.mxu1 %vm2418_vm12, %v10118_v28 }
 0x286   : > { %6398 = vmatmul.mubr.msk.f32.gmra.mrb[22].mxu0 %vm2418_vm12, %v10133_v21 }
 0x287   : > { %6195 = vmatmul.mubr.msk.f32.gmra.mrb[20].mxu1 %vm2418_vm12, %v10120_v62  ;;  %6400 = vmatprep.mubr.msk.f32.mxu0 %vm2418_vm12, %v10134_v17  ;;  %v10141_v62 = vld [vmem:[#allocation70_spill] sm:$0xff] }
 0x288   : > { %6197 = vmatprep.mubr.msk.f32.mxu1 %vm2418_vm12, %v10121_v35  ;;  %v10143_v35 = vld [vmem:[#allocation27_spill] sm:$0xff] }
 0x28a   : > { %6401 = vmatmul.mubr.msk.f32.gmra.mrb[24].mxu0 %vm2418_vm12, %v10135_v12 }
 0x28b   : > { %6198 = vmatmul.mubr.msk.f32.gmra.mrb[22].mxu1 %vm2418_vm12, %v10122_v27  ;;  %6403 = vmatprep.mubr.msk.f32.mxu0 %vm2418_vm12, %v10136_v51 }
 0x28c   : > { %6200 = vmatprep.mubr.msk.f32.mxu1 %vm2418_vm12, %v10123_v18 }
 0x28e   : > { %6404 = vmatmul.mubr.msk.f32.gmra.mrb[26].mxu0 %vm2418_vm12, %v10137_v11 }
 0x28f   : > { %6201 = vmatmul.mubr.msk.f32.gmra.mrb[24].mxu1 %vm2418_vm12, %v10124_v1  ;;  %6406 = vmatprep.mubr.msk.f32.mxu0 %vm2418_vm12, %v10139_v7 }
 0x290   : > { %6203 = vmatprep.mubr.msk.f32.mxu1 %vm2418_vm12, %v10138_v19 }
 0x292   : > { %6407 = vmatmul.mubr.msk.f32.gmra.mrb[28].mxu0 %vm2418_vm12, %v10141_v62 }
 0x293   : > { %6204 = vmatmul.mubr.msk.f32.gmra.mrb[26].mxu1 %vm2418_vm12, %v10140_v53  ;;  %6409 = vmatprep.mubr.msk.f32.mxu0 %vm2418_vm12, %v4739_v2 }
 0x294   : > { %6206 = vmatprep.mubr.msk.f32.mxu1 %vm2418_vm12, %v10127_v48 }
 0x296   : > { %6410 = vmatmul.mubr.msk.f32.gmra.mrb[30].mxu0 %vm2418_vm12, %v10143_v35 }
 0x297   : > { %6207 = vmatmul.mubr.msk.f32.gmra.mrb[28].mxu1 %vm2418_vm12, %v10128_v59 }
 0x298   : > { %6209 = vmatprep.mubr.msk.f32.mxu1 %vm2418_vm12, %v9452_v55 }
 0x29b   : > { %6210 = vmatmul.mubr.msk.f32.gmra.mrb[30].mxu1 %vm2418_vm12, %v9461_v40 }
 0x312   : > { %v6116_v28 = vpop.f32.mrb[0].mxu1 }
 0x313   : > { %v3475_v38 = vpop.f32.mrb[1].mxu1 }
 0x316   : > { %v6119_v6 = vpop.f32.mrb[2].mxu1 }
 0x317   : > { %v3485_v10 = vpop.f32.mrb[3].mxu1 }
 0x31a   : > { %v6122_v34 = vpop.f32.mrb[4].mxu1 }
 0x31b   : > { %v3495_v60 = vpop.f32.mrb[5].mxu1 }
 0x31e   : > { %v6125_v54 = vpop.f32.mrb[6].mxu1 }
 0x31f   : > { %v3505_v61 = vpop.f32.mrb[7].mxu1 }
 0x322   : > { %v9610_v43 = vpop.f32.mrb[8].mxu1 }
 0x323   : > { %v9612_v3 = vpop.f32.mrb[9].mxu1 }
 0x326   : > { %v9615_v5 = vpop.f32.mrb[10].mxu1 }
 0x327   : > { %v9617_v41 = vpop.f32.mrb[11].mxu1 }
 0x32a   : > { %v9619_v37 = vpop.f32.mrb[12].mxu1 }
 0x32b   : > { %v9621_v8 = vpop.f32.mrb[13].mxu1 }
 0x32d   : > { %v6366_v36 = vpop.f32.mrb[0].mxu0 }
 0x32e   : > { %v9623_v45 = vpop.f32.mrb[14].mxu1  ;;  %v6414_v0 = vadd.f32 %v6366_v36, %v6116_v28  ;;  %v4814_v22 = vpop.f32.mrb[1].mxu0 }
 0x32f   : > { %v9630_v14 = vpop.f32.mrb[15].mxu1  ;;  %v6415_v15 = vadd.f32 %v4814_v22, %v3475_v38 }
 0x330   : > { %v5013_v29 = vadd.f32 %v6414_v0, %v9628_v50 }
 0x331   : > { %v5012_v9 = vadd.f32 %v6415_v15, %v9628_v50  ;;  %v6369_v58 = vpop.f32.mrb[2].mxu0 }
 0x332   : > { %5045 = vst.msk [vmem:[%s9635_s14 + $0x8] sm:$0xff] %vm2418_vm12, %v5013_v29  ;;  %v5077_v20 = vsel %vm2418_vm12, %v5013_v29, 0.0  ;;  %v5140_v33 = vmul.f32 %v5013_v29, %v5013_v29  ;;  %v6416_v47 = vadd.f32 %v6369_v58, %v6119_v6  ;;  %v4824_v44 = vpop.f32.mrb[3].mxu0 }
 0x333   : > { %5044 = vst.msk [vmem:[%s9635_s14] sm:$0xff] %vm2418_vm12, %v5012_v9  ;;  %v5076_v25 = vsel %vm2418_vm12, %v5012_v9, 0.0  ;;  %v5139_v42 = vmul.f32 %v5012_v9, %v5012_v9  ;;  %v6417_v31 = vadd.f32 %v4824_v44, %v3485_v10 }
 0x334   : > { %v5172_v63 = vsel %vm2418_vm12, %v5140_v33, 0.0  ;;  %v5078_v52 = vadd.f32 %v5077_v20, %v5076_v25  ;;  %v5015_v32 = vadd.f32 %v6416_v47, %v9628_v50 }
 0x335   : > { %v5171_v27 = vsel %vm2418_vm12, %v5139_v42, 0.0  ;;  %v5014_v18 = vadd.f32 %v6417_v31, %v9628_v50  ;;  %v6372_v1 = vpop.f32.mrb[4].mxu0 }
 0x336   : > { %v5173_v59 = vadd.f32 %v5172_v63, %v5171_v27  ;;  %5047 = vst.msk [vmem:[%s9635_s14 + $0x18] sm:$0xff] %vm2418_vm12, %v5015_v32  ;;  %v5142_v55 = vmul.f32 %v5015_v32, %v5015_v32  ;;  %v6418_v48 = vadd.f32 %v6372_v1, %v6122_v34  ;;  %v4834_v4 = vpop.f32.mrb[5].mxu0  ;;  %v5081_v24 = vsel %vm2418_vm12, %v5015_v32, 0.0 }
 0x337   : > { %5046 = vst.msk [vmem:[%s9635_s14 + $0x10] sm:$0xff] %vm2418_vm12, %v5014_v18  ;;  %v5079_v49 = vsel %vm2418_vm12, %v5014_v18, 0.0  ;;  %v5141_v23 = vmul.f32 %v5014_v18, %v5014_v18  ;;  %v6419_v57 = vadd.f32 %v4834_v4, %v3495_v60 }
 0x338   : > { %v5080_v40 = vadd.f32 %v5079_v49, %v5078_v52  ;;  %v5017_v26 = vadd.f32 %v6418_v48, %v9628_v50  ;;  %v5176_v16 = vsel %vm2418_vm12, %v5142_v55, 0.0 }
 0x339   : > { %v5174_v39 = vsel %vm2418_vm12, %v5141_v23, 0.0  ;;  %v5016_v30 = vadd.f32 %v6419_v57, %v9628_v50  ;;  %v6375_v56 = vpop.f32.mrb[6].mxu0 }
 0x33a   : > { %v5175_v21 = vadd.f32 %v5174_v39, %v5173_v59  ;;  %5049 = vst.msk [vmem:[%s9635_s14 + $0x28] sm:$0xff] %vm2418_vm12, %v5017_v26  ;;  %v5144_v17 = vmul.f32 %v5017_v26, %v5017_v26  ;;  %v5082_v12 = vadd.f32 %v5081_v24, %v5080_v40  ;;  %v4844_v51 = vpop.f32.mrb[7].mxu0  ;;  %v6420_v7 = vadd.f32 %v6375_v56, %v6125_v54 }
 0x33b   : > { %5048 = vst.msk [vmem:[%s9635_s14 + $0x20] sm:$0xff] %vm2418_vm12, %v5016_v30  ;;  %v5083_v11 = vsel %vm2418_vm12, %v5016_v30, 0.0  ;;  %v5143_v19 = vmul.f32 %v5016_v30, %v5016_v30  ;;  %v6421_v13 = vadd.f32 %v4844_v51, %v3505_v61  ;;  %v5085_v46 = vsel %vm2418_vm12, %v5017_v26, 0.0 }
 0x33c   : > { %v5084_v53 = vadd.f32 %v5083_v11, %v5082_v12  ;;  %v5177_v62 = vadd.f32 %v5176_v16, %v5175_v21  ;;  %v5019_v35 = vadd.f32 %v6420_v7, %v9628_v50  ;;  %v5180_v54 = vsel %vm2418_vm12, %v5144_v17, 0.0 }
 0x33d   : > { %v5178_v2 = vsel %vm2418_vm12, %v5143_v19, 0.0  ;;  %v5018_v28 = vadd.f32 %v6421_v13, %v9628_v50  ;;  %v6378_v38 = vpop.f32.mrb[8].mxu0 }
 0x33e   : > { %v5179_v6 = vadd.f32 %v5178_v2, %v5177_v62  ;;  %v5086_v10 = vadd.f32 %v5085_v46, %v5084_v53  ;;  %v6422_v34 = vadd.f32 %v6378_v38, %v9610_v43  ;;  %v4854_v60 = vpop.f32.mrb[9].mxu0  ;;  %5051 = vst.msk [vmem:[%s9635_s14 + $0x38] sm:$0xff] %vm2418_vm12, %v5019_v35  ;;  %v5146_v61 = vmul.f32 %v5019_v35, %v5019_v35 }
 0x33f   : > { %5050 = vst.msk [vmem:[%s9635_s14 + $0x30] sm:$0xff] %vm2418_vm12, %v5018_v28  ;;  %v5087_v36 = vsel %vm2418_vm12, %v5018_v28, 0.0  ;;  %v5145_v0 = vmul.f32 %v5018_v28, %v5018_v28  ;;  %v6423_v9 = vadd.f32 %v4854_v60, %v9612_v3  ;;  %v5089_v20 = vsel %vm2418_vm12, %v5019_v35, 0.0 }
 0x340   : > { %v5088_v22 = vadd.f32 %v5087_v36, %v5086_v10  ;;  %v5181_v15 = vadd.f32 %v5180_v54, %v5179_v6  ;;  %v5021_v29 = vadd.f32 %v6422_v34, %v9628_v50  ;;  %v5184_v33 = vsel %vm2418_vm12, %v5146_v61, 0.0 }
 0x341   : > { %v5182_v43 = vsel %vm2418_vm12, %v5145_v0, 0.0  ;;  %v6381_v58 = vpop.f32.mrb[10].mxu0  ;;  %v5020_v44 = vadd.f32 %v6423_v9, %v9628_v50 }
 0x342   : > { %v5183_v47 = vadd.f32 %v5182_v43, %v5181_v15  ;;  %5053 = vst.msk [vmem:[%s9635_s14 + $0x48] sm:$0xff] %vm2418_vm12, %v5021_v29  ;;  %v4864_v25 = vpop.f32.mrb[11].mxu0  ;;  %v5148_v42 = vmul.f32 %v5021_v29, %v5021_v29  ;;  %v5090_v31 = vadd.f32 %v5089_v20, %v5088_v22  ;;  %v6424_v63 = vadd.f32 %v6381_v58, %v9615_v5 }
 0x343   : > { %v6425_v3 = vadd.f32 %v4864_v25, %v9617_v41  ;;  %5052 = vst.msk [vmem:[%s9635_s14 + $0x40] sm:$0xff] %vm2418_vm12, %v5020_v44  ;;  %v5091_v52 = vsel %vm2418_vm12, %v5020_v44, 0.0  ;;  %v5147_v32 = vmul.f32 %v5020_v44, %v5020_v44  ;;  %v5093_v48 = vsel %vm2418_vm12, %v5021_v29, 0.0 }
 0x344   : > { %v5185_v27 = vadd.f32 %v5184_v33, %v5183_v47  ;;  %v5092_v18 = vadd.f32 %v5091_v52, %v5090_v31  ;;  %v5023_v1 = vadd.f32 %v6424_v63, %v9628_v50  ;;  %v5188_v49 = vsel %vm2418_vm12, %v5148_v42, 0.0 }
 0x345   : > { %v5022_v59 = vadd.f32 %v6425_v3, %v9628_v50  ;;  %v6384_v55 = vpop.f32.mrb[12].mxu0  ;;  %v5186_v5 = vsel %vm2418_vm12, %v5147_v32, 0.0 }
 0x346   : > { %v6426_v4 = vadd.f32 %v6384_v55, %v9619_v37  ;;  %v4874_v41 = vpop.f32.mrb[13].mxu0  ;;  %v5187_v23 = vadd.f32 %v5186_v5, %v5185_v27  ;;  %5055 = vst.msk [vmem:[%s9635_s14 + $0x58] sm:$0xff] %vm2418_vm12, %v5023_v1  ;;  %v5150_v57 = vmul.f32 %v5023_v1, %v5023_v1  ;;  %v5094_v40 = vadd.f32 %v5093_v48, %v5092_v18 }
 0x347   : > { %5054 = vst.msk [vmem:[%s9635_s14 + $0x50] sm:$0xff] %vm2418_vm12, %v5022_v59  ;;  %v5095_v26 = vsel %vm2418_vm12, %v5022_v59, 0.0  ;;  %v5149_v24 = vmul.f32 %v5022_v59, %v5022_v59  ;;  %v6427_v30 = vadd.f32 %v4874_v41, %v9621_v8  ;;  %v5097_v21 = vsel %vm2418_vm12, %v5023_v1, 0.0 }
 0x348   : > { %v5025_v39 = vadd.f32 %v6426_v4, %v9628_v50  ;;  %v5096_v37 = vadd.f32 %v5095_v26, %v5094_v40  ;;  %v5189_v56 = vadd.f32 %v5188_v49, %v5187_v23  ;;  %v5192_v8 = vsel %vm2418_vm12, %v5150_v57, 0.0 }
 0x349   : > { %v6387_v16 = vpop.f32.mrb[14].mxu0  ;;  %v5190_v17 = vsel %vm2418_vm12, %v5149_v24, 0.0  ;;  %v5024_v12 = vadd.f32 %v6427_v30, %v9628_v50 }
 0x34a   : > { %5057 = vst.msk [vmem:[%s9635_s14 + $0x68] sm:$0xff] %vm2418_vm12, %v5025_v39  ;;  %v4884_v51 = vpop.f32.mrb[15].mxu0  ;;  %v5191_v11 = vadd.f32 %v5190_v17, %v5189_v56  ;;  %v5098_v19 = vadd.f32 %v5097_v21, %v5096_v37  ;;  %v6428_v7 = vadd.f32 %v6387_v16, %v9623_v45  ;;  %v5152_v53 = vmul.f32 %v5025_v39, %v5025_v39 }
 0x34b   : > { %v6429_v13 = vadd.f32 %v4884_v51, %v9630_v14  ;;  %5056 = vst.msk [vmem:[%s9635_s14 + $0x60] sm:$0xff] %vm2418_vm12, %v5024_v12  ;;  %v5099_v62 = vsel %vm2418_vm12, %v5024_v12, 0.0  ;;  %v5151_v46 = vmul.f32 %v5024_v12, %v5024_v12  ;;  %v5101_v45 = vsel %vm2418_vm12, %v5025_v39, 0.0 }
 0x34c   : > { %v5100_v2 = vadd.f32 %v5099_v62, %v5098_v19  ;;  %v5193_v35 = vadd.f32 %v5192_v8, %v5191_v11  ;;  %v5027_v28 = vadd.f32 %v6428_v7, %v9628_v50  ;;  %v5196_v54 = vsel %vm2418_vm12, %v5152_v53, 0.0 }
 0x34d   : > { %v5026_v38 = vadd.f32 %v6429_v13, %v9628_v50  ;;  %v6390_v6 = vpop.f32.mrb[16].mxu0  ;;  %v5194_v14 = vsel %vm2418_vm12, %v5151_v46, 0.0 }
 0x34e   : > { %v4894_v10 = vpop.f32.mrb[17].mxu0  ;;  %v5195_v34 = vadd.f32 %v5194_v14, %v5193_v35  ;;  %5059 = vst.msk [vmem:[%s9635_s14 + $0x78] sm:$0xff] %vm2418_vm12, %v5027_v28  ;;  %v5102_v60 = vadd.f32 %v5101_v45, %v5100_v2  ;;  %v5154_v61 = vmul.f32 %v5027_v28, %v5027_v28  ;;  %v5105_v20 = vsel %vm2418_vm12, %v5027_v28, 0.0 }
 0x34f   : > { %5058 = vst.msk [vmem:[%s9635_s14 + $0x70] sm:$0xff] %vm2418_vm12, %v5026_v38  ;;  %v5103_v36 = vsel %vm2418_vm12, %v5026_v38, 0.0  ;;  %v5153_v0 = vmul.f32 %v5026_v38, %v5026_v38 }
 0x350   : > { %v5104_v15 = vadd.f32 %v5103_v36, %v5102_v60  ;;  %v5197_v29 = vadd.f32 %v5196_v54, %v5195_v34  ;;  %v5200_v63 = vsel %vm2418_vm12, %v5154_v61, 0.0 }
 0x351   : > { %v6393_v9 = vpop.f32.mrb[18].mxu0  ;;  %v5198_v33 = vsel %vm2418_vm12, %v5153_v0, 0.0 }
 0x352   : > { %v6190_v22 = vpop.f32.mrb[16].mxu1  ;;  %v4904_v47 = vpop.f32.mrb[19].mxu0  ;;  %v5199_v25 = vadd.f32 %v5198_v33, %v5197_v29  ;;  %v5106_v31 = vadd.f32 %v5105_v20, %v5104_v15 }
 0x353   : > { %v6430_v43 = vadd.f32 %v6390_v6, %v6190_v22  ;;  %v3824_v58 = vpop.f32.mrb[17].mxu1 }
 0x354   : > { %v6431_v44 = vadd.f32 %v4894_v10, %v3824_v58  ;;  %v5201_v18 = vadd.f32 %v5200_v63, %v5199_v25 }
 0x355   : > { %v5029_v42 = vadd.f32 %v6430_v43, %v9628_v50  ;;  %v6396_v32 = vpop.f32.mrb[20].mxu0 }
 0x356   : > { %v5028_v3 = vadd.f32 %v6431_v44, %v9628_v50  ;;  %v6193_v52 = vpop.f32.mrb[18].mxu1  ;;  %v4914_v55 = vpop.f32.mrb[21].mxu0 }
 0x357   : > { %5061 = vst.msk [vmem:[%s9635_s14 + $0x88] sm:$0xff] %vm2418_vm12, %v5029_v42  ;;  %v5156_v27 = vmul.f32 %v5029_v42, %v5029_v42  ;;  %v6432_v1 = vadd.f32 %v6393_v9, %v6193_v52  ;;  %v3834_v59 = vpop.f32.mrb[19].mxu1  ;;  %v5109_v23 = vsel %vm2418_vm12, %v5029_v42, 0.0 }
 0x358   : > { %5060 = vst.msk [vmem:[%s9635_s14 + $0x80] sm:$0xff] %vm2418_vm12, %v5028_v3  ;;  %v5107_v48 = vsel %vm2418_vm12, %v5028_v3, 0.0  ;;  %v5155_v5 = vmul.f32 %v5028_v3, %v5028_v3  ;;  %v6433_v4 = vadd.f32 %v4904_v47, %v3834_v59 }
 0x359   : > { %v5108_v41 = vadd.f32 %v5107_v48, %v5106_v31  ;;  %v5031_v49 = vadd.f32 %v6432_v1, %v9628_v50  ;;  %v5204_v24 = vsel %vm2418_vm12, %v5156_v27, 0.0  ;;  %v6399_v30 = vpop.f32.mrb[22].mxu0 }
 0x35a   : > { %v5202_v57 = vsel %vm2418_vm12, %v5155_v5, 0.0  ;;  %v5030_v40 = vadd.f32 %v6433_v4, %v9628_v50  ;;  %v6196_v26 = vpop.f32.mrb[20].mxu1  ;;  %v4924_v21 = vpop.f32.mrb[23].mxu0 }
 0x35b   : > { %v5203_v39 = vadd.f32 %v5202_v57, %v5201_v18  ;;  %5063 = vst.msk [vmem:[%s9635_s14 + $0x98] sm:$0xff] %vm2418_vm12, %v5031_v49  ;;  %v5158_v37 = vmul.f32 %v5031_v49, %v5031_v49  ;;  %v5110_v56 = vadd.f32 %v5109_v23, %v5108_v41  ;;  %v3844_v16 = vpop.f32.mrb[21].mxu1  ;;  %v6434_v51 = vadd.f32 %v6396_v32, %v6196_v26 }
 0x35c   : > { %5062 = vst.msk [vmem:[%s9635_s14 + $0x90] sm:$0xff] %vm2418_vm12, %v5030_v40  ;;  %v5111_v17 = vsel %vm2418_vm12, %v5030_v40, 0.0  ;;  %v5157_v12 = vmul.f32 %v5030_v40, %v5030_v40  ;;  %v6435_v11 = vadd.f32 %v4914_v55, %v3844_v16  ;;  %v5113_v13 = vsel %vm2418_vm12, %v5031_v49, 0.0 }
 0x35d   : > { %v5112_v19 = vadd.f32 %v5111_v17, %v5110_v56  ;;  %v5205_v7 = vadd.f32 %v5204_v24, %v5203_v39  ;;  %v5033_v53 = vadd.f32 %v6434_v51, %v9628_v50  ;;  %v6402_v35 = vpop.f32.mrb[24].mxu0  ;;  %v5208_v45 = vsel %vm2418_vm12, %v5158_v37, 0.0 }
 0x35e   : > { %v5206_v8 = vsel %vm2418_vm12, %v5157_v12, 0.0  ;;  %v5032_v62 = vadd.f32 %v6435_v11, %v9628_v50  ;;  %v6199_v46 = vpop.f32.mrb[22].mxu1  ;;  %v4934_v10 = vpop.f32.mrb[25].mxu0 }
 0x35f   : > { %v5207_v2 = vadd.f32 %v5206_v8, %v5205_v7  ;;  %v5114_v28 = vadd.f32 %v5113_v13, %v5112_v19  ;;  %v6436_v38 = vadd.f32 %v6399_v30, %v6199_v46  ;;  %v3854_v6 = vpop.f32.mrb[23].mxu1  ;;  %5065 = vst.msk [vmem:[%s9635_s14 + $0xa8] sm:$0xff] %vm2418_vm12, %v5033_v53  ;;  %v5160_v14 = vmul.f32 %v5033_v53, %v5033_v53 }
 0x360   : > { %5064 = vst.msk [vmem:[%s9635_s14 + $0xa0] sm:$0xff] %vm2418_vm12, %v5032_v62  ;;  %v5115_v34 = vsel %vm2418_vm12, %v5032_v62, 0.0  ;;  %v5159_v60 = vmul.f32 %v5032_v62, %v5032_v62  ;;  %v6437_v0 = vadd.f32 %v4924_v21, %v3854_v6  ;;  %v5117_v29 = vsel %vm2418_vm12, %v5033_v53, 0.0 }
 0x361   : > { %v5116_v54 = vadd.f32 %v5115_v34, %v5114_v28  ;;  %v5209_v61 = vadd.f32 %v5208_v45, %v5207_v2  ;;  %v5035_v36 = vadd.f32 %v6436_v38, %v9628_v50  ;;  %v5212_v9 = vsel %vm2418_vm12, %v5160_v14, 0.0  ;;  %v6405_v58 = vpop.f32.mrb[26].mxu0 }
 0x362   : > { %v5210_v22 = vsel %vm2418_vm12, %v5159_v60, 0.0  ;;  %v6202_v15 = vpop.f32.mrb[24].mxu1  ;;  %v5034_v20 = vadd.f32 %v6437_v0, %v9628_v50  ;;  %v4944_v44 = vpop.f32.mrb[27].mxu0 }
 0x363   : > { %v5211_v43 = vadd.f32 %v5210_v22, %v5209_v61  ;;  %5067 = vst.msk [vmem:[%s9635_s14 + $0xb8] sm:$0xff] %vm2418_vm12, %v5035_v36  ;;  %v3864_v33 = vpop.f32.mrb[25].mxu1  ;;  %v5162_v47 = vmul.f32 %v5035_v36, %v5035_v36  ;;  %v5118_v25 = vadd.f32 %v5117_v29, %v5116_v54  ;;  %v6438_v42 = vadd.f32 %v6402_v35, %v6202_v15 }
 0x364   : > { %v6439_v31 = vadd.f32 %v4934_v10, %v3864_v33  ;;  %5066 = vst.msk [vmem:[%s9635_s14 + $0xb0] sm:$0xff] %vm2418_vm12, %v5034_v20  ;;  %v5119_v63 = vsel %vm2418_vm12, %v5034_v20, 0.0  ;;  %v5161_v3 = vmul.f32 %v5034_v20, %v5034_v20  ;;  %v5121_v59 = vsel %vm2418_vm12, %v5035_v36, 0.0 }
 0x365   : > { %v5213_v52 = vadd.f32 %v5212_v9, %v5211_v43  ;;  %v5120_v32 = vadd.f32 %v5119_v63, %v5118_v25  ;;  %v5037_v27 = vadd.f32 %v6438_v42, %v9628_v50  ;;  %v6408_v48 = vpop.f32.mrb[28].mxu0  ;;  %v5216_v41 = vsel %vm2418_vm12, %v5162_v47, 0.0 }
 0x366   : > { %v5036_v18 = vadd.f32 %v6439_v31, %v9628_v50  ;;  %v6205_v1 = vpop.f32.mrb[26].mxu1  ;;  %v5214_v55 = vsel %vm2418_vm12, %v5161_v3, 0.0  ;;  %v4954_v57 = vpop.f32.mrb[29].mxu0 }
 0x367   : > { %v6440_v5 = vadd.f32 %v6405_v58, %v6205_v1  ;;  %v3874_v4 = vpop.f32.mrb[27].mxu1  ;;  %v5215_v49 = vadd.f32 %v5214_v55, %v5213_v52  ;;  %5069 = vst.msk [vmem:[%s9635_s14 + $0xc8] sm:$0xff] %vm2418_vm12, %v5037_v27  ;;  %v5164_v23 = vmul.f32 %v5037_v27, %v5037_v27  ;;  %v5122_v40 = vadd.f32 %v5121_v59, %v5120_v32 }
 0x368   : > { %5068 = vst.msk [vmem:[%s9635_s14 + $0xc0] sm:$0xff] %vm2418_vm12, %v5036_v18  ;;  %v5123_v26 = vsel %vm2418_vm12, %v5036_v18, 0.0  ;;  %v5163_v24 = vmul.f32 %v5036_v18, %v5036_v18  ;;  %v6441_v30 = vadd.f32 %v4944_v44, %v3874_v4  ;;  %v5125_v21 = vsel %vm2418_vm12, %v5037_v27, 0.0 }
 0x369   : > { %v5039_v39 = vadd.f32 %v6440_v5, %v9628_v50  ;;  %v5124_v37 = vadd.f32 %v5123_v26, %v5122_v40  ;;  %v5217_v56 = vadd.f32 %v5216_v41, %v5215_v49  ;;  %v6411_v12 = vpop.f32.mrb[30].mxu0  ;;  %v5220_v46 = vsel %vm2418_vm12, %v5164_v23, 0.0 }
 0x36a   : > { %v6208_v16 = vpop.f32.mrb[28].mxu1  ;;  %v5218_v17 = vsel %vm2418_vm12, %v5163_v24, 0.0  ;;  %v5038_v11 = vadd.f32 %v6441_v30, %v9628_v50  ;;  %v4964_v13 = vpop.f32.mrb[31].mxu0 }
 0x36b   : > { %5071 = vst.msk [vmem:[%s9635_s14 + $0xd8] sm:$0xff] %vm2418_vm12, %v5039_v39  ;;  %v5166_v51 = vmul.f32 %v5039_v39, %v5039_v39  ;;  %v3884_v19 = vpop.f32.mrb[29].mxu1  ;;  %v5219_v7 = vadd.f32 %v5218_v17, %v5217_v56  ;;  %v5126_v8 = vadd.f32 %v5125_v21, %v5124_v37  ;;  %v6442_v53 = vadd.f32 %v6408_v48, %v6208_v16 }
 0x36c   : > { %v6443_v62 = vadd.f32 %v4954_v57, %v3884_v19  ;;  %5070 = vst.msk [vmem:[%s9635_s14 + $0xd0] sm:$0xff] %vm2418_vm12, %v5038_v11  ;;  %v5127_v2 = vsel %vm2418_vm12, %v5038_v11, 0.0  ;;  %v5165_v35 = vmul.f32 %v5038_v11, %v5038_v11  ;;  %v5129_v10 = vsel %vm2418_vm12, %v5039_v39, 0.0 }
 0x36d   : > { %v5128_v28 = vadd.f32 %v5127_v2, %v5126_v8  ;;  %v5221_v38 = vadd.f32 %v5220_v46, %v5219_v7  ;;  %v5041_v6 = vadd.f32 %v6442_v53, %v9628_v50  ;;  %v5224_v61 = vsel %vm2418_vm12, %v5166_v51, 0.0 }
 0x36e   : > { %v5040_v45 = vadd.f32 %v6443_v62, %v9628_v50  ;;  %v6211_v14 = vpop.f32.mrb[30].mxu1  ;;  %v5222_v34 = vsel %vm2418_vm12, %v5165_v35, 0.0 }
 0x36f   : > { %v6444_v60 = vadd.f32 %v6411_v12, %v6211_v14  ;;  %v3894_v54 = vpop.f32.mrb[31].mxu1  ;;  %v5223_v36 = vadd.f32 %v5222_v34, %v5221_v38  ;;  %5073 = vst.msk [vmem:[%s9635_s14 + $0xe8] sm:$0xff] %vm2418_vm12, %v5041_v6  ;;  %v5168_v0 = vmul.f32 %v5041_v6, %v5041_v6  ;;  %v5130_v22 = vadd.f32 %v5129_v10, %v5128_v28 }
 0x370   : > { %5072 = vst.msk [vmem:[%s9635_s14 + $0xe0] sm:$0xff] %vm2418_vm12, %v5040_v45  ;;  %v5131_v15 = vsel %vm2418_vm12, %v5040_v45, 0.0  ;;  %v5167_v29 = vmul.f32 %v5040_v45, %v5040_v45  ;;  %v6445_v43 = vadd.f32 %v4964_v13, %v3894_v54  ;;  %v5133_v33 = vsel %vm2418_vm12, %v5041_v6, 0.0 }
 0x371   : > { %v5043_v9 = vadd.f32 %v6444_v60, %v9628_v50  ;;  %v5132_v58 = vadd.f32 %v5131_v15, %v5130_v22  ;;  %v5225_v20 = vadd.f32 %v5224_v61, %v5223_v36  ;;  %v5228_v31 = vsel %vm2418_vm12, %v5168_v0, 0.0 }
 0x372   : > { %v5226_v47 = vsel %vm2418_vm12, %v5167_v29, 0.0  ;;  %v5042_v44 = vadd.f32 %v6445_v43, %v9628_v50 }
 0x373   : > { %5075 = vst.msk [vmem:[%s9635_s14 + $0xf8] sm:$0xff] %vm2418_vm12, %v5043_v9  ;;  %v5227_v25 = vadd.f32 %v5226_v47, %v5225_v20  ;;  %v5134_v42 = vadd.f32 %v5133_v33, %v5132_v58  ;;  %v5170_v63 = vmul.f32 %v5043_v9, %v5043_v9  ;;  %v5137_v18 = vsel %vm2418_vm12, %v5043_v9, 0.0 }
 0x374   : > { %5074 = vst.msk [vmem:[%s9635_s14 + $0xf0] sm:$0xff] %vm2418_vm12, %v5042_v44  ;;  %v5135_v3 = vsel %vm2418_vm12, %v5042_v44, 0.0  ;;  %v5169_v52 = vmul.f32 %v5042_v44, %v5042_v44 }
 0x375   : > { %v5136_v32 = vadd.f32 %v5135_v3, %v5134_v42  ;;  %v5229_v27 = vadd.f32 %v5228_v31, %v5227_v25  ;;  %v5232_v55 = vsel %vm2418_vm12, %v5170_v63, 0.0 }
 0x376   : > { %v5230_v50 = vsel %vm2418_vm12, %v5169_v52, 0.0 }
 0x377   : > { %v5138_v1 = vadd.f32 %v5137_v18, %v5136_v32  ;;  %v5231_v59 = vadd.f32 %v5230_v50, %v5229_v27 }
 0x379   : > { %v5233_v48 = vadd.f32 %v5232_v55, %v5231_v59  ;;  %5234 = vst.msk [vmem:[%s323_s18] sm:$0xff] %vm2418_vm12, %v5138_v1 }
 0x37b   : > { %5235 = vst.msk [vmem:[%s327_s21] sm:$0xff] %vm2418_vm12, %v5233_v48 }
 0x37c PF: > { %s19_s27 = sadd.s32 1, %s6911_s27  }
 0x37d   : > { %p16_p5 = scmp.ge.s32.totalorder %s19_s27, 4  }
 0x37f   :  { %18 = sbr.rel (!%p16_p5) target bundleno = 1 (0x1), region = 106 }

</bundles_post_ra>
